<compile_context>
chip_gen: v7x
topology: tpu7x:2x2x1
jax: 0.10.0
libtpu: 0.0.40
codegen_flags: <defaults>
</compile_context>

<pallas_src>
import math

import numpy as np
import jax
import jax.numpy as jnp
from jax.experimental import pallas as pl
from jax.experimental.pallas import tpu as pltpu


_MXU_MIN_DIM = 64  # below this, do the (T, d) @ (d, d) contraction on the VPU


def _make_tmv_kernel(n_dim, df, coef, log_norm):
    """Build the TMV forward kernel with host-precomputed scalar constants."""
    df = float(df)
    coef = float(coef)          # (df + d) / 2
    log_norm = float(log_norm)  # lgamma terms - (d/2)log(df*pi) - sum(log diag L)

    def kernel(eps_ref, w_ref, loc_ref, lt_ref, z_ref, logp_ref):
        eps = eps_ref[...]                       # (T, d) standard normal
        w = w_ref[...]                           # (T, 1) chi-square(df)

        inv_w = 1.0 / w                          # one divide per row
        r = jnp.sqrt(df * inv_w)                 # sqrt(df / w), per row

        lt = lt_ref[...]                         # (d, d) = L^T
        if n_dim >= _MXU_MIN_DIM:
            y = jnp.dot(eps, lt, preferred_element_type=jnp.float32)
        else:
            # tiny n_dim: a handful of unrolled VPU mul-adds beats a K=d MXU matmul
            y = eps[:, 0:1] * lt[0:1, :]
            for k in range(1, n_dim):
                y = y + eps[:, k:k + 1] * lt[k:k + 1, :]

        z_ref[...] = loc_ref[...] + y * r        # (T, d)

        # Mahalanobis via the construction identity: m / df = ||eps||^2 / w
        s = jnp.sum(eps * eps, axis=-1, keepdims=True)      # (T, 1)
        logp_ref[...] = log_norm - coef * jnp.log(1.0 + s * inv_w)

    return kernel


def _pick_tile(n, d):
    """Largest row tile that keeps the double-buffered working set tiny vs VMEM."""
    # per row (bytes): eps(d) + z(d) + w(1) + logp(1) floats, x2 for double-buffering
    per_row = (2 * d + 2) * 4 * 2
    budget = 8 << 20            # well under v5e's 16 MiB default scoped-VMEM limit
    t = min(n, budget // per_row, 1024)
    t = max(8, (t // 8) * 8)    # sublane multiple of 8
    return t


class TMV:
    """JAX/Pallas port of normflow TMV (multivariate Student-T base distribution)."""

    def __init__(self, n_dim=2, df=2.0, seed=0):
        self.n_dim = int(n_dim)
        self.df = float(df)
        rank = 2 * self.n_dim

        # Parameter init mirrors the torch module (random loc / random PSD cov),
        # but deterministically on the host (no CUDA RNG available here).
        rng = np.random.RandomState(seed)
        loc = rng.randn(1, self.n_dim)
        a = rng.randn(self.n_dim, rank)
        cov = a @ a.T
        chol = np.linalg.cholesky(cov)                     # (d, d), lower triangular

        self.scale_tril = chol.astype(np.float32)          # L (host copy, f32)
        self.loc = jnp.asarray(loc, dtype=jnp.float32)     # (1, d)
        self.lt = jnp.asarray(self.scale_tril.T)           # (d, d) = L^T for row-vec eps

        # Host-precomputed log-density constants (row-invariant work stays out of
        # the kernel so it is not re-executed every grid step).
        d = float(self.n_dim)
        half_logdet = float(np.sum(np.log(np.diag(self.scale_tril.astype(np.float64)))))
        self._coef = 0.5 * (self.df + d)
        self._log_norm = (math.lgamma(0.5 * (self.df + d))
                          - math.lgamma(0.5 * self.df)
                          - 0.5 * d * math.log(self.df * math.pi)
                          - half_logdet)
        self._kernel = _make_tmv_kernel(self.n_dim, self.df, self._coef, self._log_norm)

    # -- noise generation (wrapper-side RNG, reproducible with jax.random) --------
    def _sample_noise(self, key, num_samples):
        k_eps, k_w = jax.random.split(key)
        eps = jax.random.normal(k_eps, (num_samples, self.n_dim), dtype=jnp.float32)
        # w ~ Chi2(df) = 2 * Gamma(df/2, 1)
        w = 2.0 * jax.random.gamma(k_w, self.df / 2.0, (num_samples, 1),
                                   dtype=jnp.float32)
        return eps, w

    # -- Pallas forward -----------------------------------------------------------
    def _forward_from_noise(self, eps, w):
        n, d = eps.shape
        tile = _pick_tile(n, d)
        num_blocks = pl.cdiv(n, tile)
        n_pad = num_blocks * tile
        if n_pad != n:
            eps = jnp.pad(eps, ((0, n_pad - n), (0, 0)))
            w = jnp.pad(w, ((0, n_pad - n), (0, 0)), constant_values=1.0)

        z, logp = pl.pallas_call(
            self._kernel,
            out_shape=(
                jax.ShapeDtypeStruct((n_pad, d), jnp.float32),
                jax.ShapeDtypeStruct((n_pad, 1), jnp.float32),
            ),
            grid=(num_blocks,),
            in_specs=[
                pl.BlockSpec((tile, d), lambda i: (i, 0)),   # eps
                pl.BlockSpec((tile, 1), lambda i: (i, 0)),   # w (chi-square)
                pl.BlockSpec((1, d), lambda i: (0, 0)),      # loc (resident)
                pl.BlockSpec((d, d), lambda i: (0, 0)),      # L^T (resident)
            ],
            out_specs=(
                pl.BlockSpec((tile, d), lambda i: (i, 0)),   # z
                pl.BlockSpec((tile, 1), lambda i: (i, 0)),   # logp
            ),
            compiler_params=pltpu.CompilerParams(
                dimension_semantics=("parallel",)),
        )(eps, w, self.loc, self.lt)
        return z[:n], logp[:n, 0]

    def forward(self, key, num_samples=1):
        eps, w = self._sample_noise(key, num_samples)
        z, logp = self._forward_from_noise(eps, w)
        return z, logp   # matches torch: (z.squeeze(), log_prob.mean(axis=1))


# ------------------------------ self-check ---------------------------------------
def _reference_log_prob(z, loc, chol, df):
    """float64 numpy log_prob recomputed from z via a triangular solve."""
    z = np.asarray(z, dtype=np.float64)
    loc = np.asarray(loc, dtype=np.float64).reshape(-1)
    chol = np.asarray(chol, dtype=np.float64)
    d = z.shape[-1]
    y = np.linalg.solve(chol, (z - loc).T).T             # L^{-1}(z - loc)
    m = np.sum(y * y, axis=-1)
    return (math.lgamma(0.5 * (df + d)) - math.lgamma(0.5 * df)
            - 0.5 * d * math.log(df * math.pi)
            - np.sum(np.log(np.diag(chol)))
            - 0.5 * (df + d) * np.log1p(m / df))


if __name__ == "__main__":
    key = jax.random.PRNGKey(0)

    n_dim, df = 2, 2.0                    # module defaults
    num_samples = 2048                    # -> row-tiled grid of 2 blocks

    dist = TMV(n_dim=n_dim, df=df, seed=0)
    z, logp = dist.forward(key, num_samples=num_samples)
    z = jax.block_until_ready(z)
    logp = jax.block_until_ready(logp)

    assert z.shape == (num_samples, n_dim)
    assert logp.shape == (num_samples,)

    # 1) log_prob check: recompute from the returned z with a float64 solve
    ref_logp = _reference_log_prob(z, dist.loc, dist.scale_tril, df)
    assert np.allclose(np.asarray(logp, np.float64), ref_logp, rtol=1e-3, atol=1e-3), (
        np.max(np.abs(np.asarray(logp, np.float64) - ref_logp)))

    # 2) sample check: z must reproduce the affine construction from the same noise
    eps, w = dist._sample_noise(key, num_samples)
    eps_np = np.asarray(eps, np.float64)
    w_np = np.asarray(w, np.float64)
    loc_np = np.asarray(dist.loc, np.float64)
    chol_np = np.asarray(dist.scale_tril, np.float64)
    z_ref = loc_np + (eps_np @ chol_np.T) * np.sqrt(df / w_np)
    assert np.allclose(np.asarray(z, np.float64), z_ref, rtol=1e-4, atol=1e-4)

    print("KERNEL_OK")
</pallas_src>

<mosaic_0001>
module attributes {stable_mosaic.version = 11 : i64} {
  func.func @kernel(%arg0: i32, %arg1: memref<1024x2xf32, #tpu.memory_space<vmem>>, %arg2: memref<1024x1xf32, #tpu.memory_space<vmem>>, %arg3: memref<1x2xf32, #tpu.memory_space<vmem>>, %arg4: memref<2x2xf32, #tpu.memory_space<vmem>>, %arg5: memref<1024x2xf32, #tpu.memory_space<vmem>>, %arg6: memref<1024x1xf32, #tpu.memory_space<vmem>>) attributes {dimension_semantics = [#tpu.dimension_semantics<parallel>], iteration_bounds = array<i64: 2>, scalar_prefetch = 0 : i64, scratch_operands = 0 : i64, tpu.core_type = #tpu.core_type<tc>, window_params = [{transform_indices = @transform_0, window_bounds = array<i64: 1024, 2>}, {transform_indices = @transform_1, window_bounds = array<i64: 1024, 1>}, {pipeline_mode = #tpu.pipeline_mode<synchronous>, transform_indices = @transform_2, window_bounds = array<i64: 1, 2>}, {pipeline_mode = #tpu.pipeline_mode<synchronous>, transform_indices = @transform_3, window_bounds = array<i64: 2, 2>}, {transform_indices = @transform_4, window_bounds = array<i64: 1024, 2>}, {transform_indices = @transform_5, window_bounds = array<i64: 1024, 1>}]} {
    %c0 = arith.constant 0 : index
    %c0_0 = arith.constant 0 : index
    %0 = vector.load %arg1[%c0, %c0_0] : memref<1024x2xf32, #tpu.memory_space<vmem>>, vector<1024x2xf32>
    %c0_1 = arith.constant 0 : index
    %c0_2 = arith.constant 0 : index
    %1 = vector.load %arg2[%c0_1, %c0_2] : memref<1024x1xf32, #tpu.memory_space<vmem>>, vector<1024x1xf32>
    %cst = arith.constant 1.000000e+00 : f32
    %2 = vector.broadcast %cst : f32 to vector<1024x1xf32>
    %3 = arith.divf %2, %1 : vector<1024x1xf32>
    %cst_3 = arith.constant 2.000000e+00 : f32
    %4 = vector.broadcast %cst_3 : f32 to vector<1024x1xf32>
    %5 = arith.mulf %4, %3 : vector<1024x1xf32>
    %6 = math.sqrt %5 : vector<1024x1xf32>
    %c0_4 = arith.constant 0 : index
    %c0_5 = arith.constant 0 : index
    %7 = vector.load %arg4[%c0_4, %c0_5] : memref<2x2xf32, #tpu.memory_space<vmem>>, vector<2x2xf32>
    %8 = vector.extract_strided_slice %0 {offsets = [0, 0], sizes = [1024, 1], strides = [1, 1]} : vector<1024x2xf32> to vector<1024x1xf32>
    %9 = vector.extract_strided_slice %7 {offsets = [0, 0], sizes = [1, 2], strides = [1, 1]} : vector<2x2xf32> to vector<1x2xf32>
    %10 = vector.broadcast %8 : vector<1024x1xf32> to vector<1024x2xf32>
    %11 = vector.broadcast %9 : vector<1x2xf32> to vector<1024x2xf32>
    %12 = arith.mulf %10, %11 : vector<1024x2xf32>
    %13 = vector.extract_strided_slice %0 {offsets = [0, 1], sizes = [1024, 1], strides = [1, 1]} : vector<1024x2xf32> to vector<1024x1xf32>
    %14 = vector.extract_strided_slice %7 {offsets = [1, 0], sizes = [1, 2], strides = [1, 1]} : vector<2x2xf32> to vector<1x2xf32>
    %15 = vector.broadcast %13 : vector<1024x1xf32> to vector<1024x2xf32>
    %16 = vector.broadcast %14 : vector<1x2xf32> to vector<1024x2xf32>
    %17 = arith.mulf %15, %16 : vector<1024x2xf32>
    %18 = arith.addf %12, %17 : vector<1024x2xf32>
    %c0_6 = arith.constant 0 : index
    %c0_7 = arith.constant 0 : index
    %19 = vector.load %arg3[%c0_6, %c0_7] : memref<1x2xf32, #tpu.memory_space<vmem>>, vector<1x2xf32>
    %20 = vector.broadcast %6 : vector<1024x1xf32> to vector<1024x2xf32>
    %21 = arith.mulf %18, %20 : vector<1024x2xf32>
    %22 = vector.broadcast %19 : vector<1x2xf32> to vector<1024x2xf32>
    %23 = arith.addf %22, %21 : vector<1024x2xf32>
    %c0_8 = arith.constant 0 : index
    %c0_9 = arith.constant 0 : index
    %24 = vector.load %arg5[%c0_8, %c0_9] : memref<1024x2xf32, #tpu.memory_space<vmem>>, vector<1024x2xf32>
    tpu.vector_store %arg5[%c0_8, %c0_9], %23 {strides = array<i32>} : memref<1024x2xf32, #tpu.memory_space<vmem>>, vector<1024x2xf32>,
    %25 = arith.mulf %0, %0 : vector<1024x2xf32>
    %cst_10 = arith.constant dense<0.000000e+00> : vector<1024xf32>
    %26 = vector.multi_reduction <add>, %25, %cst_10 [1] : vector<1024x2xf32> to vector<1024xf32>
    %27 = vector.shape_cast %26 : vector<1024xf32> to vector<1024x1xf32>
    %28 = arith.mulf %27, %3 : vector<1024x1xf32>
    %cst_11 = arith.constant 1.000000e+00 : f32
    %29 = vector.broadcast %cst_11 : f32 to vector<1024x1xf32>
    %30 = arith.addf %29, %28 : vector<1024x1xf32>
    %31 = math.log %30 : vector<1024x1xf32>
    %cst_12 = arith.constant 2.000000e+00 : f32
    %32 = vector.broadcast %cst_12 : f32 to vector<1024x1xf32>
    %33 = arith.mulf %32, %31 : vector<1024x1xf32>
    %cst_13 = arith.constant -3.05969644 : f32
    %34 = vector.broadcast %cst_13 : f32 to vector<1024x1xf32>
    %35 = arith.subf %34, %33 : vector<1024x1xf32>
    %c0_14 = arith.constant 0 : index
    %c0_15 = arith.constant 0 : index
    %36 = vector.load %arg6[%c0_14, %c0_15] : memref<1024x1xf32, #tpu.memory_space<vmem>>, vector<1024x1xf32>
    tpu.vector_store %arg6[%c0_14, %c0_15], %35 {strides = array<i32>} : memref<1024x1xf32, #tpu.memory_space<vmem>>, vector<1024x1xf32>,
    return
  }
  func.func @transform_0(%arg0: i32) -> (i32, i32) {
    %c0_i32 = arith.constant 0 : i32
    %c0_i32_0 = arith.constant 0 : i32
    return %arg0, %c0_i32 : i32, i32
  }
  func.func @transform_1(%arg0: i32) -> (i32, i32) {
    %c0_i32 = arith.constant 0 : i32
    %c0_i32_0 = arith.constant 0 : i32
    return %arg0, %c0_i32 : i32, i32
  }
  func.func @transform_2(%arg0: i32) -> (i32, i32) {
    %c0_i32 = arith.constant 0 : i32
    %c0_i32_0 = arith.constant 0 : i32
    %c0_i32_1 = arith.constant 0 : i32
    return %c0_i32, %c0_i32_0 : i32, i32
  }
  func.func @transform_3(%arg0: i32) -> (i32, i32) {
    %c0_i32 = arith.constant 0 : i32
    %c0_i32_0 = arith.constant 0 : i32
    %c0_i32_1 = arith.constant 0 : i32
    return %c0_i32, %c0_i32_0 : i32, i32
  }
  func.func @transform_4(%arg0: i32) -> (i32, i32) {
    %c0_i32 = arith.constant 0 : i32
    %c0_i32_0 = arith.constant 0 : i32
    return %arg0, %c0_i32 : i32, i32
  }
  func.func @transform_5(%arg0: i32) -> (i32, i32) {
    %c0_i32 = arith.constant 0 : i32
    %c0_i32_0 = arith.constant 0 : i32
    return %arg0, %c0_i32 : i32, i32
  }
}

</mosaic_0001>

<bundles_post_ra>
// kernel: tpu_custom_call.1
= control target key start
LH: loop header
LB: loop body
LE: loop exit
PB: predicated region body
PF: predicated region fallthrough
CT: control target
= control target key end

     0   :  { %s6857_s18 = smov 0   ;;  %s11985_s0 = inlined_call_operand.vmem [shape: f32[2048,2], index: 0, kind: input, shape index: {}]   ;;  %s11986_s1 = inlined_call_operand.vmem [shape: f32[2048,1], index: 1, kind: input, shape index: {}]   ;;  %s11987_s2 = inlined_call_operand.vmem [shape: f32[1,2], index: 2, kind: input, shape index: {}]   ;;  %s11988_s3 = inlined_call_operand.vmem [shape: f32[2,2], index: 3, kind: input, shape index: {}]   ;;  %s11989_s4 = inlined_call_operand.vmem [shape: f32[2048,2], index: 4, kind: output, shape index: {0}]   ;;  %s11990_s5 = inlined_call_operand.vmem [shape: f32[2048,1], index: 5, kind: output, shape index: {1}]  }
   0x1 LB: > { %s5888_s19 = sadd.s32 4294967295, %s6823_s18   ;;  %p5892_p0 = scmp.ge.s32.totalorder %s6823_s18, 1  ;;  %s6823_s18 = sphi %s6857_s18, %s16_s18  }
   0x2   : > { %p202_p1 = scmp.lt.s32.totalorder %s6823_s18, 3 }
   0x4   : > { %p203_p2 = pnand %p5892_p0, %p202_p1 }
   0x6   : > { %206 = sbr.rel (%p203_p2) target bundleno = 1253 (0x4e5), region = 36 }
   0xd   : > { %s5893_s20 = sshll.u32 %s5888_s19, 7  ;;  %v11993_v0 = vmov 1   ;;  %v11991_v1 = vmov 0  }
   0xe   : > { %5915 = vset.pattern.permute.xlu0 %v11993_v0  ;;  %5914 = vset.pattern.permute.xlu1 %v11991_v1  ;;  %p241_p3 = scmp.lt.s32.totalorder %s5893_s20, 255 }
  0x10   : > { %s12898_s20 = smov (!%p241_p3, %s5893_s20), 255 }
  0x11   : > { %s6867_s21 = sshll.u32 %s12898_s20, 3 }
  0x12   : > { %s6873_s24 = scalar_lea.vmem %s11985_s0, %s6867_s21  ;;  %s7271_s27 = scalar_lea.vmem %s11986_s1, %s6867_s21 }
  0x13   : > { %v6876_v2 = vld [vmem:[%s6873_s24 + $0x10] sm:$0xff]  ;;  %v6879_v3 = vld [vmem:[%s6873_s24] sm:$0xff]  ;;  %v267_v4 = vld [vmem:[%s6873_s24 + $0x18] sm:$0xff]  ;;  %s9786_s9 = scalar_lea.vmem %s11989_s4, %s6867_s21  ;;  %s11506_s16 = scalar_lea.vmem %s11990_s5, %s6867_s21 }
  0x14   : > { %1813 = vperm.xlu1 %5914, %v6876_v2   ;;  %2574 = vperm.xlu0 %5915, %v6879_v3   ;;  %v269_v5 = vld [vmem:[%s6873_s24 + $0x28] sm:$0xff]  ;;  %v271_v6 = vld [vmem:[%s6873_s24 + $0x38] sm:$0xff] }
  0x15   : > { %v273_v7 = vld [vmem:[%s6873_s24 + $0x48] sm:$0xff]  ;;  %v275_v8 = vld [vmem:[%s6873_s24 + $0x58] sm:$0xff] }
  0x16   : > { %v277_v9 = vld [vmem:[%s6873_s24 + $0x68] sm:$0xff]  ;;  %v279_v10 = vld [vmem:[%s6873_s24 + $0x78] sm:$0xff] }
  0x17   : > { %v281_v11 = vld [vmem:[%s6873_s24 + $0x88] sm:$0xff]  ;;  %v283_v12 = vld [vmem:[%s6873_s24 + $0x98] sm:$0xff] }
  0x18   : > { %1818 = vperm.xlu1 %5914, %v267_v4   ;;  %2586 = vperm.xlu0 %5915, %v267_v4   ;;  %v285_v13 = vld [vmem:[%s6873_s24 + $0xa8] sm:$0xff]  ;;  %v287_v14 = vld [vmem:[%s6873_s24 + $0xb8] sm:$0xff] }
  0x19   : > { %v289_v15 = vld [vmem:[%s6873_s24 + $0xc8] sm:$0xff]  ;;  %v291_v16 = vld [vmem:[%s6873_s24 + $0xd8] sm:$0xff] }
  0x1a   : > { %v293_v17 = vld [vmem:[%s6873_s24 + $0xe8] sm:$0xff]  ;;  %v295_v18 = vld [vmem:[%s6873_s24 + $0xf8] sm:$0xff] }
  0x1b   : > { %v297_v19 = vld [vmem:[%s6873_s24 + $0x108] sm:$0xff]  ;;  %v299_v20 = vld [vmem:[%s6873_s24 + $0x118] sm:$0xff] }
  0x1c   : > { %1828 = vperm.xlu1 %5914, %v269_v5   ;;  %2594 = vperm.xlu0 %5915, %v269_v5   ;;  %v301_v21 = vld [vmem:[%s6873_s24 + $0x128] sm:$0xff]  ;;  %v303_v22 = vld [vmem:[%s6873_s24 + $0x138] sm:$0xff] }
  0x1d   : > { %v305_v23 = vld [vmem:[%s6873_s24 + $0x148] sm:$0xff]  ;;  %v307_v24 = vld [vmem:[%s6873_s24 + $0x158] sm:$0xff] }
  0x1e   : > { %v309_v25 = vld [vmem:[%s6873_s24 + $0x168] sm:$0xff]  ;;  %v311_v26 = vld [vmem:[%s6873_s24 + $0x178] sm:$0xff] }
  0x1f   : > { %v313_v27 = vld [vmem:[%s6873_s24 + $0x188] sm:$0xff]  ;;  %v315_v28 = vld [vmem:[%s6873_s24 + $0x198] sm:$0xff] }
  0x20   : > { %1838 = vperm.xlu1 %5914, %v271_v6   ;;  %2602 = vperm.xlu0 %5915, %v271_v6   ;;  %v317_v29 = vld [vmem:[%s6873_s24 + $0x1a8] sm:$0xff]  ;;  %v319_v30 = vld [vmem:[%s6873_s24 + $0x1b8] sm:$0xff] }
  0x21   : > { %v321_v31 = vld [vmem:[%s6873_s24 + $0x1c8] sm:$0xff]  ;;  %v323_v32 = vld [vmem:[%s6873_s24 + $0x1d8] sm:$0xff] }
  0x22   : > { %v325_v33 = vld [vmem:[%s6873_s24 + $0x1e8] sm:$0xff]  ;;  %v327_v34 = vld [vmem:[%s6873_s24 + $0x1f8] sm:$0xff] }
  0x23   : > { %v329_v35 = vld [vmem:[%s6873_s24 + $0x208] sm:$0xff]  ;;  %v331_v38 = vld [vmem:[%s6873_s24 + $0x218] sm:$0xff] }
  0x24   : > { %1848 = vperm.xlu1 %5914, %v273_v7   ;;  %2610 = vperm.xlu0 %5915, %v273_v7   ;;  %v333_v41 = vld [vmem:[%s6873_s24 + $0x228] sm:$0xff]  ;;  %v335_v44 = vld [vmem:[%s6873_s24 + $0x238] sm:$0xff] }
  0x25   : > { %v337_v47 = vld [vmem:[%s6873_s24 + $0x248] sm:$0xff]  ;;  %v339_v50 = vld [vmem:[%s6873_s24 + $0x258] sm:$0xff] }
  0x26   : > { %v341_v53 = vld [vmem:[%s6873_s24 + $0x268] sm:$0xff]  ;;  %v343_v56 = vld [vmem:[%s6873_s24 + $0x278] sm:$0xff] }
  0x27   : > { %v345_v59 = vld [vmem:[%s6873_s24 + $0x288] sm:$0xff]  ;;  %v347_v62 = vld [vmem:[%s6873_s24 + $0x298] sm:$0xff] }
  0x28   : > { %1858 = vperm.xlu1 %5914, %v275_v8   ;;  %2618 = vperm.xlu0 %5915, %v275_v8   ;;  %v349_v5 = vld [vmem:[%s6873_s24 + $0x2a8] sm:$0xff]  ;;  %v351_v8 = vld [vmem:[%s6873_s24 + $0x2b8] sm:$0xff] }
  0x29   : > { %v387_v0 = vld [vmem:[%s6873_s24 + $0x3d8] sm:$0xff] }
  0x2c   : > { %1868 = vperm.xlu1 %5914, %v277_v9   ;;  %2626 = vperm.xlu0 %5915, %v277_v9  }
  0x30   : > { %1878 = vperm.xlu1 %5914, %v279_v10   ;;  %2634 = vperm.xlu0 %5915, %v279_v10  }
  0x34   : > { %1888 = vperm.xlu1 %5914, %v281_v11   ;;  %2642 = vperm.xlu0 %5915, %v281_v11   ;;  %v353_v11 = vld [vmem:[%s6873_s24 + $0x2c8] sm:$0xff] }
  0x38   : > { %1898 = vperm.xlu1 %5914, %v283_v12   ;;  %2650 = vperm.xlu0 %5915, %v283_v12  }
  0x3c   : > { %1908 = vperm.xlu1 %5914, %v285_v13   ;;  %2658 = vperm.xlu0 %5915, %v285_v13  }
  0x40   : > { %1918 = vperm.xlu1 %5914, %v287_v14   ;;  %2666 = vperm.xlu0 %5915, %v287_v14   ;;  %v355_v14 = vld [vmem:[%s6873_s24 + $0x2d8] sm:$0xff] }
  0x44   : > { %1928 = vperm.xlu1 %5914, %v289_v15   ;;  %2674 = vperm.xlu0 %5915, %v289_v15  }
  0x48   : > { %1938 = vperm.xlu1 %5914, %v291_v16   ;;  %2682 = vperm.xlu0 %5915, %v291_v16  }
  0x4c   : > { %1948 = vperm.xlu1 %5914, %v293_v17   ;;  %2690 = vperm.xlu0 %5915, %v293_v17   ;;  %v357_v17 = vld [vmem:[%s6873_s24 + $0x2e8] sm:$0xff] }
  0x50   : > { %1958 = vperm.xlu1 %5914, %v295_v18   ;;  %2698 = vperm.xlu0 %5915, %v295_v18  }
  0x54   : > { %1968 = vperm.xlu1 %5914, %v297_v19   ;;  %2706 = vperm.xlu0 %5915, %v297_v19  }
  0x58   : > { %1978 = vperm.xlu1 %5914, %v299_v20   ;;  %2714 = vperm.xlu0 %5915, %v299_v20   ;;  %v359_v20 = vld [vmem:[%s6873_s24 + $0x2f8] sm:$0xff] }
  0x5c   : > { %1988 = vperm.xlu1 %5914, %v301_v21   ;;  %2722 = vperm.xlu0 %5915, %v301_v21  }
  0x60   : > { %1998 = vperm.xlu1 %5914, %v303_v22   ;;  %2730 = vperm.xlu0 %5915, %v303_v22  }
  0x64   : > { %2008 = vperm.xlu1 %5914, %v305_v23   ;;  %2738 = vperm.xlu0 %5915, %v305_v23   ;;  %v361_v23 = vld [vmem:[%s6873_s24 + $0x308] sm:$0xff] }
  0x68   : > { %2018 = vperm.xlu1 %5914, %v307_v24   ;;  %2746 = vperm.xlu0 %5915, %v307_v24  }
  0x6c   : > { %2028 = vperm.xlu1 %5914, %v309_v25   ;;  %2754 = vperm.xlu0 %5915, %v309_v25  }
  0x70   : > { %2038 = vperm.xlu1 %5914, %v311_v26   ;;  %2762 = vperm.xlu0 %5915, %v311_v26   ;;  %v363_v26 = vld [vmem:[%s6873_s24 + $0x318] sm:$0xff] }
  0x74   : > { %2048 = vperm.xlu1 %5914, %v313_v27   ;;  %2770 = vperm.xlu0 %5915, %v313_v27  }
  0x78   : > { %2058 = vperm.xlu1 %5914, %v315_v28   ;;  %2778 = vperm.xlu0 %5915, %v315_v28  }
  0x7c   : > { %2068 = vperm.xlu1 %5914, %v317_v29   ;;  %2786 = vperm.xlu0 %5915, %v317_v29   ;;  %v365_v29 = vld [vmem:[%s6873_s24 + $0x328] sm:$0xff] }
  0x80   : > { %2078 = vperm.xlu1 %5914, %v319_v30   ;;  %2794 = vperm.xlu0 %5915, %v319_v30  }
  0x84   : > { %2088 = vperm.xlu1 %5914, %v321_v31   ;;  %2802 = vperm.xlu0 %5915, %v321_v31  }
  0x88   : > { %2098 = vperm.xlu1 %5914, %v323_v32   ;;  %2810 = vperm.xlu0 %5915, %v323_v32   ;;  %v367_v32 = vld [vmem:[%s6873_s24 + $0x338] sm:$0xff] }
  0x8c   : > { %2108 = vperm.xlu1 %5914, %v325_v33   ;;  %2818 = vperm.xlu0 %5915, %v325_v33  }
  0x90   : > { %2118 = vperm.xlu1 %5914, %v327_v34   ;;  %2826 = vperm.xlu0 %5915, %v327_v34  }
  0x93   : > { %v6915_v36 = vpop.permute.xlu1 %1813  ;;  %v6917_v37 = vpop.permute.xlu0 %2574 }
  0x94   : > { %2128 = vperm.xlu1 %5914, %v329_v35   ;;  %2834 = vperm.xlu0 %5915, %v329_v35   ;;  %v369_v35 = vld [vmem:[%s6873_s24 + $0x348] sm:$0xff] }
  0x97   : > { %v6920_v39 = vpop.permute.xlu1 %1818  ;;  %v6922_v40 = vpop.permute.xlu0 %2586 }
  0x98   : > { %2138 = vperm.xlu1 %5914, %v331_v38   ;;  %2842 = vperm.xlu0 %5915, %v331_v38  }
  0x9b   : > { %v6925_v42 = vpop.permute.xlu1 %1828  ;;  %v6927_v43 = vpop.permute.xlu0 %2594 }
  0x9c   : > { %2148 = vperm.xlu1 %5914, %v333_v41   ;;  %2850 = vperm.xlu0 %5915, %v333_v41  }
  0x9f   : > { %v6930_v45 = vpop.permute.xlu1 %1838  ;;  %v6932_v46 = vpop.permute.xlu0 %2602 }
  0xa0   : > { %2158 = vperm.xlu1 %5914, %v335_v44   ;;  %2858 = vperm.xlu0 %5915, %v335_v44   ;;  %v371_v44 = vld [vmem:[%s6873_s24 + $0x358] sm:$0xff] }
  0xa3   : > { %v6935_v48 = vpop.permute.xlu1 %1848  ;;  %v6937_v49 = vpop.permute.xlu0 %2610 }
  0xa4   : > { %2168 = vperm.xlu1 %5914, %v337_v47   ;;  %2866 = vperm.xlu0 %5915, %v337_v47  }
  0xa7   : > { %v6940_v51 = vpop.permute.xlu1 %1858  ;;  %v6942_v52 = vpop.permute.xlu0 %2618 }
  0xa8   : > { %2178 = vperm.xlu1 %5914, %v339_v50   ;;  %2874 = vperm.xlu0 %5915, %v339_v50  }
  0xab   : > { %v6945_v54 = vpop.permute.xlu1 %1868  ;;  %v6947_v55 = vpop.permute.xlu0 %2626 }
  0xac   : > { %2188 = vperm.xlu1 %5914, %v341_v53   ;;  %2882 = vperm.xlu0 %5915, %v341_v53   ;;  %v373_v53 = vld [vmem:[%s6873_s24 + $0x368] sm:$0xff] }
  0xaf   : > { %v6950_v57 = vpop.permute.xlu1 %1878  ;;  %v6952_v58 = vpop.permute.xlu0 %2634 }
  0xb0   : > { %2198 = vperm.xlu1 %5914, %v343_v56   ;;  %2890 = vperm.xlu0 %5915, %v343_v56  }
  0xb3   : > { %v6955_v60 = vpop.permute.xlu1 %1888  ;;  %v6957_v61 = vpop.permute.xlu0 %2642 }
  0xb4   : > { %2208 = vperm.xlu1 %5914, %v345_v59   ;;  %2898 = vperm.xlu0 %5915, %v345_v59  }
  0xb7   : > { %v6960_v63 = vpop.permute.xlu1 %1898  ;;  %v6962_v4 = vpop.permute.xlu0 %2650 }
  0xb8   : > { %2218 = vperm.xlu1 %5914, %v347_v62   ;;  %2906 = vperm.xlu0 %5915, %v347_v62   ;;  %v375_v62 = vld [vmem:[%s6873_s24 + $0x378] sm:$0xff] }
  0xbb   : > { %v6965_v6 = vpop.permute.xlu1 %1908  ;;  %v6967_v7 = vpop.permute.xlu0 %2658 }
  0xbc   : > { %2228 = vperm.xlu1 %5914, %v349_v5   ;;  %2914 = vperm.xlu0 %5915, %v349_v5  }
  0xbf   : > { %v6970_v9 = vpop.permute.xlu1 %1918  ;;  %v6972_v10 = vpop.permute.xlu0 %2666 }
  0xc0   : > { %2238 = vperm.xlu1 %5914, %v351_v8   ;;  %2922 = vperm.xlu0 %5915, %v351_v8  }
  0xc3   : > { %v6975_v12 = vpop.permute.xlu1 %1928  ;;  %v6977_v13 = vpop.permute.xlu0 %2674 }
  0xc4   : > { %2248 = vperm.xlu1 %5914, %v353_v11   ;;  %2930 = vperm.xlu0 %5915, %v353_v11   ;;  %v377_v11 = vld [vmem:[%s6873_s24 + $0x388] sm:$0xff] }
  0xc7   : > { %v6980_v15 = vpop.permute.xlu1 %1938  ;;  %v6982_v16 = vpop.permute.xlu0 %2682 }
  0xc8   : > { %2258 = vperm.xlu1 %5914, %v355_v14   ;;  %2938 = vperm.xlu0 %5915, %v355_v14  }
  0xcb   : > { %v6985_v18 = vpop.permute.xlu1 %1948  ;;  %v6987_v19 = vpop.permute.xlu0 %2690 }
  0xcc   : > { %2268 = vperm.xlu1 %5914, %v357_v17   ;;  %2946 = vperm.xlu0 %5915, %v357_v17  }
  0xcf   : > { %v6990_v21 = vpop.permute.xlu1 %1958  ;;  %v6992_v22 = vpop.permute.xlu0 %2698 }
  0xd0   : > { %2278 = vperm.xlu1 %5914, %v359_v20   ;;  %2954 = vperm.xlu0 %5915, %v359_v20   ;;  %v379_v20 = vld [vmem:[%s6873_s24 + $0x398] sm:$0xff] }
  0xd3   : > { %v6995_v24 = vpop.permute.xlu1 %1968  ;;  %v6997_v25 = vpop.permute.xlu0 %2706 }
  0xd4   : > { %2288 = vperm.xlu1 %5914, %v361_v23   ;;  %2962 = vperm.xlu0 %5915, %v361_v23  }
  0xd7   : > { %v7000_v27 = vpop.permute.xlu1 %1978  ;;  %v7002_v28 = vpop.permute.xlu0 %2714 }
  0xd8   : > { %2298 = vperm.xlu1 %5914, %v363_v26   ;;  %2970 = vperm.xlu0 %5915, %v363_v26  }
  0xdb   : > { %v7005_v30 = vpop.permute.xlu1 %1988  ;;  %v7007_v31 = vpop.permute.xlu0 %2722 }
  0xdc   : > { %2308 = vperm.xlu1 %5914, %v365_v29   ;;  %2978 = vperm.xlu0 %5915, %v365_v29   ;;  %v381_v29 = vld [vmem:[%s6873_s24 + $0x3a8] sm:$0xff] }
  0xdf   : > { %v7010_v33 = vpop.permute.xlu1 %1998  ;;  %v7012_v34 = vpop.permute.xlu0 %2730 }
  0xe0   : > { %2318 = vperm.xlu1 %5914, %v367_v32   ;;  %2986 = vperm.xlu0 %5915, %v367_v32  }
  0xe3   : > { %v7015_v38 = vpop.permute.xlu1 %2008  ;;  %v7017_v41 = vpop.permute.xlu0 %2738 }
  0xe4   : > { %2328 = vperm.xlu1 %5914, %v369_v35   ;;  %2994 = vperm.xlu0 %5915, %v369_v35  }
  0xe7   : > { %v7020_v47 = vpop.permute.xlu1 %2018  ;;  %v7022_v50 = vpop.permute.xlu0 %2746 }
  0xe8   : > { %2338 = vperm.xlu1 %5914, %v371_v44   ;;  %3002 = vperm.xlu0 %5915, %v371_v44   ;;  %v383_v44 = vld [vmem:[%s6873_s24 + $0x3b8] sm:$0xff] }
  0xeb   : > { %v7025_v56 = vpop.permute.xlu1 %2028  ;;  %v7027_v59 = vpop.permute.xlu0 %2754 }
  0xec   : > { %2348 = vperm.xlu1 %5914, %v373_v53   ;;  %3010 = vperm.xlu0 %5915, %v373_v53  }
  0xef   : > { %v7030_v5 = vpop.permute.xlu1 %2038  ;;  %v7032_v8 = vpop.permute.xlu0 %2762 }
  0xf0   : > { %2358 = vperm.xlu1 %5914, %v375_v62   ;;  %3018 = vperm.xlu0 %5915, %v375_v62  }
  0xf3   : > { %v7035_v14 = vpop.permute.xlu1 %2048  ;;  %v7037_v17 = vpop.permute.xlu0 %2770 }
  0xf4   : > { %12105 = vst [vmem:[#allocation2_spill] sm:$0xff] %v7037_v17  ;;  %2368 = vperm.xlu1 %5914, %v377_v11   ;;  %3026 = vperm.xlu0 %5915, %v377_v11   ;;  %v385_v11 = vld [vmem:[%s6873_s24 + $0x3c8] sm:$0xff]  ;;  %v394_v17 = vld [vmem:[%s7271_s27 + $0x10] sm:$0xff] }
  0xf7   : > { %v7040_v23 = vpop.permute.xlu1 %2058  ;;  %v7042_v26 = vpop.permute.xlu0 %2778 }
  0xf8   : > { %12106 = vst [vmem:[#allocation3_spill] sm:$0xff] %v7040_v23  ;;  %12107 = vst [vmem:[#allocation4_spill] sm:$0xff] %v7042_v26  ;;  %2378 = vperm.xlu1 %5914, %v379_v20   ;;  %3034 = vperm.xlu0 %5915, %v379_v20   ;;  %v344_v23 = vld [vmem:[%s6873_s24 + $0x280] sm:$0xff] }
  0xfb   : > { %v7045_v32 = vpop.permute.xlu1 %2068  ;;  %v7047_v35 = vpop.permute.xlu0 %2786 }
  0xfc   : > { %12108 = vst [vmem:[#allocation5_spill] sm:$0xff] %v7045_v32  ;;  %12109 = vst [vmem:[#allocation6_spill] sm:$0xff] %v7047_v35  ;;  %2388 = vperm.xlu1 %5914, %v381_v29   ;;  %3042 = vperm.xlu0 %5915, %v381_v29   ;;  %v12122_v32 = vmov 1  }
  0xff   : > { %v7050_v53 = vpop.permute.xlu1 %2078  ;;  %v7052_v62 = vpop.permute.xlu0 %2794 }
 0x100   : > { %12110 = vst [vmem:[#allocation7_spill] sm:$0xff] %v7050_v53  ;;  %12111 = vst [vmem:[#allocation8_spill] sm:$0xff] %v7052_v62  ;;  %2398 = vperm.xlu1 %5914, %v383_v44   ;;  %3050 = vperm.xlu0 %5915, %v383_v44   ;;  %v389_v53 = vld [vmem:[%s6873_s24 + $0x3e8] sm:$0xff] }
 0x103   : > { %v7055_v1 = vpop.permute.xlu1 %2088  ;;  %v7057_v20 = vpop.permute.xlu0 %2802 }
 0x104   : > { %12112 = vst [vmem:[#allocation9_spill] sm:$0xff] %v7055_v1  ;;  %12113 = vst [vmem:[#allocation10_spill] sm:$0xff] %v7057_v20  ;;  %2408 = vperm.xlu1 %5914, %v385_v11   ;;  %3058 = vperm.xlu0 %5915, %v385_v11   ;;  %v391_v1 = vld [vmem:[%s6873_s24 + $0x3f8] sm:$0xff] }
 0x107   : > { %v7060_v35 = vpop.permute.xlu1 %2098  ;;  %v7062_v29 = vpop.permute.xlu0 %2810 }
 0x108   : > { %12114 = vst [vmem:[#allocation11_spill] sm:$0xff] %v7060_v35  ;;  %12115 = vst [vmem:[#allocation12_spill] sm:$0xff] %v7062_v29  ;;  %2418 = vperm.xlu1 %5914, %v387_v0   ;;  %3066 = vperm.xlu0 %5915, %v387_v0   ;;  %v265_v35 = vld [vmem:[%s6873_s24 + $0x8] sm:$0xff] }
 0x10b   : > { %v7065_v62 = vpop.permute.xlu1 %2108  ;;  %v7067_v44 = vpop.permute.xlu0 %2818 }
 0x10c   : > { %12116 = vst [vmem:[#allocation13_spill] sm:$0xff] %v7065_v62  ;;  %12117 = vst [vmem:[#allocation14_spill] sm:$0xff] %v7067_v44  ;;  %2428 = vperm.xlu1 %5914, %v389_v53   ;;  %3074 = vperm.xlu0 %5915, %v389_v53   ;;  %v12123_v62 = vmov 0  }
 0x10f   : > { %v7070_v20 = vpop.permute.xlu1 %2118  ;;  %v7072_v11 = vpop.permute.xlu0 %2826 }
 0x110   : > { %12118 = vst [vmem:[#allocation15_spill] sm:$0xff] %v7070_v20  ;;  %12119 = vst [vmem:[#allocation16_spill] sm:$0xff] %v7072_v11  ;;  %2438 = vperm.xlu1 %5914, %v391_v1   ;;  %3082 = vperm.xlu0 %5915, %v391_v1   ;;  %v268_v1 = vld [vmem:[%s6873_s24 + $0x20] sm:$0xff] }
 0x113   : > { %v7075_v29 = vpop.permute.xlu1 %2128  ;;  %v7077_v0 = vpop.permute.xlu0 %2834 }
 0x114   : > { %12120 = vst [vmem:[#allocation17_spill] sm:$0xff] %v7075_v29  ;;  %12121 = vst [vmem:[#allocation18_spill] sm:$0xff] %v7077_v0  ;;  %5916 = vset.pattern.permute.xlu1 %v12122_v32  ;;  %5917 = vset.pattern.permute.xlu0 %v12123_v62  ;;  %v270_v32 = vld [vmem:[%s6873_s24 + $0x30] sm:$0xff]  ;;  %v336_v62 = vld [vmem:[%s6873_s24 + $0x240] sm:$0xff] }
 0x115   : > { %2578 = vperm.xlu1 %5916, %v265_v35   ;;  %1803 = vperm.xlu0 %5917, %v6879_v3  }
 0x117   : > { %v7082_v53 = vpop.permute.xlu1 %2138  ;;  %v7084_v20 = vpop.permute.xlu0 %2842 }
 0x118   : > { %12124 = vst [vmem:[#allocation19_spill] sm:$0xff] %v7082_v53  ;;  %12125 = vst [vmem:[#allocation20_spill] sm:$0xff] %v7084_v20  ;;  %v272_v20 = vld [vmem:[%s6873_s24 + $0x40] sm:$0xff]  ;;  %v334_v53 = vld [vmem:[%s6873_s24 + $0x230] sm:$0xff] }
 0x119   : > { %2582 = vperm.xlu1 %5916, %v6876_v2   ;;  %1808 = vperm.xlu0 %5917, %v265_v35  }
 0x11b   : > { %v7088_v29 = vpop.permute.xlu1 %2148  ;;  %v7090_v0 = vpop.permute.xlu0 %2850 }
 0x11c   : > { %12126 = vst [vmem:[#allocation21_spill] sm:$0xff] %v7088_v29  ;;  %12127 = vst [vmem:[#allocation22_spill] sm:$0xff] %v7090_v0  ;;  %v274_v0 = vld [vmem:[%s6873_s24 + $0x50] sm:$0xff] }
 0x11d   : > { %2590 = vperm.xlu1 %5916, %v268_v1   ;;  %1823 = vperm.xlu0 %5917, %v268_v1  }
 0x11f   : > { %v7093_v11 = vpop.permute.xlu1 %2158  ;;  %v7095_v3 = vpop.permute.xlu0 %2858 }
 0x120   : > { %12128 = vst [vmem:[#allocation23_spill] sm:$0xff] %v7093_v11  ;;  %12129 = vst [vmem:[#allocation24_spill] sm:$0xff] %v7095_v3  ;;  %v276_v3 = vld [vmem:[%s6873_s24 + $0x60] sm:$0xff] }
 0x121   : > { %2598 = vperm.xlu1 %5916, %v270_v32   ;;  %1833 = vperm.xlu0 %5917, %v270_v32  }
 0x123   : > { %v7098_v2 = vpop.permute.xlu1 %2168  ;;  %v7100_v35 = vpop.permute.xlu0 %2866 }
 0x124   : > { %12130 = vst [vmem:[#allocation25_spill] sm:$0xff] %v7098_v2  ;;  %12131 = vst [vmem:[#allocation26_spill] sm:$0xff] %v7100_v35  ;;  %v278_v35 = vld [vmem:[%s6873_s24 + $0x70] sm:$0xff] }
 0x125   : > { %2606 = vperm.xlu1 %5916, %v272_v20   ;;  %1843 = vperm.xlu0 %5917, %v272_v20  }
 0x127   : > { %v7103_v29 = vpop.permute.xlu1 %2178  ;;  %v7105_v1 = vpop.permute.xlu0 %2874 }
 0x128   : > { %12132 = vst [vmem:[#allocation27_spill] sm:$0xff] %v7103_v29  ;;  %12133 = vst [vmem:[#allocation28_spill] sm:$0xff] %v7105_v1  ;;  %v280_v1 = vld [vmem:[%s6873_s24 + $0x80] sm:$0xff] }
 0x129   : > { %2614 = vperm.xlu1 %5916, %v274_v0   ;;  %1853 = vperm.xlu0 %5917, %v274_v0  }
 0x12b   : > { %v7108_v11 = vpop.permute.xlu1 %2188  ;;  %v7110_v32 = vpop.permute.xlu0 %2882 }
 0x12c   : > { %12134 = vst [vmem:[#allocation29_spill] sm:$0xff] %v7108_v11  ;;  %12135 = vst [vmem:[#allocation30_spill] sm:$0xff] %v7110_v32  ;;  %v282_v32 = vld [vmem:[%s6873_s24 + $0x90] sm:$0xff] }
 0x12d   : > { %2622 = vperm.xlu1 %5916, %v276_v3   ;;  %1863 = vperm.xlu0 %5917, %v276_v3  }
 0x12f   : > { %v7113_v2 = vpop.permute.xlu1 %2198  ;;  %v7115_v20 = vpop.permute.xlu0 %2890 }
 0x130   : > { %12136 = vst [vmem:[#allocation31_spill] sm:$0xff] %v7113_v2  ;;  %12137 = vst [vmem:[#allocation32_spill] sm:$0xff] %v7115_v20  ;;  %v284_v20 = vld [vmem:[%s6873_s24 + $0xa0] sm:$0xff] }
 0x131   : > { %2630 = vperm.xlu1 %5916, %v278_v35   ;;  %1873 = vperm.xlu0 %5917, %v278_v35  }
 0x133   : > { %v7118_v29 = vpop.permute.xlu1 %2208  ;;  %v7120_v0 = vpop.permute.xlu0 %2898 }
 0x134   : > { %12138 = vst [vmem:[#allocation33_spill] sm:$0xff] %v7118_v29  ;;  %12139 = vst [vmem:[#allocation34_spill] sm:$0xff] %v7120_v0  ;;  %v286_v0 = vld [vmem:[%s6873_s24 + $0xb0] sm:$0xff] }
 0x135   : > { %2638 = vperm.xlu1 %5916, %v280_v1   ;;  %1883 = vperm.xlu0 %5917, %v280_v1  }
 0x137   : > { %v7123_v11 = vpop.permute.xlu1 %2218  ;;  %v7125_v3 = vpop.permute.xlu0 %2906 }
 0x138   : > { %12140 = vst [vmem:[#allocation35_spill] sm:$0xff] %v7123_v11  ;;  %12141 = vst [vmem:[#allocation36_spill] sm:$0xff] %v7125_v3  ;;  %v288_v3 = vld [vmem:[%s6873_s24 + $0xc0] sm:$0xff] }
 0x139   : > { %2646 = vperm.xlu1 %5916, %v282_v32   ;;  %1893 = vperm.xlu0 %5917, %v282_v32  }
 0x13b   : > { %v7128_v2 = vpop.permute.xlu1 %2228  ;;  %v7130_v35 = vpop.permute.xlu0 %2914 }
 0x13c   : > { %12142 = vst [vmem:[#allocation37_spill] sm:$0xff] %v7128_v2  ;;  %12143 = vst [vmem:[#allocation38_spill] sm:$0xff] %v7130_v35  ;;  %v290_v35 = vld [vmem:[%s6873_s24 + $0xd0] sm:$0xff] }
 0x13d   : > { %2654 = vperm.xlu1 %5916, %v284_v20   ;;  %1903 = vperm.xlu0 %5917, %v284_v20  }
 0x13f   : > { %v7133_v29 = vpop.permute.xlu1 %2238  ;;  %v7135_v1 = vpop.permute.xlu0 %2922 }
 0x140   : > { %12144 = vst [vmem:[#allocation39_spill] sm:$0xff] %v7133_v29  ;;  %12145 = vst [vmem:[#allocation40_spill] sm:$0xff] %v7135_v1  ;;  %v292_v1 = vld [vmem:[%s6873_s24 + $0xe0] sm:$0xff] }
 0x141   : > { %2662 = vperm.xlu1 %5916, %v286_v0   ;;  %1913 = vperm.xlu0 %5917, %v286_v0  }
 0x143   : > { %v7138_v11 = vpop.permute.xlu1 %2248  ;;  %v7140_v32 = vpop.permute.xlu0 %2930 }
 0x144   : > { %12146 = vst [vmem:[#allocation41_spill] sm:$0xff] %v7138_v11  ;;  %12147 = vst [vmem:[#allocation42_spill] sm:$0xff] %v7140_v32  ;;  %v294_v32 = vld [vmem:[%s6873_s24 + $0xf0] sm:$0xff] }
 0x145   : > { %2670 = vperm.xlu1 %5916, %v288_v3   ;;  %1923 = vperm.xlu0 %5917, %v288_v3  }
 0x147   : > { %v7143_v2 = vpop.permute.xlu1 %2258  ;;  %v7145_v20 = vpop.permute.xlu0 %2938 }
 0x148   : > { %12148 = vst [vmem:[#allocation43_spill] sm:$0xff] %v7143_v2  ;;  %12149 = vst [vmem:[#allocation44_spill] sm:$0xff] %v7145_v20  ;;  %v296_v20 = vld [vmem:[%s6873_s24 + $0x100] sm:$0xff] }
 0x149   : > { %2678 = vperm.xlu1 %5916, %v290_v35   ;;  %1933 = vperm.xlu0 %5917, %v290_v35  }
 0x14b   : > { %v7148_v29 = vpop.permute.xlu1 %2268  ;;  %v7150_v0 = vpop.permute.xlu0 %2946 }
 0x14c   : > { %12150 = vst [vmem:[#allocation45_spill] sm:$0xff] %v7148_v29  ;;  %12151 = vst [vmem:[#allocation46_spill] sm:$0xff] %v7150_v0  ;;  %v298_v0 = vld [vmem:[%s6873_s24 + $0x110] sm:$0xff] }
 0x14d   : > { %2686 = vperm.xlu1 %5916, %v292_v1   ;;  %1943 = vperm.xlu0 %5917, %v292_v1  }
 0x14f   : > { %v7153_v11 = vpop.permute.xlu1 %2278  ;;  %v7155_v3 = vpop.permute.xlu0 %2954 }
 0x150   : > { %12152 = vst [vmem:[#allocation47_spill] sm:$0xff] %v7153_v11  ;;  %12153 = vst [vmem:[#allocation48_spill] sm:$0xff] %v7155_v3  ;;  %v300_v3 = vld [vmem:[%s6873_s24 + $0x120] sm:$0xff] }
 0x151   : > { %2694 = vperm.xlu1 %5916, %v294_v32   ;;  %1953 = vperm.xlu0 %5917, %v294_v32  }
 0x153   : > { %v7158_v2 = vpop.permute.xlu1 %2288  ;;  %v7160_v35 = vpop.permute.xlu0 %2962 }
 0x154   : > { %12154 = vst [vmem:[#allocation49_spill] sm:$0xff] %v7158_v2  ;;  %12155 = vst [vmem:[#allocation50_spill] sm:$0xff] %v7160_v35  ;;  %v302_v35 = vld [vmem:[%s6873_s24 + $0x130] sm:$0xff] }
 0x155   : > { %2702 = vperm.xlu1 %5916, %v296_v20   ;;  %1963 = vperm.xlu0 %5917, %v296_v20  }
 0x157   : > { %v7163_v29 = vpop.permute.xlu1 %2298  ;;  %v7165_v1 = vpop.permute.xlu0 %2970 }
 0x158   : > { %12156 = vst [vmem:[#allocation51_spill] sm:$0xff] %v7163_v29  ;;  %12157 = vst [vmem:[#allocation52_spill] sm:$0xff] %v7165_v1  ;;  %v304_v1 = vld [vmem:[%s6873_s24 + $0x140] sm:$0xff] }
 0x159   : > { %2710 = vperm.xlu1 %5916, %v298_v0   ;;  %1973 = vperm.xlu0 %5917, %v298_v0  }
 0x15b   : > { %v7168_v11 = vpop.permute.xlu1 %2308  ;;  %v7170_v32 = vpop.permute.xlu0 %2978 }
 0x15c   : > { %12158 = vst [vmem:[#allocation53_spill] sm:$0xff] %v7168_v11  ;;  %12159 = vst [vmem:[#allocation54_spill] sm:$0xff] %v7170_v32  ;;  %v306_v32 = vld [vmem:[%s6873_s24 + $0x150] sm:$0xff] }
 0x15d   : > { %2718 = vperm.xlu1 %5916, %v300_v3   ;;  %1983 = vperm.xlu0 %5917, %v300_v3  }
 0x15f   : > { %v7173_v2 = vpop.permute.xlu1 %2318  ;;  %v7175_v20 = vpop.permute.xlu0 %2986 }
 0x160   : > { %12160 = vst [vmem:[#allocation55_spill] sm:$0xff] %v7173_v2  ;;  %12161 = vst [vmem:[#allocation56_spill] sm:$0xff] %v7175_v20  ;;  %v308_v20 = vld [vmem:[%s6873_s24 + $0x160] sm:$0xff] }
 0x161   : > { %2726 = vperm.xlu1 %5916, %v302_v35   ;;  %1993 = vperm.xlu0 %5917, %v302_v35  }
 0x163   : > { %v7178_v29 = vpop.permute.xlu1 %2328  ;;  %v7180_v0 = vpop.permute.xlu0 %2994 }
 0x164   : > { %12162 = vst [vmem:[#allocation57_spill] sm:$0xff] %v7178_v29  ;;  %12163 = vst [vmem:[#allocation58_spill] sm:$0xff] %v7180_v0  ;;  %v310_v0 = vld [vmem:[%s6873_s24 + $0x170] sm:$0xff] }
 0x165   : > { %2734 = vperm.xlu1 %5916, %v304_v1   ;;  %2003 = vperm.xlu0 %5917, %v304_v1  }
 0x167   : > { %v7183_v11 = vpop.permute.xlu1 %2338  ;;  %v7185_v3 = vpop.permute.xlu0 %3002 }
 0x168   : > { %12164 = vst [vmem:[#allocation59_spill] sm:$0xff] %v7183_v11  ;;  %12165 = vst [vmem:[#allocation60_spill] sm:$0xff] %v7185_v3  ;;  %v312_v3 = vld [vmem:[%s6873_s24 + $0x180] sm:$0xff] }
 0x169   : > { %2742 = vperm.xlu1 %5916, %v306_v32   ;;  %2013 = vperm.xlu0 %5917, %v306_v32  }
 0x16b   : > { %v7188_v2 = vpop.permute.xlu1 %2348  ;;  %v7190_v35 = vpop.permute.xlu0 %3010 }
 0x16c   : > { %12166 = vst [vmem:[#allocation61_spill] sm:$0xff] %v7188_v2  ;;  %12167 = vst [vmem:[#allocation62_spill] sm:$0xff] %v7190_v35  ;;  %v314_v35 = vld [vmem:[%s6873_s24 + $0x190] sm:$0xff] }
 0x16d   : > { %2750 = vperm.xlu1 %5916, %v308_v20   ;;  %2023 = vperm.xlu0 %5917, %v308_v20  }
 0x16f   : > { %v7193_v29 = vpop.permute.xlu1 %2358  ;;  %v7195_v1 = vpop.permute.xlu0 %3018 }
 0x170   : > { %12168 = vst [vmem:[#allocation63_spill] sm:$0xff] %v7193_v29  ;;  %12169 = vst [vmem:[#allocation64_spill] sm:$0xff] %v7195_v1  ;;  %v316_v1 = vld [vmem:[%s6873_s24 + $0x1a0] sm:$0xff] }
 0x171   : > { %2758 = vperm.xlu1 %5916, %v310_v0   ;;  %2033 = vperm.xlu0 %5917, %v310_v0  }
 0x173   : > { %v7198_v11 = vpop.permute.xlu1 %2368  ;;  %v7200_v32 = vpop.permute.xlu0 %3026 }
 0x174   : > { %12170 = vst [vmem:[#allocation65_spill] sm:$0xff] %v7198_v11  ;;  %12171 = vst [vmem:[#allocation66_spill] sm:$0xff] %v7200_v32  ;;  %v318_v32 = vld [vmem:[%s6873_s24 + $0x1b0] sm:$0xff] }
 0x175   : > { %2766 = vperm.xlu1 %5916, %v312_v3   ;;  %2043 = vperm.xlu0 %5917, %v312_v3  }
 0x177   : > { %v7203_v2 = vpop.permute.xlu1 %2378  ;;  %v7205_v20 = vpop.permute.xlu0 %3034 }
 0x178   : > { %12172 = vst [vmem:[#allocation67_spill] sm:$0xff] %v7203_v2  ;;  %12173 = vst [vmem:[#allocation68_spill] sm:$0xff] %v7205_v20  ;;  %v320_v20 = vld [vmem:[%s6873_s24 + $0x1c0] sm:$0xff] }
 0x179   : > { %2774 = vperm.xlu1 %5916, %v314_v35   ;;  %2053 = vperm.xlu0 %5917, %v314_v35  }
 0x17b   : > { %v7208_v29 = vpop.permute.xlu1 %2388  ;;  %v7210_v0 = vpop.permute.xlu0 %3042 }
 0x17c   : > { %12174 = vst [vmem:[#allocation69_spill] sm:$0xff] %v7208_v29  ;;  %12175 = vst [vmem:[#allocation70_spill] sm:$0xff] %v7210_v0  ;;  %v322_v0 = vld [vmem:[%s6873_s24 + $0x1d0] sm:$0xff] }
 0x17d   : > { %2782 = vperm.xlu1 %5916, %v316_v1   ;;  %2063 = vperm.xlu0 %5917, %v316_v1  }
 0x17f   : > { %v7213_v11 = vpop.permute.xlu1 %2398  ;;  %v7215_v3 = vpop.permute.xlu0 %3050 }
 0x180   : > { %12176 = vst [vmem:[#allocation71_spill] sm:$0xff] %v7213_v11  ;;  %12177 = vst [vmem:[#allocation72_spill] sm:$0xff] %v7215_v3  ;;  %v324_v3 = vld [vmem:[%s6873_s24 + $0x1e0] sm:$0xff] }
 0x181   : > { %2790 = vperm.xlu1 %5916, %v318_v32   ;;  %2073 = vperm.xlu0 %5917, %v318_v32  }
 0x183   : > { %v7218_v2 = vpop.permute.xlu1 %2408  ;;  %v7220_v35 = vpop.permute.xlu0 %3058 }
 0x184   : > { %12178 = vst [vmem:[#allocation73_spill] sm:$0xff] %v7218_v2  ;;  %12179 = vst [vmem:[#allocation74_spill] sm:$0xff] %v7220_v35  ;;  %v326_v35 = vld [vmem:[%s6873_s24 + $0x1f0] sm:$0xff] }
 0x185   : > { %2798 = vperm.xlu1 %5916, %v320_v20   ;;  %2083 = vperm.xlu0 %5917, %v320_v20  }
 0x187   : > { %v7223_v29 = vpop.permute.xlu1 %2418  ;;  %v7225_v1 = vpop.permute.xlu0 %3066 }
 0x188   : > { %12180 = vst [vmem:[#allocation75_spill] sm:$0xff] %v7223_v29  ;;  %12181 = vst [vmem:[#allocation76_spill] sm:$0xff] %v7225_v1  ;;  %v328_v1 = vld [vmem:[%s6873_s24 + $0x200] sm:$0xff] }
 0x189   : > { %2806 = vperm.xlu1 %5916, %v322_v0   ;;  %2093 = vperm.xlu0 %5917, %v322_v0  }
 0x18b   : > { %v7228_v11 = vpop.permute.xlu1 %2428  ;;  %v7230_v32 = vpop.permute.xlu0 %3074 }
 0x18c   : > { %12182 = vst [vmem:[#allocation77_spill] sm:$0xff] %v7228_v11  ;;  %12183 = vst [vmem:[#allocation78_spill] sm:$0xff] %v7230_v32  ;;  %v330_v32 = vld [vmem:[%s6873_s24 + $0x210] sm:$0xff] }
 0x18d   : > { %2814 = vperm.xlu1 %5916, %v324_v3   ;;  %2103 = vperm.xlu0 %5917, %v324_v3  }
 0x18f   : > { %v7233_v2 = vpop.permute.xlu1 %2438  ;;  %v7235_v20 = vpop.permute.xlu0 %3082 }
 0x190   : > { %12184 = vst [vmem:[#allocation79_spill] sm:$0xff] %v7233_v2  ;;  %12185 = vst [vmem:[#allocation80_spill] sm:$0xff] %v7235_v20  ;;  %v332_v2 = vld [vmem:[%s6873_s24 + $0x220] sm:$0xff] }
 0x191   : > { %2822 = vperm.xlu1 %5916, %v326_v35   ;;  %2113 = vperm.xlu0 %5917, %v326_v35  }
 0x194   : > { %v7238_v29 = vpop.permute.xlu1 %2578  ;;  %v7240_v0 = vpop.permute.xlu0 %1803 }
 0x195   : > { %12186 = vst [vmem:[#allocation81_spill] sm:$0xff] %v7238_v29  ;;  %12187 = vst [vmem:[#allocation82_spill] sm:$0xff] %v7240_v0  ;;  %2830 = vperm.xlu1 %5916, %v328_v1   ;;  %2123 = vperm.xlu0 %5917, %v328_v1  }
 0x198   : > { %v7243_v11 = vpop.permute.xlu1 %2582  ;;  %v7245_v3 = vpop.permute.xlu0 %1808 }
 0x199   : > { %12188 = vst [vmem:[#allocation83_spill] sm:$0xff] %v7243_v11  ;;  %12189 = vst [vmem:[#allocation84_spill] sm:$0xff] %v7245_v3  ;;  %2838 = vperm.xlu1 %5916, %v330_v32   ;;  %2133 = vperm.xlu0 %5917, %v330_v32   ;;  %v2441_v3 = vlaneseq }
 0x19c   : > { %v7248_v20 = vpop.permute.xlu1 %2590  ;;  %v7250_v35 = vpop.permute.xlu0 %1823 }
 0x19d   : > { %12190 = vst [vmem:[#allocation85_spill] sm:$0xff] %v7248_v20  ;;  %12191 = vst [vmem:[#allocation86_spill] sm:$0xff] %v7250_v35  ;;  %2846 = vperm.xlu1 %5916, %v332_v2   ;;  %2143 = vperm.xlu0 %5917, %v332_v2   ;;  %v338_v35 = vld [vmem:[%s6873_s24 + $0x250] sm:$0xff]  ;;  %v2442_v2 = vshrl.u32 %v2441_v3, 7 }
 0x19f   : > { %v3087_v3 = vsub.s32 1, %v2442_v2 }
 0x1a0   : > { %v7253_v44 = vpop.permute.xlu1 %2598  ;;  %v7255_v1 = vpop.permute.xlu0 %1833 }
 0x1a1   : > { %12192 = vst [vmem:[#allocation87_spill] sm:$0xff] %v7253_v44  ;;  %12193 = vst [vmem:[#allocation88_spill] sm:$0xff] %v7255_v1  ;;  %2854 = vperm.xlu1 %5916, %v334_v53   ;;  %2153 = vperm.xlu0 %5917, %v334_v53   ;;  %v340_v53 = vld [vmem:[%s6873_s24 + $0x260] sm:$0xff] }
 0x1a4   : > { %v7258_v32 = vpop.permute.xlu1 %2606  ;;  %v7260_v11 = vpop.permute.xlu0 %1843 }
 0x1a5   : > { %12194 = vst [vmem:[#allocation89_spill] sm:$0xff] %v7258_v32  ;;  %12195 = vst [vmem:[#allocation90_spill] sm:$0xff] %v7260_v11  ;;  %2862 = vperm.xlu1 %5916, %v336_v62   ;;  %2163 = vperm.xlu0 %5917, %v336_v62   ;;  %v2443_v11 = vsub.s32 0, %v2442_v2  ;;  %v1800_v62 = vld [vmem:[%s11988_s3] sm:$0x3]  ;;  %v342_v32 = vld [vmem:[%s6873_s24 + $0x270] sm:$0xff] }
 0x1a6   : > { %v7285_v0 = vrot.slane %v1800_v62, %v3087_v3  ;;  %v392_v2 = vld [vmem:[%s7271_s27] sm:$0xff] }
 0x1a7   : > { %v7283_v1 = vrot.slane %v1800_v62, %v2443_v11 }
 0x1a8   : > { %v7263_v20 = vpop.permute.xlu1 %2614  ;;  %v7265_v44 = vpop.permute.xlu0 %1853  ;;  %v3094_v3 = vmul.f32 %v7285_v0, %v6927_v43  ;;  %v346_v43 = vld [vmem:[%s6873_s24 + $0x290] sm:$0xff] }
 0x1a9   : > { %12196 = vst [vmem:[#allocation91_spill] sm:$0xff] %v7263_v20  ;;  %12197 = vst [vmem:[#allocation92_spill] sm:$0xff] %v7265_v44  ;;  %2870 = vperm.xlu1 %5916, %v338_v35   ;;  %2173 = vperm.xlu0 %5917, %v338_v35   ;;  %v393_v44 = vld [vmem:[%s7271_s27 + $0x8] sm:$0xff]  ;;  %v2448_v11 = vmul.f32 %v7283_v1, %v6920_v39  ;;  %v3096_v39 = vmul.f32 %v7285_v0, %v6932_v46 }
 0x1aa   : > { %5919 = vrcp.f32 %v393_v44  ;;  %v7301_v44 = vmul.f32 %v7285_v0, %v6917_v37  ;;  %v2452_v37 = vmul.f32 %v7283_v1, %v6930_v45  ;;  %v3100_v45 = vmul.f32 %v7285_v0, %v6942_v52 }
 0x1ab   : > { %5921 = vrcp.f32 %v392_v2  ;;  %v3102_v46 = vmul.f32 %v7285_v0, %v6947_v55  ;;  %v3106_v52 = vmul.f32 %v7285_v0, %v6957_v61  ;;  %v398_v2 = vld [vmem:[%s7271_s27 + $0x30] sm:$0xff]  ;;  %v3110_v61 = vmul.f32 %v7285_v0, %v6967_v7 }
 0x1ac   : > { %v7277_v20 = vpop.permute.xlu1 %2622  ;;  %v7279_v35 = vpop.permute.xlu0 %1863 }
 0x1ad   : > { %12198 = vst [vmem:[#allocation93_spill] sm:$0xff] %v7277_v20  ;;  %12199 = vst [vmem:[#allocation94_spill] sm:$0xff] %v7279_v35  ;;  %2878 = vperm.xlu1 %5916, %v340_v53   ;;  %2183 = vperm.xlu0 %5917, %v340_v53   ;;  %v396_v20 = vld [vmem:[%s7271_s27 + $0x20] sm:$0xff]  ;;  %v7297_v35 = vmul.f32 %v7283_v1, %v6915_v36  ;;  %v3092_v53 = vmul.f32 %v7285_v0, %v6922_v40 }
 0x1ae   : > { %5923 = vrcp.f32 %v396_v20  ;;  %v2450_v36 = vmul.f32 %v7283_v1, %v6925_v42  ;;  %v2454_v40 = vmul.f32 %v7283_v1, %v6935_v48  ;;  %v3098_v20 = vmul.f32 %v7285_v0, %v6937_v49 }
 0x1af   : > { %5925 = vrcp.f32 %v394_v17  ;;  %v2456_v42 = vmul.f32 %v7283_v1, %v6940_v51  ;;  %v2458_v17 = vmul.f32 %v7283_v1, %v6945_v54  ;;  %v2460_v48 = vmul.f32 %v7283_v1, %v6950_v57 }
 0x1b0   : > { %v7287_v29 = vpop.permute.xlu1 %2630  ;;  %v7289_v26 = vpop.permute.xlu0 %1873  ;;  %v3104_v49 = vmul.f32 %v7285_v0, %v6952_v58  ;;  %v2462_v51 = vmul.f32 %v7283_v1, %v6955_v60  ;;  %v2464_v54 = vmul.f32 %v7283_v1, %v6960_v63  ;;  %v3108_v58 = vmul.f32 %v7285_v0, %v6962_v4  ;;  %v395_v63 = vld [vmem:[%s7271_s27 + $0x18] sm:$0xff]  ;;  %v400_v4 = vld [vmem:[%s7271_s27 + $0x40] sm:$0xff] }
 0x1b1   : > { %12200 = vst [vmem:[#allocation95_spill] sm:$0xff] %v7287_v29  ;;  %12201 = vst [vmem:[#allocation96_spill] sm:$0xff] %v7289_v26  ;;  %2886 = vperm.xlu1 %5916, %v342_v32   ;;  %2193 = vperm.xlu0 %5917, %v342_v32   ;;  %v2466_v60 = vmul.f32 %v7283_v1, %v6965_v6  ;;  %v7363_v26 = vadd.f32 %v3094_v3, %v2450_v36  ;;  %5927 = vrcp.f32 %v398_v2  ;;  %v352_v2 = vld [vmem:[%s6873_s24 + $0x2c0] sm:$0xff] }
 0x1b2   : > { %v7366_v6 = vadd.f32 %v3096_v39, %v2452_v37  ;;  %v7368_v29 = vadd.f32 %v3098_v20, %v2454_v40  ;;  %v7370_v7 = vadd.f32 %v3100_v45, %v2456_v42  ;;  %5929 = vrcp.f32 %v395_v63  ;;  %v350_v45 = vld [vmem:[%s6873_s24 + $0x2b0] sm:$0xff] }
 0x1b3   : > { %12208 = vst [vmem:[#allocation103_spill] sm:$0xff] %v7363_v26  ;;  %v7385_v3 = vadd.f32 %v3106_v52, %v2462_v51  ;;  %v7387_v37 = vadd.f32 %v3108_v58, %v2464_v54  ;;  %v7389_v39 = vadd.f32 %v3110_v61, %v2466_v60  ;;  %v2470_v20 = vmul.f32 %v7283_v1, %v6975_v12 }
 0x1b4   : > { %v7307_v32 = vpop.permute.xlu1 %2638  ;;  %v7309_v62 = vpop.permute.xlu0 %1883  ;;  %12209 = vst [vmem:[#allocation104_spill] sm:$0xff] %v7366_v6  ;;  %12210 = vst [vmem:[#allocation105_spill] sm:$0xff] %v7368_v29  ;;  %v3114_v42 = vmul.f32 %v7285_v0, %v6977_v13  ;;  %5931 = vrcp.f32 %v400_v4  ;;  %v2474_v51 = vmul.f32 %v7283_v1, %v6985_v18  ;;  %v3118_v12 = vmul.f32 %v7285_v0, %v6987_v19  ;;  %v402_v13 = vld [vmem:[%s7271_s27 + $0x50] sm:$0xff]  ;;  %v12266_v6 = vld [vmem:[#allocation87_spill] sm:$0xff] }
 0x1b5   : > { %12202 = vst [vmem:[#allocation97_spill] sm:$0xff] %v7307_v32  ;;  %12203 = vst [vmem:[#allocation98_spill] sm:$0xff] %v7309_v62  ;;  %2894 = vperm.xlu1 %5916, %v344_v23   ;;  %2203 = vperm.xlu0 %5917, %v344_v23   ;;  %v7347_v57 = vpop.eup %5919  ;;  %v348_v62 = vld [vmem:[%s6873_s24 + $0x2a0] sm:$0xff]  ;;  %v7361_v32 = vadd.f32 %v3092_v53, %v2448_v11  ;;  %v7379_v11 = vadd.f32 %v3102_v46, %v2458_v17  ;;  %v397_v17 = vld [vmem:[%s7271_s27 + $0x28] sm:$0xff] }
 0x1b6   : > { %12206 = vst [vmem:[#allocation101_spill] sm:$0xff] %v7347_v57  ;;  %12211 = vst [vmem:[#allocation106_spill] sm:$0xff] %v7370_v7  ;;  %v7381_v53 = vadd.f32 %v3104_v49, %v2460_v48  ;;  %v7383_v36 = vpop.eup %5921  ;;  %v2472_v48 = vmul.f32 %v7283_v1, %v6980_v15  ;;  %v3116_v49 = vmul.f32 %v7285_v0, %v6982_v16 }
 0x1b7   : > { %12207 = vst [vmem:[#allocation102_spill] sm:$0xff] %v7361_v32  ;;  %12212 = vst [vmem:[#allocation107_spill] sm:$0xff] %v7379_v11  ;;  %v2476_v52 = vmul.f32 %v7283_v1, %v6990_v21  ;;  %v3120_v54 = vmul.f32 %v7285_v0, %v6992_v22  ;;  %v7422_v16 = vmul.f32 2.0, %v7383_v36  ;;  %v2478_v18 = vmul.f32 %v7283_v1, %v6995_v24  ;;  %v12274_v32 = vld [vmem:[#allocation89_spill] sm:$0xff] }
 0x1b8   : > { %v7342_v23 = vpop.permute.xlu1 %2646  ;;  %v7344_v55 = vpop.permute.xlu0 %1893  ;;  %12213 = vst [vmem:[#allocation108_spill] sm:$0xff] %v7381_v53  ;;  %12214 = vst [vmem:[#allocation109_spill] sm:$0xff] %v7383_v36  ;;  %v3122_v19 = vmul.f32 %v7285_v0, %v6997_v25  ;;  %v2480_v22 = vmul.f32 %v7283_v1, %v7000_v27  ;;  %v2482_v24 = vmul.f32 %v7283_v1, %v7005_v30 }
 0x1b9   : > { %12204 = vst [vmem:[#allocation99_spill] sm:$0xff] %v7342_v23  ;;  %12205 = vst [vmem:[#allocation100_spill] sm:$0xff] %v7344_v55  ;;  %2902 = vperm.xlu1 %5916, %v346_v43   ;;  %2213 = vperm.xlu0 %5917, %v346_v43   ;;  %v2468_v23 = vmul.f32 %v7283_v1, %v6970_v9  ;;  %v3112_v55 = vmul.f32 %v7285_v0, %v6972_v10  ;;  %v7377_v10 = vmul.f32 2.0, %v7347_v57  ;;  %v7391_v40 = vpop.eup %5923 }
 0x1ba   : > { %12215 = vst [vmem:[#allocation110_spill] sm:$0xff] %v7385_v3  ;;  %12216 = vst [vmem:[#allocation111_spill] sm:$0xff] %v7387_v37  ;;  %v7429_v21 = vmul.f32 2.0, %v7391_v40  ;;  %v3126_v25 = vmul.f32 %v7285_v0, %v7007_v31  ;;  %v2484_v60 = vmul.f32 %v7283_v1, %v7010_v33  ;;  %v3128_v27 = vmul.f32 %v7285_v0, %v7012_v34  ;;  %v399_v33 = vld [vmem:[%s7271_s27 + $0x38] sm:$0xff] }
 0x1bb   : > { %12217 = vst [vmem:[#allocation112_spill] sm:$0xff] %v7389_v39  ;;  %12218 = vst [vmem:[#allocation113_spill] sm:$0xff] %v7391_v40  ;;  %v7399_v46 = vadd.f32 %v3112_v55, %v2468_v23  ;;  %5933 = vrsqrt.f32 %v7377_v10  ;;  %v3124_v55 = vmul.f32 %v7285_v0, %v7002_v28  ;;  %v2486_v28 = vmul.f32 %v7283_v1, %v7015_v38 }
 0x1bc   : > { %v7372_v43 = vpop.permute.xlu1 %2654  ;;  %v7374_v9 = vpop.permute.xlu0 %1903  ;;  %5935 = vrcp.f32 %v397_v17  ;;  %v3130_v61 = vmul.f32 %v7285_v0, %v7017_v41  ;;  %v2488_v30 = vmul.f32 %v7283_v1, %v7020_v47  ;;  %v3132_v34 = vmul.f32 %v7285_v0, %v7022_v50  ;;  %v404_v47 = vld [vmem:[%s7271_s27 + $0x60] sm:$0xff]  ;;  %v354_v17 = vld [vmem:[%s6873_s24 + $0x2d0] sm:$0xff] }
 0x1bd   : > { %2910 = vperm.xlu1 %5916, %v348_v62   ;;  %2223 = vperm.xlu0 %5917, %v348_v62   ;;  %12219 = vst [vmem:[#allocation114_spill] sm:$0xff] %v7399_v46  ;;  %v7401_v62 = vpop.eup %5925  ;;  %5937 = vrcp.f32 %v402_v13  ;;  %v2490_v38 = vmul.f32 %v7283_v1, %v7025_v56  ;;  %v3134_v41 = vmul.f32 %v7285_v0, %v7027_v59  ;;  %vm913_vm0 = vcmp.eq.f32.partialorder %v7377_v10, inf }
 0x1be   : > { %12220 = vst [vmem:[#allocation115_spill] sm:$0xff] %v7401_v62  ;;  %v7437_v58 = vmul.f32 2.0, %v7401_v62  ;;  %5939 = vrsqrt.f32 %v7422_v16  ;;  %v7459_v4 = vpop.eup %5927  ;;  %v7473_v13 = vadd.f32 %v3114_v42, %v2470_v20  ;;  %v7475_v50 = vadd.f32 %v3116_v49, %v2472_v48  ;;  %v401_v42 = vld [vmem:[%s7271_s27 + $0x48] sm:$0xff] }
 0x1bf   : > { %12221 = vst [vmem:[#allocation116_spill] sm:$0xff] %v7459_v4  ;;  %5941 = vrsqrt.f32 %v7429_v21  ;;  %v7477_v40 = vadd.f32 %v3118_v12, %v2474_v51  ;;  %v7479_v56 = vadd.f32 %v3120_v54, %v2476_v52  ;;  %v7481_v59 = vadd.f32 %v3122_v19, %v2478_v18 }
 0x1c0   : > { %v7416_v23 = vpop.permute.xlu1 %2662  ;;  %v7418_v15 = vpop.permute.xlu0 %1913  ;;  %5943 = vrsqrt.f32 %v7437_v58  ;;  %12223 = vst [vmem:[#allocation118_spill] sm:$0xff] %v7473_v13  ;;  %12224 = vst [vmem:[#allocation119_spill] sm:$0xff] %v7475_v50  ;;  %v7492_v20 = vmul.f32 2.0, %v7459_v4  ;;  %v7495_v48 = vadd.f32 %v3126_v25, %v2482_v24  ;;  %v7497_v49 = vadd.f32 %v3128_v27, %v2484_v60  ;;  %v12235_v24 = vld [vmem:[#allocation2_spill] sm:$0xff]  ;;  %v12244_v4 = vld [vmem:[#allocation9_spill] sm:$0xff] }
 0x1c1   : > { %2918 = vperm.xlu1 %5916, %v350_v45   ;;  %2233 = vperm.xlu0 %5917, %v350_v45   ;;  %v7469_v45 = vpop.eup %5929  ;;  %12225 = vst [vmem:[#allocation120_spill] sm:$0xff] %v7477_v40  ;;  %5945 = vrcp.f32 %v399_v33  ;;  %12226 = vst [vmem:[#allocation121_spill] sm:$0xff] %v7479_v56  ;;  %v7502_v12 = vadd.f32 %v3130_v61, %v2486_v28  ;;  %v7504_v52 = vadd.f32 %v3132_v34, %v2488_v30  ;;  %v356_v60 = vld [vmem:[%s6873_s24 + $0x2e0] sm:$0xff]  ;;  %v12237_v28 = vld [vmem:[#allocation3_spill] sm:$0xff] }
 0x1c2   : > { %12222 = vst [vmem:[#allocation117_spill] sm:$0xff] %v7469_v45  ;;  %12227 = vst [vmem:[#allocation122_spill] sm:$0xff] %v7481_v59  ;;  %v7485_v57 = vpop.eup %5931  ;;  %5947 = vrcp.f32 %v404_v47  ;;  %v7500_v51 = vmul.f32 2.0, %v7469_v45  ;;  %v7506_v54 = vadd.f32 %v3134_v41, %v2490_v38  ;;  %v2492_v19 = vmul.f32 %v7283_v1, %v7030_v5  ;;  %v12238_v30 = vld [vmem:[#allocation4_spill] sm:$0xff]  ;;  %v12241_v41 = vld [vmem:[#allocation6_spill] sm:$0xff] }
 0x1c3   : > { %12229 = vst [vmem:[#allocation124_spill] sm:$0xff] %v7485_v57  ;;  %12230 = vst [vmem:[#allocation125_spill] sm:$0xff] %v7495_v48  ;;  %v3138_v25 = vmul.f32 %v7285_v0, %v12235_v24  ;;  %v2496_v61 = vmul.f32 %v7283_v1, %v12237_v28  ;;  %v3140_v33 = vmul.f32 %v7285_v0, %v12238_v30  ;;  %v7524_v5 = vmul.f32 2.0, %v7485_v57  ;;  %v12248_v48 = vld [vmem:[#allocation11_spill] sm:$0xff]  ;;  %v360_v59 = vld [vmem:[%s6873_s24 + $0x300] sm:$0xff] }
 0x1c4   : > { %v7453_v63 = vpop.permute.xlu1 %2670  ;;  %v7455_v31 = vpop.permute.xlu0 %1923  ;;  %12231 = vst [vmem:[#allocation126_spill] sm:$0xff] %v7497_v49  ;;  %12232 = vst [vmem:[#allocation127_spill] sm:$0xff] %v7502_v12  ;;  %5949 = vrcp.f32 %v401_v42  ;;  %v3142_v47 = vmul.f32 %v7285_v0, %v12241_v41  ;;  %v12243_v42 = vld [vmem:[#allocation8_spill] sm:$0xff]  ;;  %v2502_v45 = vmul.f32 %v7283_v1, %v12244_v4  ;;  %vm906_vm1 = vcmp.eq.f32.partialorder %v7422_v16, inf  ;;  %v408_v56 = vld [vmem:[%s7271_s27 + $0x80] sm:$0xff] }
 0x1c5   : > { %2926 = vperm.xlu1 %5916, %v352_v2   ;;  %2243 = vperm.xlu0 %5917, %v352_v2   ;;  %v7483_v2 = vadd.f32 %v3124_v55, %v2480_v22  ;;  %12233 = vst [vmem:[#allocation128_spill] sm:$0xff] %v7504_v52  ;;  %12234 = vst [vmem:[#allocation129_spill] sm:$0xff] %v7506_v54  ;;  %v5934_v18 = vpop.eup %5933  ;;  %v3136_v22 = vmul.f32 %v7285_v0, %v7032_v8  ;;  %v406_v8 = vld [vmem:[%s7271_s27 + $0x70] sm:$0xff]  ;;  %5951 = vrsqrt.f32 %v7492_v20  ;;  %v12245_v54 = vld [vmem:[#allocation10_spill] sm:$0xff] }
 0x1c6   : > { %v2494_v55 = vmul.f32 %v7283_v1, %v7035_v14  ;;  %v7517_v27 = vpop.eup %5935  ;;  %v12240_v14 = vld [vmem:[#allocation5_spill] sm:$0xff]  ;;  %v3144_v57 = vmul.f32 %v7285_v0, %v12243_v42  ;;  %5953 = vrsqrt.f32 %v7500_v51  ;;  %v912_v52 = vmul.f32 %v5934_v18, %v7377_v10  ;;  %v12262_v50 = vld [vmem:[#allocation84_spill] sm:$0xff]  ;;  %v405_v13 = vld [vmem:[%s7271_s27 + $0x68] sm:$0xff] }
 0x1c7   : > { %12228 = vst [vmem:[#allocation123_spill] sm:$0xff] %v7483_v2  ;;  %12236 = vst [vmem:[#allocation2_spill] sm:$0xff] %v7517_v27  ;;  %v7527_v34 = vpop.eup %5937  ;;  %v2498_v38 = vmul.f32 %v7283_v1, %v12240_v14  ;;  %v3146_v14 = vmul.f32 %v7285_v0, %v12245_v54  ;;  %v7550_v12 = vmul.f32 2.0, %v7517_v27  ;;  %5955 = vrcp.f32 %v406_v8  ;;  %v12249_v27 = vld [vmem:[#allocation12_spill] sm:$0xff] }
 0x1c8   : > { %v7487_v62 = vpop.permute.xlu1 %2678  ;;  %v7489_v36 = vpop.permute.xlu0 %1933  ;;  %12239 = vst [vmem:[#allocation3_spill] sm:$0xff] %v7527_v34  ;;  %v7552_v49 = vadd.f32 %v3136_v22, %v2492_v19  ;;  %5957 = vrsqrt.f32 %v7524_v5  ;;  %v7557_v4 = vmul.f32 2.0, %v7527_v34  ;;  %v7559_v54 = vadd.f32 %v3138_v25, %v2494_v55 }
 0x1c9   : > { %2934 = vperm.xlu1 %5916, %v354_v17   ;;  %2253 = vperm.xlu0 %5917, %v354_v17   ;;  %v12242_v17 = vld [vmem:[#allocation7_spill] sm:$0xff]  ;;  %v5940_v41 = vpop.eup %5939  ;;  %v2504_v18 = vmul.f32 %v7283_v1, %v12248_v48  ;;  %v3148_v8 = vmul.f32 %v7285_v0, %v12249_v27  ;;  %v7571_v2 = vadd.f32 %v3142_v47, %v2498_v38  ;;  %v916_v55 = vand.u32 2147483648, %v7377_v10 }
 0x1ca   : > { %v2500_v24 = vmul.f32 %v7283_v1, %v12242_v17  ;;  %v358_v17 = vld [vmem:[%s6873_s24 + $0x2f0] sm:$0xff]  ;;  %12246 = vst [vmem:[#allocation4_spill] sm:$0xff] %v7552_v49  ;;  %v5942_v42 = vpop.eup %5941  ;;  %12247 = vst [vmem:[#allocation5_spill] sm:$0xff] %v7559_v54  ;;  %v7569_v49 = vadd.f32 %v3140_v33, %v2496_v61  ;;  %v905_v25 = vmul.f32 %v5940_v41, %v7422_v16  ;;  %5959 = vrsqrt.f32 %v7550_v12 }
 0x1cb   : > { %12251 = vst [vmem:[#allocation7_spill] sm:$0xff] %v7571_v2  ;;  %v7579_v54 = vadd.f32 %v3146_v14, %v2502_v45  ;;  %v914_v61 = vsel %vm913_vm0, %v7377_v10, %v912_v52  ;;  %v933_v33 = vmul.f32 %v5942_v42, %v7429_v21  ;;  %vm915_vm2 = vcmp.eq.f32.partialorder %v7377_v10, 0.0 }
 0x1cc   : > { %v7535_v28 = vpop.permute.xlu1 %2686  ;;  %v7537_v30 = vpop.permute.xlu0 %1943  ;;  %12250 = vst [vmem:[#allocation6_spill] sm:$0xff] %v7569_v49  ;;  %v7577_v48 = vadd.f32 %v3144_v57, %v2500_v24  ;;  %vm934_vm3 = vcmp.eq.f32.partialorder %v7429_v21, inf  ;;  %5961 = vrsqrt.f32 %v7557_v4  ;;  %v909_v52 = vand.u32 2147483648, %v7422_v16 }
 0x1cd   : > { %2942 = vperm.xlu1 %5916, %v356_v60   ;;  %2263 = vperm.xlu0 %5917, %v356_v60   ;;  %v5944_v60 = vpop.eup %5943  ;;  %12254 = vst [vmem:[#allocation10_spill] sm:$0xff] %v7579_v54  ;;  %vm920_vm4 = vcmp.eq.f32.partialorder %v7437_v58, inf  ;;  %v7603_v24 = vadd.f32 %v3148_v8, %v2504_v18  ;;  %v907_v41 = vsel %vm906_vm1, %v7422_v16, %v905_v25  ;;  %vm908_vm5 = vcmp.eq.f32.partialorder %v7422_v16, 0.0  ;;  %v12259_v54 = vld [vmem:[#allocation82_spill] sm:$0xff] }
 0x1ce   : > { %v7573_v34 = vpop.eup %5945  ;;  %12253 = vst [vmem:[#allocation9_spill] sm:$0xff] %v7577_v48  ;;  %v919_v57 = vmul.f32 %v5944_v60, %v7437_v58  ;;  %v7618_v18 = vsel %vm915_vm2, %v916_v55, %v914_v61  ;;  %vm936_vm6 = vcmp.eq.f32.partialorder %v7429_v21, 0.0  ;;  %v923_v8 = vand.u32 2147483648, %v7437_v58  ;;  %v403_v55 = vld [vmem:[%s7271_s27 + $0x58] sm:$0xff] }
 0x1cf   : > { %12252 = vst [vmem:[#allocation8_spill] sm:$0xff] %v7573_v34  ;;  %v7581_v27 = vpop.eup %5947  ;;  %v7601_v47 = vmul.f32 2.0, %v7573_v34  ;;  %12256 = vst [vmem:[#allocation12_spill] sm:$0xff] %v7603_v24  ;;  %v362_v34 = vld [vmem:[%s6873_s24 + $0x310] sm:$0xff]  ;;  %v12258_v24 = vld [vmem:[#allocation81_spill] sm:$0xff]  ;;  %v7631_v48 = vmul.f32 %v7283_v1, %v12259_v54  ;;  %vm922_vm7 = vcmp.eq.f32.partialorder %v7437_v58, 0.0  ;;  %v7650_v54 = vsel %vm908_vm5, %v909_v52, %v907_v41 }
 0x1d0   : > { %v7565_v19 = vpop.permute.xlu1 %2694  ;;  %v7567_v22 = vpop.permute.xlu0 %1953  ;;  %12255 = vst [vmem:[#allocation11_spill] sm:$0xff] %v7581_v27  ;;  %v7613_v42 = vmul.f32 2.0, %v7581_v27  ;;  %v7627_v27 = vmul.f32 %v7285_v0, %v12258_v24  ;;  %v921_v10 = vsel %vm920_vm4, %v7437_v58, %v919_v57  ;;  %v364_v41 = vld [vmem:[%s6873_s24 + $0x320] sm:$0xff]  ;;  %vm948_vm8 = vcmp.eq.f32.partialorder %v7492_v20, inf }
 0x1d1   : > { %2950 = vperm.xlu1 %5916, %v358_v17   ;;  %2273 = vperm.xlu0 %5917, %v358_v17   ;;  %v7605_v14 = vpop.eup %5949  ;;  %v937_v17 = vand.u32 2147483648, %v7429_v21  ;;  %5963 = vrsqrt.f32 %v7601_v47  ;;  %vm927_vm9 = vcmp.eq.f32.partialorder %v7500_v51, inf  ;;  %vm950_vm10 = vcmp.eq.f32.partialorder %v7492_v20, 0.0 }
 0x1d2   : > { %12257 = vst [vmem:[#allocation130_spill] sm:$0xff] %v7605_v14  ;;  %v5952_v60 = vpop.eup %5951  ;;  %v7654_v57 = vmul.f32 2.0, %v7605_v14  ;;  %5965 = vrsqrt.f32 %v7613_v42  ;;  %v7670_v14 = vsel %vm922_vm7, %v923_v8, %v921_v10  ;;  %v930_v8 = vand.u32 2147483648, %v7500_v51 }
 0x1d3   : > { %v5954_v25 = vpop.eup %5953  ;;  %v947_v52 = vmul.f32 %v5952_v60, %v7492_v20  ;;  %5967 = vrcp.f32 %v403_v55  ;;  %vm929_vm11 = vcmp.eq.f32.partialorder %v7500_v51, 0.0  ;;  %vm962_vm12 = vcmp.eq.f32.partialorder %v7524_v5, inf  ;;  %v407_v55 = vld [vmem:[%s7271_s27 + $0x78] sm:$0xff] }
 0x1d4   : > { %v7594_v45 = vpop.permute.xlu1 %2702  ;;  %v7596_v38 = vpop.permute.xlu0 %1963  ;;  %5969 = vrcp.f32 %v408_v56  ;;  %vm964_vm13 = vcmp.eq.f32.partialorder %v7524_v5, 0.0  ;;  %vm941_vm14 = vcmp.eq.f32.partialorder %v7550_v12, inf  ;;  %v944_v7 = vand.u32 2147483648, %v7550_v12 }
 0x1d5   : > { %2958 = vperm.xlu1 %5916, %v360_v59   ;;  %2283 = vperm.xlu0 %5917, %v360_v59   ;;  %v935_v59 = vsel %vm934_vm3, %v7429_v21, %v933_v33  ;;  %v7638_v61 = vpop.eup %5955  ;;  %v12261_v33 = vld [vmem:[#allocation83_spill] sm:$0xff]  ;;  %5971 = vrsqrt.f32 %v7654_v57  ;;  %v949_v56 = vsel %vm948_vm8, %v7492_v20, %v947_v52  ;;  %vm976_vm15 = vcmp.eq.f32.partialorder %v7557_v4, inf }
 0x1d6   : > { %12260 = vst [vmem:[#allocation81_spill] sm:$0xff] %v7638_v61  ;;  %v7642_v2 = vmul.f32 %v7285_v0, %v12261_v33  ;;  %v5958_v40 = vpop.eup %5957  ;;  %v7659_v33 = vmul.f32 %v7283_v1, %v12262_v50  ;;  %v7663_v16 = vsel %vm936_vm6, %v937_v17, %v935_v59  ;;  %v926_v50 = vmul.f32 %v5954_v25, %v7500_v51  ;;  %v410_v17 = vld [vmem:[%s7271_s27 + $0x90] sm:$0xff] }
 0x1d7   : > { %v7678_v21 = vmul.f32 2.0, %v7638_v61  ;;  %v5960_v60 = vpop.eup %5959  ;;  %v961_v25 = vmul.f32 %v5958_v40, %v7524_v5  ;;  %5973 = vrcp.f32 %v405_v13  ;;  %v12263_v61 = vld [vmem:[#allocation85_spill] sm:$0xff]  ;;  %v12264_v40 = vld [vmem:[#allocation86_spill] sm:$0xff]  ;;  %v965_v13 = vand.u32 2147483648, %v7524_v5 }
 0x1d8   : > { %v7644_v24 = vpop.permute.xlu1 %2710  ;;  %v7646_v49 = vpop.permute.xlu0 %1973  ;;  %v7697_v46 = vmul.f32 %v7285_v0, %v12263_v61  ;;  %v7701_v39 = vmul.f32 %v7283_v1, %v12264_v40  ;;  %v928_v52 = vsel %vm927_vm9, %v7500_v51, %v926_v50  ;;  %5975 = vrcp.f32 %v410_v17  ;;  %v412_v61 = vld [vmem:[%s7271_s27 + $0xa0] sm:$0xff]  ;;  %v409_v17 = vld [vmem:[%s7271_s27 + $0x88] sm:$0xff] }
 0x1d9   : > { %2966 = vperm.xlu1 %5916, %v362_v34   ;;  %2293 = vperm.xlu0 %5917, %v362_v34   ;;  %v951_v34 = vand.u32 2147483648, %v7492_v20  ;;  %v5962_v10 = vpop.eup %5961  ;;  %v940_v37 = vmul.f32 %v5960_v60, %v7550_v12  ;;  %5977 = vrsqrt.f32 %v7678_v21  ;;  %v963_v53 = vsel %vm962_vm12, %v7524_v5, %v961_v25  ;;  %v414_v25 = vld [vmem:[%s7271_s27 + $0xb0] sm:$0xff]  ;;  %v368_v20 = vld [vmem:[%s6873_s24 + $0x340] sm:$0xff] }
 0x1da   : > { %v975_v50 = vmul.f32 %v5962_v10, %v7557_v4  ;;  %5979 = vrcp.f32 %v407_v55  ;;  %v7726_v11 = vsel %vm929_vm11, %v930_v8, %v928_v52  ;;  %v7733_v10 = vmul.f32 %v7285_v0, %v12266_v6  ;;  %v12267_v55 = vld [vmem:[#allocation88_spill] sm:$0xff] }
 0x1db   : > { %v7722_v60 = vsel %vm950_vm10, %v951_v34, %v949_v56  ;;  %12265 = vst [vmem:[#allocation82_spill] sm:$0xff] %v7726_v11  ;;  %v5964_v29 = vpop.eup %5963  ;;  %vm943_vm0 = vcmp.eq.f32.partialorder %v7550_v12, 0.0  ;;  %5981 = vrcp.f32 %v412_v61  ;;  %v7743_v34 = vsel %vm964_vm13, %v965_v13, %v963_v53  ;;  %v411_v53 = vld [vmem:[%s7271_s27 + $0x98] sm:$0xff] }
 0x1dc   : > { %v7681_v58 = vpop.permute.xlu1 %2718  ;;  %v7683_v59 = vpop.permute.xlu0 %1983  ;;  %12268 = vst [vmem:[#allocation83_spill] sm:$0xff] %v7743_v34  ;;  %v942_v8 = vsel %vm941_vm14, %v7550_v12, %v940_v37  ;;  %v979_v6 = vand.u32 2147483648, %v7557_v4  ;;  %5983 = vrcp.f32 %v409_v17  ;;  %v977_v5 = vsel %vm976_vm15, %v7557_v4, %v975_v50  ;;  %v416_v17 = vld [vmem:[%s7271_s27 + $0xc0] sm:$0xff] }
 0x1dd   : > { %2974 = vperm.xlu1 %5916, %v364_v41   ;;  %2303 = vperm.xlu0 %5917, %v364_v41   ;;  %v366_v41 = vld [vmem:[%s6873_s24 + $0x330] sm:$0xff]  ;;  %v5966_v51 = vpop.eup %5965  ;;  %vm978_vm1 = vcmp.eq.f32.partialorder %v7557_v4, 0.0  ;;  %vm955_vm2 = vcmp.eq.f32.partialorder %v7601_v47, inf  ;;  %5985 = vrcp.f32 %v414_v25  ;;  %v954_v13 = vmul.f32 %v5964_v29, %v7601_v47  ;;  %v12275_v34 = vld [vmem:[#allocation90_spill] sm:$0xff] }
 0x1de   : > { %v7749_v56 = vpop.eup %5967  ;;  %vm957_vm3 = vcmp.eq.f32.partialorder %v7601_v47, 0.0  ;;  %v958_v61 = vand.u32 2147483648, %v7601_v47  ;;  %v7769_v50 = vadd.f32 %v7627_v27, %v7659_v33  ;;  %v7773_v25 = vmul.f32 %v7285_v0, %v12274_v32  ;;  %v370_v29 = vld [vmem:[%s6873_s24 + $0x350] sm:$0xff] }
 0x1df   : > { %12269 = vst [vmem:[#allocation84_spill] sm:$0xff] %v7749_v56  ;;  %v7761_v37 = vpop.eup %5969  ;;  %vm990_vm4 = vcmp.eq.f32.partialorder %v7613_v42, inf  ;;  %v7789_v27 = vsel %vm978_vm1, %v979_v6, %v977_v5  ;;  %v7793_v33 = vmul.f32 2.0, %v7749_v56  ;;  %5987 = vrcp.f32 %v411_v53  ;;  %v372_v56 = vld [vmem:[%s6873_s24 + $0x360] sm:$0xff] }
 0x1e0   : > { %v7712_v3 = vpop.permute.xlu1 %2726  ;;  %v7714_v40 = vpop.permute.xlu0 %1993  ;;  %12272 = vst [vmem:[#allocation87_spill] sm:$0xff] %v7761_v37  ;;  %12273 = vst [vmem:[#allocation88_spill] sm:$0xff] %v7769_v50  ;;  %vm992_vm5 = vcmp.eq.f32.partialorder %v7613_v42, 0.0  ;;  %vm969_vm6 = vcmp.eq.f32.partialorder %v7654_v57, inf  ;;  %v7805_v4 = vmul.f32 2.0, %v7761_v37  ;;  %5989 = vrcp.f32 %v416_v17  ;;  %v12284_v37 = vld [vmem:[#allocation91_spill] sm:$0xff] }
 0x1e1   : > { %2982 = vperm.xlu1 %5916, %v366_v41   ;;  %2313 = vperm.xlu0 %5917, %v366_v41   ;;  %v7737_v41 = vmul.f32 %v7283_v1, %v12267_v55  ;;  %v5972_v26 = vpop.eup %5971  ;;  %12278 = vst [vmem:[#allocation131_spill] sm:$0xff] %v7789_v27  ;;  %v956_v6 = vsel %vm955_vm2, %v7601_v47, %v954_v13  ;;  %vm971_vm7 = vcmp.eq.f32.partialorder %v7654_v57, 0.0  ;;  %v972_v5 = vand.u32 2147483648, %v7654_v57  ;;  %v418_v13 = vld [vmem:[%s7271_s27 + $0xd0] sm:$0xff]  ;;  %v415_v47 = vld [vmem:[%s7271_s27 + $0xb8] sm:$0xff] }
 0x1e2   : > { %v7814_v53 = vadd.f32 %v7301_v44, %v7631_v48  ;;  %v3099_v17 = vmul.f32 %v7285_v0, %v12284_v37  ;;  %vm1004_vm8 = vcmp.eq.f32.partialorder %v7678_v21, inf  ;;  %vm1006_vm9 = vcmp.eq.f32.partialorder %v7678_v21, 0.0 }
 0x1e3   : > { %vm983_vm10 = vcmp.eq.f32.partialorder %v7793_v33, inf  ;;  %vm985_vm11 = vcmp.eq.f32.partialorder %v7793_v33, 0.0  ;;  %vm1018_vm12 = vcmp.eq.f32.partialorder %v7805_v4, inf  ;;  %vm1020_vm13 = vcmp.eq.f32.partialorder %v7805_v4, 0.0 }
 0x1e4   : > { %v7751_v52 = vpop.permute.xlu1 %2734  ;;  %v7753_v55 = vpop.permute.xlu0 %2003  ;;  %12282 = vst [vmem:[#allocation135_spill] sm:$0xff] %v7814_v53  ;;  %v7867_v53 = vadd.f32 %v7642_v2, %v7297_v35 }
 0x1e5   : > { %12270 = vst [vmem:[#allocation85_spill] sm:$0xff] %v7751_v52  ;;  %12271 = vst [vmem:[#allocation86_spill] sm:$0xff] %v7753_v55  ;;  %2990 = vperm.xlu1 %5916, %v368_v20   ;;  %2323 = vperm.xlu0 %5917, %v368_v20   ;;  %v7777_v20 = vmul.f32 %v7283_v1, %v12275_v34  ;;  %v7782_v55 = vsel %vm943_vm0, %v944_v7, %v942_v8  ;;  %v7785_v52 = vpop.eup %5973  ;;  %v413_v34 = vld [vmem:[%s7271_s27 + $0xa8] sm:$0xff] }
 0x1e6   : > { %12276 = vst [vmem:[#allocation89_spill] sm:$0xff] %v7782_v55  ;;  %12277 = vst [vmem:[#allocation90_spill] sm:$0xff] %v7785_v52  ;;  %v7796_v50 = vpop.eup %5975  ;;  %v7823_v27 = vmul.f32 2.0, %v7785_v52  ;;  %5991 = vrcp.f32 %v413_v34  ;;  %v968_v55 = vmul.f32 %v5972_v26, %v7654_v57  ;;  %v7841_v34 = vsel %vm957_vm3, %v958_v61, %v956_v6 }
 0x1e7   : > { %12279 = vst [vmem:[#allocation132_spill] sm:$0xff] %v7796_v50  ;;  %v5978_v8 = vpop.eup %5977  ;;  %5993 = vrsqrt.f32 %v7793_v33  ;;  %v7831_v44 = vmul.f32 2.0, %v7796_v50  ;;  %12289 = vst [vmem:[#allocation138_spill] sm:$0xff] %v7841_v34  ;;  %v1007_v50 = vand.u32 2147483648, %v7678_v21 }
 0x1e8   : > { %v7798_v7 = vpop.permute.xlu1 %2742  ;;  %v7800_v12 = vpop.permute.xlu0 %2013  ;;  %5995 = vrsqrt.f32 %v7805_v4  ;;  %12293 = vst [vmem:[#allocation142_spill] sm:$0xff] %v7867_v53  ;;  %vm997_vm14 = vcmp.eq.f32.partialorder %v7823_v27, inf  ;;  %vm999_vm0 = vcmp.eq.f32.partialorder %v7823_v27, 0.0 }
 0x1e9   : > { %12280 = vst [vmem:[#allocation133_spill] sm:$0xff] %v7798_v7  ;;  %12281 = vst [vmem:[#allocation134_spill] sm:$0xff] %v7800_v12  ;;  %2998 = vperm.xlu1 %5916, %v370_v29   ;;  %2333 = vperm.xlu0 %5917, %v370_v29   ;;  %v7816_v32 = vpop.eup %5979  ;;  %v989_v29 = vmul.f32 %v5966_v51, %v7613_v42  ;;  %v12285_v12 = vld [vmem:[#allocation92_spill] sm:$0xff]  ;;  %5997 = vrcp.f32 %v418_v13  ;;  %v970_v13 = vsel %vm969_vm6, %v7654_v57, %v968_v55 }
 0x1ea   : > { %12283 = vst [vmem:[#allocation136_spill] sm:$0xff] %v7816_v32  ;;  %v2455_v7 = vmul.f32 %v7283_v1, %v12285_v12  ;;  %v7833_v48 = vpop.eup %5981  ;;  %v1003_v12 = vmul.f32 %v5978_v8, %v7678_v21  ;;  %v7851_v52 = vmul.f32 2.0, %v7816_v32  ;;  %v374_v8 = vld [vmem:[%s6873_s24 + $0x370] sm:$0xff]  ;;  %5999 = vrsqrt.f32 %v7823_v27 }
 0x1eb   : > { %12286 = vst [vmem:[#allocation91_spill] sm:$0xff] %v7833_v48  ;;  %v7846_v26 = vpop.eup %5983  ;;  %v991_v6 = vsel %vm990_vm4, %v7613_v42, %v989_v29  ;;  %6001 = vrsqrt.f32 %v7831_v44  ;;  %v7874_v32 = vmul.f32 2.0, %v7833_v48  ;;  %v7878_v29 = vadd.f32 %v7733_v10, %v7737_v41  ;;  %v12299_v10 = vld [vmem:[#allocation94_spill] sm:$0xff] }
 0x1ec   : > { %v7835_v51 = vpop.permute.xlu1 %2750  ;;  %v7837_v37 = vpop.permute.xlu0 %2023  ;;  %12290 = vst [vmem:[#allocation139_spill] sm:$0xff] %v7846_v26  ;;  %v1005_v2 = vsel %vm1004_vm8, %v7678_v21, %v1003_v12  ;;  %v7890_v55 = vmul.f32 2.0, %v7846_v26  ;;  %6003 = vrcp.f32 %v415_v47  ;;  %v2457_v41 = vmul.f32 %v7283_v1, %v12299_v10  ;;  %v12303_v47 = vld [vmem:[#allocation95_spill] sm:$0xff]  ;;  %v376_v10 = vld [vmem:[%s6873_s24 + $0x380] sm:$0xff] }
 0x1ed   : > { %12287 = vst [vmem:[#allocation92_spill] sm:$0xff] %v7835_v51  ;;  %12288 = vst [vmem:[#allocation137_spill] sm:$0xff] %v7837_v37  ;;  %3006 = vperm.xlu1 %5916, %v372_v56   ;;  %2343 = vperm.xlu0 %5917, %v372_v56   ;;  %v7854_v61 = vpop.eup %5985  ;;  %v7863_v56 = vadd.f32 %v7697_v46, %v7701_v39  ;;  %v12295_v37 = vld [vmem:[#allocation93_spill] sm:$0xff]  ;;  %6005 = vrsqrt.f32 %v7851_v52  ;;  %v7910_v53 = vmul.f32 %v7285_v0, %v12303_v47  ;;  %v12313_v47 = vld [vmem:[#allocation98_spill] sm:$0xff] }
 0x1ee   : > { %12291 = vst [vmem:[#allocation140_spill] sm:$0xff] %v7854_v61  ;;  %12294 = vst [vmem:[#allocation143_spill] sm:$0xff] %v7878_v29  ;;  %v3101_v39 = vmul.f32 %v7285_v0, %v12295_v37  ;;  %v7892_v48 = vpop.eup %5987  ;;  %v12300_v37 = vand.u32 2147483648, %v7613_v42  ;;  %v7904_v12 = vmul.f32 2.0, %v7854_v61  ;;  %v7919_v42 = vadd.f32 %v7773_v25, %v7777_v20 }
 0x1ef   : > { %12292 = vst [vmem:[#allocation141_spill] sm:$0xff] %v7863_v56  ;;  %12298 = vst [vmem:[#allocation145_spill] sm:$0xff] %v7892_v48  ;;  %v7906_v26 = vpop.eup %5989  ;;  %v7929_v56 = vsel %vm1006_vm9, %v1007_v50, %v1005_v2  ;;  %6007 = vrsqrt.f32 %v7874_v32  ;;  %v7943_v21 = vmul.f32 2.0, %v7892_v48  ;;  %vm1032_vm15 = vcmp.eq.f32.partialorder %v7831_v44, inf }
 0x1f0   : > { %v7882_v46 = vpop.permute.xlu1 %2758  ;;  %v7884_v35 = vpop.permute.xlu0 %2033  ;;  %v7900_v29 = vsel %vm992_vm5, %v12300_v37, %v991_v6  ;;  %12302 = vst [vmem:[#allocation146_spill] sm:$0xff] %v7906_v26  ;;  %12305 = vst [vmem:[#allocation147_spill] sm:$0xff] %v7919_v42  ;;  %v7921_v6 = vadd.f32 %v3099_v17, %v2455_v7  ;;  %v12307_v37 = vld [vmem:[#allocation96_spill] sm:$0xff]  ;;  %6009 = vrsqrt.f32 %v7890_v55  ;;  %v7949_v7 = vmul.f32 2.0, %v7906_v26  ;;  %v420_v42 = vld [vmem:[%s7271_s27 + $0xe0] sm:$0xff] }
 0x1f1   : > { %12296 = vst [vmem:[#allocation93_spill] sm:$0xff] %v7882_v46  ;;  %12297 = vst [vmem:[#allocation144_spill] sm:$0xff] %v7884_v35  ;;  %3014 = vperm.xlu1 %5916, %v374_v8   ;;  %2353 = vperm.xlu0 %5917, %v374_v8   ;;  %v7915_v8 = vsel %vm971_vm7, %v972_v5, %v970_v13  ;;  %v7925_v61 = vmul.f32 %v7283_v1, %v12307_v37  ;;  %v7933_v57 = vpop.eup %5991  ;;  %6011 = vrsqrt.f32 %v7904_v12  ;;  %v12312_v13 = vld [vmem:[#allocation97_spill] sm:$0xff]  ;;  %v12318_v26 = vld [vmem:[#allocation99_spill] sm:$0xff] }
 0x1f2   : > { %12301 = vst [vmem:[#allocation94_spill] sm:$0xff] %v7900_v29  ;;  %12304 = vst [vmem:[#allocation95_spill] sm:$0xff] %v7915_v8  ;;  %v5994_v50 = vpop.eup %5993  ;;  %v7953_v2 = vmul.f32 %v7285_v0, %v12312_v13  ;;  %v7957_v37 = vmul.f32 %v7283_v1, %v12313_v47  ;;  %v7961_v48 = vadd.f32 %v3101_v39, %v2457_v41  ;;  %vm1034_vm1 = vcmp.eq.f32.partialorder %v7831_v44, 0.0  ;;  %v422_v8 = vld [vmem:[%s7271_s27 + $0xf0] sm:$0xff] }
 0x1f3   : > { %12306 = vst [vmem:[#allocation148_spill] sm:$0xff] %v7921_v6  ;;  %12308 = vst [vmem:[#allocation96_spill] sm:$0xff] %v7929_v56  ;;  %v5996_v17 = vpop.eup %5995  ;;  %v982_v39 = vmul.f32 %v5994_v50, %v7793_v33  ;;  %vm1011_vm2 = vcmp.eq.f32.partialorder %v7851_v52, inf  ;;  %6013 = vrsqrt.f32 %v7943_v21  ;;  %v7980_v41 = vmul.f32 2.0, %v7933_v57 }
 0x1f4   : > { %12309 = vst [vmem:[#allocation149_spill] sm:$0xff] %v7933_v57  ;;  %v7935_v5 = vpop.permute.xlu1 %2766  ;;  %v7937_v25 = vpop.permute.xlu0 %2043  ;;  %12314 = vst [vmem:[#allocation97_spill] sm:$0xff] %v7961_v48  ;;  %v7984_v20 = vmul.f32 %v7285_v0, %v12318_v26  ;;  %v1017_v50 = vmul.f32 %v5996_v17, %v7805_v4  ;;  %6015 = vrsqrt.f32 %v7949_v7  ;;  %v380_v57 = vld [vmem:[%s6873_s24 + $0x3a0] sm:$0xff]  ;;  %vm1013_vm3 = vcmp.eq.f32.partialorder %v7851_v52, 0.0  ;;  %v417_v17 = vld [vmem:[%s7271_s27 + $0xc8] sm:$0xff] }
 0x1f5   : > { %12310 = vst [vmem:[#allocation150_spill] sm:$0xff] %v7935_v5  ;;  %12311 = vst [vmem:[#allocation151_spill] sm:$0xff] %v7937_v25  ;;  %3022 = vperm.xlu1 %5916, %v376_v10   ;;  %2363 = vperm.xlu0 %5917, %v376_v10   ;;  %v378_v10 = vld [vmem:[%s6873_s24 + $0x390] sm:$0xff]  ;;  %v7963_v6 = vpop.eup %5997  ;;  %vm1046_vm4 = vcmp.eq.f32.partialorder %v7874_v32, inf  ;;  %6017 = vrcp.f32 %v420_v42  ;;  %vm1025_vm5 = vcmp.eq.f32.partialorder %v7890_v55, inf  ;;  %vm1060_vm6 = vcmp.eq.f32.partialorder %v7904_v12, inf }
 0x1f6   : > { %12315 = vst [vmem:[#allocation98_spill] sm:$0xff] %v7963_v6  ;;  %v6000_v25 = vpop.eup %5999  ;;  %v7999_v26 = vmul.f32 2.0, %v7963_v6  ;;  %v984_v42 = vsel %vm983_vm10, %v7793_v33, %v982_v39  ;;  %6019 = vrsqrt.f32 %v7980_v41  ;;  %v8019_v29 = vmul.f32 %v7285_v0, %v7372_v43 }
 0x1f7   : > { %v6002_v13 = vpop.eup %6001  ;;  %v996_v6 = vmul.f32 %v6000_v25, %v7823_v27  ;;  %v1019_v25 = vsel %vm1018_vm12, %v7805_v4, %v1017_v50  ;;  %vm1048_vm7 = vcmp.eq.f32.partialorder %v7874_v32, 0.0  ;;  %6021 = vrcp.f32 %v417_v17 }
 0x1f8   : > { %v7970_v5 = vpop.permute.xlu1 %2774  ;;  %v7972_v47 = vpop.permute.xlu0 %2053  ;;  %v1031_v48 = vmul.f32 %v6002_v13, %v7831_v44  ;;  %v419_v13 = vld [vmem:[%s7271_s27 + $0xd8] sm:$0xff]  ;;  %vm1027_vm8 = vcmp.eq.f32.partialorder %v7890_v55, 0.0  ;;  %vm1062_vm9 = vcmp.eq.f32.partialorder %v7904_v12, 0.0  ;;  %6023 = vrsqrt.f32 %v7999_v26 }
 0x1f9   : > { %12316 = vst [vmem:[#allocation152_spill] sm:$0xff] %v7970_v5  ;;  %12317 = vst [vmem:[#allocation153_spill] sm:$0xff] %v7972_v47  ;;  %3030 = vperm.xlu1 %5916, %v378_v10   ;;  %2373 = vperm.xlu0 %5917, %v378_v10   ;;  %v7989_v47 = vpop.eup %6003  ;;  %v12320_v5 = vld [vmem:[#allocation100_spill] sm:$0xff]  ;;  %v12323_v50 = vand.u32 2147483648, %v7793_v33  ;;  %vm1039_vm10 = vcmp.eq.f32.partialorder %v7943_v21, inf  ;;  %6025 = vrcp.f32 %v422_v8  ;;  %v998_v33 = vsel %vm997_vm14, %v7823_v27, %v996_v6  ;;  %v424_v8 = vld [vmem:[%s7271_s27 + $0x100] sm:$0xff] }
 0x1fa   : > { %12319 = vst [vmem:[#allocation99_spill] sm:$0xff] %v7989_v47  ;;  %v7993_v56 = vmul.f32 %v7283_v1, %v12320_v5  ;;  %v6006_v10 = vpop.eup %6005  ;;  %6027 = vrcp.f32 %v419_v13  ;;  %v421_v6 = vld [vmem:[%s7271_s27 + $0xe8] sm:$0xff]  ;;  %vm1041_vm12 = vcmp.eq.f32.partialorder %v7943_v21, 0.0  ;;  %vm1053_vm14 = vcmp.eq.f32.partialorder %v7980_v41, inf }
 0x1fb   : > { %v6008_v35 = vpop.eup %6007  ;;  %v1010_v51 = vmul.f32 %v6006_v10, %v7851_v52  ;;  %v8043_v17 = vsel %vm985_vm11, %v12323_v50, %v984_v42  ;;  %v1033_v42 = vsel %vm1032_vm15, %v7831_v44, %v1031_v48  ;;  %v8066_v50 = vmul.f32 %v7285_v0, %v7416_v23 }
 0x1fc   : > { %v8006_v5 = vpop.permute.xlu1 %2782  ;;  %v8008_v46 = vpop.permute.xlu0 %2063  ;;  %vm1074_vm11 = vcmp.eq.f32.partialorder %v7949_v7, inf  ;;  %vm1088_vm15 = vcmp.eq.f32.partialorder %v7999_v26, inf }
 0x1fd   : > { %12321 = vst [vmem:[#allocation100_spill] sm:$0xff] %v8006_v5  ;;  %12322 = vst [vmem:[#allocation154_spill] sm:$0xff] %v8008_v46  ;;  %v8023_v46 = vmul.f32 %v7283_v1, %v7374_v9  ;;  %3038 = vperm.xlu1 %5916, %v380_v57   ;;  %2383 = vperm.xlu0 %5917, %v380_v57   ;;  %v6010_v39 = vpop.eup %6009  ;;  %v382_v5 = vld [vmem:[%s6873_s24 + $0x3b0] sm:$0xff]  ;;  %v8037_v9 = vmul.f32 2.0, %v7989_v47  ;;  %v12326_v47 = vand.u32 2147483648, %v7805_v4 }
 0x1fe   : > { %v6012_v57 = vpop.eup %6011  ;;  %v8070_v4 = vmul.f32 %v7283_v1, %v7418_v15  ;;  %v1012_v13 = vsel %vm1011_vm2, %v7851_v52, %v1010_v51  ;;  %v1024_v23 = vmul.f32 %v6010_v39, %v7890_v55  ;;  %v426_v15 = vld [vmem:[%s7271_s27 + $0x110] sm:$0xff] }
 0x1ff   : > { %v8055_v11 = vsel %vm1020_vm13, %v12326_v47, %v1019_v25  ;;  %v1045_v47 = vmul.f32 %v6008_v35, %v7874_v32  ;;  %v6014_v48 = vpop.eup %6013  ;;  %v384_v25 = vld [vmem:[%s6873_s24 + $0x3c0] sm:$0xff]  ;;  %v1059_v10 = vmul.f32 %v6012_v57, %v7904_v12  ;;  %6029 = vrsqrt.f32 %v8037_v9  ;;  %v423_v57 = vld [vmem:[%s7271_s27 + $0xf8] sm:$0xff] }
 0x200   : > { %v8047_v43 = vpop.permute.xlu1 %2790  ;;  %v8049_v34 = vpop.permute.xlu0 %2073  ;;  %12327 = vst [vmem:[#allocation157_spill] sm:$0xff] %v8055_v11  ;;  %vm1076_vm13 = vcmp.eq.f32.partialorder %v7949_v7, 0.0  ;;  %6031 = vrcp.f32 %v424_v8  ;;  %vm1067_vm2 = vcmp.eq.f32.partialorder %v8037_v9, inf }
 0x201   : > { %12324 = vst [vmem:[#allocation155_spill] sm:$0xff] %v8047_v43  ;;  %12325 = vst [vmem:[#allocation156_spill] sm:$0xff] %v8049_v34  ;;  %3046 = vperm.xlu1 %5916, %v382_v5   ;;  %2393 = vperm.xlu0 %5917, %v382_v5   ;;  %v6016_v35 = vpop.eup %6015  ;;  %v12328_v5 = vand.u32 2147483648, %v7823_v27  ;;  %v12329_v43 = vand.u32 2147483648, %v7831_v44  ;;  %v8103_v27 = vmul.f32 %v7285_v0, %v7453_v63  ;;  %6033 = vrcp.f32 %v421_v6 }
 0x202   : > { %v8099_v11 = vpop.eup %6017  ;;  %6035 = vrcp.f32 %v426_v15  ;;  %v1026_v6 = vsel %vm1025_vm5, %v7890_v55, %v1024_v23  ;;  %v1073_v15 = vmul.f32 %v6016_v35, %v7949_v7  ;;  %v430_v23 = vld [vmem:[%s7271_s27 + $0x130] sm:$0xff] }
 0x203   : > { %v8088_v34 = vsel %vm999_vm0, %v12328_v5, %v998_v33  ;;  %v8094_v51 = vsel %vm1034_vm1, %v12329_v43, %v1033_v42  ;;  %12330 = vst [vmem:[#allocation158_spill] sm:$0xff] %v8099_v11  ;;  %v8107_v33 = vmul.f32 %v7283_v1, %v7455_v31  ;;  %v12333_v42 = vand.u32 2147483648, %v7851_v52  ;;  %v428_v5 = vld [vmem:[%s7271_s27 + $0x120] sm:$0xff]  ;;  %v6020_v39 = vpop.eup %6019 }
 0x204   : > { %v8109_v44 = vpop.permute.xlu1 %2798  ;;  %v8111_v43 = vpop.permute.xlu0 %2083  ;;  %v1047_v31 = vsel %vm1046_vm4, %v7874_v32, %v1045_v47  ;;  %v1061_v52 = vsel %vm1060_vm6, %v7904_v12, %v1059_v10  ;;  %6037 = vrcp.f32 %v423_v57  ;;  %v425_v47 = vld [vmem:[%s7271_s27 + $0x108] sm:$0xff]  ;;  %v8140_v8 = vmul.f32 2.0, %v8099_v11 }
 0x205   : > { %12331 = vst [vmem:[#allocation159_spill] sm:$0xff] %v8109_v44  ;;  %12332 = vst [vmem:[#allocation160_spill] sm:$0xff] %v8111_v43  ;;  %3054 = vperm.xlu1 %5916, %v384_v25   ;;  %2403 = vperm.xlu0 %5917, %v384_v25   ;;  %v8118_v63 = vsel %vm1013_vm3, %v12333_v42, %v1012_v13  ;;  %v386_v43 = vld [vmem:[%s6873_s24 + $0x3d0] sm:$0xff]  ;;  %v1038_v25 = vmul.f32 %v6014_v48, %v7943_v21  ;;  %v8135_v13 = vpop.eup %6021  ;;  %v12337_v11 = vand.u32 2147483648, %v7874_v32  ;;  %v427_v32 = vld [vmem:[%s7271_s27 + $0x118] sm:$0xff] }
 0x206   : > { %12334 = vst [vmem:[#allocation161_spill] sm:$0xff] %v8135_v13  ;;  %v8145_v44 = vadd.f32 %v7910_v53, %v7925_v61  ;;  %v6024_v10 = vpop.eup %6023  ;;  %v8149_v48 = vmul.f32 %v7285_v0, %v7487_v62  ;;  %v8153_v57 = vmul.f32 %v7283_v1, %v7489_v36  ;;  %vm1055_vm0 = vcmp.eq.f32.partialorder %v7980_v41, 0.0 }
 0x207   : > { %v8163_v53 = vsel %vm1048_vm7, %v12337_v11, %v1047_v31  ;;  %6039 = vrcp.f32 %v428_v5  ;;  %v8166_v62 = vpop.eup %6025  ;;  %v12339_v36 = vand.u32 2147483648, %v7890_v55  ;;  %vm1090_vm1 = vcmp.eq.f32.partialorder %v7999_v26, 0.0 }
 0x208   : > { %12335 = vst [vmem:[#allocation162_spill] sm:$0xff] %v8145_v44  ;;  %v8155_v35 = vpop.permute.xlu1 %2806  ;;  %v8157_v42 = vpop.permute.xlu0 %2093  ;;  %12338 = vst [vmem:[#allocation164_spill] sm:$0xff] %v8166_v62  ;;  %v12340_v44 = vand.u32 2147483648, %v7904_v12  ;;  %6041 = vrcp.f32 %v425_v47  ;;  %v1040_v55 = vsel %vm1039_vm10, %v7943_v21, %v1038_v25  ;;  %v8191_v12 = vmul.f32 2.0, %v8135_v13  ;;  %v429_v13 = vld [vmem:[%s7271_s27 + $0x128] sm:$0xff] }
 0x209   : > { %12336 = vst [vmem:[#allocation163_spill] sm:$0xff] %v8157_v42  ;;  %3062 = vperm.xlu1 %5916, %v386_v43   ;;  %2413 = vperm.xlu0 %5917, %v386_v43   ;;  %v8172_v61 = vsel %vm1027_vm8, %v12339_v36, %v1026_v6  ;;  %v8183_v31 = vpop.eup %6027  ;;  %v388_v43 = vld [vmem:[%s6873_s24 + $0x3e0] sm:$0xff]  ;;  %6043 = vrcp.f32 %v430_v23  ;;  %v1075_v6 = vsel %vm1074_vm11, %v7949_v7, %v1073_v15  ;;  %vm1069_vm3 = vcmp.eq.f32.partialorder %v8037_v9, 0.0 }
 0x20a   : > { %v8178_v11 = vsel %vm1062_vm9, %v12340_v44, %v1061_v52  ;;  %12341 = vst [vmem:[#allocation165_spill] sm:$0xff] %v8183_v31  ;;  %v432_v44 = vld [vmem:[%s7271_s27 + $0x140] sm:$0xff]  ;;  %v1052_v52 = vmul.f32 %v6020_v39, %v7980_v41  ;;  %6045 = vrsqrt.f32 %v8140_v8  ;;  %v8202_v25 = vadd.f32 %v7953_v2, %v7957_v37  ;;  %v6030_v47 = vpop.eup %6029 }
 0x20b   : > { %v3117_v23 = vmul.f32 %v7285_v0, %v7535_v28  ;;  %v2473_v36 = vmul.f32 %v7283_v1, %v7537_v30  ;;  %v8213_v39 = vmul.f32 2.0, %v8166_v62  ;;  %6047 = vrcp.f32 %v427_v32  ;;  %v8216_v42 = vpop.eup %6031  ;;  %v390_v32 = vld [vmem:[%s6873_s24 + $0x3f0] sm:$0xff] }
 0x20c   : > { %12342 = vst [vmem:[#allocation166_spill] sm:$0xff] %v8202_v25  ;;  %v8208_v5 = vpop.permute.xlu1 %2814  ;;  %v8210_v15 = vpop.permute.xlu0 %2103  ;;  %12343 = vst [vmem:[#allocation167_spill] sm:$0xff] %v8216_v42  ;;  %v12344_v2 = vand.u32 2147483648, %v7943_v21  ;;  %v1087_v30 = vmul.f32 %v6024_v10, %v7999_v26  ;;  %v8226_v37 = vmul.f32 2.0, %v8183_v31  ;;  %6049 = vrcp.f32 %v432_v44 }
 0x20d   : > { %3070 = vperm.xlu1 %5916, %v388_v43   ;;  %2423 = vperm.xlu0 %5917, %v388_v43   ;;  %v8228_v62 = vpop.eup %6033  ;;  %v12346_v25 = vand.u32 2147483648, %v7949_v7  ;;  %6051 = vrsqrt.f32 %v8191_v12  ;;  %v8240_v21 = vadd.f32 %v7984_v20, %v7993_v56  ;;  %v8244_v10 = vadd.f32 %v8019_v29, %v8023_v46 }
 0x20e   : > { %v8222_v28 = vsel %vm1041_vm12, %v12344_v2, %v1040_v55  ;;  %12345 = vst [vmem:[#allocation168_spill] sm:$0xff] %v8228_v62  ;;  %v8246_v55 = vpop.eup %6035  ;;  %v1054_v44 = vsel %vm1053_vm14, %v7980_v41, %v1052_v52  ;;  %v1066_v7 = vmul.f32 %v6030_v47, %v8037_v9  ;;  %6053 = vrcp.f32 %v429_v13 }
 0x20f   : > { %v8235_v43 = vsel %vm1076_vm13, %v12346_v25, %v1075_v6  ;;  %12347 = vst [vmem:[#allocation169_spill] sm:$0xff] %v8240_v21  ;;  %12348 = vst [vmem:[#allocation170_spill] sm:$0xff] %v8244_v10  ;;  %v8254_v6 = vadd.f32 %v8066_v50, %v8070_v4  ;;  %v8256_v25 = vpop.eup %6037  ;;  %v3119_v56 = vmul.f32 %v7285_v0, %v7565_v19  ;;  %6055 = vrsqrt.f32 %v8213_v39 }
 0x210   : > { %12349 = vst [vmem:[#allocation171_spill] sm:$0xff] %v8246_v55  ;;  %12351 = vst [vmem:[#allocation173_spill] sm:$0xff] %v8256_v25  ;;  %v2475_v29 = vmul.f32 %v7283_v1, %v7567_v22  ;;  %v8262_v46 = vpop.permute.xlu1 %2822  ;;  %v8264_v20 = vpop.permute.xlu0 %2113  ;;  %v8268_v13 = vmul.f32 2.0, %v8216_v42  ;;  %v1089_v50 = vsel %vm1088_vm15, %v7999_v26, %v1087_v30  ;;  %6057 = vrsqrt.f32 %v8226_v37 }
 0x211   : > { %12350 = vst [vmem:[#allocation172_spill] sm:$0xff] %v8254_v6  ;;  %12352 = vst [vmem:[#allocation174_spill] sm:$0xff] %v8264_v20  ;;  %3078 = vperm.xlu1 %5916, %v390_v32   ;;  %2433 = vperm.xlu0 %5917, %v390_v32   ;;  %v8275_v19 = vmul.f32 2.0, %v8228_v62  ;;  %v8279_v22 = vadd.f32 %v8103_v27, %v8107_v33  ;;  %v8281_v4 = vpop.eup %6039  ;;  %v3121_v52 = vmul.f32 %v7285_v0, %v7594_v45  ;;  %v12380_v20 = vld [vmem:[#allocation83_spill] sm:$0xff]  ;;  %v12393_v6 = vld [vmem:[#allocation92_spill] sm:$0xff] }
 0x212   : > { %12354 = vst [vmem:[#allocation176_spill] sm:$0xff] %v8281_v4  ;;  %v2477_v47 = vmul.f32 %v7283_v1, %v7596_v38  ;;  %v8288_v2 = vmul.f32 2.0, %v8246_v55  ;;  %v8292_v30 = vadd.f32 %v8149_v48, %v8153_v57  ;;  %v8294_v32 = vpop.eup %6041  ;;  %v12357_v27 = vand.u32 2147483648, %v7980_v41 }
 0x213   : > { %12353 = vst [vmem:[#allocation175_spill] sm:$0xff] %v8279_v22  ;;  %12356 = vst [vmem:[#allocation178_spill] sm:$0xff] %v8294_v32  ;;  %v1068_v45 = vsel %vm1067_vm2, %v8037_v9, %v1066_v7  ;;  %v8306_v38 = vmul.f32 2.0, %v8256_v25  ;;  %v8308_v55 = vadd.f32 %v3117_v23, %v2473_v36  ;;  %v8310_v42 = vpop.eup %6043  ;;  %v12362_v62 = vand.u32 2147483648, %v7999_v26  ;;  %v434_v25 = vld [vmem:[%s7271_s27 + $0x150] sm:$0xff] }
 0x214   : > { %12355 = vst [vmem:[#allocation177_spill] sm:$0xff] %v8292_v30  ;;  %v8300_v33 = vsel %vm1055_vm0, %v12357_v27, %v1054_v44  ;;  %12359 = vst [vmem:[#allocation180_spill] sm:$0xff] %v8310_v42  ;;  %v8312_v48 = vpop.permute.xlu1 %2830  ;;  %v8314_v57 = vpop.permute.xlu0 %2123  ;;  %vm1102_vm4 = vcmp.eq.f32.partialorder %v8140_v8, inf  ;;  %6059 = vrsqrt.f32 %v8268_v13  ;;  %v8324_v44 = vadd.f32 %v3119_v56, %v2475_v29 }
 0x215   : > { %12358 = vst [vmem:[#allocation179_spill] sm:$0xff] %v8308_v55  ;;  %12360 = vst [vmem:[#allocation181_spill] sm:$0xff] %v8312_v48  ;;  %v8320_v41 = vsel %vm1090_vm1, %v12362_v62, %v1089_v50  ;;  %v6046_v23 = vpop.eup %6045  ;;  %v12364_v36 = vmov 0   ;;  %3353 = vperm.xlu0 %5917, %v7618_v18   ;;  %vm1104_vm5 = vcmp.eq.f32.partialorder %v8140_v8, 0.0  ;;  %6061 = vrsqrt.f32 %v8275_v19 }
 0x216   : > { %12361 = vst [vmem:[#allocation182_spill] sm:$0xff] %v8314_v57  ;;  %12363 = vst [vmem:[#allocation183_spill] sm:$0xff] %v8324_v44  ;;  %5918 = vset.pattern.permute.xlu1 %v12364_v36  ;;  %v8332_v26 = vmul.f32 2.0, %v8281_v4  ;;  %v8334_v62 = vpop.eup %6047  ;;  %v8338_v56 = vmul.f32 %v7285_v0, %v7644_v24  ;;  %v12366_v29 = vand.u32 2147483648, %v8037_v9  ;;  %6063 = vrsqrt.f32 %v8288_v2 }
 0x217   : > { %12365 = vst [vmem:[#allocation184_spill] sm:$0xff] %v8334_v62  ;;  %3348 = vperm.xlu1 %5918, %v7650_v54   ;;  %v8348_v50 = vadd.f32 %v3121_v52, %v2477_v47  ;;  %v8350_v27 = vpop.eup %6049  ;;  %v8354_v36 = vmul.f32 %v7283_v1, %v7646_v49  ;;  %vm1081_vm6 = vcmp.eq.f32.partialorder %v8191_v12, inf  ;;  %6065 = vrsqrt.f32 %v8306_v38 }
 0x218   : > { %v8345_v18 = vsel %vm1069_vm3, %v12366_v29, %v1068_v45  ;;  %12368 = vst [vmem:[#allocation186_spill] sm:$0xff] %v8350_v27  ;;  %v8359_v24 = vmul.f32 2.0, %v8294_v32  ;;  %v6052_v54 = vpop.eup %6051  ;;  %v8361_v9 = vpop.permute.xlu1 %2838  ;;  %vm1083_vm7 = vcmp.eq.f32.partialorder %v8191_v12, 0.0  ;;  %vm1116_vm8 = vcmp.eq.f32.partialorder %v8213_v39, inf }
 0x219   : > { %12367 = vst [vmem:[#allocation185_spill] sm:$0xff] %v8348_v50  ;;  %12369 = vst [vmem:[#allocation187_spill] sm:$0xff] %v8361_v9  ;;  %v8363_v45 = vpop.permute.xlu0 %2133  ;;  %v8370_v47 = vmul.f32 2.0, %v8310_v42  ;;  %v8372_v29 = vpop.eup %6053  ;;  %3368 = vperm.xlu0 %5917, %v7663_v16   ;;  %v1101_v7 = vmul.f32 %v6046_v23, %v8140_v8  ;;  %vm1118_vm9 = vcmp.eq.f32.partialorder %v8213_v39, 0.0  ;;  %vm1095_vm10 = vcmp.eq.f32.partialorder %v8226_v37, inf }
 0x21a   : > { %12370 = vst [vmem:[#allocation188_spill] sm:$0xff] %v8363_v45  ;;  %12371 = vst [vmem:[#allocation189_spill] sm:$0xff] %v8372_v29  ;;  %6067 = vrsqrt.f32 %v8332_v26  ;;  %v8380_v52 = vmul.f32 2.0, %v8334_v62  ;;  %v6056_v4 = vpop.eup %6055  ;;  %v8384_v49 = vmul.f32 %v7285_v0, %v7681_v58  ;;  %v8388_v42 = vmul.f32 %v7283_v1, %v7683_v59 }
 0x21b   : > { %3358 = vperm.xlu1 %5918, %v7670_v14   ;;  %vm1097_vm11 = vcmp.eq.f32.partialorder %v8226_v37, 0.0  ;;  %v8394_v23 = vmul.f32 2.0, %v8350_v27  ;;  %v6058_v62 = vpop.eup %6057  ;;  %vm1130_vm12 = vcmp.eq.f32.partialorder %v8268_v13, inf  ;;  %vm1109_vm13 = vcmp.eq.f32.partialorder %v8275_v19, inf }
 0x21c   : > { %6069 = vrsqrt.f32 %v8359_v24  ;;  %v8400_v59 = vpop.permute.xlu1 %2846  ;;  %v1080_v14 = vmul.f32 %v6052_v54, %v8191_v12  ;;  %v8408_v27 = vmul.f32 2.0, %v8372_v29  ;;  %v1103_v58 = vsel %vm1102_vm4, %v8140_v8, %v1101_v7 }
 0x21d   : > { %12372 = vst [vmem:[#allocation190_spill] sm:$0xff] %v8400_v59  ;;  %v8402_v32 = vpop.permute.xlu0 %2143  ;;  %6071 = vrsqrt.f32 %v8370_v47  ;;  %3378 = vperm.xlu0 %5917, %v7722_v60   ;;  %v1115_v31 = vmul.f32 %v6056_v4, %v8213_v39  ;;  %vm1144_vm14 = vcmp.eq.f32.partialorder %v8288_v2, inf  ;;  %v8420_v16 = vmul.f32 %v7285_v0, %v7712_v3  ;;  %v12374_v60 = vld [vmem:[#allocation82_spill] sm:$0xff]  ;;  %v431_v4 = vld [vmem:[%s7271_s27 + $0x138] sm:$0xff] }
 0x21e   : > { %12373 = vst [vmem:[#allocation191_spill] sm:$0xff] %v8402_v32  ;;  %6073 = vrsqrt.f32 %v8380_v52  ;;  %v6060_v54 = vpop.eup %6059  ;;  %v8424_v29 = vmul.f32 %v7283_v1, %v7714_v40  ;;  %v1094_v7 = vmul.f32 %v6058_v62, %v8226_v37  ;;  %vm1132_vm15 = vcmp.eq.f32.partialorder %v8268_v13, 0.0  ;;  %v12375_v59 = vld [vmem:[#allocation85_spill] sm:$0xff] }
 0x21f   : > { %3363 = vperm.xlu1 %5918, %v12374_v60   ;;  %vm1111_vm0 = vcmp.eq.f32.partialorder %v8275_v19, 0.0  ;;  %6075 = vrsqrt.f32 %v8394_v23  ;;  %v6062_v32 = vpop.eup %6061  ;;  %vm1146_vm1 = vcmp.eq.f32.partialorder %v8288_v2, 0.0  ;;  %vm1123_vm2 = vcmp.eq.f32.partialorder %v8306_v38, inf  ;;  %v436_v60 = vld [vmem:[%s7271_s27 + $0x160] sm:$0xff] }
 0x220   : > { %6077 = vrcp.f32 %v434_v25  ;;  %v6064_v62 = vpop.eup %6063  ;;  %v8439_v45 = vmul.f32 %v7285_v0, %v12375_v59  ;;  %v8441_v9 = vpop.permute.xlu1 %2854  ;;  %v12378_v48 = vand.u32 2147483648, %v8140_v8  ;;  %v1082_v25 = vsel %vm1081_vm6, %v8191_v12, %v1080_v14  ;;  %v433_v59 = vld [vmem:[%s7271_s27 + $0x148] sm:$0xff] }
 0x221   : > { %12376 = vst [vmem:[#allocation82_spill] sm:$0xff] %v8441_v9  ;;  %v8443_v57 = vpop.permute.xlu0 %2153  ;;  %vm1125_vm3 = vcmp.eq.f32.partialorder %v8306_v38, 0.0  ;;  %6079 = vrsqrt.f32 %v8408_v27  ;;  %v6066_v40 = vpop.eup %6065  ;;  %v12379_v9 = vld [vmem:[#allocation86_spill] sm:$0xff]  ;;  %3388 = vperm.xlu0 %5917, %v12380_v20   ;;  %v1117_v8 = vsel %vm1116_vm8, %v8213_v39, %v1115_v31  ;;  %vm1158_vm4 = vcmp.eq.f32.partialorder %v8332_v26, inf  ;;  %v435_v31 = vld [vmem:[%s7271_s27 + $0x158] sm:$0xff] }
 0x222   : > { %12377 = vst [vmem:[#allocation85_spill] sm:$0xff] %v8443_v57  ;;  %v8449_v3 = vsel %vm1104_vm5, %v12378_v48, %v1103_v58  ;;  %v8459_v57 = vmul.f32 %v7283_v1, %v12379_v9  ;;  %6081 = vrcp.f32 %v431_v4  ;;  %v438_v48 = vld [vmem:[%s7271_s27 + $0x170] sm:$0xff]  ;;  %v12381_v58 = vld [vmem:[#allocation89_spill] sm:$0xff]  ;;  %v1096_v14 = vsel %vm1095_vm10, %v8226_v37, %v1094_v7  ;;  %v12388_v7 = vld [vmem:[#allocation134_spill] sm:$0xff] }
 0x223   : > { %3373 = vperm.xlu1 %5918, %v12381_v58   ;;  %v1129_v9 = vmul.f32 %v6060_v54, %v8268_v13  ;;  %v1108_v50 = vmul.f32 %v6062_v32, %v8275_v19  ;;  %vm1160_vm5 = vcmp.eq.f32.partialorder %v8332_v26, 0.0  ;;  %6083 = vrcp.f32 %v436_v60  ;;  %v440_v54 = vld [vmem:[%s7271_s27 + $0x180] sm:$0xff] }
 0x224   : > { %v6068_v20 = vpop.eup %6067  ;;  %v12382_v44 = vand.u32 2147483648, %v8191_v12  ;;  %v1143_v58 = vmul.f32 %v6064_v62, %v8288_v2  ;;  %6085 = vrcp.f32 %v433_v59  ;;  %v8484_v32 = vpop.permute.xlu1 %2862  ;;  %v12385_v60 = vand.u32 2147483648, %v8213_v39 }
 0x225   : > { %12383 = vst [vmem:[#allocation86_spill] sm:$0xff] %v8484_v32  ;;  %v8486_v55 = vpop.permute.xlu0 %2163  ;;  %v1122_v12 = vmul.f32 %v6066_v40, %v8306_v38  ;;  %vm1137_vm6 = vcmp.eq.f32.partialorder %v8359_v24, inf  ;;  %6087 = vrcp.f32 %v438_v48  ;;  %v12389_v32 = vld [vmem:[#allocation131_spill] sm:$0xff]  ;;  %v12390_v39 = vand.u32 2147483648, %v8226_v37 }
 0x226   : > { %v8479_v4 = vsel %vm1083_vm7, %v12382_v44, %v1082_v25  ;;  %12384 = vst [vmem:[#allocation83_spill] sm:$0xff] %v8486_v55  ;;  %v8492_v30 = vsel %vm1118_vm9, %v12385_v60, %v1117_v8  ;;  %v437_v44 = vld [vmem:[%s7271_s27 + $0x168] sm:$0xff]  ;;  %v6070_v62 = vpop.eup %6069  ;;  %v12387_v25 = vld [vmem:[#allocation133_spill] sm:$0xff]  ;;  %v8503_v55 = vmul.f32 %v7283_v1, %v12388_v7  ;;  %3398 = vperm.xlu0 %5917, %v12389_v32   ;;  %vm1139_vm7 = vcmp.eq.f32.partialorder %v8359_v24, 0.0  ;;  %v442_v8 = vld [vmem:[%s7271_s27 + $0x190] sm:$0xff] }
 0x227   : > { %12386 = vst [vmem:[#allocation89_spill] sm:$0xff] %v8492_v30  ;;  %v8499_v59 = vmul.f32 %v7285_v0, %v12387_v25  ;;  %v8510_v40 = vsel %vm1097_vm11, %v12390_v39, %v1096_v14  ;;  %6089 = vrcp.f32 %v435_v31  ;;  %v8514_v48 = vpop.eup %6071  ;;  %v12392_v60 = vld [vmem:[#allocation138_spill] sm:$0xff]  ;;  %v1131_v7 = vsel %vm1130_vm12, %v8268_v13, %v1129_v9  ;;  %v439_v14 = vld [vmem:[%s7271_s27 + $0x178] sm:$0xff]  ;;  %v12401_v30 = vld [vmem:[#allocation95_spill] sm:$0xff] }
 0x228   : > { %12391 = vst [vmem:[#allocation133_spill] sm:$0xff] %v8510_v40  ;;  %3383 = vperm.xlu1 %5918, %v12392_v60   ;;  %v1110_v32 = vsel %vm1109_vm13, %v8275_v19, %v1108_v50  ;;  %v1157_v37 = vmul.f32 %v6068_v20, %v8332_v26  ;;  %6091 = vrcp.f32 %v440_v54  ;;  %v6074_v25 = vpop.eup %6073  ;;  %v1145_v31 = vsel %vm1144_vm14, %v8288_v2, %v1143_v58  ;;  %v444_v9 = vld [vmem:[%s7271_s27 + $0x1a0] sm:$0xff]  ;;  %v12394_v20 = vld [vmem:[#allocation137_spill] sm:$0xff]  ;;  %v8541_v10 = vpop.permute.xlu1 %2870 }
 0x229   : > { %6093 = vrcp.f32 %v437_v44  ;;  %v8531_v22 = vpop.eup %6075  ;;  %v8535_v50 = vmul.f32 %v7285_v0, %v12393_v6  ;;  %v8539_v54 = vmul.f32 %v7283_v1, %v12394_v20  ;;  %12395 = vst [vmem:[#allocation134_spill] sm:$0xff] %v8541_v10  ;;  %v8543_v58 = vpop.permute.xlu0 %2173  ;;  %v1124_v44 = vsel %vm1123_vm2, %v8306_v38, %v1122_v12  ;;  %v441_v6 = vld [vmem:[%s7271_s27 + $0x188] sm:$0xff]  ;;  %v12398_v39 = vld [vmem:[#allocation94_spill] sm:$0xff] }
 0x22a   : > { %12396 = vst [vmem:[#allocation131_spill] sm:$0xff] %v8543_v58  ;;  %vm1172_vm8 = vcmp.eq.f32.partialorder %v8370_v47, inf  ;;  %vm1151_vm9 = vcmp.eq.f32.partialorder %v8380_v52, inf  ;;  %6095 = vrcp.f32 %v442_v8  ;;  %v8551_v60 = vpop.eup %6077  ;;  %3408 = vperm.xlu0 %5917, %v12398_v39   ;;  %v12399_v20 = vand.u32 2147483648, %v8268_v13  ;;  %v446_v8 = vld [vmem:[%s7271_s27 + $0x1b0] sm:$0xff] }
 0x22b   : > { %12397 = vst [vmem:[#allocation138_spill] sm:$0xff] %v8551_v60  ;;  %v12400_v10 = vand.u32 2147483648, %v8275_v19  ;;  %v1136_v21 = vmul.f32 %v6070_v62, %v8359_v24  ;;  %6097 = vrcp.f32 %v439_v14  ;;  %v8568_v40 = vpop.eup %6079  ;;  %v12402_v39 = vand.u32 2147483648, %v8288_v2  ;;  %v443_v62 = vld [vmem:[%s7271_s27 + $0x198] sm:$0xff]  ;;  %v12411_v2 = vld [vmem:[#allocation96_spill] sm:$0xff] }
 0x22c   : > { %v8558_v58 = vsel %vm1132_vm15, %v12399_v20, %v1131_v7  ;;  %3393 = vperm.xlu1 %5918, %v12401_v30   ;;  %v1159_v19 = vsel %vm1158_vm4, %v8332_v26, %v1157_v37  ;;  %6099 = vrcp.f32 %v444_v9  ;;  %v8582_v7 = vpop.eup %6081  ;;  %vm1174_vm10 = vcmp.eq.f32.partialorder %v8370_v47, 0.0  ;;  %v12406_v14 = vld [vmem:[#allocation93_spill] sm:$0xff]  ;;  %v12407_v9 = vld [vmem:[#allocation144_spill] sm:$0xff] }
 0x22d   : > { %v8564_v12 = vsel %vm1111_vm0, %v12400_v10, %v1110_v32  ;;  %v8575_v13 = vsel %vm1146_vm1, %v12402_v39, %v1145_v31  ;;  %12403 = vst [vmem:[#allocation92_spill] sm:$0xff] %v8582_v7  ;;  %v12404_v32 = vand.u32 2147483648, %v8306_v38  ;;  %vm1186_vm11 = vcmp.eq.f32.partialorder %v8394_v23, inf  ;;  %v8593_v37 = vpop.eup %6083  ;;  %v8599_v39 = vpop.permute.xlu1 %2878 }
 0x22e   : > { %6101 = vrcp.f32 %v441_v6  ;;  %12405 = vst [vmem:[#allocation137_spill] sm:$0xff] %v8593_v37  ;;  %v3135_v31 = vmul.f32 %v7285_v0, %v12406_v14  ;;  %v2491_v20 = vmul.f32 %v7283_v1, %v12407_v9  ;;  %12408 = vst [vmem:[#allocation94_spill] sm:$0xff] %v8599_v39  ;;  %v8601_v38 = vpop.permute.xlu0 %2183  ;;  %3418 = vperm.xlu0 %5917, %v12411_v2   ;;  %v12412_v6 = vand.u32 2147483648, %v8332_v26 }
 0x22f   : > { %v8588_v30 = vsel %vm1125_vm3, %v12404_v32, %v1124_v44  ;;  %12409 = vst [vmem:[#allocation95_spill] sm:$0xff] %v8601_v38  ;;  %v8604_v44 = vmul.f32 2.0, %v8551_v60  ;;  %6103 = vrcp.f32 %v446_v8  ;;  %v8606_v32 = vpop.eup %6085  ;;  %v1138_v9 = vsel %vm1137_vm6, %v8359_v24, %v1136_v21 }
 0x230   : > { %12410 = vst [vmem:[#allocation93_spill] sm:$0xff] %v8606_v32  ;;  %v8613_v14 = vsel %vm1160_vm5, %v12412_v6, %v1159_v19  ;;  %vm1153_vm12 = vcmp.eq.f32.partialorder %v8380_v52, 0.0  ;;  %6105 = vrcp.f32 %v443_v62  ;;  %v8621_v8 = vadd.f32 %v8338_v56, %v8354_v36  ;;  %v8623_v10 = vpop.eup %6087  ;;  %3403 = vperm.xlu1 %5918, %v8043_v17   ;;  %v12415_v17 = vld [vmem:[#allocation150_spill] sm:$0xff] }
 0x231   : > { %12413 = vst [vmem:[#allocation144_spill] sm:$0xff] %v8623_v10  ;;  %vm1188_vm13 = vcmp.eq.f32.partialorder %v8394_v23, 0.0  ;;  %vm1165_vm14 = vcmp.eq.f32.partialorder %v8408_v27, inf  ;;  %v8630_v19 = vmul.f32 2.0, %v8582_v7  ;;  %v8634_v21 = vadd.f32 %v8384_v49, %v8388_v42  ;;  %v8640_v36 = vpop.eup %6089  ;;  %v12417_v42 = vld [vmem:[#allocation151_spill] sm:$0xff] }
 0x232   : > { %v8638_v56 = vadd.f32 %v8420_v16, %v8424_v29  ;;  %12414 = vst [vmem:[#allocation96_spill] sm:$0xff] %v8640_v36  ;;  %v3137_v62 = vmul.f32 %v7285_v0, %v12415_v17  ;;  %v1171_v2 = vmul.f32 %v8514_v48, %v8370_v47  ;;  %v1150_v6 = vmul.f32 %v6074_v25, %v8380_v52  ;;  %v8650_v60 = vpop.eup %6091  ;;  %v8654_v29 = vpop.permute.xlu1 %2886 }
 0x233   : > { %v8648_v26 = vmul.f32 2.0, %v8593_v37  ;;  %12416 = vst [vmem:[#allocation150_spill] sm:$0xff] %v8650_v60  ;;  %v2493_v49 = vmul.f32 %v7283_v1, %v12417_v42  ;;  %12418 = vst [vmem:[#allocation151_spill] sm:$0xff] %v8654_v29  ;;  %v8656_v16 = vpop.permute.xlu0 %2193  ;;  %v12420_v7 = vand.u32 2147483648, %v8359_v24  ;;  %6107 = vrsqrt.f32 %v8604_v44  ;;  %v8668_v25 = vpop.eup %6093  ;;  %v12422_v37 = vld [vmem:[#allocation157_spill] sm:$0xff] }
 0x234   : > { %12419 = vst [vmem:[#allocation192_spill] sm:$0xff] %v8656_v16  ;;  %v8666_v48 = vmul.f32 2.0, %v8606_v32  ;;  %12421 = vst [vmem:[#allocation193_spill] sm:$0xff] %v8668_v25  ;;  %3428 = vperm.xlu0 %5917, %v12422_v37   ;;  %vm1167_vm15 = vcmp.eq.f32.partialorder %v8408_v27, 0.0  ;;  %v8673_v42 = vmul.f32 2.0, %v8623_v10  ;;  %v8677_v16 = vadd.f32 %v8439_v45, %v8459_v57  ;;  %3413 = vperm.xlu1 %5918, %v8088_v34  }
 0x235   : > { %v8662_v17 = vsel %vm1139_vm7, %v12420_v7, %v1138_v9  ;;  %v8681_v24 = vadd.f32 %v8499_v59, %v8503_v55  ;;  %v8685_v7 = vadd.f32 %v8535_v50, %v8539_v54  ;;  %v8687_v9 = vpop.eup %6095  ;;  %v1185_v37 = vmul.f32 %v8531_v22, %v8394_v23  ;;  %v12429_v54 = vld [vmem:[#allocation152_spill] sm:$0xff] }
 0x236   : > { %12425 = vst [vmem:[#allocation195_spill] sm:$0xff] %v8687_v9  ;;  %6109 = vrsqrt.f32 %v8630_v19  ;;  %v8694_v57 = vmul.f32 2.0, %v8640_v36  ;;  %v8696_v45 = vadd.f32 %v3135_v31, %v2491_v20  ;;  %v8698_v55 = vpop.eup %6097  ;;  %v1173_v59 = vsel %vm1172_vm8, %v8370_v47, %v1171_v2  ;;  %v12430_v20 = vld [vmem:[#allocation153_spill] sm:$0xff]  ;;  %v8716_v36 = vpop.permute.xlu1 %2894 }
 0x237   : > { %12423 = vst [vmem:[#allocation157_spill] sm:$0xff] %v8681_v24  ;;  %12424 = vst [vmem:[#allocation194_spill] sm:$0xff] %v8685_v7  ;;  %v1152_v34 = vsel %vm1151_vm9, %v8380_v52, %v1150_v6  ;;  %6111 = vrsqrt.f32 %v8648_v26  ;;  %v8708_v22 = vmul.f32 2.0, %v8650_v60  ;;  %v8710_v50 = vpop.eup %6099  ;;  %v3139_v31 = vmul.f32 %v7285_v0, %v12429_v54  ;;  %v8718_v2 = vpop.permute.xlu0 %2203  ;;  %v456_v7 = vld [vmem:[%s7271_s27 + $0x200] sm:$0xff] }
 0x238   : > { %12426 = vst [vmem:[#allocation196_spill] sm:$0xff] %v8696_v45  ;;  %12427 = vst [vmem:[#allocation197_spill] sm:$0xff] %v8698_v55  ;;  %v2495_v10 = vmul.f32 %v7283_v1, %v12430_v20  ;;  %6113 = vrsqrt.f32 %v8666_v48  ;;  %v8722_v6 = vmul.f32 2.0, %v8668_v25  ;;  %v8724_v32 = vpop.eup %6101  ;;  %3438 = vperm.xlu0 %5917, %v8094_v51   ;;  %v1164_v60 = vmul.f32 %v8568_v40, %v8408_v27 }
 0x239   : > { %12428 = vst [vmem:[#allocation198_spill] sm:$0xff] %v8710_v50  ;;  %12431 = vst [vmem:[#allocation152_spill] sm:$0xff] %v8716_v36  ;;  %6115 = vrsqrt.f32 %v8673_v42  ;;  %v8731_v54 = vmul.f32 2.0, %v8687_v9  ;;  %v8733_v20 = vadd.f32 %v3137_v62, %v2493_v49  ;;  %3423 = vperm.xlu1 %5918, %v8118_v63   ;;  %v12436_v25 = vand.u32 2147483648, %v8370_v47  ;;  %v12438_v49 = vld [vmem:[#allocation100_spill] sm:$0xff]  ;;  %v12439_v9 = vld [vmem:[#allocation154_spill] sm:$0xff] }
 0x23a   : > { %12432 = vst [vmem:[#allocation153_spill] sm:$0xff] %v8718_v2  ;;  %12433 = vst [vmem:[#allocation199_spill] sm:$0xff] %v8724_v32  ;;  %v8735_v2 = vpop.eup %6103  ;;  %v1187_v51 = vsel %vm1186_vm11, %v8394_v23, %v1185_v37  ;;  %6117 = vrsqrt.f32 %v8694_v57  ;;  %v8749_v40 = vmul.f32 2.0, %v8698_v55  ;;  %v3141_v63 = vmul.f32 %v7285_v0, %v12438_v49 }
 0x23b   : > { %12434 = vst [vmem:[#allocation200_spill] sm:$0xff] %v8733_v20  ;;  %12435 = vst [vmem:[#allocation201_spill] sm:$0xff] %v8735_v2  ;;  %v8742_v36 = vsel %vm1174_vm10, %v12436_v25, %v1173_v59  ;;  %v8751_v62 = vpop.eup %6105  ;;  %v2497_v29 = vmul.f32 %v7283_v1, %v12439_v9  ;;  %6119 = vrsqrt.f32 %v8708_v22  ;;  %v8759_v47 = vmul.f32 2.0, %v8710_v50  ;;  %v8761_v25 = vpop.permute.xlu1 %2902 }
 0x23c   : > { %12437 = vst [vmem:[#allocation202_spill] sm:$0xff] %v8751_v62  ;;  %12440 = vst [vmem:[#allocation100_spill] sm:$0xff] %v8761_v25  ;;  %v8763_v37 = vpop.permute.xlu0 %2213  ;;  %v12442_v59 = vand.u32 2147483648, %v8380_v52  ;;  %6121 = vrsqrt.f32 %v8722_v6  ;;  %v8773_v49 = vmul.f32 2.0, %v8724_v32  ;;  %v8775_v9 = vadd.f32 %v3139_v31, %v2495_v10  ;;  %3448 = vperm.xlu0 %5917, %v8163_v53   ;;  %v12447_v31 = vld [vmem:[#allocation156_spill] sm:$0xff] }
 0x23d   : > { %12441 = vst [vmem:[#allocation154_spill] sm:$0xff] %v8763_v37  ;;  %v12444_v50 = vand.u32 2147483648, %v8394_v23  ;;  %v1166_v52 = vsel %vm1165_vm14, %v8408_v27, %v1164_v60  ;;  %6123 = vrsqrt.f32 %v8731_v54  ;;  %3433 = vperm.xlu1 %5918, %v8172_v61   ;;  %vm1200_vm0 = vcmp.eq.f32.partialorder %v8604_v44, inf  ;;  %v12445_v23 = vld [vmem:[#allocation155_spill] sm:$0xff]  ;;  %v12452_v25 = vld [vmem:[#allocation160_spill] sm:$0xff] }
 0x23e   : > { %v8769_v55 = vsel %vm1153_vm12, %v12442_v59, %v1152_v34  ;;  %12443 = vst [vmem:[#allocation203_spill] sm:$0xff] %v8775_v9  ;;  %v8789_v34 = vmul.f32 2.0, %v8735_v2  ;;  %v6108_v59 = vpop.eup %6107  ;;  %vm1202_vm1 = vcmp.eq.f32.partialorder %v8604_v44, 0.0  ;;  %6125 = vrsqrt.f32 %v8749_v40 }
 0x23f   : > { %v8782_v37 = vsel %vm1188_vm13, %v12444_v50, %v1187_v51  ;;  %v8796_v53 = vmul.f32 2.0, %v8751_v62  ;;  %v8800_v60 = vmul.f32 %v7285_v0, %v12445_v23  ;;  %6127 = vrsqrt.f32 %v8759_v47  ;;  %v8810_v2 = vpop.permute.xlu1 %2910 }
 0x240   : > { %v8804_v50 = vadd.f32 %v3141_v63, %v2497_v29  ;;  %v6110_v61 = vpop.eup %6109  ;;  %v8808_v51 = vmul.f32 %v7283_v1, %v12447_v31  ;;  %12448 = vst [vmem:[#allocation156_spill] sm:$0xff] %v8810_v2  ;;  %v8812_v62 = vpop.permute.xlu0 %2223  ;;  %v12450_v32 = vand.u32 2147483648, %v8408_v27  ;;  %vm1179_vm2 = vcmp.eq.f32.partialorder %v8630_v19, inf  ;;  %v448_v29 = vld [vmem:[%s7271_s27 + $0x1c0] sm:$0xff]  ;;  %3458 = vperm.xlu0 %5917, %v8178_v11   ;;  %v445_v27 = vld [vmem:[%s7271_s27 + $0x1a8] sm:$0xff]  ;;  %v447_v11 = vld [vmem:[%s7271_s27 + $0x1b8] sm:$0xff] }
 0x241   : > { %12449 = vst [vmem:[#allocation204_spill] sm:$0xff] %v8812_v62  ;;  %6129 = vrsqrt.f32 %v8773_v49  ;;  %v6112_v63 = vpop.eup %6111  ;;  %v1199_v31 = vmul.f32 %v6108_v59, %v8604_v44  ;;  %vm1181_vm3 = vcmp.eq.f32.partialorder %v8630_v19, 0.0  ;;  %vm1214_vm4 = vcmp.eq.f32.partialorder %v8648_v26, inf  ;;  %3443 = vperm.xlu1 %5918, %v8222_v28   ;;  %v450_v59 = vld [vmem:[%s7271_s27 + $0x1d0] sm:$0xff]  ;;  %v12451_v62 = vld [vmem:[#allocation159_spill] sm:$0xff] }
 0x242   : > { %12446 = vst [vmem:[#allocation155_spill] sm:$0xff] %v8804_v50  ;;  %v8818_v23 = vsel %vm1167_vm15, %v12450_v32, %v1166_v52  ;;  %6131 = vrsqrt.f32 %v8789_v34  ;;  %v6114_v32 = vpop.eup %6113  ;;  %vm1216_vm5 = vcmp.eq.f32.partialorder %v8648_v26, 0.0  ;;  %vm1193_vm6 = vcmp.eq.f32.partialorder %v8666_v48, inf  ;;  %v449_v50 = vld [vmem:[%s7271_s27 + $0x1c8] sm:$0xff] }
 0x243   : > { %6133 = vrsqrt.f32 %v8796_v53  ;;  %v6116_v10 = vpop.eup %6115  ;;  %v8839_v2 = vmul.f32 %v7285_v0, %v12451_v62  ;;  %v8843_v28 = vmul.f32 %v7283_v1, %v12452_v25  ;;  %vm1195_vm7 = vcmp.eq.f32.partialorder %v8666_v48, 0.0  ;;  %v8848_v38 = vpop.permute.xlu1 %2918  ;;  %v452_v25 = vld [vmem:[%s7271_s27 + $0x1e0] sm:$0xff]  ;;  %v12455_v62 = vld [vmem:[#allocation163_spill] sm:$0xff] }
 0x244   : > { %vm1228_vm8 = vcmp.eq.f32.partialorder %v8673_v42, inf  ;;  %6135 = vrcp.f32 %v448_v29  ;;  %v6118_v52 = vpop.eup %6117  ;;  %12453 = vst [vmem:[#allocation159_spill] sm:$0xff] %v8848_v38  ;;  %v8850_v39 = vpop.permute.xlu0 %2233  ;;  %vm1207_vm9 = vcmp.eq.f32.partialorder %v8694_v57, inf  ;;  %3468 = vperm.xlu0 %5917, %v8235_v43   ;;  %v1201_v29 = vsel %vm1200_vm0, %v8604_v44, %v1199_v31  ;;  %v454_v31 = vld [vmem:[%s7271_s27 + $0x1f0] sm:$0xff] }
 0x245   : > { %12454 = vst [vmem:[#allocation160_spill] sm:$0xff] %v8850_v39  ;;  %6137 = vrcp.f32 %v445_v27  ;;  %v6120_v9 = vpop.eup %6119  ;;  %v1178_v38 = vmul.f32 %v6110_v61, %v8630_v19  ;;  %vm1242_vm10 = vcmp.eq.f32.partialorder %v8708_v22, inf  ;;  %v8865_v27 = vmul.f32 %v7285_v0, %v8155_v35  ;;  %3453 = vperm.xlu1 %5918, %v8300_v33   ;;  %v451_v33 = vld [vmem:[%s7271_s27 + $0x1d8] sm:$0xff] }
 0x246   : > { %6139 = vrcp.f32 %v450_v59  ;;  %v6122_v39 = vpop.eup %6121  ;;  %v1213_v43 = vmul.f32 %v6112_v63, %v8648_v26  ;;  %vm1230_vm11 = vcmp.eq.f32.partialorder %v8673_v42, 0.0  ;;  %vm1209_vm12 = vcmp.eq.f32.partialorder %v8694_v57, 0.0 }
 0x247   : > { %6141 = vrcp.f32 %v447_v11  ;;  %v6124_v59 = vpop.eup %6123  ;;  %v8875_v20 = vmul.f32 %v7283_v1, %v12455_v62  ;;  %v1192_v35 = vmul.f32 %v6114_v32, %v8666_v48  ;;  %vm1244_vm13 = vcmp.eq.f32.partialorder %v8708_v22, 0.0  ;;  %v8887_v61 = vpop.permute.xlu1 %2926 }
 0x248   : > { %vm1221_vm14 = vcmp.eq.f32.partialorder %v8722_v6, inf  ;;  %6143 = vrcp.f32 %v452_v25  ;;  %v8881_v63 = vpop.eup %6125  ;;  %v8885_v11 = vmul.f32 %v7285_v0, %v8208_v5  ;;  %12456 = vst [vmem:[#allocation163_spill] sm:$0xff] %v8887_v61  ;;  %v8889_v45 = vpop.permute.xlu0 %2243  ;;  %v12458_v62 = vand.u32 2147483648, %v8604_v44  ;;  %3478 = vperm.xlu0 %5917, %v8320_v41  }
 0x249   : > { %12457 = vst [vmem:[#allocation205_spill] sm:$0xff] %v8889_v45  ;;  %vm1223_vm15 = vcmp.eq.f32.partialorder %v8722_v6, 0.0  ;;  %6145 = vrcp.f32 %v449_v50  ;;  %v8900_v24 = vpop.eup %6127  ;;  %v8904_v5 = vmul.f32 %v7283_v1, %v8210_v15  ;;  %v1180_v44 = vsel %vm1179_vm2, %v8630_v19, %v1178_v38  ;;  %3463 = vperm.xlu1 %5918, %v8345_v18   ;;  %v458_v45 = vld [vmem:[%s7271_s27 + $0x210] sm:$0xff] }
 0x24a   : > { %v8895_v32 = vsel %vm1202_vm1, %v12458_v62, %v1201_v29  ;;  %vm1256_vm0 = vcmp.eq.f32.partialorder %v8731_v54, inf  ;;  %6147 = vrcp.f32 %v454_v31  ;;  %v453_v29 = vld [vmem:[%s7271_s27 + $0x1e8] sm:$0xff]  ;;  %v1215_v50 = vsel %vm1214_vm4, %v8648_v26, %v1213_v43 }
 0x24b   : > { %v8912_v62 = vpop.eup %6129  ;;  %v1227_v15 = vmul.f32 %v6116_v10, %v8673_v42  ;;  %v1206_v41 = vmul.f32 %v6118_v52, %v8694_v57  ;;  %6149 = vrcp.f32 %v451_v33  ;;  %v1194_v38 = vsel %vm1193_vm6, %v8666_v48, %v1192_v35  ;;  %v8929_v43 = vpop.permute.xlu1 %2934 }
 0x24c   : > { %v8920_v25 = vpop.eup %6131  ;;  %v1241_v31 = vmul.f32 %v6120_v9, %v8708_v22  ;;  %vm1258_vm1 = vcmp.eq.f32.partialorder %v8731_v54, 0.0  ;;  %6151 = vrcp.f32 %v456_v7  ;;  %12459 = vst [vmem:[#allocation206_spill] sm:$0xff] %v8929_v43  ;;  %v8931_v10 = vpop.permute.xlu0 %2253  ;;  %v12461_v52 = vand.u32 2147483648, %v8630_v19  ;;  %3488 = vperm.xlu0 %5917, %v8449_v3  }
 0x24d   : > { %v8927_v18 = vpop.eup %6133  ;;  %12460 = vst [vmem:[#allocation207_spill] sm:$0xff] %v8931_v10  ;;  %v1220_v35 = vmul.f32 %v6122_v39, %v8722_v6  ;;  %v1259_v9 = vand.u32 2147483648, %v8731_v54  ;;  %6153 = vrcp.f32 %v453_v29  ;;  %v8946_v61 = vmul.f32 %v7285_v0, %v8262_v46  ;;  %v455_v29 = vld [vmem:[%s7271_s27 + $0x1f8] sm:$0xff]  ;;  %3473 = vperm.xlu1 %5918, %v8479_v4  }
 0x24e   : > { %v8937_v33 = vsel %vm1181_vm3, %v12461_v52, %v1180_v44  ;;  %v8942_v7 = vpop.eup %6135  ;;  %v12463_v10 = vand.u32 2147483648, %v8648_v26  ;;  %v1255_v39 = vmul.f32 %v6124_v59, %v8731_v54  ;;  %vm1235_vm2 = vcmp.eq.f32.partialorder %v8749_v40, inf  ;;  %v12471_v44 = vld [vmem:[#allocation89_spill] sm:$0xff] }
 0x24f   : > { %12462 = vst [vmem:[#allocation208_spill] sm:$0xff] %v8942_v7  ;;  %v8959_v52 = vpop.eup %6137  ;;  %v12465_v46 = vand.u32 2147483648, %v8666_v48  ;;  %v1229_v26 = vsel %vm1228_vm8, %v8673_v42, %v1227_v15  ;;  %v1208_v59 = vsel %vm1207_vm9, %v8694_v57, %v1206_v41  ;;  %vm1270_vm3 = vcmp.eq.f32.partialorder %v8759_v47, inf  ;;  %v8985_v15 = vpop.permute.xlu1 %2942 }
 0x250   : > { %v8953_v19 = vsel %vm1216_vm5, %v12463_v10, %v1215_v50  ;;  %12464 = vst [vmem:[#allocation209_spill] sm:$0xff] %v8959_v52  ;;  %v8975_v50 = vpop.eup %6139  ;;  %v1243_v4 = vsel %vm1242_vm10, %v8708_v22, %v1241_v31  ;;  %vm1249_vm4 = vcmp.eq.f32.partialorder %v8773_v49, inf  ;;  %6155 = vrcp.f32 %v458_v45  ;;  %12468 = vst [vmem:[#allocation212_spill] sm:$0xff] %v8985_v15  ;;  %3498 = vperm.xlu0 %5917, %v12471_v44  }
 0x251   : > { %v8966_v3 = vsel %vm1195_vm7, %v12465_v46, %v1194_v38  ;;  %12466 = vst [vmem:[#allocation210_spill] sm:$0xff] %v8975_v50  ;;  %v460_v38 = vld [vmem:[%s7271_s27 + $0x220] sm:$0xff]  ;;  %v8983_v10 = vpop.eup %6141  ;;  %v8987_v46 = vpop.permute.xlu0 %2263  ;;  %v1222_v41 = vsel %vm1221_vm14, %v8722_v6, %v1220_v35  ;;  %vm1237_vm5 = vcmp.eq.f32.partialorder %v8749_v40, 0.0  ;;  %v8995_v48 = vmul.f32 2.0, %v8942_v7 }
 0x252   : > { %12467 = vst [vmem:[#allocation211_spill] sm:$0xff] %v8983_v10  ;;  %12469 = vst [vmem:[#allocation213_spill] sm:$0xff] %v8987_v46  ;;  %6157 = vrcp.f32 %v455_v29  ;;  %v8997_v45 = vpop.eup %6143  ;;  %v12472_v15 = vand.u32 2147483648, %v8673_v42  ;;  %v12473_v35 = vand.u32 2147483648, %v8694_v57  ;;  %v1257_v29 = vsel %vm1256_vm0, %v8731_v54, %v1255_v39 }
 0x253   : > { %12470 = vst [vmem:[#allocation214_spill] sm:$0xff] %v8997_v45  ;;  %vm1272_vm6 = vcmp.eq.f32.partialorder %v8759_v47, 0.0  ;;  %vm1251_vm7 = vcmp.eq.f32.partialorder %v8773_v49, 0.0  ;;  %v9018_v44 = vmul.f32 2.0, %v8959_v52  ;;  %v9020_v42 = vpop.eup %6145  ;;  %vm1284_vm8 = vcmp.eq.f32.partialorder %v8789_v34, inf }
 0x254   : > { %v9004_v46 = vsel %vm1230_vm11, %v12472_v15, %v1229_v26  ;;  %v9010_v43 = vsel %vm1209_vm12, %v12473_v35, %v1208_v59  ;;  %12474 = vst [vmem:[#allocation89_spill] sm:$0xff] %v9020_v42  ;;  %v12475_v26 = vld [vmem:[#allocation133_spill] sm:$0xff]  ;;  %v12476_v15 = vand.u32 2147483648, %v8708_v22  ;;  %v9031_v39 = vmul.f32 2.0, %v8975_v50  ;;  %v9033_v59 = vpop.eup %6147  ;;  %3508 = vperm.xlu0 %5917, %v8558_v58  }
 0x255   : > { %3483 = vperm.xlu1 %5918, %v12475_v26   ;;  %6159 = vrcp.f32 %v460_v38  ;;  %12477 = vst [vmem:[#allocation133_spill] sm:$0xff] %v9033_v59  ;;  %v12478_v35 = vand.u32 2147483648, %v8722_v6  ;;  %vm1286_vm9 = vcmp.eq.f32.partialorder %v8789_v34, 0.0  ;;  %v1287_v22 = vand.u32 2147483648, %v8789_v34  ;;  %v9046_v26 = vpop.eup %6149  ;;  %v9050_v38 = vpop.permute.xlu0 %2273 }
 0x256   : > { %v9027_v57 = vsel %vm1244_vm13, %v12476_v15, %v1243_v4  ;;  %v9044_v4 = vmul.f32 2.0, %v8983_v10  ;;  %12479 = vst [vmem:[#allocation215_spill] sm:$0xff] %v9046_v26  ;;  %v9048_v15 = vpop.permute.xlu1 %2950  ;;  %v9054_v50 = vsel %vm1258_vm1, %v1259_v9, %v1257_v29  ;;  %v1234_v6 = vmul.f32 %v8881_v63, %v8749_v40 }
 0x257   : > { %v9039_v31 = vsel %vm1223_vm15, %v12478_v35, %v1222_v41  ;;  %6161 = vrsqrt.f32 %v8995_v48  ;;  %v9060_v41 = vmul.f32 2.0, %v8997_v45  ;;  %v9062_v35 = vpop.eup %6151  ;;  %v1269_v7 = vmul.f32 %v8900_v24, %v8759_v47 }
 0x258   : > { %12480 = vst [vmem:[#allocation216_spill] sm:$0xff] %v9062_v35  ;;  %v1248_v54 = vmul.f32 %v8912_v62, %v8773_v49  ;;  %6163 = vrsqrt.f32 %v9018_v44  ;;  %v9071_v9 = vmul.f32 2.0, %v9020_v42  ;;  %v9073_v63 = vpop.eup %6153  ;;  %v1283_v29 = vmul.f32 %v8920_v25, %v8789_v34  ;;  %3518 = vperm.xlu0 %5917, %v8575_v13  }
 0x259   : > { %12481 = vst [vmem:[#allocation217_spill] sm:$0xff] %v9073_v63  ;;  %3493 = vperm.xlu1 %5918, %v8564_v12   ;;  %v1262_v58 = vmul.f32 %v8927_v18, %v8796_v53  ;;  %6165 = vrsqrt.f32 %v9031_v39  ;;  %v9082_v24 = vmul.f32 2.0, %v9033_v59  ;;  %vm1263_vm10 = vcmp.eq.f32.partialorder %v8796_v53, inf  ;;  %v9092_v25 = vpop.permute.xlu0 %2283 }
 0x25a   : > { %vm1265_vm11 = vcmp.eq.f32.partialorder %v8796_v53, 0.0  ;;  %6167 = vrsqrt.f32 %v9044_v4  ;;  %v9088_v62 = vmul.f32 2.0, %v9046_v26  ;;  %v9090_v12 = vpop.permute.xlu1 %2958  ;;  %12482 = vst [vmem:[#allocation218_spill] sm:$0xff] %v9092_v25  ;;  %v1236_v18 = vsel %vm1235_vm2, %v8749_v40, %v1234_v6  ;;  %v9102_v42 = vpop.eup %6155 }
 0x25b   : > { %v1266_v59 = vand.u32 2147483648, %v8796_v53  ;;  %6169 = vrsqrt.f32 %v9060_v41  ;;  %v9100_v45 = vmul.f32 2.0, %v9062_v35  ;;  %12483 = vst [vmem:[#allocation219_spill] sm:$0xff] %v9102_v42  ;;  %v1271_v26 = vsel %vm1270_vm3, %v8759_v47, %v1269_v7 }
 0x25c   : > { %v1250_v6 = vsel %vm1249_vm4, %v8773_v49, %v1248_v54  ;;  %6171 = vrsqrt.f32 %v9071_v9  ;;  %v9113_v10 = vmul.f32 2.0, %v9073_v63  ;;  %v9115_v52 = vpop.eup %6157  ;;  %v1285_v13 = vsel %vm1284_vm8, %v8789_v34, %v1283_v29  ;;  %v457_v29 = vld [vmem:[%s7271_s27 + $0x208] sm:$0xff]  ;;  %3528 = vperm.xlu0 %5917, %v8613_v14  }
 0x25d   : > { %12484 = vst [vmem:[#allocation220_spill] sm:$0xff] %v9115_v52  ;;  %3503 = vperm.xlu1 %5918, %v8588_v30   ;;  %v1264_v7 = vsel %vm1263_vm10, %v8796_v53, %v1262_v58  ;;  %6173 = vrsqrt.f32 %v9082_v24  ;;  %v9127_v54 = vadd.f32 %v8800_v60, %v8808_v51  ;;  %v12485_v35 = vand.u32 2147483648, %v8749_v40  ;;  %v9149_v51 = vpop.permute.xlu0 %2293 }
 0x25e   : > { %6175 = vrsqrt.f32 %v9088_v62  ;;  %v9139_v63 = vadd.f32 %v8839_v2, %v8843_v28  ;;  %v9143_v58 = vadd.f32 %v8865_v27, %v8875_v20  ;;  %v9147_v60 = vpop.permute.xlu1 %2966  ;;  %12487 = vst [vmem:[#allocation222_spill] sm:$0xff] %v9149_v51  ;;  %v12488_v40 = vand.u32 2147483648, %v8759_v47  ;;  %v462_v28 = vld [vmem:[%s7271_s27 + $0x230] sm:$0xff] }
 0x25f   : > { %v9133_v30 = vsel %vm1237_vm5, %v12485_v35, %v1236_v18  ;;  %v9145_v25 = vpop.eup %6159  ;;  %v12489_v18 = vand.u32 2147483648, %v8773_v49  ;;  %6177 = vrsqrt.f32 %v9100_v45  ;;  %v9165_v20 = vmul.f32 2.0, %v9102_v42 }
 0x260   : > { %12486 = vst [vmem:[#allocation221_spill] sm:$0xff] %v9145_v25  ;;  %v9155_v35 = vsel %vm1272_vm6, %v12488_v40, %v1271_v26  ;;  %v9171_v47 = vsel %vm1286_vm9, %v1287_v22, %v1285_v13  ;;  %v9175_v27 = vsel %vm1265_vm11, %v1266_v59, %v1264_v7  ;;  %6179 = vrsqrt.f32 %v9113_v10  ;;  %v459_v59 = vld [vmem:[%s7271_s27 + $0x218] sm:$0xff]  ;;  %3538 = vperm.xlu0 %5917, %v8742_v36   ;;  %v461_v36 = vld [vmem:[%s7271_s27 + $0x228] sm:$0xff] }
 0x261   : > { %v9161_v2 = vsel %vm1251_vm7, %v12489_v18, %v1250_v6  ;;  %v9179_v49 = vmul.f32 2.0, %v9115_v52  ;;  %v6162_v26 = vpop.eup %6161  ;;  %3513 = vperm.xlu1 %5918, %v8662_v17   ;;  %vm1298_vm12 = vcmp.eq.f32.partialorder %v8995_v48, inf  ;;  %vm1300_vm13 = vcmp.eq.f32.partialorder %v8995_v48, 0.0  ;;  %v9193_v6 = vpop.permute.xlu0 %2303  ;;  %v464_v18 = vld [vmem:[%s7271_s27 + $0x240] sm:$0xff] }
 0x262   : > { %6181 = vrcp.f32 %v457_v29  ;;  %v6164_v34 = vpop.eup %6163  ;;  %vm1277_vm14 = vcmp.eq.f32.partialorder %v9018_v44, inf  ;;  %vm1279_vm15 = vcmp.eq.f32.partialorder %v9018_v44, 0.0  ;;  %v9188_v53 = vmul.f32 2.0, %v9145_v25  ;;  %v9191_v17 = vpop.permute.xlu1 %2974  ;;  %12491 = vst [vmem:[#allocation224_spill] sm:$0xff] %v9193_v6  ;;  %v466_v25 = vld [vmem:[%s7271_s27 + $0x250] sm:$0xff] }
 0x263   : > { %6183 = vrcp.f32 %v462_v28  ;;  %v6166_v22 = vpop.eup %6165  ;;  %12490 = vst [vmem:[#allocation223_spill] sm:$0xff] %v9191_v17  ;;  %vm1312_vm0 = vcmp.eq.f32.partialorder %v9031_v39, inf  ;;  %vm1314_vm1 = vcmp.eq.f32.partialorder %v9031_v39, 0.0  ;;  %v1297_v29 = vmul.f32 %v6162_v26, %v8995_v48 }
 0x264   : > { %6185 = vrsqrt.f32 %v9165_v20  ;;  %v6168_v7 = vpop.eup %6167  ;;  %vm1291_vm2 = vcmp.eq.f32.partialorder %v9044_v4, inf  ;;  %vm1293_vm3 = vcmp.eq.f32.partialorder %v9044_v4, 0.0  ;;  %vm1326_vm4 = vcmp.eq.f32.partialorder %v9060_v41, inf  ;;  %3548 = vperm.xlu0 %5917, %v8782_v37   ;;  %v465_v37 = vld [vmem:[%s7271_s27 + $0x248] sm:$0xff] }
 0x265   : > { %6187 = vrsqrt.f32 %v9179_v49  ;;  %v6170_v28 = vpop.eup %6169  ;;  %3523 = vperm.xlu1 %5918, %v8769_v55   ;;  %v1276_v40 = vmul.f32 %v6164_v34, %v9018_v44  ;;  %vm1328_vm5 = vcmp.eq.f32.partialorder %v9060_v41, 0.0  ;;  %v9217_v13 = vpop.permute.xlu0 %2313  ;;  %v1311_v52 = vmul.f32 %v6166_v22, %v9031_v39  ;;  %v463_v34 = vld [vmem:[%s7271_s27 + $0x238] sm:$0xff]  ;;  %v468_v22 = vld [vmem:[%s7271_s27 + $0x260] sm:$0xff] }
 0x266   : > { %6189 = vrcp.f32 %v459_v59  ;;  %v6172_v26 = vpop.eup %6171  ;;  %v9215_v42 = vpop.permute.xlu1 %2982  ;;  %12493 = vst [vmem:[#allocation226_spill] sm:$0xff] %v9217_v13  ;;  %vm1305_vm6 = vcmp.eq.f32.partialorder %v9071_v9, inf  ;;  %v1299_v14 = vsel %vm1298_vm12, %v8995_v48, %v1297_v29  ;;  %vm1307_vm7 = vcmp.eq.f32.partialorder %v9071_v9, 0.0 }
 0x267   : > { %6191 = vrsqrt.f32 %v9188_v53  ;;  %v6174_v55 = vpop.eup %6173  ;;  %12492 = vst [vmem:[#allocation225_spill] sm:$0xff] %v9215_v42  ;;  %v1290_v42 = vmul.f32 %v6168_v7, %v9044_v4  ;;  %vm1340_vm8 = vcmp.eq.f32.partialorder %v9082_v24, inf  ;;  %vm1319_vm9 = vcmp.eq.f32.partialorder %v9088_v62, inf }
 0x268   : > { %6193 = vrcp.f32 %v464_v18  ;;  %v6176_v6 = vpop.eup %6175  ;;  %v1325_v18 = vmul.f32 %v6170_v28, %v9060_v41  ;;  %v1278_v7 = vsel %vm1277_vm14, %v9018_v44, %v1276_v40  ;;  %vm1342_vm10 = vcmp.eq.f32.partialorder %v9082_v24, 0.0  ;;  %3558 = vperm.xlu0 %5917, %v8895_v32  }
 0x269   : > { %6195 = vrcp.f32 %v461_v36  ;;  %v6178_v13 = vpop.eup %6177  ;;  %3533 = vperm.xlu1 %5918, %v8818_v23   ;;  %vm1321_vm11 = vcmp.eq.f32.partialorder %v9088_v62, 0.0  ;;  %v9246_v59 = vpop.permute.xlu0 %2323  ;;  %v1313_v40 = vsel %vm1312_vm0, %v9031_v39, %v1311_v52  ;;  %vm1354_vm12 = vcmp.eq.f32.partialorder %v9100_v45, inf }
 0x26a   : > { %6197 = vrcp.f32 %v466_v25  ;;  %v6180_v29 = vpop.eup %6179  ;;  %v9244_v36 = vpop.permute.xlu1 %2990  ;;  %12496 = vst [vmem:[#allocation229_spill] sm:$0xff] %v9246_v59  ;;  %v12497_v25 = vand.u32 2147483648, %v8995_v48  ;;  %v1292_v23 = vsel %vm1291_vm2, %v9044_v4, %v1290_v42  ;;  %v1304_v48 = vmul.f32 %v6172_v26, %v9071_v9  ;;  %v467_v26 = vld [vmem:[%s7271_s27 + $0x258] sm:$0xff] }
 0x26b   : > { %6199 = vrcp.f32 %v463_v34  ;;  %12495 = vst [vmem:[#allocation228_spill] sm:$0xff] %v9244_v36  ;;  %v1327_v32 = vsel %vm1326_vm4, %v9060_v41, %v1325_v18  ;;  %v1339_v42 = vmul.f32 %v6174_v55, %v9082_v24  ;;  %vm1356_vm14 = vcmp.eq.f32.partialorder %v9100_v45, 0.0  ;;  %v472_v55 = vld [vmem:[%s7271_s27 + $0x280] sm:$0xff] }
 0x26c   : > { %v9242_v28 = vpop.eup %6181  ;;  %v9252_v17 = vsel %vm1300_vm13, %v12497_v25, %v1299_v14  ;;  %6201 = vrcp.f32 %v468_v22  ;;  %v470_v25 = vld [vmem:[%s7271_s27 + $0x270] sm:$0xff]  ;;  %v12499_v22 = vand.u32 2147483648, %v9018_v44  ;;  %vm1333_vm13 = vcmp.eq.f32.partialorder %v9113_v10, inf  ;;  %3568 = vperm.xlu0 %5917, %v8953_v19  }
 0x26d   : > { %12494 = vst [vmem:[#allocation227_spill] sm:$0xff] %v9242_v28  ;;  %v9258_v34 = vpop.eup %6183  ;;  %6203 = vrcp.f32 %v465_v37  ;;  %3543 = vperm.xlu1 %5918, %v8937_v33   ;;  %v12500_v14 = vand.u32 2147483648, %v9031_v39  ;;  %v1318_v44 = vmul.f32 %v6176_v6, %v9088_v62  ;;  %v9290_v18 = vmul.f32 2.0, %v9242_v28  ;;  %v9297_v51 = vpop.permute.xlu0 %2333 }
 0x26e   : > { %12498 = vst [vmem:[#allocation230_spill] sm:$0xff] %v9258_v34  ;;  %v6186_v52 = vpop.eup %6185  ;;  %v9272_v59 = vsel %vm1279_vm15, %v12499_v22, %v1278_v7  ;;  %v9295_v36 = vpop.permute.xlu1 %2998  ;;  %12502 = vst [vmem:[#allocation232_spill] sm:$0xff] %v9297_v51  ;;  %v12503_v39 = vand.u32 2147483648, %v9044_v4  ;;  %vm1335_vm15 = vcmp.eq.f32.partialorder %v9113_v10, 0.0  ;;  %vm1368_vm0 = vcmp.eq.f32.partialorder %v9165_v20, inf }
 0x26f   : > { %v6188_v37 = vpop.eup %6187  ;;  %v9284_v33 = vsel %vm1314_vm1, %v12500_v14, %v1313_v40  ;;  %v9308_v6 = vmul.f32 2.0, %v9258_v34  ;;  %6205 = vrcp.f32 %v470_v25  ;;  %v12504_v7 = vand.u32 2147483648, %v9060_v41 }
 0x270   : > { %v9293_v22 = vpop.eup %6189  ;;  %v9303_v40 = vsel %vm1293_vm3, %v12503_v39, %v1292_v23  ;;  %v1306_v4 = vsel %vm1305_vm6, %v9071_v9, %v1304_v48  ;;  %vm1370_vm1 = vcmp.eq.f32.partialorder %v9165_v20, 0.0  ;;  %6207 = vrcp.f32 %v467_v26  ;;  %3578 = vperm.xlu0 %5917, %v9004_v46  }
 0x271   : > { %12501 = vst [vmem:[#allocation231_spill] sm:$0xff] %v9293_v22  ;;  %v6192_v14 = vpop.eup %6191  ;;  %v9315_v28 = vsel %vm1328_vm5, %v12504_v7, %v1327_v32  ;;  %3553 = vperm.xlu1 %5918, %v8966_v3   ;;  %v1341_v19 = vsel %vm1340_vm8, %v9082_v24, %v1339_v42  ;;  %v1353_v41 = vmul.f32 %v6178_v13, %v9100_v45  ;;  %v1371_v25 = vand.u32 2147483648, %v9165_v20  ;;  %v469_v42 = vld [vmem:[%s7271_s27 + $0x268] sm:$0xff] }
 0x272   : > { %v9321_v23 = vpop.eup %6193  ;;  %6209 = vrcp.f32 %v472_v55  ;;  %v1320_v48 = vsel %vm1319_vm9, %v9088_v62, %v1318_v44  ;;  %v1332_v26 = vmul.f32 %v6180_v29, %v9113_v10  ;;  %v9337_v3 = vmul.f32 2.0, %v9293_v22  ;;  %v9342_v13 = vpop.permute.xlu1 %3006 }
 0x273   : > { %12505 = vst [vmem:[#allocation233_spill] sm:$0xff] %v9321_v23  ;;  %v9329_v32 = vpop.eup %6195  ;;  %6211 = vrsqrt.f32 %v9290_v18  ;;  %12508 = vst [vmem:[#allocation236_spill] sm:$0xff] %v9342_v13  ;;  %v9344_v55 = vpop.permute.xlu0 %2343  ;;  %v12510_v39 = vand.u32 2147483648, %v9071_v9  ;;  %v1367_v29 = vmul.f32 %v6186_v52, %v9165_v20  ;;  %vm1347_vm2 = vcmp.eq.f32.partialorder %v9179_v49, inf }
 0x274   : > { %12506 = vst [vmem:[#allocation234_spill] sm:$0xff] %v9329_v32  ;;  %v9340_v7 = vpop.eup %6197  ;;  %12509 = vst [vmem:[#allocation237_spill] sm:$0xff] %v9344_v55  ;;  %6213 = vrsqrt.f32 %v9308_v6  ;;  %v1346_v22 = vmul.f32 %v6188_v37, %v9179_v49  ;;  %vm1349_vm3 = vcmp.eq.f32.partialorder %v9179_v49, 0.0  ;;  %v1350_v55 = vand.u32 2147483648, %v9179_v49  ;;  %3588 = vperm.xlu0 %5917, %v9027_v57  }
 0x275   : > { %12507 = vst [vmem:[#allocation235_spill] sm:$0xff] %v9340_v7  ;;  %v9350_v44 = vsel %vm1307_vm7, %v12510_v39, %v1306_v4  ;;  %v9355_v34 = vpop.eup %6199  ;;  %v9362_v9 = vmul.f32 2.0, %v9321_v23  ;;  %v474_v4 = vld [vmem:[%s7271_s27 + $0x290] sm:$0xff]  ;;  %3563 = vperm.xlu1 %5918, %v9010_v43   ;;  %v12513_v52 = vand.u32 2147483648, %v9082_v24  ;;  %v12514_v46 = vand.u32 2147483648, %v9088_v62 }
 0x276   : > { %12511 = vst [vmem:[#allocation238_spill] sm:$0xff] %v9355_v34  ;;  %v9365_v39 = vpop.eup %6201  ;;  %v9381_v23 = vmul.f32 2.0, %v9329_v32  ;;  %6215 = vrcp.f32 %v469_v42  ;;  %v1355_v43 = vsel %vm1354_vm12, %v9100_v45, %v1353_v41  ;;  %v1334_v24 = vsel %vm1333_vm13, %v9113_v10, %v1332_v26 }
 0x277   : > { %12512 = vst [vmem:[#allocation239_spill] sm:$0xff] %v9365_v39  ;;  %v9372_v13 = vsel %vm1342_vm10, %v12513_v52, %v1341_v19  ;;  %v9378_v37 = vsel %vm1321_vm11, %v12514_v46, %v1320_v48  ;;  %v9383_v51 = vpop.eup %6203  ;;  %6217 = vrsqrt.f32 %v9337_v3  ;;  %v9393_v62 = vmul.f32 2.0, %v9340_v7  ;;  %v9395_v19 = vpop.permute.xlu1 %3014 }
 0x278   : > { %12515 = vst [vmem:[#allocation240_spill] sm:$0xff] %v9383_v51  ;;  %v9397_v48 = vpop.permute.xlu0 %2353  ;;  %v1369_v42 = vsel %vm1368_vm0, %v9165_v20, %v1367_v29  ;;  %v1381_v52 = vmul.f32 %v6192_v14, %v9188_v53  ;;  %v9404_v41 = vmul.f32 2.0, %v9355_v34  ;;  %6219 = vrcp.f32 %v474_v4  ;;  %3598 = vperm.xlu0 %5917, %v9054_v50  }
 0x279   : > { %v1348_v26 = vsel %vm1347_vm2, %v9179_v49, %v1346_v22  ;;  %vm1382_vm4 = vcmp.eq.f32.partialorder %v9188_v53, inf  ;;  %6221 = vrsqrt.f32 %v9362_v9  ;;  %v9413_v46 = vmul.f32 2.0, %v9365_v39  ;;  %v9415_v29 = vpop.eup %6205  ;;  %3573 = vperm.xlu1 %5918, %v9039_v31  }
 0x27a   : > { %12516 = vst [vmem:[#allocation241_spill] sm:$0xff] %v9415_v29  ;;  %v12517_v14 = vand.u32 2147483648, %v9100_v45  ;;  %vm1384_vm5 = vcmp.eq.f32.partialorder %v9188_v53, 0.0  ;;  %6223 = vrsqrt.f32 %v9381_v23  ;;  %v9427_v22 = vmul.f32 2.0, %v9383_v51  ;;  %v9429_v4 = vpop.eup %6207 }
 0x27b   : > { %12518 = vst [vmem:[#allocation242_spill] sm:$0xff] %v9429_v4  ;;  %v12519_v39 = vand.u32 2147483648, %v9113_v10  ;;  %v9439_v45 = vsel %vm1370_vm1, %v1371_v25, %v1369_v42  ;;  %6225 = vrsqrt.f32 %v9393_v62  ;;  %v9445_v7 = vpop.permute.xlu1 %3022  ;;  %v9451_v10 = vsel %vm1349_vm3, %v1350_v55, %v1348_v26  ;;  %v471_v25 = vld [vmem:[%s7271_s27 + $0x278] sm:$0xff]  ;;  %v476_v55 = vld [vmem:[%s7271_s27 + $0x2a0] sm:$0xff] }
 0x27c   : > { %v9422_v57 = vsel %vm1356_vm14, %v12517_v14, %v1355_v43  ;;  %v1385_v43 = vand.u32 2147483648, %v9188_v53  ;;  %v9443_v14 = vpop.eup %6209  ;;  %12521 = vst [vmem:[#allocation244_spill] sm:$0xff] %v9445_v7  ;;  %v9447_v51 = vpop.permute.xlu0 %2363  ;;  %v1383_v20 = vsel %vm1382_vm4, %v9188_v53, %v1381_v52  ;;  %vm1361_vm6 = vcmp.eq.f32.partialorder %v9290_v18, inf  ;;  %3608 = vperm.xlu0 %5917, %v9155_v35   ;;  %v478_v35 = vld [vmem:[%s7271_s27 + $0x2b0] sm:$0xff] }
 0x27d   : > { %v9435_v31 = vsel %vm1335_vm15, %v12519_v39, %v1334_v24  ;;  %12520 = vst [vmem:[#allocation243_spill] sm:$0xff] %v9443_v14  ;;  %12522 = vst [vmem:[#allocation245_spill] sm:$0xff] %v9447_v51  ;;  %6227 = vrsqrt.f32 %v9404_v41  ;;  %v6212_v39 = vpop.eup %6211  ;;  %vm1363_vm7 = vcmp.eq.f32.partialorder %v9290_v18, 0.0  ;;  %v9464_v49 = vmul.f32 2.0, %v9415_v29  ;;  %3583 = vperm.xlu1 %5918, %v9133_v30  }
 0x27e   : > { %6229 = vrsqrt.f32 %v9413_v46  ;;  %v6214_v42 = vpop.eup %6213  ;;  %vm1396_vm8 = vcmp.eq.f32.partialorder %v9308_v6, inf  ;;  %vm1398_vm9 = vcmp.eq.f32.partialorder %v9308_v6, 0.0  ;;  %v9472_v50 = vmul.f32 2.0, %v9429_v4 }
 0x27f   : > { %6231 = vrsqrt.f32 %v9427_v22  ;;  %v9476_v52 = vsel %vm1384_vm5, %v1385_v43, %v1383_v20  ;;  %v1399_v26 = vand.u32 2147483648, %v9308_v6  ;;  %v9480_v24 = vmul.f32 2.0, %v9443_v14  ;;  %v9484_v29 = vpop.permute.xlu1 %3030 }
 0x280   : > { %6233 = vrcp.f32 %v471_v25  ;;  %v9482_v30 = vpop.eup %6215  ;;  %12524 = vst [vmem:[#allocation247_spill] sm:$0xff] %v9484_v29  ;;  %v9486_v34 = vpop.permute.xlu0 %2373  ;;  %v1360_v4 = vmul.f32 %v6212_v39, %v9290_v18  ;;  %vm1375_vm10 = vcmp.eq.f32.partialorder %v9337_v3, inf  ;;  %vm1377_vm11 = vcmp.eq.f32.partialorder %v9337_v3, 0.0  ;;  %v473_v25 = vld [vmem:[%s7271_s27 + $0x288] sm:$0xff]  ;;  %3618 = vperm.xlu0 %5917, %v9171_v47  }
 0x281   : > { %12523 = vst [vmem:[#allocation246_spill] sm:$0xff] %v9482_v30  ;;  %12525 = vst [vmem:[#allocation248_spill] sm:$0xff] %v9486_v34  ;;  %6235 = vrcp.f32 %v476_v55  ;;  %v6218_v53 = vpop.eup %6217  ;;  %v1395_v43 = vmul.f32 %v6214_v42, %v9308_v6  ;;  %vm1410_vm12 = vcmp.eq.f32.partialorder %v9362_v9, inf  ;;  %3593 = vperm.xlu1 %5918, %v9161_v2   ;;  %vm1412_vm13 = vcmp.eq.f32.partialorder %v9362_v9, 0.0 }
 0x282   : > { %6237 = vrsqrt.f32 %v9464_v49  ;;  %v9497_v14 = vpop.eup %6219  ;;  %vm1389_vm14 = vcmp.eq.f32.partialorder %v9381_v23, inf  ;;  %vm1391_vm15 = vcmp.eq.f32.partialorder %v9381_v23, 0.0  ;;  %vm1424_vm0 = vcmp.eq.f32.partialorder %v9393_v62, inf }
 0x283   : > { %12526 = vst [vmem:[#allocation249_spill] sm:$0xff] %v9497_v14  ;;  %6239 = vrsqrt.f32 %v9472_v50  ;;  %v6222_v55 = vpop.eup %6221  ;;  %v9510_v2 = vmul.f32 2.0, %v9482_v30  ;;  %v9512_v39 = vpop.permute.xlu1 %3038  ;;  %v1362_v34 = vsel %vm1361_vm6, %v9290_v18, %v1360_v4  ;;  %v1374_v29 = vmul.f32 %v6218_v53, %v9337_v3  ;;  %v475_v4 = vld [vmem:[%s7271_s27 + $0x298] sm:$0xff] }
 0x284   : > { %6241 = vrsqrt.f32 %v9480_v24  ;;  %v6224_v20 = vpop.eup %6223  ;;  %12527 = vst [vmem:[#allocation250_spill] sm:$0xff] %v9512_v39  ;;  %v9514_v32 = vpop.permute.xlu0 %2383  ;;  %vm1426_vm1 = vcmp.eq.f32.partialorder %v9393_v62, 0.0  ;;  %v1397_v30 = vsel %vm1396_vm8, %v9308_v6, %v1395_v43  ;;  %v1409_v53 = vmul.f32 %v6222_v55, %v9362_v9  ;;  %3628 = vperm.xlu0 %5917, %v9252_v17  }
 0x285   : > { %12528 = vst [vmem:[#allocation251_spill] sm:$0xff] %v9514_v32  ;;  %6243 = vrcp.f32 %v473_v25  ;;  %v6226_v42 = vpop.eup %6225  ;;  %v9527_v32 = vmul.f32 2.0, %v9497_v14  ;;  %3603 = vperm.xlu1 %5918, %v9175_v27   ;;  %vm1403_vm2 = vcmp.eq.f32.partialorder %v9404_v41, inf  ;;  %vm1405_vm3 = vcmp.eq.f32.partialorder %v9404_v41, 0.0  ;;  %v480_v27 = vld [vmem:[%s7271_s27 + $0x2c0] sm:$0xff] }
 0x286   : > { %6245 = vrcp.f32 %v478_v35  ;;  %v12529_v25 = vand.u32 2147483648, %v9290_v18  ;;  %v1388_v35 = vmul.f32 %v6224_v20, %v9381_v23  ;;  %vm1438_vm4 = vcmp.eq.f32.partialorder %v9413_v46, inf  ;;  %v477_v20 = vld [vmem:[%s7271_s27 + $0x2a8] sm:$0xff] }
 0x287   : > { %v6228_v51 = vpop.eup %6227  ;;  %6247 = vrsqrt.f32 %v9510_v2  ;;  %v9545_v14 = vpop.permute.xlu1 %3046  ;;  %v9551_v47 = vsel %vm1398_vm9, %v1399_v26, %v1397_v30  ;;  %v1423_v18 = vmul.f32 %v6226_v42, %v9393_v62  ;;  %vm1440_vm5 = vcmp.eq.f32.partialorder %v9413_v46, 0.0 }
 0x288   : > { %v6230_v43 = vpop.eup %6229  ;;  %v9539_v39 = vsel %vm1363_vm7, %v12529_v25, %v1362_v34  ;;  %12530 = vst [vmem:[#allocation252_spill] sm:$0xff] %v9545_v14  ;;  %v9547_v7 = vpop.permute.xlu0 %2393  ;;  %v1376_v34 = vsel %vm1375_vm10, %v9337_v3, %v1374_v29  ;;  %6249 = vrcp.f32 %v475_v4  ;;  %v1402_v14 = vmul.f32 %v6228_v51, %v9404_v41  ;;  %v482_v4 = vld [vmem:[%s7271_s27 + $0x2d0] sm:$0xff]  ;;  %3638 = vperm.xlu0 %5917, %v9284_v33  }
 0x289   : > { %v6232_v55 = vpop.eup %6231  ;;  %12531 = vst [vmem:[#allocation253_spill] sm:$0xff] %v9547_v7  ;;  %vm1417_vm6 = vcmp.eq.f32.partialorder %v9427_v22, inf  ;;  %6251 = vrsqrt.f32 %v9527_v32  ;;  %3613 = vperm.xlu1 %5918, %v9272_v59   ;;  %v1411_v26 = vsel %vm1410_vm12, %v9362_v9, %v1409_v53  ;;  %vm1419_vm7 = vcmp.eq.f32.partialorder %v9427_v22, 0.0 }
 0x28a   : > { %v9558_v25 = vpop.eup %6233  ;;  %6253 = vrcp.f32 %v480_v27  ;;  %v12534_v30 = vand.u32 2147483648, %v9337_v3  ;;  %v1390_v59 = vsel %vm1389_vm14, %v9381_v23, %v1388_v35  ;;  %vm1452_vm8 = vcmp.eq.f32.partialorder %v9464_v49, inf  ;;  %v479_v35 = vld [vmem:[%s7271_s27 + $0x2b8] sm:$0xff] }
 0x28b   : > { %12532 = vst [vmem:[#allocation254_spill] sm:$0xff] %v9558_v25  ;;  %v9566_v29 = vpop.eup %6235  ;;  %6255 = vrcp.f32 %v477_v20  ;;  %v9585_v6 = vpop.permute.xlu1 %3054  ;;  %v1425_v27 = vsel %vm1424_vm0, %v9393_v62, %v1423_v18  ;;  %v1437_v3 = vmul.f32 %v6230_v43, %v9413_v46  ;;  %vm1454_vm9 = vcmp.eq.f32.partialorder %v9464_v49, 0.0 }
 0x28c   : > { %12533 = vst [vmem:[#allocation255_spill] sm:$0xff] %v9566_v29  ;;  %v6238_v17 = vpop.eup %6237  ;;  %v9578_v42 = vsel %vm1377_vm11, %v12534_v30, %v1376_v34  ;;  %12535 = vst [vmem:[#allocation256_spill] sm:$0xff] %v9585_v6  ;;  %v9587_v51 = vpop.permute.xlu0 %2403  ;;  %v9595_v34 = vmul.f32 2.0, %v9558_v25  ;;  %v12537_v20 = vand.u32 2147483648, %v9362_v9  ;;  %v1404_v43 = vsel %vm1403_vm2, %v9404_v41, %v1402_v14  ;;  %3648 = vperm.xlu0 %5917, %v9315_v28  }
 0x28d   : > { %v6240_v53 = vpop.eup %6239  ;;  %12536 = vst [vmem:[#allocation257_spill] sm:$0xff] %v9587_v51  ;;  %v1416_v18 = vmul.f32 %v6232_v55, %v9427_v22  ;;  %v9610_v25 = vmul.f32 2.0, %v9566_v29  ;;  %3623 = vperm.xlu1 %5918, %v9303_v40   ;;  %v12539_v33 = vand.u32 2147483648, %v9381_v23  ;;  %vm1431_vm10 = vcmp.eq.f32.partialorder %v9472_v50, inf  ;;  %v484_v23 = vld [vmem:[%s7271_s27 + $0x2e0] sm:$0xff] }
 0x28e   : > { %v6242_v30 = vpop.eup %6241  ;;  %v9603_v51 = vsel %vm1412_vm13, %v12537_v20, %v1411_v26  ;;  %v1455_v26 = vand.u32 2147483648, %v9464_v49  ;;  %6257 = vrcp.f32 %v482_v4  ;;  %v12541_v55 = vand.u32 2147483648, %v9393_v62 }
 0x28f   : > { %v9612_v6 = vpop.eup %6243  ;;  %v9619_v9 = vsel %vm1391_vm15, %v12539_v33, %v1390_v59  ;;  %v1451_v40 = vmul.f32 %v6238_v17, %v9464_v49  ;;  %vm1433_vm11 = vcmp.eq.f32.partialorder %v9472_v50, 0.0  ;;  %6259 = vrcp.f32 %v479_v35  ;;  %v9634_v59 = vpop.permute.xlu1 %3062 }
 0x290   : > { %12538 = vst [vmem:[#allocation258_spill] sm:$0xff] %v9612_v6  ;;  %v9623_v14 = vpop.eup %6245  ;;  %v9629_v20 = vsel %vm1426_vm1, %v12541_v55, %v1425_v27  ;;  %12542 = vst [vmem:[#allocation260_spill] sm:$0xff] %v9634_v59  ;;  %v9636_v33 = vpop.permute.xlu0 %2413  ;;  %v12544_v4 = vand.u32 2147483648, %v9404_v41  ;;  %v1439_v62 = vsel %vm1438_vm4, %v9413_v46, %v1437_v3  ;;  %v1434_v17 = vand.u32 2147483648, %v9472_v50  ;;  %v481_v27 = vld [vmem:[%s7271_s27 + $0x2c8] sm:$0xff]  ;;  %3658 = vperm.xlu0 %5917, %v9372_v13  }
 0x291   : > { %12540 = vst [vmem:[#allocation259_spill] sm:$0xff] %v9623_v14  ;;  %12543 = vst [vmem:[#allocation261_spill] sm:$0xff] %v9636_v33  ;;  %6261 = vrsqrt.f32 %v9595_v34  ;;  %v6248_v35 = vpop.eup %6247  ;;  %v1418_v55 = vsel %vm1417_vm6, %v9427_v22, %v1416_v18  ;;  %v1430_v41 = vmul.f32 %v6240_v53, %v9472_v50  ;;  %3633 = vperm.xlu1 %5918, %v9350_v44   ;;  %vm1466_vm12 = vcmp.eq.f32.partialorder %v9480_v24, inf }
 0x292   : > { %v9642_v29 = vsel %vm1405_vm3, %v12544_v4, %v1404_v43  ;;  %6263 = vrsqrt.f32 %v9610_v25  ;;  %v9657_v43 = vmul.f32 2.0, %v9612_v6  ;;  %v9659_v3 = vpop.eup %6249  ;;  %v1465_v4 = vmul.f32 %v6242_v30, %v9480_v24 }
 0x293   : > { %12545 = vst [vmem:[#allocation262_spill] sm:$0xff] %v9659_v3  ;;  %v9665_v28 = vmul.f32 2.0, %v9623_v14  ;;  %6265 = vrcp.f32 %v484_v23  ;;  %v6252_v18 = vpop.eup %6251  ;;  %v1453_v53 = vsel %vm1452_vm8, %v9464_v49, %v1451_v40  ;;  %vm1468_vm13 = vcmp.eq.f32.partialorder %v9480_v24, 0.0  ;;  %v9674_v30 = vpop.permute.xlu1 %3070  ;;  %v483_v49 = vld [vmem:[%s7271_s27 + $0x2d8] sm:$0xff] }
 0x294   : > { %v1469_v6 = vand.u32 2147483648, %v9480_v24  ;;  %6267 = vrcp.f32 %v481_v27  ;;  %v9672_v44 = vpop.eup %6253  ;;  %12547 = vst [vmem:[#allocation264_spill] sm:$0xff] %v9674_v30  ;;  %v9676_v33 = vpop.permute.xlu0 %2423  ;;  %v12549_v14 = vand.u32 2147483648, %v9413_v46  ;;  %v12550_v40 = vand.u32 2147483648, %v9427_v22  ;;  %3668 = vperm.xlu0 %5917, %v9422_v57  }
 0x295   : > { %12546 = vst [vmem:[#allocation263_spill] sm:$0xff] %v9672_v44  ;;  %12548 = vst [vmem:[#allocation265_spill] sm:$0xff] %v9676_v33  ;;  %vm1445_vm14 = vcmp.eq.f32.partialorder %v9510_v2, inf  ;;  %vm1447_vm15 = vcmp.eq.f32.partialorder %v9510_v2, 0.0  ;;  %v9692_v27 = vpop.eup %6255  ;;  %v1432_v46 = vsel %vm1431_vm10, %v9472_v50, %v1430_v41  ;;  %6269 = vrsqrt.f32 %v9657_v43  ;;  %3643 = vperm.xlu1 %5918, %v9378_v37  }
 0x296   : > { %v9682_v23 = vsel %vm1440_vm5, %v12549_v14, %v1439_v62  ;;  %v9688_v59 = vsel %vm1419_vm7, %v12550_v40, %v1418_v55  ;;  %12551 = vst [vmem:[#allocation266_spill] sm:$0xff] %v9692_v27  ;;  %v1444_v14 = vmul.f32 %v6248_v35, %v9510_v2  ;;  %v9701_v22 = vmul.f32 2.0, %v9659_v3  ;;  %v486_v62 = vld [vmem:[%s7271_s27 + $0x2f0] sm:$0xff] }
 0x297   : > { %vm4248_vm0 = vcmask 15360   ;;  %v9707_v55 = vsel %vm1454_vm9, %v1455_v26, %v1453_v53  ;;  %v1467_v13 = vsel %vm1466_vm12, %v9480_v24, %v1465_v4  ;;  %v1448_v41 = vand.u32 2147483648, %v9510_v2  ;;  %v9723_v53 = vpop.permute.xlu1 %3078 }
 0x298   : > { %6271 = vrsqrt.f32 %v9665_v28  ;;  %vm1480_vm1 = vcmp.eq.f32.partialorder %v9527_v32, inf  ;;  %vm1482_vm2 = vcmp.eq.f32.partialorder %v9527_v32, 0.0  ;;  %v1483_v35 = vand.u32 2147483648, %v9527_v32  ;;  %v9721_v26 = vpop.eup %6257  ;;  %12553 = vst [vmem:[#allocation268_spill] sm:$0xff] %v9723_v53  ;;  %v9725_v40 = vpop.permute.xlu0 %2433  ;;  %3678 = vperm.xlu0 %5917, %v9439_v45  }
 0x299   : > { %v9718_v37 = vmul.f32 2.0, %v9672_v44  ;;  %12552 = vst [vmem:[#allocation267_spill] sm:$0xff] %v9721_v26  ;;  %12554 = vst [vmem:[#allocation269_spill] sm:$0xff] %v9725_v40  ;;  %v9729_v4 = vsel %vm1433_vm11, %v1434_v17, %v1432_v46  ;;  %v1479_v3 = vmul.f32 %v6252_v18, %v9527_v32  ;;  %v9733_v33 = vmul.f32 2.0, %v9692_v27  ;;  %v9735_v30 = vpop.eup %6259  ;;  %3653 = vperm.xlu1 %5918, %v9435_v31   ;;  %v9762_v31 = vld [vmem:[%s11987_s2] ss:$0 sm:$0xff] }
 0x29a   : > { %6273 = vrcp.f32 %v486_v62  ;;  %12555 = vst [vmem:[#allocation270_spill] sm:$0xff] %v9735_v30  ;;  %v9740_v44 = vsel %vm1468_vm13, %v1469_v6, %v1467_v13  ;;  %v1446_v50 = vsel %vm1445_vm14, %v9510_v2, %v1444_v14  ;;  %vm1459_vm3 = vcmp.eq.f32.partialorder %v9595_v34, inf  ;;  %v12558_v18 = vld [vmem:[#allocation88_spill] sm:$0xff] }
 0x29b   : > { %6275 = vrsqrt.f32 %v9701_v22  ;;  %v6262_v17 = vpop.eup %6261  ;;  %vm1461_vm4 = vcmp.eq.f32.partialorder %v9595_v34, 0.0  ;;  %vm1494_vm5 = vcmp.eq.f32.partialorder %v9610_v25, inf  ;;  %vm1496_vm6 = vcmp.eq.f32.partialorder %v9610_v25, 0.0  ;;  %v3349_v27 = vpop.permute.xlu1 %3348 }
 0x29c   : > { %6277 = vrcp.f32 %v483_v49  ;;  %v6264_v57 = vpop.eup %6263  ;;  %v9755_v6 = vmul.f32 2.0, %v9721_v26  ;;  %v3354_v14 = vpop.permute.xlu0 %3353  ;;  %v9766_v62 = vsel %vm1447_vm15, %v1448_v41, %v1446_v50  ;;  %v1481_v13 = vsel %vm1480_vm1, %v9527_v32, %v1479_v3  ;;  %v12559_v41 = vld [vmem:[#allocation135_spill] sm:$0xff]  ;;  %3688 = vperm.xlu0 %5917, %v9476_v52  }
 0x29d   : > { %6279 = vrsqrt.f32 %v9718_v37  ;;  %v9757_v46 = vpop.eup %6265  ;;  %v9773_v49 = vmul.f32 2.0, %v9735_v30  ;;  %v3987_v26 = vmul.f32 %v3354_v14, %v12558_v18  ;;  %v1458_v2 = vmul.f32 %v6262_v17, %v9595_v34  ;;  %3663 = vperm.xlu1 %5918, %v9451_v10   ;;  %v488_v17 = vld [vmem:[%s7271_s27 + $0x300] sm:$0xff] }
 0x29e   : > { %12556 = vst [vmem:[#allocation271_spill] sm:$0xff] %v9757_v46  ;;  %6281 = vrsqrt.f32 %v9733_v33  ;;  %v9775_v24 = vpop.eup %6267  ;;  %vm1473_vm7 = vcmp.eq.f32.partialorder %v9657_v43, inf  ;;  %v3986_v50 = vmul.f32 %v3349_v27, %v12559_v41  ;;  %v1493_v18 = vmul.f32 %v6264_v57, %v9610_v25  ;;  %v485_v27 = vld [vmem:[%s7271_s27 + $0x2e8] sm:$0xff] }
 0x29f   : > { %12557 = vst [vmem:[#allocation272_spill] sm:$0xff] %v9775_v24  ;;  %vm1508_vm8 = vcmp.eq.f32.partialorder %v9665_v28, inf  ;;  %v6270_v14 = vpop.eup %6269  ;;  %v4121_v3 = vadd.f32 %v9762_v31, %v3987_v26  ;;  %v9797_v30 = vsel %vm1482_vm2, %v1483_v35, %v1481_v13  ;;  %vm1475_vm9 = vcmp.eq.f32.partialorder %v9657_v43, 0.0  ;;  %v12560_v35 = vld [vmem:[#allocation141_spill] sm:$0xff] }
 0x2a0   : > { %vm1510_vm10 = vcmp.eq.f32.partialorder %v9665_v28, 0.0  ;;  %6283 = vrsqrt.f32 %v9755_v6  ;;  %v9803_v10 = vmul.f32 2.0, %v9757_v46  ;;  %v4120_v41 = vadd.f32 %v9762_v31, %v3986_v50  ;;  %v3369_v45 = vpop.permute.xlu0 %3368  ;;  %v3359_v46 = vpop.permute.xlu1 %3358  ;;  %3698 = vperm.xlu0 %5917, %v9551_v47  }
 0x2a1   : > { %6285 = vrsqrt.f32 %v9773_v49  ;;  %v9810_v32 = vmul.f32 2.0, %v9775_v24  ;;  %4250 = vst.msk [vmem:[%s9786_s9 + $0x8] sm:$0xff] %vm4248_vm0, %v4121_v3  ;;  %v3990_v13 = vmul.f32 %v3369_v45, %v12560_v35  ;;  %v1460_v50 = vsel %vm1459_vm3, %v9595_v34, %v1458_v2  ;;  %v12562_v3 = vld [vmem:[#allocation142_spill] sm:$0xff]  ;;  %3673 = vperm.xlu1 %5918, %v9539_v39   ;;  %v490_v2 = vld [vmem:[%s7271_s27 + $0x310] sm:$0xff] }
 0x2a2   : > { %v6272_v57 = vpop.eup %6271  ;;  %vm1487_vm11 = vcmp.eq.f32.partialorder %v9701_v22, inf  ;;  %vm1522_vm12 = vcmp.eq.f32.partialorder %v9718_v37, inf  ;;  %6287 = vrcp.f32 %v488_v17  ;;  %4249 = vst.msk [vmem:[%s9786_s9] sm:$0xff] %vm4248_vm0, %v4120_v41  ;;  %v3988_v45 = vmul.f32 %v3359_v46, %v12562_v3  ;;  %v487_v46 = vld [vmem:[%s7271_s27 + $0x2f8] sm:$0xff] }
 0x2a3   : > { %v1495_v52 = vsel %vm1494_vm5, %v9610_v25, %v1493_v18  ;;  %vm1501_vm13 = vcmp.eq.f32.partialorder %v9733_v33, inf  ;;  %6289 = vrcp.f32 %v485_v27  ;;  %v4124_v17 = vadd.f32 %v9762_v31, %v3990_v13  ;;  %v12564_v13 = vld [vmem:[#allocation143_spill] sm:$0xff] }
 0x2a4   : > { %v9822_v24 = vpop.eup %6273  ;;  %v1472_v26 = vmul.f32 %v6270_v14, %v9657_v43  ;;  %v1507_v41 = vmul.f32 %v6272_v57, %v9665_v28  ;;  %6291 = vrsqrt.f32 %v9803_v10  ;;  %v4122_v3 = vadd.f32 %v9762_v31, %v3988_v45  ;;  %v3379_v18 = vpop.permute.xlu0 %3378  ;;  %3708 = vperm.xlu0 %5917, %v9603_v51   ;;  %v12568_v14 = vld [vmem:[#allocation103_spill] sm:$0xff] }
 0x2a5   : > { %12561 = vst [vmem:[#allocation88_spill] sm:$0xff] %v9822_v24  ;;  %v6276_v35 = vpop.eup %6275  ;;  %v12563_v40 = vand.u32 2147483648, %v9595_v34  ;;  %vm1489_vm14 = vcmp.eq.f32.partialorder %v9701_v22, 0.0  ;;  %6293 = vrsqrt.f32 %v9810_v32  ;;  %4253 = vst.msk [vmem:[%s9786_s9 + $0x20] sm:$0xff] %vm4248_vm0, %v4124_v17  ;;  %v3992_v53 = vmul.f32 %v3379_v18, %v12564_v13  ;;  %v3364_v45 = vpop.permute.xlu1 %3363  ;;  %v12566_v17 = vld [vmem:[#allocation102_spill] sm:$0xff]  ;;  %3683 = vperm.xlu1 %5918, %v9578_v42  }
 0x2a6   : > { %v9838_v39 = vpop.eup %6277  ;;  %v12565_v7 = vand.u32 2147483648, %v9610_v25  ;;  %vm1524_vm15 = vcmp.eq.f32.partialorder %v9718_v37, 0.0  ;;  %vm1503_vm1 = vcmp.eq.f32.partialorder %v9733_v33, 0.0  ;;  %6295 = vrcp.f32 %v490_v2  ;;  %4251 = vst.msk [vmem:[%s9786_s9 + $0x10] sm:$0xff] %vm4248_vm0, %v4122_v3  ;;  %v492_v42 = vld [vmem:[%s7271_s27 + $0x320] sm:$0xff] }
 0x2a7   : > { %v9845_v27 = vsel %vm1461_vm4, %v12563_v40, %v1460_v50  ;;  %v6280_v57 = vpop.eup %6279  ;;  %v9863_v40 = vmul.f32 2.0, %v9822_v24  ;;  %v3989_v47 = vmul.f32 %v3364_v45, %v12566_v17  ;;  %vm1536_vm2 = vcmp.eq.f32.partialorder %v9755_v6, inf  ;;  %v12567_v45 = vld [vmem:[#allocation147_spill] sm:$0xff] }
 0x2a8   : > { %v9858_v34 = vsel %vm1496_vm6, %v12565_v7, %v1495_v52  ;;  %v6282_v50 = vpop.eup %6281  ;;  %6297 = vrcp.f32 %v487_v46  ;;  %v4126_v25 = vadd.f32 %v9762_v31, %v3992_v53  ;;  %v1474_v52 = vsel %vm1473_vm7, %v9657_v43, %v1472_v26  ;;  %v3389_v13 = vpop.permute.xlu0 %3388  ;;  %3718 = vperm.xlu0 %5917, %v9629_v20   ;;  %v491_v20 = vld [vmem:[%s7271_s27 + $0x318] sm:$0xff] }
 0x2a9   : > { %v1509_v2 = vsel %vm1508_vm8, %v9665_v28, %v1507_v41  ;;  %v9879_v3 = vmul.f32 2.0, %v9838_v39  ;;  %v4123_v18 = vadd.f32 %v9762_v31, %v3989_v47  ;;  %v1486_v46 = vmul.f32 %v6276_v35, %v9701_v22  ;;  %v3374_v17 = vpop.permute.xlu1 %3373  ;;  %v489_v35 = vld [vmem:[%s7271_s27 + $0x308] sm:$0xff]  ;;  %3693 = vperm.xlu1 %5918, %v9619_v9  }
 0x2aa   : > { %v1521_v53 = vmul.f32 %v6280_v57, %v9718_v37  ;;  %vm1515_vm3 = vcmp.eq.f32.partialorder %v9773_v49, inf  ;;  %v6284_v26 = vpop.eup %6283  ;;  %4255 = vst.msk [vmem:[%s9786_s9 + $0x30] sm:$0xff] %vm4248_vm0, %v4126_v25  ;;  %v3994_v41 = vmul.f32 %v3389_v13, %v12567_v45  ;;  %v1500_v7 = vmul.f32 %v6282_v50, %v9733_v33 }
 0x2ab   : > { %vm1538_vm4 = vcmp.eq.f32.partialorder %v9755_v6, 0.0  ;;  %6299 = vrsqrt.f32 %v9863_v40  ;;  %v6286_v57 = vpop.eup %6285  ;;  %4252 = vst.msk [vmem:[%s9786_s9 + $0x18] sm:$0xff] %vm4248_vm0, %v4123_v18  ;;  %v3991_v25 = vmul.f32 %v3374_v17, %v12568_v14  ;;  %v12569_v13 = vand.u32 2147483648, %v9657_v43  ;;  %v494_v14 = vld [vmem:[%s7271_s27 + $0x330] sm:$0xff] }
 0x2ac   : > { %v12570_v50 = vand.u32 2147483648, %v9665_v28  ;;  %vm1517_vm5 = vcmp.eq.f32.partialorder %v9773_v49, 0.0  ;;  %6301 = vrcp.f32 %v492_v42  ;;  %v9912_v18 = vpop.eup %6287  ;;  %v4128_v9 = vadd.f32 %v9762_v31, %v3994_v41  ;;  %3728 = vperm.xlu0 %5917, %v9682_v23  }
 0x2ad   : > { %v9903_v51 = vsel %vm1475_vm9, %v12569_v13, %v1474_v52  ;;  %12571 = vst [vmem:[#allocation135_spill] sm:$0xff] %v9912_v18  ;;  %vm1550_vm6 = vcmp.eq.f32.partialorder %v9803_v10, inf  ;;  %6303 = vrsqrt.f32 %v9879_v3  ;;  %v9919_v52 = vpop.eup %6289  ;;  %v4125_v28 = vadd.f32 %v9762_v31, %v3991_v25  ;;  %v12572_v13 = vld [vmem:[#allocation148_spill] sm:$0xff]  ;;  %v3384_v43 = vpop.permute.xlu1 %3383  ;;  %3703 = vperm.xlu1 %5918, %v9642_v29  }
 0x2ae   : > { %v9909_v45 = vsel %vm1510_vm10, %v12570_v50, %v1509_v2  ;;  %v3399_v2 = vpop.permute.xlu0 %3398  ;;  %v1488_v42 = vsel %vm1487_vm11, %v9701_v22, %v1486_v46  ;;  %v1523_v41 = vsel %vm1522_vm12, %v9718_v37, %v1521_v53  ;;  %6305 = vrcp.f32 %v489_v35  ;;  %v6292_v17 = vpop.eup %6291  ;;  %4257 = vst.msk [vmem:[%s9786_s9 + $0x40] sm:$0xff] %vm4248_vm0, %v4128_v9  ;;  %v12573_v53 = vld [vmem:[#allocation104_spill] sm:$0xff] }
 0x2af   : > { %v3996_v50 = vmul.f32 %v3399_v2, %v12572_v13  ;;  %v1502_v25 = vsel %vm1501_vm13, %v9733_v33, %v1500_v7  ;;  %v1535_v46 = vmul.f32 %v6284_v26, %v9755_v6  ;;  %v1514_v47 = vmul.f32 %v6286_v57, %v9773_v49  ;;  %v6294_v24 = vpop.eup %6293  ;;  %4254 = vst.msk [vmem:[%s9786_s9 + $0x28] sm:$0xff] %vm4248_vm0, %v4125_v28 }
 0x2b0   : > { %v3993_v35 = vmul.f32 %v3384_v43, %v12573_v53  ;;  %vm1529_vm7 = vcmp.eq.f32.partialorder %v9810_v32, inf  ;;  %v9943_v9 = vmul.f32 2.0, %v9912_v18  ;;  %6307 = vrcp.f32 %v494_v14  ;;  %v9946_v7 = vpop.eup %6295  ;;  %3738 = vperm.xlu0 %5917, %v9707_v55  }
 0x2b1   : > { %12574 = vst [vmem:[#allocation141_spill] sm:$0xff] %v9946_v7  ;;  %v4130_v26 = vadd.f32 %v9762_v31, %v3996_v50  ;;  %v12575_v57 = vand.u32 2147483648, %v9701_v22  ;;  %vm1552_vm8 = vcmp.eq.f32.partialorder %v9803_v10, 0.0  ;;  %vm1531_vm9 = vcmp.eq.f32.partialorder %v9810_v32, 0.0  ;;  %v3394_v29 = vpop.permute.xlu1 %3393  ;;  %3713 = vperm.xlu1 %5918, %v9688_v59  }
 0x2b2   : > { %v9959_v43 = vmul.f32 2.0, %v9919_v52  ;;  %v9961_v14 = vpop.eup %6297  ;;  %v4127_v2 = vadd.f32 %v9762_v31, %v3993_v35  ;;  %v3409_v13 = vpop.permute.xlu0 %3408  ;;  %v12576_v22 = vand.u32 2147483648, %v9718_v37  ;;  %v12577_v50 = vand.u32 2147483648, %v9733_v33 }
 0x2b3   : > { %v9953_v28 = vsel %vm1489_vm14, %v12575_v57, %v1488_v42  ;;  %vm1564_vm10 = vcmp.eq.f32.partialorder %v9863_v40, inf  ;;  %4259 = vst.msk [vmem:[%s9786_s9 + $0x50] sm:$0xff] %vm4248_vm0, %v4130_v26  ;;  %v12578_v57 = vld [vmem:[#allocation97_spill] sm:$0xff]  ;;  %v1537_v37 = vsel %vm1536_vm2, %v9755_v6, %v1535_v46  ;;  %v1516_v33 = vsel %vm1515_vm3, %v9773_v49, %v1514_v47  ;;  %v493_v46 = vld [vmem:[%s7271_s27 + $0x328] sm:$0xff] }
 0x2b4   : > { %v9968_v42 = vsel %vm1524_vm15, %v12576_v22, %v1523_v41  ;;  %v9974_v53 = vsel %vm1503_vm1, %v12577_v50, %v1502_v25  ;;  %v3998_v35 = vmul.f32 %v3409_v13, %v12578_v57  ;;  %6309 = vrcp.f32 %v491_v20  ;;  %v496_v41 = vld [vmem:[%s7271_s27 + $0x340] sm:$0xff]  ;;  %4256 = vst.msk [vmem:[%s9786_s9 + $0x38] sm:$0xff] %vm4248_vm0, %v4127_v2  ;;  %v12579_v25 = vld [vmem:[#allocation105_spill] sm:$0xff]  ;;  %3748 = vperm.xlu0 %5917, %v9740_v44  }
 0x2b5   : > { %v3995_v22 = vmul.f32 %v3394_v29, %v12579_v25  ;;  %v1549_v26 = vmul.f32 %v6292_v17, %v9803_v10  ;;  %6311 = vrsqrt.f32 %v9943_v9  ;;  %v9995_v23 = vmul.f32 2.0, %v9946_v7  ;;  %v6300_v13 = vpop.eup %6299  ;;  %v3404_v7 = vpop.permute.xlu1 %3403  ;;  %3723 = vperm.xlu1 %5918, %v9729_v4  }
 0x2b6   : > { %v4132_v47 = vadd.f32 %v9762_v31, %v3998_v35  ;;  %v1528_v20 = vmul.f32 %v6294_v24, %v9810_v32  ;;  %6313 = vrsqrt.f32 %v9959_v43  ;;  %v10002_v29 = vmul.f32 2.0, %v9961_v14  ;;  %v10004_v59 = vpop.eup %6301  ;;  %v3419_v2 = vpop.permute.xlu0 %3418  ;;  %v12582_v35 = vld [vmem:[#allocation162_spill] sm:$0xff] }
 0x2b7   : > { %12580 = vst [vmem:[#allocation142_spill] sm:$0xff] %v10004_v59  ;;  %v4129_v17 = vadd.f32 %v9762_v31, %v3995_v22  ;;  %v12581_v50 = vand.u32 2147483648, %v9755_v6  ;;  %vm1566_vm11 = vcmp.eq.f32.partialorder %v9863_v40, 0.0  ;;  %6315 = vrcp.f32 %v496_v41  ;;  %v6304_v24 = vpop.eup %6303  ;;  %v12584_v41 = vld [vmem:[#allocation106_spill] sm:$0xff] }
 0x2b8   : > { %4261 = vst.msk [vmem:[%s9786_s9 + $0x60] sm:$0xff] %vm4248_vm0, %v4132_v47  ;;  %v4000_v25 = vmul.f32 %v3419_v2, %v12582_v35  ;;  %v12583_v22 = vand.u32 2147483648, %v9773_v49  ;;  %v1567_v6 = vand.u32 2147483648, %v9863_v40  ;;  %6317 = vrcp.f32 %v493_v46  ;;  %3758 = vperm.xlu0 %5917, %v9797_v30   ;;  %v497_v30 = vld [vmem:[%s7271_s27 + $0x348] sm:$0xff] }
 0x2b9   : > { %v10011_v57 = vsel %vm1538_vm4, %v12581_v50, %v1537_v37  ;;  %v498_v37 = vld [vmem:[%s7271_s27 + $0x350] sm:$0xff]  ;;  %v10026_v50 = vpop.eup %6305  ;;  %4258 = vst.msk [vmem:[%s9786_s9 + $0x48] sm:$0xff] %vm4248_vm0, %v4129_v17  ;;  %v3997_v47 = vmul.f32 %v3404_v7, %v12584_v41  ;;  %v1551_v55 = vsel %vm1550_vm6, %v9803_v10, %v1549_v26  ;;  %v1563_v49 = vmul.f32 %v6300_v13, %v9863_v40  ;;  %v12586_v13 = vld [vmem:[#allocation166_spill] sm:$0xff]  ;;  %v3414_v2 = vpop.permute.xlu1 %3413  ;;  %v12587_v41 = vld [vmem:[#allocation107_spill] sm:$0xff] }
 0x2ba   : > { %v10022_v18 = vsel %vm1517_vm5, %v12583_v22, %v1516_v33  ;;  %6319 = vrsqrt.f32 %v9995_v23  ;;  %v4134_v33 = vadd.f32 %v9762_v31, %v4000_v25  ;;  %v1530_v46 = vsel %vm1529_vm7, %v9810_v32, %v1528_v20  ;;  %v10045_v4 = vpop.eup %6307  ;;  %v3429_v17 = vpop.permute.xlu0 %3428  ;;  %3733 = vperm.xlu1 %5918, %v9766_v62  }
 0x2bb   : > { %6321 = vrsqrt.f32 %v10002_v29  ;;  %v10043_v7 = vmul.f32 2.0, %v10004_v59  ;;  %12585 = vst [vmem:[#allocation143_spill] sm:$0xff] %v10045_v4  ;;  %v4131_v26 = vadd.f32 %v9762_v31, %v3997_v47  ;;  %vm1543_vm12 = vcmp.eq.f32.partialorder %v9879_v3, inf }
 0x2bc   : > { %vm1545_vm13 = vcmp.eq.f32.partialorder %v9879_v3, 0.0  ;;  %6323 = vrcp.f32 %v498_v37  ;;  %4263 = vst.msk [vmem:[%s9786_s9 + $0x70] sm:$0xff] %vm4248_vm0, %v4134_v33  ;;  %v4002_v20 = vmul.f32 %v3429_v17, %v12586_v13  ;;  %v1542_v35 = vmul.f32 %v6304_v24, %v9879_v3  ;;  %3768 = vperm.xlu0 %5917, %v9858_v34  }
 0x2bd   : > { %v1546_v25 = vand.u32 2147483648, %v9879_v3  ;;  %v10057_v22 = vmul.f32 2.0, %v10026_v50  ;;  %4260 = vst.msk [vmem:[%s9786_s9 + $0x58] sm:$0xff] %vm4248_vm0, %v4131_v26  ;;  %v3999_v47 = vmul.f32 %v3414_v2, %v12587_v41  ;;  %v12588_v37 = vand.u32 2147483648, %v9803_v10  ;;  %v3424_v41 = vpop.permute.xlu1 %3423 }
 0x2be   : > { %v12589_v44 = vand.u32 2147483648, %v9810_v32  ;;  %v1565_v26 = vsel %vm1564_vm10, %v9863_v40, %v1563_v49  ;;  %v10078_v17 = vpop.eup %6309  ;;  %v4136_v62 = vadd.f32 %v9762_v31, %v4002_v20  ;;  %vm1578_vm14 = vcmp.eq.f32.partialorder %v9943_v9, inf  ;;  %v12590_v20 = vld [vmem:[#allocation169_spill] sm:$0xff]  ;;  %3743 = vperm.xlu1 %5918, %v9845_v27   ;;  %v500_v27 = vld [vmem:[%s7271_s27 + $0x360] sm:$0xff] }
 0x2bf   : > { %v10067_v33 = vsel %vm1552_vm8, %v12588_v37, %v1551_v55  ;;  %6325 = vrsqrt.f32 %v10043_v7  ;;  %v10084_v10 = vmul.f32 2.0, %v10045_v4  ;;  %v6312_v55 = vpop.eup %6311  ;;  %v4133_v32 = vadd.f32 %v9762_v31, %v3999_v47 }
 0x2c0   : > { %v10073_v24 = vsel %vm1531_vm9, %v12589_v44, %v1530_v46  ;;  %v3439_v46 = vpop.permute.xlu0 %3438  ;;  %vm1580_vm15 = vcmp.eq.f32.partialorder %v9943_v9, 0.0  ;;  %vm1557_vm1 = vcmp.eq.f32.partialorder %v9959_v43, inf  ;;  %v6314_v13 = vpop.eup %6313  ;;  %4265 = vst.msk [vmem:[%s9786_s9 + $0x80] sm:$0xff] %vm4248_vm0, %v4136_v62  ;;  %v10096_v37 = vsel %vm1566_vm11, %v1567_v6, %v1565_v26  ;;  %v12592_v62 = vld [vmem:[#allocation108_spill] sm:$0xff]  ;;  %v495_v6 = vld [vmem:[%s7271_s27 + $0x338] sm:$0xff]  ;;  %3778 = vperm.xlu0 %5917, %v9909_v45  }
 0x2c1   : > { %v4004_v2 = vmul.f32 %v3439_v46, %v12590_v20  ;;  %v1544_v47 = vsel %vm1543_vm12, %v9879_v3, %v1542_v35  ;;  %6327 = vrsqrt.f32 %v10057_v22  ;;  %v10102_v44 = vpop.eup %6315  ;;  %4262 = vst.msk [vmem:[%s9786_s9 + $0x68] sm:$0xff] %vm4248_vm0, %v4133_v32  ;;  %v4001_v46 = vmul.f32 %v3424_v41, %v12592_v62  ;;  %v3434_v59 = vpop.permute.xlu1 %3433  ;;  %v12597_v3 = vld [vmem:[#allocation111_spill] sm:$0xff] }
 0x2c2   : > { %12591 = vst [vmem:[#allocation102_spill] sm:$0xff] %v10102_v44  ;;  %vm1559_vm2 = vcmp.eq.f32.partialorder %v9959_v43, 0.0  ;;  %vm1592_vm3 = vcmp.eq.f32.partialorder %v9995_v23, inf  ;;  %v10113_v35 = vpop.eup %6317  ;;  %v1577_v32 = vmul.f32 %v6312_v55, %v9943_v9  ;;  %vm1571_vm4 = vcmp.eq.f32.partialorder %v10002_v29, inf  ;;  %v12595_v55 = vld [vmem:[#allocation110_spill] sm:$0xff]  ;;  %3753 = vperm.xlu1 %5918, %v9903_v51  }
 0x2c3   : > { %v4138_v26 = vadd.f32 %v9762_v31, %v4004_v2  ;;  %6329 = vrsqrt.f32 %v10084_v10  ;;  %v4135_v41 = vadd.f32 %v9762_v31, %v4001_v46  ;;  %v10123_v40 = vsel %vm1545_vm13, %v1546_v25, %v1544_v47  ;;  %v12593_v46 = vld [vmem:[#allocation170_spill] sm:$0xff] }
 0x2c4   : > { %v6320_v20 = vpop.eup %6319  ;;  %v3449_v62 = vpop.permute.xlu0 %3448  ;;  %vm1594_vm5 = vcmp.eq.f32.partialorder %v9995_v23, 0.0  ;;  %vm1573_vm6 = vcmp.eq.f32.partialorder %v10002_v29, 0.0  ;;  %v10129_v2 = vmul.f32 2.0, %v10078_v17  ;;  %vm1606_vm7 = vcmp.eq.f32.partialorder %v10043_v7, inf  ;;  %3788 = vperm.xlu0 %5917, %v9968_v42  }
 0x2c5   : > { %v6322_v49 = vpop.eup %6321  ;;  %4267 = vst.msk [vmem:[%s9786_s9 + $0x90] sm:$0xff] %vm4248_vm0, %v4138_v26  ;;  %v4006_v4 = vmul.f32 %v3449_v62, %v12593_v46  ;;  %v10139_v25 = vmul.f32 2.0, %v10102_v44  ;;  %6331 = vrcp.f32 %v495_v6  ;;  %4264 = vst.msk [vmem:[%s9786_s9 + $0x78] sm:$0xff] %vm4248_vm0, %v4135_v41  ;;  %v4003_v26 = vmul.f32 %v3434_v59, %v12595_v55 }
 0x2c6   : > { %v10141_v47 = vpop.eup %6323  ;;  %v1556_v34 = vmul.f32 %v6314_v13, %v9959_v43  ;;  %v10149_v62 = vmul.f32 2.0, %v10113_v35  ;;  %6333 = vrcp.f32 %v500_v27  ;;  %v1579_v6 = vsel %vm1578_vm14, %v9943_v9, %v1577_v32  ;;  %v12596_v32 = vld [vmem:[#allocation172_spill] sm:$0xff]  ;;  %3763 = vperm.xlu1 %5918, %v9953_v28  }
 0x2c7   : > { %12594 = vst [vmem:[#allocation147_spill] sm:$0xff] %v10141_v47  ;;  %v4140_v46 = vadd.f32 %v9762_v31, %v4006_v4  ;;  %v1591_v41 = vmul.f32 %v6320_v20, %v9995_v23  ;;  %6335 = vrcp.f32 %v497_v30  ;;  %v4137_v59 = vadd.f32 %v9762_v31, %v4003_v26  ;;  %v502_v4 = vld [vmem:[%s7271_s27 + $0x370] sm:$0xff]  ;;  %v3444_v30 = vpop.permute.xlu1 %3443  ;;  %v499_v26 = vld [vmem:[%s7271_s27 + $0x358] sm:$0xff] }
 0x2c8   : > { %v3459_v51 = vpop.permute.xlu0 %3458  ;;  %v1570_v13 = vmul.f32 %v6322_v49, %v10002_v29  ;;  %vm1608_vm8 = vcmp.eq.f32.partialorder %v10043_v7, 0.0  ;;  %vm1585_vm9 = vcmp.eq.f32.partialorder %v10057_v22, inf  ;;  %6337 = vrsqrt.f32 %v10129_v2  ;;  %3798 = vperm.xlu0 %5917, %v10011_v57  }
 0x2c9   : > { %v6326_v27 = vpop.eup %6325  ;;  %4269 = vst.msk [vmem:[%s9786_s9 + $0xa0] sm:$0xff] %vm4248_vm0, %v4140_v46  ;;  %v4008_v20 = vmul.f32 %v3459_v51, %v12596_v32  ;;  %6339 = vrsqrt.f32 %v10139_v25  ;;  %v10169_v49 = vmul.f32 2.0, %v10141_v47  ;;  %4266 = vst.msk [vmem:[%s9786_s9 + $0x88] sm:$0xff] %vm4248_vm0, %v4137_v59  ;;  %v4005_v44 = vmul.f32 %v3444_v30, %v12597_v3 }
 0x2ca   : > { %v12598_v46 = vand.u32 2147483648, %v9943_v9  ;;  %v1558_v51 = vsel %vm1557_vm1, %v9959_v43, %v1556_v34  ;;  %vm1587_vm10 = vcmp.eq.f32.partialorder %v10057_v22, 0.0  ;;  %6341 = vrsqrt.f32 %v10149_v62  ;;  %v504_v9 = vld [vmem:[%s7271_s27 + $0x380] sm:$0xff]  ;;  %3773 = vperm.xlu1 %5918, %v9974_v53  }
 0x2cb   : > { %v6328_v59 = vpop.eup %6327  ;;  %v4142_v3 = vadd.f32 %v9762_v31, %v4008_v20  ;;  %v1593_v28 = vsel %vm1592_vm3, %v9995_v23, %v1591_v41  ;;  %vm1620_vm11 = vcmp.eq.f32.partialorder %v10084_v10, inf  ;;  %6343 = vrcp.f32 %v502_v4  ;;  %v12599_v41 = vld [vmem:[#allocation175_spill] sm:$0xff]  ;;  %v3454_v55 = vpop.permute.xlu1 %3453 }
 0x2cc   : > { %v10180_v45 = vsel %vm1580_vm15, %v12598_v46, %v1579_v6  ;;  %v4139_v6 = vadd.f32 %v9762_v31, %v4005_v44  ;;  %v3469_v32 = vpop.permute.xlu0 %3468  ;;  %v1572_v34 = vsel %vm1571_vm4, %v10002_v29, %v1570_v13  ;;  %v1605_v30 = vmul.f32 %v6326_v27, %v10043_v7  ;;  %v12601_v13 = vld [vmem:[#allocation112_spill] sm:$0xff]  ;;  %3808 = vperm.xlu0 %5917, %v10067_v33  }
 0x2cd   : > { %6345 = vrcp.f32 %v499_v26  ;;  %v6330_v20 = vpop.eup %6329  ;;  %4271 = vst.msk [vmem:[%s9786_s9 + $0xb0] sm:$0xff] %vm4248_vm0, %v4142_v3  ;;  %v4010_v46 = vmul.f32 %v3469_v32, %v12599_v41  ;;  %v12600_v4 = vand.u32 2147483648, %v9959_v43  ;;  %vm1622_vm12 = vcmp.eq.f32.partialorder %v10084_v10, 0.0  ;;  %v501_v43 = vld [vmem:[%s7271_s27 + $0x368] sm:$0xff] }
 0x2ce   : > { %6347 = vrsqrt.f32 %v10169_v49  ;;  %4268 = vst.msk [vmem:[%s9786_s9 + $0x98] sm:$0xff] %vm4248_vm0, %v4139_v6  ;;  %v4007_v27 = vmul.f32 %v3454_v55, %v12601_v13  ;;  %v1584_v26 = vmul.f32 %v6328_v59, %v10057_v22  ;;  %v12602_v32 = vand.u32 2147483648, %v9995_v23  ;;  %v506_v59 = vld [vmem:[%s7271_s27 + $0x390] sm:$0xff]  ;;  %v12606_v13 = vld [vmem:[#allocation177_spill] sm:$0xff]  ;;  %3783 = vperm.xlu1 %5918, %v10022_v18  }
 0x2cf   : > { %v10206_v44 = vsel %vm1559_vm2, %v12600_v4, %v1558_v51  ;;  %6349 = vrcp.f32 %v504_v9  ;;  %v10217_v51 = vpop.eup %6331  ;;  %v4144_v3 = vadd.f32 %v9762_v31, %v4010_v46  ;;  %v12603_v53 = vand.u32 2147483648, %v10002_v29  ;;  %v12607_v29 = vld [vmem:[#allocation114_spill] sm:$0xff] }
 0x2d0   : > { %v10224_v6 = vsel %vm1594_vm5, %v12602_v32, %v1593_v28  ;;  %vm1599_vm13 = vcmp.eq.f32.partialorder %v10129_v2, inf  ;;  %v10234_v9 = vpop.eup %6333  ;;  %v4141_v41 = vadd.f32 %v9762_v31, %v4007_v27  ;;  %v3479_v46 = vpop.permute.xlu0 %3478  ;;  %v1607_v23 = vsel %vm1606_vm7, %v10043_v7, %v1605_v30  ;;  %3818 = vperm.xlu0 %5917, %v10096_v37  }
 0x2d1   : > { %v10230_v55 = vsel %vm1573_vm6, %v12603_v53, %v1572_v34  ;;  %12604 = vst [vmem:[#allocation103_spill] sm:$0xff] %v10234_v9  ;;  %v1619_v28 = vmul.f32 %v6330_v20, %v10084_v10  ;;  %v503_v34 = vld [vmem:[%s7271_s27 + $0x378] sm:$0xff]  ;;  %v10243_v4 = vpop.eup %6335  ;;  %4273 = vst.msk [vmem:[%s9786_s9 + $0xc0] sm:$0xff] %vm4248_vm0, %v4144_v3  ;;  %v4012_v32 = vmul.f32 %v3479_v46, %v12606_v13  ;;  %v3464_v53 = vpop.permute.xlu1 %3463  ;;  %vm1601_vm14 = vcmp.eq.f32.partialorder %v10129_v2, 0.0  ;;  %v508_v20 = vld [vmem:[%s7271_s27 + $0x3a0] sm:$0xff] }
 0x2d2   : > { %12605 = vst [vmem:[#allocation148_spill] sm:$0xff] %v10243_v4  ;;  %vm1634_vm15 = vcmp.eq.f32.partialorder %v10139_v25, inf  ;;  %6351 = vrcp.f32 %v501_v43  ;;  %v6338_v27 = vpop.eup %6337  ;;  %4270 = vst.msk [vmem:[%s9786_s9 + $0xa8] sm:$0xff] %vm4248_vm0, %v4141_v41  ;;  %v4009_v42 = vmul.f32 %v3464_v53, %v12607_v29  ;;  %v1586_v3 = vsel %vm1585_vm9, %v10057_v22, %v1584_v26  ;;  %3793 = vperm.xlu1 %5918, %v10073_v24   ;;  %v505_v24 = vld [vmem:[%s7271_s27 + $0x388] sm:$0xff] }
 0x2d3   : > { %vm1636_vm1 = vcmp.eq.f32.partialorder %v10139_v25, 0.0  ;;  %v10262_v57 = vmul.f32 2.0, %v10217_v51  ;;  %6353 = vrcp.f32 %v506_v59  ;;  %v6340_v43 = vpop.eup %6339  ;;  %v4146_v46 = vadd.f32 %v9762_v31, %v4012_v32 }
 0x2d4   : > { %v12608_v41 = vand.u32 2147483648, %v10043_v7  ;;  %v10272_v18 = vmul.f32 2.0, %v10234_v9  ;;  %6355 = vrcp.f32 %v503_v34  ;;  %v6342_v26 = vpop.eup %6341  ;;  %v4143_v13 = vadd.f32 %v9762_v31, %v4009_v42  ;;  %v3489_v53 = vpop.permute.xlu0 %3488  ;;  %3828 = vperm.xlu0 %5917, %v10180_v45  }
 0x2d5   : > { %v1621_v59 = vsel %vm1620_vm11, %v10084_v10, %v1619_v28  ;;  %v10279_v32 = vmul.f32 2.0, %v10243_v4  ;;  %6357 = vrcp.f32 %v508_v20  ;;  %v10281_v7 = vpop.eup %6343  ;;  %4275 = vst.msk [vmem:[%s9786_s9 + $0xd0] sm:$0xff] %vm4248_vm0, %v4146_v46  ;;  %v3474_v34 = vpop.permute.xlu1 %3473  ;;  %v12611_v42 = vand.u32 2147483648, %v10057_v22  ;;  %v12612_v46 = vld [vmem:[#allocation118_spill] sm:$0xff] }
 0x2d6   : > { %v10269_v29 = vsel %vm1608_vm8, %v12608_v41, %v1607_v23  ;;  %12609 = vst [vmem:[#allocation104_spill] sm:$0xff] %v10281_v7  ;;  %v12610_v23 = vld [vmem:[#allocation179_spill] sm:$0xff]  ;;  %v1598_v28 = vmul.f32 %v6338_v27, %v10129_v2  ;;  %vm1613_vm2 = vcmp.eq.f32.partialorder %v10149_v62, inf  ;;  %4272 = vst.msk [vmem:[%s9786_s9 + $0xb8] sm:$0xff] %vm4248_vm0, %v4143_v13  ;;  %v1633_v33 = vmul.f32 %v6340_v43, %v10139_v25 }
 0x2d7   : > { %v4014_v41 = vmul.f32 %v3489_v53, %v12610_v23  ;;  %v10291_v30 = vsel %vm1587_vm10, %v12611_v42, %v1586_v3  ;;  %v10295_v20 = vpop.eup %6345  ;;  %v4011_v53 = vmul.f32 %v3474_v34, %v12612_v46  ;;  %vm1615_vm3 = vcmp.eq.f32.partialorder %v10149_v62, 0.0  ;;  %3803 = vperm.xlu1 %5918, %v10123_v40  }
 0x2d8   : > { %6359 = vrsqrt.f32 %v10262_v57  ;;  %v6348_v22 = vpop.eup %6347  ;;  %v12613_v3 = vand.u32 2147483648, %v10084_v10  ;;  %v1616_v23 = vand.u32 2147483648, %v10149_v62  ;;  %v3499_v42 = vpop.permute.xlu0 %3498  ;;  %vm1648_vm4 = vcmp.eq.f32.partialorder %v10169_v49, inf  ;;  %v510_v10 = vld [vmem:[%s7271_s27 + $0x3b0] sm:$0xff]  ;;  %3838 = vperm.xlu0 %5917, %v10224_v6  }
 0x2d9   : > { %v4148_v27 = vadd.f32 %v9762_v31, %v4014_v41  ;;  %6361 = vrsqrt.f32 %v10272_v18  ;;  %v10314_v43 = vpop.eup %6349  ;;  %v4145_v34 = vadd.f32 %v9762_v31, %v4011_v53  ;;  %v10320_v41 = vmul.f32 2.0, %v10281_v7  ;;  %v12615_v7 = vld [vmem:[#allocation119_spill] sm:$0xff] }
 0x2da   : > { %v10309_v13 = vsel %vm1622_vm12, %v12613_v3, %v1621_v59  ;;  %6363 = vrsqrt.f32 %v10279_v32  ;;  %v12614_v59 = vld [vmem:[#allocation183_spill] sm:$0xff]  ;;  %v3484_v3 = vpop.permute.xlu1 %3483  ;;  %v1600_v53 = vsel %vm1599_vm13, %v10129_v2, %v1598_v28  ;;  %v1612_v9 = vmul.f32 %v6342_v26, %v10149_v62 }
 0x2db   : > { %4277 = vst.msk [vmem:[%s9786_s9 + $0xe0] sm:$0xff] %vm4248_vm0, %v4148_v27  ;;  %v4016_v46 = vmul.f32 %v3499_v42, %v12614_v59  ;;  %v10332_v47 = vmul.f32 2.0, %v10295_v20  ;;  %4274 = vst.msk [vmem:[%s9786_s9 + $0xc8] sm:$0xff] %vm4248_vm0, %v4145_v34  ;;  %v4013_v4 = vmul.f32 %v3484_v3, %v12615_v7  ;;  %v1635_v37 = vsel %vm1634_vm15, %v10139_v25, %v1633_v33 }
 0x2dc   : > { %vm1650_vm5 = vcmp.eq.f32.partialorder %v10169_v49, 0.0  ;;  %6365 = vrcp.f32 %v505_v24  ;;  %v10342_v28 = vpop.eup %6351  ;;  %v1647_v27 = vmul.f32 %v6348_v22, %v10169_v49  ;;  %v10347_v34 = vmul.f32 2.0, %v10314_v43  ;;  %v3509_v42 = vpop.permute.xlu0 %3508  ;;  %3813 = vperm.xlu1 %5918, %v10206_v44   ;;  %3848 = vperm.xlu0 %5917, %v10269_v29   ;;  %v514_v29 = vld [vmem:[%s7271_s27 + $0x3d0] sm:$0xff] }
 0x2dd   : > { %v4150_v26 = vadd.f32 %v9762_v31, %v4016_v46  ;;  %6367 = vrcp.f32 %v510_v10  ;;  %v10349_v40 = vpop.eup %6353  ;;  %v4147_v7 = vadd.f32 %v9762_v31, %v4013_v4  ;;  %v12617_v33 = vand.u32 2147483648, %v10129_v2  ;;  %v12618_v10 = vld [vmem:[#allocation185_spill] sm:$0xff] }
 0x2de   : > { %12616 = vst [vmem:[#allocation97_spill] sm:$0xff] %v10349_v40  ;;  %v1651_v59 = vand.u32 2147483648, %v10169_v49  ;;  %6369 = vrsqrt.f32 %v10320_v41  ;;  %v10360_v22 = vpop.eup %6355  ;;  %v4018_v46 = vmul.f32 %v3509_v42, %v12618_v10  ;;  %v3494_v3 = vpop.permute.xlu1 %3493  ;;  %v12619_v4 = vand.u32 2147483648, %v10139_v25 }
 0x2df   : > { %v10356_v24 = vsel %vm1601_vm14, %v12617_v33, %v1600_v53  ;;  %4279 = vst.msk [vmem:[%s9786_s9 + $0xf0] sm:$0xff] %vm4248_vm0, %v4150_v26  ;;  %v1614_v53 = vsel %vm1613_vm2, %v10149_v62, %v1612_v9  ;;  %6371 = vrsqrt.f32 %v10332_v47  ;;  %v10376_v33 = vpop.eup %6357  ;;  %4276 = vst.msk [vmem:[%s9786_s9 + $0xd8] sm:$0xff] %vm4248_vm0, %v4147_v7  ;;  %v12621_v26 = vld [vmem:[#allocation120_spill] sm:$0xff]  ;;  %vm1627_vm6 = vcmp.eq.f32.partialorder %v10262_v57, inf }
 0x2e0   : > { %v10370_v2 = vsel %vm1636_vm1, %v12619_v4, %v1635_v37  ;;  %12620 = vst [vmem:[#allocation105_spill] sm:$0xff] %v10376_v33  ;;  %v4015_v42 = vmul.f32 %v3494_v3, %v12621_v26  ;;  %v10385_v45 = vmul.f32 2.0, %v10342_v28  ;;  %v4152_v9 = vadd.f32 %v9762_v31, %v4018_v46  ;;  %v3519_v3 = vpop.permute.xlu0 %3518  ;;  %3823 = vperm.xlu1 %5918, %v10230_v55   ;;  %v507_v55 = vld [vmem:[%s7271_s27 + $0x398] sm:$0xff] }
 0x2e1   : > { %v1649_v37 = vsel %vm1648_vm4, %v10169_v49, %v1647_v27  ;;  %6373 = vrsqrt.f32 %v10347_v34  ;;  %v10393_v7 = vmul.f32 2.0, %v10349_v40  ;;  %v10398_v4 = vsel %vm1615_vm3, %v1616_v23, %v1614_v53  ;;  %3858 = vperm.xlu0 %5917, %v10309_v13   ;;  %v516_v13 = vld [vmem:[%s7271_s27 + $0x3e0] sm:$0xff] }
 0x2e2   : > { %v6360_v44 = vpop.eup %6359  ;;  %v4149_v10 = vadd.f32 %v9762_v31, %v4015_v42  ;;  %vm1629_vm7 = vcmp.eq.f32.partialorder %v10262_v57, 0.0  ;;  %vm1662_vm8 = vcmp.eq.f32.partialorder %v10272_v18, inf  ;;  %v10403_v27 = vmul.f32 2.0, %v10360_v22  ;;  %4281 = vst.msk [vmem:[%s9786_s9 + $0x100] sm:$0xff] %vm4248_vm0, %v4152_v9  ;;  %v3504_v25 = vpop.permute.xlu1 %3503  ;;  %v12622_v42 = vld [vmem:[#allocation121_spill] sm:$0xff] }
 0x2e3   : > { %v6362_v46 = vpop.eup %6361  ;;  %v4020_v26 = vmul.f32 %v3519_v3, %v8621_v8  ;;  %vm1664_vm9 = vcmp.eq.f32.partialorder %v10272_v18, 0.0  ;;  %vm1641_vm10 = vcmp.eq.f32.partialorder %v10279_v32, inf  ;;  %v10413_v23 = vmul.f32 2.0, %v10376_v33 }
 0x2e4   : > { %v6364_v53 = vpop.eup %6363  ;;  %4278 = vst.msk [vmem:[%s9786_s9 + $0xe8] sm:$0xff] %vm4248_vm0, %v4149_v10  ;;  %v4017_v9 = vmul.f32 %v3504_v25, %v12622_v42  ;;  %v10421_v8 = vsel %vm1650_vm5, %v1651_v59, %v1649_v37  ;;  %vm1643_vm11 = vcmp.eq.f32.partialorder %v10279_v32, 0.0  ;;  %6375 = vrsqrt.f32 %v10385_v45  ;;  %v3529_v25 = vpop.permute.xlu0 %3528  ;;  %3833 = vperm.xlu1 %5918, %v10291_v30   ;;  %v511_v30 = vld [vmem:[%s7271_s27 + $0x3b8] sm:$0xff] }
 0x2e5   : > { %v4154_v3 = vadd.f32 %v9762_v31, %v4020_v26  ;;  %v1626_v10 = vmul.f32 %v6360_v44, %v10262_v57  ;;  %vm1676_vm12 = vcmp.eq.f32.partialorder %v10320_v41, inf  ;;  %6377 = vrsqrt.f32 %v10393_v7  ;;  %v512_v26 = vld [vmem:[%s7271_s27 + $0x3c0] sm:$0xff]  ;;  %3868 = vperm.xlu0 %5917, %v10370_v2  }
 0x2e6   : > { %v10431_v49 = vpop.eup %6365  ;;  %v4151_v59 = vadd.f32 %v9762_v31, %v4017_v9  ;;  %v1661_v37 = vmul.f32 %v6362_v46, %v10272_v18  ;;  %6379 = vrsqrt.f32 %v10403_v27  ;;  %v4022_v6 = vmul.f32 %v3529_v25, %v8634_v21  ;;  %v3514_v62 = vpop.permute.xlu1 %3513  ;;  %v509_v46 = vld [vmem:[%s7271_s27 + $0x3a8] sm:$0xff] }
 0x2e7   : > { %v10438_v44 = vpop.eup %6367  ;;  %4283 = vst.msk [vmem:[%s9786_s9 + $0x110] sm:$0xff] %vm4248_vm0, %v4154_v3  ;;  %v1640_v9 = vmul.f32 %v6364_v53, %v10279_v32  ;;  %vm1678_vm13 = vcmp.eq.f32.partialorder %v10320_v41, 0.0  ;;  %vm1655_vm14 = vcmp.eq.f32.partialorder %v10332_v47, inf  ;;  %6381 = vrsqrt.f32 %v10413_v23  ;;  %v12624_v3 = vld [vmem:[#allocation122_spill] sm:$0xff] }
 0x2e8   : > { %12623 = vst [vmem:[#allocation162_spill] sm:$0xff] %v10438_v44  ;;  %v6370_v42 = vpop.eup %6369  ;;  %4280 = vst.msk [vmem:[%s9786_s9 + $0xf8] sm:$0xff] %vm4248_vm0, %v4151_v59  ;;  %v4019_v33 = vmul.f32 %v3514_v62, %v12624_v3  ;;  %vm1657_vm15 = vcmp.eq.f32.partialorder %v10332_v47, 0.0  ;;  %vm1690_vm1 = vcmp.eq.f32.partialorder %v10347_v34, inf  ;;  %6383 = vrcp.f32 %v507_v55  ;;  %v3539_v21 = vpop.permute.xlu0 %3538  ;;  %3843 = vperm.xlu1 %5918, %v10356_v24  }
 0x2e9   : > { %v6372_v53 = vpop.eup %6371  ;;  %v4156_v25 = vadd.f32 %v9762_v31, %v4022_v6  ;;  %v1628_v59 = vsel %vm1627_vm6, %v10262_v57, %v1626_v10  ;;  %6385 = vrcp.f32 %v512_v26  ;;  %v1663_v55 = vsel %vm1662_vm8, %v10272_v18, %v1661_v37  ;;  %v12625_v37 = vld [vmem:[#allocation123_spill] sm:$0xff]  ;;  %3878 = vperm.xlu0 %5917, %v10421_v8  }
 0x2ea   : > { %v4153_v3 = vadd.f32 %v9762_v31, %v4019_v33  ;;  %vm1692_vm2 = vcmp.eq.f32.partialorder %v10347_v34, 0.0  ;;  %v10469_v6 = vmul.f32 2.0, %v10431_v49  ;;  %6387 = vrcp.f32 %v509_v46  ;;  %v3524_v62 = vpop.permute.xlu1 %3523 }
 0x2eb   : > { %v6374_v10 = vpop.eup %6373  ;;  %4285 = vst.msk [vmem:[%s9786_s9 + $0x120] sm:$0xff] %vm4248_vm0, %v4156_v25  ;;  %v4024_v26 = vmul.f32 %v3539_v21, %v8638_v56  ;;  %v1642_v31 = vsel %vm1641_vm10, %v10279_v32, %v1640_v9  ;;  %v1675_v33 = vmul.f32 %v6370_v42, %v10320_v41  ;;  %6389 = vrcp.f32 %v514_v29  ;;  %v10491_v42 = vld [vmem:[%s11987_s2] ss:$0 sm:$0xff] }
 0x2ec   : > { %4282 = vst.msk [vmem:[%s9786_s9 + $0x108] sm:$0xff] %vm4248_vm0, %v4153_v3  ;;  %v4021_v40 = vmul.f32 %v3524_v62, %v12625_v37  ;;  %v1654_v46 = vmul.f32 %v6372_v53, %v10332_v47  ;;  %v10485_v56 = vmul.f32 2.0, %v10438_v44  ;;  %6391 = vrcp.f32 %v511_v30  ;;  %v3549_v62 = vpop.permute.xlu0 %3548  ;;  %3853 = vperm.xlu1 %5918, %v10398_v4   ;;  %v515_v4 = vld [vmem:[%s7271_s27 + $0x3d8] sm:$0xff] }
 0x2ed   : > { %v4158_v9 = vadd.f32 %v10491_v42, %v4024_v26  ;;  %v12626_v21 = vand.u32 2147483648, %v10262_v57  ;;  %vm1669_vm3 = vcmp.eq.f32.partialorder %v10385_v45, inf  ;;  %v12627_v30 = vand.u32 2147483648, %v10272_v18  ;;  %v513_v57 = vld [vmem:[%s7271_s27 + $0x3c8] sm:$0xff] }
 0x2ee   : > { %v6376_v53 = vpop.eup %6375  ;;  %v4155_v25 = vadd.f32 %v10491_v42, %v4021_v40  ;;  %v1689_v26 = vmul.f32 %v6374_v10, %v10347_v34  ;;  %6393 = vrsqrt.f32 %v10469_v6  ;;  %v4026_v40 = vmul.f32 %v3549_v62, %v8677_v16  ;;  %v3534_v37 = vpop.permute.xlu1 %3533  ;;  %v12629_v16 = vld [vmem:[#allocation125_spill] sm:$0xff] }
 0x2ef   : > { %v1631_v24 = vsel %vm1629_vm7, %v12626_v21, %v1628_v59  ;;  %v10505_v3 = vsel %vm1664_vm9, %v12627_v30, %v1663_v55  ;;  %v10510_v59 = vpop.eup %6377  ;;  %4287 = vst.msk [vmem:[%s9786_s9 + $0x130] sm:$0xff] %vm4248_vm0, %v4158_v9  ;;  %v12628_v21 = vand.u32 2147483648, %v10279_v32  ;;  %v1677_v55 = vsel %vm1676_vm12, %v10320_v41, %v1675_v33 }
 0x2f0   : > { %vm1671_vm4 = vcmp.eq.f32.partialorder %v10385_v45, 0.0  ;;  %6395 = vrcp.f32 %v516_v13  ;;  %v6380_v10 = vpop.eup %6379  ;;  %4284 = vst.msk [vmem:[%s9786_s9 + $0x118] sm:$0xff] %vm4248_vm0, %v4155_v25  ;;  %v4023_v9 = vmul.f32 %v3534_v37, %v12629_v16  ;;  %v1656_v32 = vsel %vm1655_vm14, %v10332_v47, %v1654_v46  ;;  %v3559_v30 = vpop.permute.xlu0 %3558  ;;  %v12632_v25 = vld [vmem:[#allocation157_spill] sm:$0xff]  ;;  %3863 = vperm.xlu1 %5918, %v1631_v24   ;;  %3888 = vperm.xlu0 %5917, %v10505_v3  }
 0x2f1   : > { %v10520_v18 = vsel %vm1643_vm11, %v12628_v21, %v1642_v31  ;;  %vm1704_vm5 = vcmp.eq.f32.partialorder %v10393_v7, inf  ;;  %6397 = vrsqrt.f32 %v10485_v56  ;;  %v518_v31 = vld [vmem:[%s7271_s27 + $0x3f0] sm:$0xff]  ;;  %v6382_v33 = vpop.eup %6381  ;;  %v4160_v13 = vadd.f32 %v10491_v42, %v4026_v40 }
 0x2f2   : > { %vm1683_vm6 = vcmp.eq.f32.partialorder %v10403_v27, inf  ;;  %6399 = vrcp.f32 %v513_v57  ;;  %v10541_v62 = vpop.eup %6383  ;;  %v4157_v46 = vadd.f32 %v10491_v42, %v4023_v9  ;;  %v12630_v37 = vand.u32 2147483648, %v10320_v41  ;;  %v3544_v29 = vpop.permute.xlu1 %3543 }
 0x2f3   : > { %v1691_v40 = vsel %vm1690_vm1, %v10347_v34, %v1689_v26  ;;  %v1668_v16 = vmul.f32 %v6376_v53, %v10385_v45  ;;  %v10552_v57 = vpop.eup %6385  ;;  %4289 = vst.msk [vmem:[%s9786_s9 + $0x140] sm:$0xff] %vm4248_vm0, %v4160_v13  ;;  %v4028_v2 = vmul.f32 %v3559_v30, %v12632_v25  ;;  %v12633_v9 = vand.u32 2147483648, %v10332_v47  ;;  %v517_v26 = vld [vmem:[%s7271_s27 + $0x3e8] sm:$0xff]  ;;  %v12635_v13 = vld [vmem:[#allocation126_spill] sm:$0xff] }
 0x2f4   : > { %v1680_v21 = vsel %vm1678_vm13, %v12630_v37, %v1677_v55  ;;  %12631 = vst [vmem:[#allocation106_spill] sm:$0xff] %v10552_v57  ;;  %v10563_v55 = vmul.f32 2.0, %v10541_v62  ;;  %6401 = vrcp.f32 %v518_v31  ;;  %v10566_v53 = vpop.eup %6387  ;;  %4286 = vst.msk [vmem:[%s9786_s9 + $0x128] sm:$0xff] %vm4248_vm0, %v4157_v46  ;;  %v4025_v37 = vmul.f32 %v3544_v29, %v12635_v13  ;;  %v3569_v46 = vpop.permute.xlu0 %3568  ;;  %3873 = vperm.xlu1 %5918, %v10520_v18  }
 0x2f5   : > { %v1659_v41 = vsel %vm1657_vm15, %v12633_v9, %v1656_v32  ;;  %12634 = vst [vmem:[#allocation166_spill] sm:$0xff] %v10566_v53  ;;  %vm1706_vm7 = vcmp.eq.f32.partialorder %v10393_v7, 0.0  ;;  %vm1685_vm8 = vcmp.eq.f32.partialorder %v10403_v27, 0.0  ;;  %vm1718_vm9 = vcmp.eq.f32.partialorder %v10413_v23, inf  ;;  %v10577_v8 = vpop.eup %6389  ;;  %3898 = vperm.xlu0 %5917, %v1680_v21  }
 0x2f6   : > { %v10575_v47 = vmul.f32 2.0, %v10552_v57  ;;  %6403 = vrcp.f32 %v515_v4  ;;  %12636 = vst [vmem:[#allocation107_spill] sm:$0xff] %v10577_v8  ;;  %v4162_v32 = vadd.f32 %v10491_v42, %v4028_v2  ;;  %v12637_v31 = vand.u32 2147483648, %v10347_v34  ;;  %v10589_v25 = vpop.eup %6391  ;;  %v12639_v34 = vld [vmem:[#allocation194_spill] sm:$0xff] }
 0x2f7   : > { %vm1720_vm10 = vcmp.eq.f32.partialorder %v10413_v23, 0.0  ;;  %6405 = vrsqrt.f32 %v10563_v55  ;;  %12638 = vst [vmem:[#allocation169_spill] sm:$0xff] %v10589_v25  ;;  %v4159_v4 = vadd.f32 %v10491_v42, %v4025_v37  ;;  %v1670_v2 = vsel %vm1669_vm3, %v10385_v45, %v1668_v16  ;;  %v12640_v37 = vld [vmem:[#allocation127_spill] sm:$0xff] }
 0x2f8   : > { %v10584_v24 = vsel %vm1692_vm2, %v12637_v31, %v1691_v40  ;;  %vm1697_vm11 = vcmp.eq.f32.partialorder %v10469_v6, inf  ;;  %6407 = vrcp.f32 %v517_v26  ;;  %4291 = vst.msk [vmem:[%s9786_s9 + $0x150] sm:$0xff] %vm4248_vm0, %v4162_v32  ;;  %v4030_v30 = vmul.f32 %v3569_v46, %v12639_v34  ;;  %v3554_v40 = vpop.permute.xlu1 %3553  ;;  %v6394_v16 = vpop.eup %6393  ;;  %3883 = vperm.xlu1 %5918, %v1659_v41  }
 0x2f9   : > { %v1703_v9 = vmul.f32 %v10510_v59, %v10393_v7  ;;  %6409 = vrsqrt.f32 %v10575_v47  ;;  %v10604_v13 = vmul.f32 2.0, %v10566_v53  ;;  %4288 = vst.msk [vmem:[%s9786_s9 + $0x138] sm:$0xff] %vm4248_vm0, %v4159_v4  ;;  %v4027_v26 = vmul.f32 %v3554_v40, %v12640_v37  ;;  %v519_v59 = vld [vmem:[%s7271_s27 + $0x3f8] sm:$0xff]  ;;  %v3579_v40 = vpop.permute.xlu0 %3578  ;;  %3908 = vperm.xlu0 %5917, %v10584_v24  }
 0x2fa   : > { %v1682_v32 = vmul.f32 %v6380_v10, %v10403_v27  ;;  %vm1699_vm12 = vcmp.eq.f32.partialorder %v10469_v6, 0.0  ;;  %v10613_v3 = vmul.f32 2.0, %v10577_v8  ;;  %v10616_v31 = vpop.eup %6395  ;;  %v4164_v46 = vadd.f32 %v10491_v42, %v4030_v30  ;;  %v12644_v30 = vld [vmem:[#allocation196_spill] sm:$0xff] }
 0x2fb   : > { %12641 = vst [vmem:[#allocation108_spill] sm:$0xff] %v10616_v31  ;;  %v1717_v34 = vmul.f32 %v6382_v33, %v10413_v23  ;;  %6411 = vrsqrt.f32 %v10604_v13  ;;  %v10622_v18 = vmul.f32 2.0, %v10589_v25  ;;  %v6398_v10 = vpop.eup %6397  ;;  %v4161_v4 = vadd.f32 %v10491_v42, %v4027_v26 }
 0x2fc   : > { %v12642_v37 = vand.u32 2147483648, %v10385_v45  ;;  %v1700_v8 = vand.u32 2147483648, %v10469_v6  ;;  %vm1732_vm13 = vcmp.eq.f32.partialorder %v10485_v56, inf  ;;  %v10631_v33 = vpop.eup %6399  ;;  %4293 = vst.msk [vmem:[%s9786_s9 + $0x160] sm:$0xff] %vm4248_vm0, %v4164_v46  ;;  %v4032_v57 = vmul.f32 %v3579_v40, %v12644_v30  ;;  %v3564_v44 = vpop.permute.xlu1 %3563  ;;  %v12645_v45 = vld [vmem:[#allocation128_spill] sm:$0xff] }
 0x2fd   : > { %12643 = vst [vmem:[#allocation170_spill] sm:$0xff] %v10631_v33  ;;  %v1705_v26 = vsel %vm1704_vm5, %v10393_v7, %v1703_v9  ;;  %v1696_v25 = vmul.f32 %v6394_v16, %v10469_v6  ;;  %6413 = vrcp.f32 %v519_v59  ;;  %4290 = vst.msk [vmem:[%s9786_s9 + $0x148] sm:$0xff] %vm4248_vm0, %v4161_v4  ;;  %v1684_v46 = vsel %vm1683_vm6, %v10403_v27, %v1682_v32  ;;  %v3589_v32 = vpop.permute.xlu0 %3588 }
 0x2fe   : > { %v1673_v29 = vsel %vm1671_vm4, %v12642_v37, %v1670_v2  ;;  %v4029_v2 = vmul.f32 %v3564_v44, %v12645_v45  ;;  %6415 = vrsqrt.f32 %v10613_v3  ;;  %v10648_v21 = vmul.f32 2.0, %v10616_v31  ;;  %v10650_v40 = vpop.eup %6401 }
 0x2ff   : > { %v4166_v9 = vadd.f32 %v10491_v42, %v4032_v57  ;;  %v1719_v16 = vsel %vm1718_vm9, %v10413_v23, %v1717_v34  ;;  %vm1734_vm14 = vcmp.eq.f32.partialorder %v10485_v56, 0.0  ;;  %6417 = vrsqrt.f32 %v10622_v18  ;;  %v12646_v34 = vld [vmem:[#allocation200_spill] sm:$0xff]  ;;  %3893 = vperm.xlu1 %5918, %v1673_v29  }
 0x300   : > { %v10658_v44 = vpop.eup %6403  ;;  %v4163_v41 = vadd.f32 %v10491_v42, %v4029_v2  ;;  %v1731_v59 = vmul.f32 %v6398_v10, %v10485_v56  ;;  %v1735_v4 = vand.u32 2147483648, %v10485_v56  ;;  %v10664_v57 = vmul.f32 2.0, %v10631_v33  ;;  %v3574_v45 = vpop.permute.xlu1 %3573 }
 0x301   : > { %v6406_v37 = vpop.eup %6405  ;;  %4295 = vst.msk [vmem:[%s9786_s9 + $0x170] sm:$0xff] %vm4248_vm0, %v4166_v9  ;;  %v4034_v30 = vmul.f32 %v3589_v32, %v12646_v34  ;;  %v12647_v31 = vand.u32 2147483648, %v10393_v7  ;;  %v12648_v10 = vand.u32 2147483648, %v10403_v27  ;;  %v1698_v33 = vsel %vm1697_vm11, %v10469_v6, %v1696_v25  ;;  %v12649_v32 = vld [vmem:[#allocation129_spill] sm:$0xff]  ;;  %v12652_v6 = vld [vmem:[#allocation4_spill] sm:$0xff] }
 0x302   : > { %v10681_v9 = vpop.eup %6407  ;;  %4292 = vst.msk [vmem:[%s9786_s9 + $0x158] sm:$0xff] %vm4248_vm0, %v4163_v41  ;;  %v4031_v24 = vmul.f32 %v3574_v45, %v12649_v32  ;;  %v12650_v7 = vand.u32 2147483648, %v10413_v23  ;;  %6419 = vrsqrt.f32 %v10648_v21  ;;  %v10692_v27 = vmul.f32 2.0, %v10650_v40  ;;  %v3599_v23 = vpop.permute.xlu0 %3598 }
 0x303   : > { %v1708_v2 = vsel %vm1706_vm7, %v12647_v31, %v1705_v26  ;;  %v1687_v53 = vsel %vm1685_vm8, %v12648_v10, %v1684_v46  ;;  %v6410_v26 = vpop.eup %6409  ;;  %v4168_v25 = vadd.f32 %v10491_v42, %v4034_v30  ;;  %v1710_v46 = vmul.f32 %v6406_v37, %v10563_v55  ;;  %v12651_v37 = vld [vmem:[#allocation203_spill] sm:$0xff] }
 0x304   : > { %v1722_v31 = vsel %vm1720_vm10, %v12650_v7, %v1719_v16  ;;  %6421 = vrsqrt.f32 %v10664_v57  ;;  %v10698_v29 = vmul.f32 2.0, %v10658_v44  ;;  %v4165_v41 = vadd.f32 %v10491_v42, %v4031_v24  ;;  %v3584_v10 = vpop.permute.xlu1 %3583  ;;  %3918 = vperm.xlu0 %5917, %v1708_v2   ;;  %3903 = vperm.xlu1 %5918, %v1687_v53  }
 0x305   : > { %v1701_v16 = vsel %vm1699_vm12, %v1700_v8, %v1698_v33  ;;  %v1733_v34 = vsel %vm1732_vm13, %v10485_v56, %v1731_v59  ;;  %vm1711_vm15 = vcmp.eq.f32.partialorder %v10563_v55, inf  ;;  %v6412_v30 = vpop.eup %6411  ;;  %4297 = vst.msk [vmem:[%s9786_s9 + $0x180] sm:$0xff] %vm4248_vm0, %v4168_v25  ;;  %v4036_v45 = vmul.f32 %v3599_v23, %v12651_v37  ;;  %v12654_v56 = vld [vmem:[#allocation5_spill] sm:$0xff] }
 0x306   : > { %vm1713_vm1 = vcmp.eq.f32.partialorder %v10563_v55, 0.0  ;;  %v1714_v32 = vand.u32 2147483648, %v10563_v55  ;;  %vm1746_vm2 = vcmp.eq.f32.partialorder %v10575_v47, inf  ;;  %4294 = vst.msk [vmem:[%s9786_s9 + $0x168] sm:$0xff] %vm4248_vm0, %v4165_v41  ;;  %v4033_v8 = vmul.f32 %v3584_v10, %v12652_v6  ;;  %v3609_v41 = vpop.permute.xlu0 %3608 }
 0x307   : > { %v1745_v33 = vmul.f32 %v6410_v26, %v10575_v47  ;;  %6423 = vrsqrt.f32 %v10692_v27  ;;  %v10719_v59 = vmul.f32 2.0, %v10681_v9  ;;  %v10721_v2 = vpop.eup %6413  ;;  %v4170_v24 = vadd.f32 %v10491_v42, %v4036_v45 }
 0x308   : > { %v1712_v7 = vsel %vm1711_vm15, %v10563_v55, %v1710_v46  ;;  %v1724_v25 = vmul.f32 %v6412_v30, %v10604_v13  ;;  %6425 = vrsqrt.f32 %v10698_v29  ;;  %v6416_v53 = vpop.eup %6415  ;;  %v4167_v26 = vadd.f32 %v10491_v42, %v4033_v8  ;;  %v12653_v46 = vld [vmem:[#allocation155_spill] sm:$0xff]  ;;  %v3594_v30 = vpop.permute.xlu1 %3593  ;;  %3928 = vperm.xlu0 %5917, %v1722_v31   ;;  %3913 = vperm.xlu1 %5918, %v1701_v16  }
 0x309   : > { %v1736_v23 = vsel %vm1734_vm14, %v1735_v4, %v1733_v34  ;;  %vm1748_vm3 = vcmp.eq.f32.partialorder %v10575_v47, 0.0  ;;  %vm1725_vm4 = vcmp.eq.f32.partialorder %v10604_v13, inf  ;;  %v6418_v37 = vpop.eup %6417  ;;  %4299 = vst.msk [vmem:[%s9786_s9 + $0x190] sm:$0xff] %vm4248_vm0, %v4170_v24  ;;  %v4038_v45 = vmul.f32 %v3609_v41, %v12653_v46 }
 0x30a   : > { %v1749_v10 = vand.u32 2147483648, %v10575_v47  ;;  %vm1727_vm5 = vcmp.eq.f32.partialorder %v10604_v13, 0.0  ;;  %v1728_v6 = vand.u32 2147483648, %v10604_v13  ;;  %4296 = vst.msk [vmem:[%s9786_s9 + $0x178] sm:$0xff] %vm4248_vm0, %v4167_v26  ;;  %v4035_v4 = vmul.f32 %v3594_v30, %v12654_v56 }
 0x30b   : > { %v1715_v34 = vsel %vm1713_vm1, %v1714_v32, %v1712_v7  ;;  %v1747_v8 = vsel %vm1746_vm2, %v10575_v47, %v1745_v33  ;;  %v10749_v31 = vmul.f32 2.0, %v10721_v2  ;;  %v4172_v24 = vadd.f32 %v10491_v42, %v4038_v45  ;;  %v3619_v32 = vpop.permute.xlu0 %3618  ;;  %v12655_v45 = vld [vmem:[#allocation6_spill] sm:$0xff] }
 0x30c   : > { %v1726_v26 = vsel %vm1725_vm4, %v10604_v13, %v1724_v25  ;;  %v1759_v41 = vmul.f32 %v6416_v53, %v10613_v3  ;;  %6427 = vrsqrt.f32 %v10719_v59  ;;  %v6420_v55 = vpop.eup %6419  ;;  %v4169_v16 = vadd.f32 %v10491_v42, %v4035_v4  ;;  %v3604_v46 = vpop.permute.xlu1 %3603  ;;  %3938 = vperm.xlu0 %5917, %v1736_v23   ;;  %3923 = vperm.xlu1 %5918, %v1715_v34  }
 0x30d   : > { %vm1760_vm6 = vcmp.eq.f32.partialorder %v10613_v3, inf  ;;  %vm1762_vm7 = vcmp.eq.f32.partialorder %v10613_v3, 0.0  ;;  %v1738_v33 = vmul.f32 %v6418_v37, %v10622_v18  ;;  %4301 = vst.msk [vmem:[%s9786_s9 + $0x1a0] sm:$0xff] %vm4248_vm0, %v4172_v24  ;;  %v4040_v25 = vmul.f32 %v3619_v32, %v9127_v54 }
 0x30e   : > { %v6422_v7 = vpop.eup %6421  ;;  %v1763_v53 = vand.u32 2147483648, %v10613_v3  ;;  %vm1739_vm8 = vcmp.eq.f32.partialorder %v10622_v18, inf  ;;  %vm1741_vm9 = vcmp.eq.f32.partialorder %v10622_v18, 0.0  ;;  %4298 = vst.msk [vmem:[%s9786_s9 + $0x188] sm:$0xff] %vm4248_vm0, %v4169_v16  ;;  %v4037_v30 = vmul.f32 %v3604_v46, %v12655_v45  ;;  %v12656_v16 = vld [vmem:[#allocation7_spill] sm:$0xff] }
 0x30f   : > { %v1750_v37 = vsel %vm1748_vm3, %v1749_v10, %v1747_v8  ;;  %v1729_v54 = vsel %vm1727_vm5, %v1728_v6, %v1726_v26  ;;  %v1742_v23 = vand.u32 2147483648, %v10622_v18  ;;  %v4174_v56 = vadd.f32 %v10491_v42, %v4040_v25  ;;  %v3629_v10 = vpop.permute.xlu0 %3628 }
 0x310   : > { %v1761_v4 = vsel %vm1760_vm6, %v10613_v3, %v1759_v41  ;;  %v1773_v24 = vmul.f32 %v6420_v55, %v10648_v21  ;;  %6429 = vrsqrt.f32 %v10749_v31  ;;  %v4171_v47 = vadd.f32 %v10491_v42, %v4037_v30  ;;  %v3614_v41 = vpop.permute.xlu1 %3613  ;;  %3948 = vperm.xlu0 %5917, %v1750_v37   ;;  %3933 = vperm.xlu1 %5918, %v1729_v54  }
 0x311   : > { %v6424_v34 = vpop.eup %6423  ;;  %v1740_v13 = vsel %vm1739_vm8, %v10622_v18, %v1738_v33  ;;  %vm1774_vm10 = vcmp.eq.f32.partialorder %v10648_v21, inf  ;;  %v1752_v6 = vmul.f32 %v6422_v7, %v10664_v57  ;;  %4303 = vst.msk [vmem:[%s9786_s9 + $0x1b0] sm:$0xff] %vm4248_vm0, %v4174_v56  ;;  %v4042_v26 = vmul.f32 %v3629_v10, %v9139_v63  ;;  %v12657_v56 = vld [vmem:[#allocation174_spill] sm:$0xff] }
 0x312   : > { %v6426_v8 = vpop.eup %6425  ;;  %vm1776_vm11 = vcmp.eq.f32.partialorder %v10648_v21, 0.0  ;;  %v1777_v55 = vand.u32 2147483648, %v10648_v21  ;;  %vm1753_vm12 = vcmp.eq.f32.partialorder %v10664_v57, inf  ;;  %4300 = vst.msk [vmem:[%s9786_s9 + $0x198] sm:$0xff] %vm4248_vm0, %v4171_v47  ;;  %v4039_v32 = vmul.f32 %v3614_v41, %v12656_v16  ;;  %v12659_v16 = vld [vmem:[#allocation13_spill] sm:$0xff] }
 0x313   : > { %v1764_v33 = vsel %vm1762_vm7, %v1763_v53, %v1761_v4  ;;  %vm1755_vm13 = vcmp.eq.f32.partialorder %v10664_v57, 0.0  ;;  %v1756_v63 = vand.u32 2147483648, %v10664_v57  ;;  %v4176_v7 = vadd.f32 %v10491_v42, %v4042_v26  ;;  %v3639_v3 = vpop.permute.xlu0 %3638 }
 0x314   : > { %v1743_v25 = vsel %vm1741_vm9, %v1742_v23, %v1740_v13  ;;  %v1775_v46 = vsel %vm1774_vm10, %v10648_v21, %v1773_v24  ;;  %v1787_v45 = vmul.f32 %v6424_v34, %v10692_v27  ;;  %v4173_v30 = vadd.f32 %v10491_v42, %v4039_v32  ;;  %v3624_v4 = vpop.permute.xlu1 %3623  ;;  %3958 = vperm.xlu0 %5917, %v1764_v33   ;;  %v12658_v34 = vld [vmem:[#allocation9_spill] sm:$0xff]  ;;  %v12660_v32 = vld [vmem:[#allocation14_spill] sm:$0xff] }
 0x315   : > { %v1754_v53 = vsel %vm1753_vm12, %v10664_v57, %v1752_v6  ;;  %vm1788_vm14 = vcmp.eq.f32.partialorder %v10692_v27, inf  ;;  %v1766_v37 = vmul.f32 %v6426_v8, %v10698_v29  ;;  %v2507_v18 = vmul.f32 %v7283_v1, %v12657_v56  ;;  %4305 = vst.msk [vmem:[%s9786_s9 + $0x1c0] sm:$0xff] %vm4248_vm0, %v4176_v7  ;;  %3943 = vperm.xlu1 %5918, %v1743_v25   ;;  %v12661_v25 = vld [vmem:[#allocation181_spill] sm:$0xff] }
 0x316   : > { %v6428_v54 = vpop.eup %6427  ;;  %v4044_v23 = vmul.f32 %v3639_v3, %v9143_v58  ;;  %v3277_v24 = vadd.f32 %v8885_v11, %v8904_v5  ;;  %vm1767_vm15 = vcmp.eq.f32.partialorder %v10698_v29, inf  ;;  %4302 = vst.msk [vmem:[%s9786_s9 + $0x1a8] sm:$0xff] %vm4248_vm0, %v4173_v30  ;;  %v4041_v47 = vmul.f32 %v3624_v4, %v12658_v34  ;;  %v12663_v3 = vld [vmem:[#allocation10_spill] sm:$0xff] }
 0x317   : > { %v1778_v10 = vsel %vm1776_vm11, %v1777_v55, %v1775_v46  ;;  %vm1790_vm1 = vcmp.eq.f32.partialorder %v10692_v27, 0.0  ;;  %v1791_v58 = vand.u32 2147483648, %v10692_v27  ;;  %v1757_v11 = vsel %vm1755_vm13, %v1756_v63, %v1754_v53  ;;  %v3649_v8 = vpop.permute.xlu0 %3648 }
 0x318   : > { %v4178_v13 = vadd.f32 %v10491_v42, %v4044_v23  ;;  %v1789_v5 = vsel %vm1788_vm14, %v10692_v27, %v1787_v45  ;;  %v1770_v6 = vand.u32 2147483648, %v10698_v29  ;;  %v4175_v21 = vadd.f32 %v10491_v42, %v4041_v47  ;;  %v3634_v7 = vpop.permute.xlu1 %3633  ;;  %3968 = vperm.xlu0 %5917, %v1778_v10   ;;  %v12662_v45 = vld [vmem:[#allocation182_spill] sm:$0xff] }
 0x319   : > { %v1768_v26 = vsel %vm1767_vm15, %v10698_v29, %v1766_v37  ;;  %vm1769_vm2 = vcmp.eq.f32.partialorder %v10698_v29, 0.0  ;;  %v1780_v41 = vmul.f32 %v6428_v54, %v10719_v59  ;;  %v2506_v57 = vmul.f32 %v7283_v1, %v12659_v16  ;;  %3953 = vperm.xlu1 %5918, %v1757_v11   ;;  %v12664_v29 = vld [vmem:[#allocation15_spill] sm:$0xff] }
 0x31a   : > { %v6430_v55 = vpop.eup %6429  ;;  %v3150_v33 = vmul.f32 %v7285_v0, %v12660_v32  ;;  %4307 = vst.msk [vmem:[%s9786_s9 + $0x1d0] sm:$0xff] %vm4248_vm0, %v4178_v13  ;;  %v4046_v63 = vmul.f32 %v3649_v8, %v3277_v24  ;;  %vm1781_vm3 = vcmp.eq.f32.partialorder %v10719_v59, inf  ;;  %v3153_v46 = vmul.f32 %v7285_v0, %v12661_v25  ;;  %4304 = vst.msk [vmem:[%s9786_s9 + $0x1b8] sm:$0xff] %vm4248_vm0, %v4175_v21  ;;  %v12665_v13 = vld [vmem:[#allocation187_spill] sm:$0xff]  ;;  %v12667_v21 = vld [vmem:[#allocation12_spill] sm:$0xff] }
 0x31b   : > { %v2509_v30 = vmul.f32 %v7283_v1, %v12662_v45  ;;  %v4043_v53 = vmul.f32 %v3634_v7, %v12663_v3  ;;  %v1792_v37 = vsel %vm1790_vm1, %v1791_v58, %v1789_v5  ;;  %v3279_v56 = vadd.f32 %v8946_v61, %v2507_v18  ;;  %v3659_v34 = vpop.permute.xlu0 %3658  ;;  %v12666_v5 = vld [vmem:[#allocation188_spill] sm:$0xff]  ;;  %v12669_v45 = vld [vmem:[#allocation190_spill] sm:$0xff]  ;;  %v12670_v3 = vld [vmem:[#allocation191_spill] sm:$0xff] }
 0x31c   : > { %v4180_v54 = vadd.f32 %v10491_v42, %v4046_v63  ;;  %v1771_v23 = vsel %vm1769_vm2, %v1770_v6, %v1768_v26  ;;  %v1784_v4 = vand.u32 2147483648, %v10719_v59  ;;  %v1782_v47 = vsel %vm1781_vm3, %v10719_v59, %v1780_v41  ;;  %v3644_v58 = vpop.permute.xlu1 %3643  ;;  %3978 = vperm.xlu0 %5917, %v1792_v37  }
 0x31d   : > { %v4177_v24 = vadd.f32 %v10491_v42, %v4043_v53  ;;  %vm1783_vm4 = vcmp.eq.f32.partialorder %v10719_v59, 0.0  ;;  %v1794_v27 = vmul.f32 %v6430_v55, %v10749_v31  ;;  %v4048_v10 = vmul.f32 %v3659_v34, %v3279_v56  ;;  %3963 = vperm.xlu1 %5918, %v1771_v23   ;;  %v12671_v56 = vld [vmem:[#allocation17_spill] sm:$0xff] }
 0x31e   : > { %4309 = vst.msk [vmem:[%s9786_s9 + $0x1e0] sm:$0xff] %vm4248_vm0, %v4180_v54  ;;  %v3278_v61 = vadd.f32 %v3150_v33, %v2506_v57  ;;  %vm1795_vm5 = vcmp.eq.f32.partialorder %v10749_v31, inf  ;;  %v2508_v18 = vmul.f32 %v7283_v1, %v12664_v29  ;;  %v3155_v11 = vmul.f32 %v7285_v0, %v12665_v13  ;;  %v12668_v57 = vld [vmem:[#allocation16_spill] sm:$0xff]  ;;  %v12673_v29 = vld [vmem:[#allocation82_spill] sm:$0xff] }
 0x31f   : > { %v2511_v6 = vmul.f32 %v7283_v1, %v12666_v5  ;;  %4306 = vst.msk [vmem:[%s9786_s9 + $0x1c8] sm:$0xff] %vm4248_vm0, %v4177_v24  ;;  %v4045_v8 = vmul.f32 %v3644_v58, %v12667_v21  ;;  %v4182_v26 = vadd.f32 %v10491_v42, %v4048_v10  ;;  %v3281_v41 = vadd.f32 %v3153_v46, %v2509_v30  ;;  %v3669_v63 = vpop.permute.xlu0 %3668 }
 0x320   : > { %v1785_v55 = vsel %vm1783_vm4, %v1784_v4, %v1782_v47  ;;  %v1798_v16 = vand.u32 2147483648, %v10749_v31  ;;  %v3152_v32 = vmul.f32 %v7285_v0, %v12668_v57  ;;  %v1796_v7 = vsel %vm1795_vm5, %v10749_v31, %v1794_v27  ;;  %v3654_v46 = vpop.permute.xlu1 %3653  ;;  %v12672_v4 = vld [vmem:[#allocation18_spill] sm:$0xff] }
 0x321   : > { %v4179_v33 = vadd.f32 %v10491_v42, %v4045_v8  ;;  %vm1797_vm6 = vcmp.eq.f32.partialorder %v10749_v31, 0.0  ;;  %4311 = vst.msk [vmem:[%s9786_s9 + $0x1f0] sm:$0xff] %vm4248_vm0, %v4182_v26  ;;  %v4050_v25 = vmul.f32 %v3669_v63, %v3281_v41  ;;  %v3157_v59 = vmul.f32 %v7285_v0, %v12669_v45  ;;  %3973 = vperm.xlu1 %5918, %v1785_v55   ;;  %v12676_v26 = vld [vmem:[#allocation20_spill] sm:$0xff] }
 0x322   : > { %v4047_v30 = vmul.f32 %v3654_v46, %v3278_v61  ;;  %v2513_v53 = vmul.f32 %v7283_v1, %v12670_v3  ;;  %v3283_v54 = vadd.f32 %v3155_v11, %v2511_v6  ;;  %v1799_v31 = vsel %vm1797_vm6, %v1798_v16, %v1796_v7  ;;  %v12674_v11 = vld [vmem:[#allocation85_spill] sm:$0xff]  ;;  %v12677_v7 = vld [vmem:[#allocation86_spill] sm:$0xff]  ;;  %v12678_v46 = vld [vmem:[#allocation83_spill] sm:$0xff] }
 0x323   : > { %4308 = vst.msk [vmem:[%s9786_s9 + $0x1d8] sm:$0xff] %vm4248_vm0, %v4179_v33  ;;  %v4184_v37 = vadd.f32 %v10491_v42, %v4050_v25  ;;  %v2510_v23 = vmul.f32 %v7283_v1, %v12671_v56  ;;  %v3154_v24 = vmul.f32 %v7285_v0, %v12672_v4  ;;  %v3679_v47 = vpop.permute.xlu0 %3678  ;;  %v3280_v27 = vadd.f32 %v3152_v32, %v2508_v18  ;;  %v12675_v18 = vld [vmem:[#allocation19_spill] sm:$0xff]  ;;  %v12679_v3 = vld [vmem:[#allocation21_spill] sm:$0xff] }
 0x324   : > { %v4181_v34 = vadd.f32 %v10491_v42, %v4047_v30  ;;  %v4052_v10 = vmul.f32 %v3679_v47, %v3283_v54  ;;  %v3664_v58 = vpop.permute.xlu1 %3663  ;;  %v3159_v13 = vmul.f32 %v7285_v0, %v12673_v29  ;;  %v2515_v5 = vmul.f32 %v7283_v1, %v12674_v11  ;;  %v12681_v47 = vld [vmem:[#allocation134_spill] sm:$0xff] }
 0x325   : > { %4313 = vst.msk [vmem:[%s9786_s9 + $0x200] sm:$0xff] %vm4248_vm0, %v4184_v37  ;;  %v4049_v61 = vmul.f32 %v3664_v58, %v3280_v27  ;;  %3983 = vperm.xlu1 %5918, %v1799_v31   ;;  %v3285_v21 = vadd.f32 %v3157_v59, %v2513_v53  ;;  %v2512_v8 = vmul.f32 %v7283_v1, %v12675_v18  ;;  %v12680_v37 = vld [vmem:[#allocation22_spill] sm:$0xff]  ;;  %vm5657_vm7 = vcmask 7168  }
 0x326   : > { %4310 = vst.msk [vmem:[%s9786_s9 + $0x1e8] sm:$0xff] %vm4248_vm0, %v4181_v34  ;;  %v4186_v6 = vadd.f32 %v10491_v42, %v4052_v10  ;;  %v3156_v41 = vmul.f32 %v7285_v0, %v12676_v26  ;;  %v3282_v57 = vadd.f32 %v3154_v24, %v2510_v23  ;;  %v3161_v25 = vmul.f32 %v7285_v0, %v12677_v7  ;;  %v12682_v10 = vld [vmem:[#allocation131_spill] sm:$0xff] }
 0x327   : > { %v4183_v55 = vadd.f32 %v10491_v42, %v4049_v61  ;;  %v3689_v16 = vpop.permute.xlu0 %3688  ;;  %v2517_v45 = vmul.f32 %v7283_v1, %v12678_v46  ;;  %v3287_v30 = vadd.f32 %v3159_v13, %v2515_v5  ;;  %v2514_v53 = vmul.f32 %v7283_v1, %v12679_v3  ;;  %v12683_v13 = vld [vmem:[#allocation23_spill] sm:$0xff]  ;;  %v12684_v5 = vld [vmem:[#allocation24_spill] sm:$0xff] }
 0x328   : > { %4315 = vst.msk [vmem:[%s9786_s9 + $0x210] sm:$0xff] %vm4248_vm0, %v4186_v6  ;;  %v4054_v32 = vmul.f32 %v3689_v16, %v3285_v21  ;;  %v3674_v33 = vpop.permute.xlu1 %3673  ;;  %v3158_v54 = vmul.f32 %v7285_v0, %v12680_v37  ;;  %v3284_v23 = vadd.f32 %v3156_v41, %v2512_v8  ;;  %v3163_v27 = vmul.f32 %v7285_v0, %v12681_v47  ;;  %v12685_v16 = vld [vmem:[#allocation94_spill] sm:$0xff] }
 0x329   : > { %4312 = vst.msk [vmem:[%s9786_s9 + $0x1f8] sm:$0xff] %vm4248_vm0, %v4183_v55  ;;  %v4051_v63 = vmul.f32 %v3674_v33, %v3282_v57  ;;  %v2519_v58 = vmul.f32 %v7283_v1, %v12682_v10  ;;  %v3289_v29 = vadd.f32 %v3161_v25, %v2517_v45  ;;  %v2516_v11 = vmul.f32 %v7283_v1, %v12683_v13  ;;  %v12687_v25 = vld [vmem:[#allocation25_spill] sm:$0xff]  ;;  %v12688_v45 = vld [vmem:[#allocation26_spill] sm:$0xff] }
 0x32a   : > { %v4188_v59 = vadd.f32 %v10491_v42, %v4054_v32  ;;  %v3160_v6 = vmul.f32 %v7285_v0, %v12684_v5  ;;  %v3286_v8 = vadd.f32 %v3158_v54, %v2514_v53  ;;  %v3165_v57 = vmul.f32 %v7285_v0, %v12685_v16  ;;  %v12686_v32 = vld [vmem:[#allocation95_spill] sm:$0xff]  ;;  %v12693_v16 = vld [vmem:[#allocation152_spill] sm:$0xff] }
 0x32b   : > { %v4185_v31 = vadd.f32 %v10491_v42, %v4051_v63  ;;  %v3699_v56 = vpop.permute.xlu0 %3698  ;;  %v2521_v33 = vmul.f32 %v7283_v1, %v12686_v32  ;;  %v3291_v7 = vadd.f32 %v3163_v27, %v2519_v58  ;;  %v2518_v46 = vmul.f32 %v7283_v1, %v12687_v25  ;;  %v12691_v58 = vld [vmem:[#allocation27_spill] sm:$0xff]  ;;  %v12694_v32 = vld [vmem:[#allocation153_spill] sm:$0xff] }
 0x32c   : > { %4317 = vst.msk [vmem:[%s9786_s9 + $0x220] sm:$0xff] %vm4248_vm0, %v4188_v59  ;;  %v4056_v4 = vmul.f32 %v3699_v56, %v3287_v30  ;;  %v3684_v24 = vpop.permute.xlu1 %3683  ;;  %v3162_v59 = vmul.f32 %v7285_v0, %v12688_v45  ;;  %v3288_v53 = vadd.f32 %v3160_v6, %v2516_v11  ;;  %v12695_v25 = vld [vmem:[#allocation29_spill] sm:$0xff]  ;;  %v12696_v45 = vld [vmem:[#allocation30_spill] sm:$0xff] }
 0x32d   : > { %4314 = vst.msk [vmem:[%s9786_s9 + $0x208] sm:$0xff] %vm4248_vm0, %v4185_v31  ;;  %v4053_v34 = vmul.f32 %v3684_v24, %v3284_v23  ;;  %v6688_v31 = vld [vmem:[%s6873_s24] sm:$0xff]  ;;  %v3293_v10 = vadd.f32 %v3165_v57, %v2521_v33  ;;  %v3169_v57 = vmul.f32 %v7285_v0, %v12693_v16  ;;  %v2525_v33 = vmul.f32 %v7283_v1, %v12694_v32  ;;  %v12701_v16 = vld [vmem:[#allocation156_spill] sm:$0xff] }
 0x32e   : > { %v4190_v61 = vadd.f32 %v10491_v42, %v4056_v4  ;;  %v4377_v56 = vmul.f32 %v6688_v31, %v6688_v31  ;;  %v12689_v4 = vld [vmem:[#allocation151_spill] sm:$0xff]  ;;  %v3290_v6 = vadd.f32 %v3162_v59, %v2518_v46  ;;  %v2522_v46 = vmul.f32 %v7283_v1, %v12695_v25 }
 0x32f   : > { %v4187_v21 = vadd.f32 %v10491_v42, %v4053_v34  ;;  %v3709_v18 = vpop.permute.xlu0 %3708  ;;  %v3167_v24 = vmul.f32 %v7285_v0, %v12689_v4  ;;  %v12690_v34 = vld [vmem:[#allocation192_spill] sm:$0xff]  ;;  %v3166_v59 = vmul.f32 %v7285_v0, %v12696_v45 }
 0x330   : > { %4319 = vst.msk [vmem:[%s9786_s9 + $0x230] sm:$0xff] %vm4248_vm0, %v4190_v61  ;;  %v4058_v26 = vmul.f32 %v3709_v18, %v3289_v29  ;;  %v3694_v41 = vpop.permute.xlu1 %3693  ;;  %v2523_v47 = vmul.f32 %v7283_v1, %v12690_v34  ;;  %v2520_v61 = vmul.f32 %v7283_v1, %v12691_v58  ;;  %v12692_v29 = vld [vmem:[#allocation28_spill] sm:$0xff]  ;;  %v3297_v58 = vadd.f32 %v3169_v57, %v2525_v33 }
 0x331   : > { %4316 = vst.msk [vmem:[%s9786_s9 + $0x218] sm:$0xff] %vm4248_vm0, %v4187_v21  ;;  %v4055_v55 = vmul.f32 %v3694_v41, %v3286_v8  ;;  %v3164_v13 = vmul.f32 %v7285_v0, %v12692_v29  ;;  %v4505_v8 = vsel %vm4248_vm0, %v4377_v56, 0.0  ;;  %v6690_v56 = vld [vmem:[%s6873_s24 + $0x18] sm:$0xff]  ;;  %v3173_v57 = vmul.f32 %v7285_v0, %v12701_v16  ;;  %v12702_v33 = vld [vmem:[#allocation204_spill] sm:$0xff] }
 0x332   : > { %v4192_v63 = vadd.f32 %v10491_v42, %v4058_v26  ;;  %v6689_v26 = vld [vmem:[%s6873_s24 + $0x10] sm:$0xff] }
 0x333   : > { %v4189_v30 = vadd.f32 %v10491_v42, %v4055_v55  ;;  %v3719_v3 = vpop.permute.xlu0 %3718  ;;  %v4379_v41 = vmul.f32 %v6689_v26, %v6689_v26 }
 0x334   : > { %4321 = vst.msk [vmem:[%s9786_s9 + $0x240] sm:$0xff] %vm4248_vm0, %v4192_v63  ;;  %v4060_v37 = vmul.f32 %v3719_v3, %v3291_v7  ;;  %v3704_v54 = vpop.permute.xlu1 %3703  ;;  %v3295_v7 = vadd.f32 %v3167_v24, %v2523_v47  ;;  %v12697_v24 = vld [vmem:[#allocation100_spill] sm:$0xff]  ;;  %v12698_v47 = vld [vmem:[#allocation154_spill] sm:$0xff] }
 0x335   : > { %4318 = vst.msk [vmem:[%s9786_s9 + $0x228] sm:$0xff] %vm4248_vm0, %v4189_v30  ;;  %v4057_v23 = vmul.f32 %v3704_v54, %v3288_v53  ;;  %v3292_v53 = vadd.f32 %v3164_v13, %v2520_v61  ;;  %v4511_v31 = vsel %vm4248_vm0, %v4379_v41, 0.0  ;;  %v3171_v34 = vmul.f32 %v7285_v0, %v12697_v24  ;;  %v12699_v61 = vld [vmem:[#allocation31_spill] sm:$0xff]  ;;  %v12700_v13 = vld [vmem:[#allocation32_spill] sm:$0xff]  ;;  %v6693_v24 = vld [vmem:[%s6873_s24 + $0x38] sm:$0xff] }
 0x336   : > { %v4194_v27 = vadd.f32 %v10491_v42, %v4060_v37  ;;  %v2524_v29 = vmul.f32 %v7283_v1, %v12699_v61  ;;  %v6691_v41 = vld [vmem:[%s6873_s24 + $0x28] sm:$0xff] }
 0x337   : > { %v4191_v11 = vadd.f32 %v10491_v42, %v4057_v23  ;;  %v3729_v5 = vpop.permute.xlu0 %3728  ;;  %v4380_v23 = vmul.f32 %v6690_v56, %v6690_v56 }
 0x338   : > { %4323 = vst.msk [vmem:[%s9786_s9 + $0x250] sm:$0xff] %vm4248_vm0, %v4194_v27  ;;  %v4062_v21 = vmul.f32 %v3729_v5, %v3293_v10  ;;  %v3714_v18 = vpop.permute.xlu1 %3713  ;;  %v2527_v27 = vmul.f32 %v7283_v1, %v12698_v47  ;;  %v12705_v47 = vld [vmem:[#allocation159_spill] sm:$0xff] }
 0x339   : > { %4320 = vst.msk [vmem:[%s9786_s9 + $0x238] sm:$0xff] %vm4248_vm0, %v4191_v11  ;;  %v4059_v55 = vmul.f32 %v3714_v18, %v3290_v6  ;;  %v3168_v11 = vmul.f32 %v7285_v0, %v12700_v13  ;;  %v4514_v26 = vsel %vm4248_vm0, %v4380_v23, 0.0 }
 0x33a   : > { %v4196_v63 = vadd.f32 %v10491_v42, %v4062_v21  ;;  %v3294_v21 = vadd.f32 %v3166_v59, %v2522_v46  ;;  %v3299_v25 = vadd.f32 %v3171_v34, %v2527_v27  ;;  %v6692_v46 = vld [vmem:[%s6873_s24 + $0x8] sm:$0xff]  ;;  %v12703_v59 = vld [vmem:[#allocation33_spill] sm:$0xff]  ;;  %v4384_v34 = vmul.f32 %v6693_v24, %v6693_v24 }
 0x33b   : > { %v4193_v30 = vadd.f32 %v10491_v42, %v4059_v55  ;;  %v3739_v3 = vpop.permute.xlu0 %3738  ;;  %4506 = vadd.xlane.f32.xlu0 %v4505_v8  ;;  %v4382_v55 = vmul.f32 %v6691_v41, %v6691_v41  ;;  %v4378_v45 = vmul.f32 %v6692_v46, %v6692_v46  ;;  %v3175_v27 = vmul.f32 %v7285_v0, %v12705_v47 }
 0x33c   : > { %4325 = vst.msk [vmem:[%s9786_s9 + $0x260] sm:$0xff] %vm4248_vm0, %v4196_v63  ;;  %v4064_v37 = vmul.f32 %v3739_v3, %v3295_v7  ;;  %v3724_v54 = vpop.permute.xlu1 %3723  ;;  %v2529_v63 = vmul.f32 %v7283_v1, %v12702_v33  ;;  %v12704_v3 = vld [vmem:[#allocation34_spill] sm:$0xff]  ;;  %v4526_v33 = vsel %vm4248_vm0, %v4384_v34, 0.0 }
 0x33d   : > { %4322 = vst.msk [vmem:[%s9786_s9 + $0x248] sm:$0xff] %vm4248_vm0, %v4193_v30  ;;  %v4061_v4 = vmul.f32 %v3724_v54, %v3292_v53  ;;  %v2526_v30 = vmul.f32 %v7283_v1, %v12703_v59  ;;  %v3170_v53 = vmul.f32 %v7285_v0, %v12704_v3 }
 0x33e   : > { %v4198_v10 = vadd.f32 %v10491_v42, %v4064_v37  ;;  %v3301_v13 = vadd.f32 %v3173_v57, %v2529_v63  ;;  %v6695_v63 = vld [vmem:[%s6873_s24 + $0x48] sm:$0xff] }
 0x33f   : > { %v4195_v5 = vadd.f32 %v10491_v42, %v4061_v4  ;;  %v3749_v6 = vpop.permute.xlu0 %3748  ;;  %4512 = vadd.xlane.f32.xlu0 %v4511_v31  ;;  %v3296_v31 = vadd.f32 %v3168_v11, %v2524_v29  ;;  %v4520_v4 = vsel %vm4248_vm0, %v4382_v55, 0.0  ;;  %v4508_v11 = vsel %vm4248_vm0, %v4378_v45, 0.0  ;;  %v12710_v45 = vld [vmem:[#allocation205_spill] sm:$0xff] }
 0x340   : > { %4327 = vst.msk [vmem:[%s9786_s9 + $0x270] sm:$0xff] %vm4248_vm0, %v4198_v10  ;;  %v4066_v18 = vmul.f32 %v3749_v6, %v3297_v58  ;;  %v3734_v8 = vpop.permute.xlu1 %3733  ;;  %v12706_v10 = vld [vmem:[#allocation160_spill] sm:$0xff]  ;;  %v3298_v16 = vadd.f32 %v3170_v53, %v2526_v30  ;;  %v2533_v59 = vmul.f32 %v7283_v1, %v12710_v45 }
 0x341   : > { %4324 = vst.msk [vmem:[%s9786_s9 + $0x258] sm:$0xff] %vm4248_vm0, %v4195_v5  ;;  %v4063_v32 = vmul.f32 %v3734_v8, %v3294_v21  ;;  %v2531_v58 = vmul.f32 %v7283_v1, %v12706_v10  ;;  %v6694_v5 = vld [vmem:[%s6873_s24 + $0x20] sm:$0xff]  ;;  %v12707_v21 = vld [vmem:[#allocation35_spill] sm:$0xff]  ;;  %v12708_v8 = vld [vmem:[#allocation36_spill] sm:$0xff] }
 0x342   : > { %v4200_v7 = vadd.f32 %v10491_v42, %v4066_v18  ;;  %v4381_v6 = vmul.f32 %v6694_v5, %v6694_v5  ;;  %v2528_v18 = vmul.f32 %v7283_v1, %v12707_v21 }
 0x343   : > { %v4197_v37 = vadd.f32 %v10491_v42, %v4063_v32  ;;  %v3759_v54 = vpop.permute.xlu0 %3758  ;;  %4515 = vadd.xlane.f32.xlu0 %v4514_v26  ;;  %v3172_v26 = vmul.f32 %v7285_v0, %v12708_v8  ;;  %v3303_v53 = vadd.f32 %v3175_v27, %v2531_v58 }
 0x344   : > { %4329 = vst.msk [vmem:[%s9786_s9 + $0x280] sm:$0xff] %vm4248_vm0, %v4200_v7  ;;  %v4068_v56 = vmul.f32 %v3759_v54, %v3299_v25  ;;  %v3744_v23 = vpop.permute.xlu1 %3743  ;;  %v4386_v7 = vmul.f32 %v6695_v63, %v6695_v63  ;;  %v12709_v25 = vld [vmem:[#allocation163_spill] sm:$0xff]  ;;  %v6696_v54 = vld [vmem:[%s6873_s24 + $0x30] sm:$0xff] }
 0x345   : > { %4326 = vst.msk [vmem:[%s9786_s9 + $0x268] sm:$0xff] %vm4248_vm0, %v4197_v37  ;;  %v4065_v61 = vmul.f32 %v3744_v23, %v3296_v31  ;;  %v3177_v46 = vmul.f32 %v7285_v0, %v12709_v25  ;;  %v4517_v37 = vsel %vm4248_vm0, %v4381_v6, 0.0  ;;  %v4383_v31 = vmul.f32 %v6696_v54, %v6696_v54  ;;  %v12714_v6 = vld [vmem:[#allocation207_spill] sm:$0xff] }
 0x346   : > { %v4202_v29 = vadd.f32 %v10491_v42, %v4068_v56  ;;  %v12711_v56 = vld [vmem:[#allocation37_spill] sm:$0xff]  ;;  %v3300_v10 = vadd.f32 %v3172_v26, %v2528_v18  ;;  %v2535_v21 = vmul.f32 %v7283_v1, %v12714_v6 }
 0x347   : > { %v4199_v41 = vadd.f32 %v10491_v42, %v4065_v61  ;;  %v3769_v55 = vpop.permute.xlu0 %3768  ;;  %4521 = vadd.xlane.f32.xlu0 %v4520_v4  ;;  %v2530_v23 = vmul.f32 %v7283_v1, %v12711_v56  ;;  %v12712_v4 = vld [vmem:[#allocation38_spill] sm:$0xff]  ;;  %v4532_v61 = vsel %vm4248_vm0, %v4386_v7, 0.0  ;;  %v3305_v26 = vadd.f32 %v3177_v46, %v2533_v59  ;;  %v12718_v56 = vld [vmem:[#allocation213_spill] sm:$0xff] }
 0x348   : > { %4331 = vst.msk [vmem:[%s9786_s9 + $0x290] sm:$0xff] %vm4248_vm0, %v4202_v29  ;;  %v4070_v57 = vmul.f32 %v3769_v55, %v3301_v13  ;;  %v3754_v32 = vpop.permute.xlu1 %3753  ;;  %v3174_v24 = vmul.f32 %v7285_v0, %v12712_v4  ;;  %v6697_v29 = vld [vmem:[%s6873_s24 + $0x58] sm:$0xff]  ;;  %v6698_v55 = vld [vmem:[%s6873_s24 + $0x40] sm:$0xff] }
 0x349   : > { %4328 = vst.msk [vmem:[%s9786_s9 + $0x278] sm:$0xff] %vm4248_vm0, %v4199_v41  ;;  %v4067_v30 = vmul.f32 %v3754_v32, %v3298_v16  ;;  %4509 = vadd.xlane.f32.xlu1 %v4508_v11  ;;  %v4388_v13 = vmul.f32 %v6697_v29, %v6697_v29  ;;  %v12713_v11 = vld [vmem:[#allocation206_spill] sm:$0xff]  ;;  %v4523_v41 = vsel %vm4248_vm0, %v4383_v31, 0.0  ;;  %v4385_v16 = vmul.f32 %v6698_v55, %v6698_v55 }
 0x34a   : > { %v4204_v3 = vadd.f32 %v10491_v42, %v4070_v57  ;;  %v3179_v5 = vmul.f32 %v7285_v0, %v12713_v11  ;;  %v12715_v57 = vld [vmem:[#allocation39_spill] sm:$0xff]  ;;  %v3302_v45 = vadd.f32 %v3174_v24, %v2530_v23  ;;  %v2537_v23 = vmul.f32 %v7283_v1, %v12718_v56  ;;  %v11082_v4 = vld [vmem:[%s11987_s2] ss:$0 sm:$0xff] }
 0x34b   : > { %v4201_v34 = vadd.f32 %v10491_v42, %v4067_v30  ;;  %v3779_v47 = vpop.permute.xlu0 %3778  ;;  %4527 = vadd.xlane.f32.xlu0 %v4526_v33  ;;  %v2532_v32 = vmul.f32 %v7283_v1, %v12715_v57  ;;  %v12716_v33 = vld [vmem:[#allocation40_spill] sm:$0xff]  ;;  %v4538_v30 = vsel %vm4248_vm0, %v4388_v13, 0.0  ;;  %v2539_v55 = vmul.f32 %v7283_v1, %v9050_v38 }
 0x34c   : > { %4333 = vst.msk [vmem:[%s9786_s9 + $0x2a0] sm:$0xff] %vm4248_vm0, %v4204_v3  ;;  %v4072_v27 = vmul.f32 %v3779_v47, %v3303_v53  ;;  %v3764_v58 = vpop.permute.xlu1 %3763  ;;  %v3176_v63 = vmul.f32 %v7285_v0, %v12716_v33  ;;  %v6699_v3 = vld [vmem:[%s6873_s24 + $0x68] sm:$0xff]  ;;  %v6701_v47 = vld [vmem:[%s6873_s24 + $0x50] sm:$0xff] }
 0x34d   : > { %4330 = vst.msk [vmem:[%s9786_s9 + $0x288] sm:$0xff] %vm4248_vm0, %v4201_v34  ;;  %v4069_v18 = vmul.f32 %v3764_v58, %v3300_v10  ;;  %4518 = vadd.xlane.f32.xlu1 %v4517_v37  ;;  %v4390_v53 = vmul.f32 %v6699_v3, %v6699_v3  ;;  %v12717_v37 = vld [vmem:[#allocation212_spill] sm:$0xff]  ;;  %v4529_v34 = vsel %vm4248_vm0, %v4385_v16, 0.0  ;;  %v4387_v10 = vmul.f32 %v6701_v47, %v6701_v47 }
 0x34e   : > { %v4206_v8 = vadd.f32 %v10491_v42, %v4072_v27  ;;  %v3181_v54 = vmul.f32 %v7285_v0, %v12717_v37  ;;  %v12719_v27 = vld [vmem:[#allocation41_spill] sm:$0xff] }
 0x34f   : > { %v4203_v7 = vadd.f32 %v10491_v42, %v4069_v18  ;;  %v3789_v25 = vpop.permute.xlu0 %3788  ;;  %4533 = vadd.xlane.f32.xlu0 %v4532_v61  ;;  %v3307_v42 = vadd.f32 %v3179_v5, %v2535_v21  ;;  %v2534_v58 = vmul.f32 %v7283_v1, %v12719_v27  ;;  %v12720_v61 = vld [vmem:[#allocation42_spill] sm:$0xff]  ;;  %v3304_v5 = vadd.f32 %v3176_v63, %v2532_v32  ;;  %v6705_v27 = vld [vmem:[%s6873_s24 + $0x70] sm:$0xff] }
 0x350   : > { %4335 = vst.msk [vmem:[%s9786_s9 + $0x2b0] sm:$0xff] %vm4248_vm0, %v4206_v8  ;;  %v4074_v46 = vmul.f32 %v3789_v25, %v3305_v26  ;;  %v3774_v59 = vpop.permute.xlu1 %3773  ;;  %v3178_v29 = vmul.f32 %v7285_v0, %v12720_v61  ;;  %v4544_v18 = vsel %vm4248_vm0, %v4390_v53, 0.0  ;;  %v6702_v8 = vld [vmem:[%s6873_s24 + $0x78] sm:$0xff]  ;;  %v3309_v32 = vadd.f32 %v3181_v54, %v2537_v23  ;;  %v6703_v63 = vld [vmem:[%s6873_s24 + $0x60] sm:$0xff]  ;;  %v12721_v25 = vld [vmem:[#allocation43_spill] sm:$0xff] }
 0x351   : > { %4332 = vst.msk [vmem:[%s9786_s9 + $0x298] sm:$0xff] %vm4248_vm0, %v4203_v7  ;;  %v4071_v31 = vmul.f32 %v3774_v59, %v3302_v45  ;;  %4524 = vadd.xlane.f32.xlu1 %v4523_v41  ;;  %v4392_v26 = vmul.f32 %v6702_v8, %v6702_v8  ;;  %v3183_v41 = vmul.f32 %v7285_v0, %v9048_v15  ;;  %v4535_v33 = vsel %vm4248_vm0, %v4387_v10, 0.0  ;;  %v12722_v45 = vld [vmem:[#allocation44_spill] sm:$0xff]  ;;  %v6704_v54 = vld [vmem:[%s6873_s24 + $0x88] sm:$0xff]  ;;  %v12724_v61 = vld [vmem:[#allocation45_spill] sm:$0xff] }
 0x352   : > { %v4208_v24 = vadd.f32 %v11082_v4, %v4074_v46  ;;  %v4389_v7 = vmul.f32 %v6703_v63, %v6703_v63  ;;  %v2536_v15 = vmul.f32 %v7283_v1, %v12721_v25  ;;  %v3180_v46 = vmul.f32 %v7285_v0, %v12722_v45  ;;  %v6707_v25 = vld [vmem:[%s6873_s24 + $0x80] sm:$0xff]  ;;  %v12727_v45 = vld [vmem:[#allocation47_spill] sm:$0xff] }
 0x353   : > { %v4205_v13 = vadd.f32 %v11082_v4, %v4071_v31  ;;  %v3799_v11 = vpop.permute.xlu0 %3798  ;;  %4539 = vadd.xlane.f32.xlu0 %v4538_v30  ;;  %v3306_v30 = vadd.f32 %v3178_v29, %v2534_v58  ;;  %v4550_v37 = vsel %vm4248_vm0, %v4392_v26, 0.0  ;;  %v4394_v31 = vmul.f32 %v6704_v54, %v6704_v54  ;;  %v12725_v29 = vld [vmem:[#allocation46_spill] sm:$0xff]  ;;  %v6706_v26 = vld [vmem:[%s6873_s24 + $0x98] sm:$0xff] }
 0x354   : > { %4337 = vst.msk [vmem:[%s9786_s9 + $0x2c0] sm:$0xff] %vm4248_vm0, %v4208_v24  ;;  %v4076_v6 = vmul.f32 %v3799_v11, %v3307_v42  ;;  %v3784_v21 = vpop.permute.xlu1 %3783  ;;  %v3185_v42 = vmul.f32 %v7285_v0, %v9090_v12  ;;  %v3311_v23 = vadd.f32 %v3183_v41, %v2539_v55  ;;  %v12723_v24 = vld [vmem:[#allocation218_spill] sm:$0xff]  ;;  %v4541_v10 = vsel %vm4248_vm0, %v4389_v7, 0.0 }
 0x355   : > { %4334 = vst.msk [vmem:[%s9786_s9 + $0x2a8] sm:$0xff] %vm4248_vm0, %v4205_v13  ;;  %v4073_v16 = vmul.f32 %v3784_v21, %v3304_v5  ;;  %4530 = vadd.xlane.f32.xlu1 %v4529_v34  ;;  %v2541_v34 = vmul.f32 %v7283_v1, %v12723_v24  ;;  %v4391_v58 = vmul.f32 %v6705_v27, %v6705_v27  ;;  %v4556_v8 = vsel %vm4248_vm0, %v4394_v31, 0.0  ;;  %v6708_v31 = vld [vmem:[%s6873_s24 + $0xa8] sm:$0xff]  ;;  %v12730_v24 = vld [vmem:[#allocation224_spill] sm:$0xff] }
 0x356   : > { %v4210_v57 = vadd.f32 %v11082_v4, %v4076_v6  ;;  %v2538_v12 = vmul.f32 %v7283_v1, %v12724_v61  ;;  %v3182_v13 = vmul.f32 %v7285_v0, %v12725_v29  ;;  %v3308_v6 = vadd.f32 %v3180_v46, %v2536_v15  ;;  %v12728_v46 = vld [vmem:[#allocation48_spill] sm:$0xff]  ;;  %v12731_v29 = vld [vmem:[#allocation49_spill] sm:$0xff] }
 0x357   : > { %v4207_v38 = vadd.f32 %v11082_v4, %v4073_v16  ;;  %v3809_v59 = vpop.permute.xlu0 %3808  ;;  %4545 = vadd.xlane.f32.xlu0 %v4544_v18  ;;  %v4396_v41 = vmul.f32 %v6706_v26, %v6706_v26  ;;  %v3187_v55 = vmul.f32 %v7285_v0, %v9147_v60  ;;  %v12726_v16 = vld [vmem:[#allocation222_spill] sm:$0xff]  ;;  %v3313_v63 = vadd.f32 %v3185_v42, %v2541_v34  ;;  %v6709_v61 = vld [vmem:[%s6873_s24 + $0x90] sm:$0xff] }
 0x358   : > { %4339 = vst.msk [vmem:[%s9786_s9 + $0x2d0] sm:$0xff] %vm4248_vm0, %v4210_v57  ;;  %v4078_v3 = vmul.f32 %v3809_v59, %v3309_v32  ;;  %v3794_v53 = vpop.permute.xlu1 %3793  ;;  %v2543_v57 = vmul.f32 %v7283_v1, %v12726_v16  ;;  %v4547_v7 = vsel %vm4248_vm0, %v4391_v58, 0.0  ;;  %v4393_v15 = vmul.f32 %v6707_v25, %v6707_v25 }
 0x359   : > { %4336 = vst.msk [vmem:[%s9786_s9 + $0x2b8] sm:$0xff] %vm4248_vm0, %v4207_v38  ;;  %v4075_v56 = vmul.f32 %v3794_v53, %v3306_v30  ;;  %4536 = vadd.xlane.f32.xlu1 %v4535_v33  ;;  %v2540_v60 = vmul.f32 %v7283_v1, %v12727_v45  ;;  %v3184_v38 = vmul.f32 %v7285_v0, %v12728_v46  ;;  %v4562_v54 = vsel %vm4248_vm0, %v4396_v41, 0.0 }
 0x35a   : > { %v4212_v47 = vadd.f32 %v11082_v4, %v4078_v3  ;;  %v3310_v3 = vadd.f32 %v3182_v13, %v2538_v12  ;;  %v4398_v42 = vmul.f32 %v6708_v31, %v6708_v31  ;;  %v2545_v34 = vmul.f32 %v7283_v1, %v12730_v24 }
 0x35b   : > { %v4209_v11 = vadd.f32 %v11082_v4, %v4075_v56  ;;  %v3819_v5 = vpop.permute.xlu0 %3818  ;;  %4551 = vadd.xlane.f32.xlu0 %v4550_v37  ;;  %v12729_v56 = vld [vmem:[#allocation223_spill] sm:$0xff]  ;;  %v3315_v27 = vadd.f32 %v3187_v55, %v2543_v57  ;;  %v4553_v58 = vsel %vm4248_vm0, %v4393_v15, 0.0  ;;  %v4395_v12 = vmul.f32 %v6709_v61, %v6709_v61  ;;  %v6710_v55 = vld [vmem:[%s6873_s24 + $0xb8] sm:$0xff] }
 0x35c   : > { %4341 = vst.msk [vmem:[%s9786_s9 + $0x2e0] sm:$0xff] %vm4248_vm0, %v4212_v47  ;;  %v4080_v21 = vmul.f32 %v3819_v5, %v3311_v23  ;;  %v3804_v18 = vpop.permute.xlu1 %3803  ;;  %v3189_v23 = vmul.f32 %v7285_v0, %v12729_v56  ;;  %v2542_v13 = vmul.f32 %v7283_v1, %v12731_v29  ;;  %v4568_v41 = vsel %vm4248_vm0, %v4398_v42, 0.0  ;;  %v12733_v57 = vld [vmem:[#allocation225_spill] sm:$0xff] }
 0x35d   : > { %4338 = vst.msk [vmem:[%s9786_s9 + $0x2c8] sm:$0xff] %vm4248_vm0, %v4209_v11  ;;  %v4077_v32 = vmul.f32 %v3804_v18, %v3308_v6  ;;  %4542 = vadd.xlane.f32.xlu1 %v4541_v10  ;;  %v12732_v11 = vld [vmem:[#allocation50_spill] sm:$0xff]  ;;  %v3312_v18 = vadd.f32 %v3184_v38, %v2540_v60  ;;  %v4400_v16 = vmul.f32 %v6710_v55, %v6710_v55  ;;  %v4559_v45 = vsel %vm4248_vm0, %v4395_v12, 0.0  ;;  %v12735_v38 = vld [vmem:[#allocation51_spill] sm:$0xff] }
 0x35e   : > { %v4214_v33 = vadd.f32 %v11082_v4, %v4080_v21  ;;  %v3186_v5 = vmul.f32 %v7285_v0, %v12732_v11  ;;  %v3317_v15 = vadd.f32 %v3189_v23, %v2545_v34  ;;  %v6711_v60 = vld [vmem:[%s6873_s24 + $0xa0] sm:$0xff]  ;;  %v6712_v23 = vld [vmem:[%s6873_s24 + $0xc8] sm:$0xff]  ;;  %v12737_v34 = vld [vmem:[#allocation228_spill] sm:$0xff] }
 0x35f   : > { %v4211_v59 = vadd.f32 %v11082_v4, %v4077_v32  ;;  %v3829_v30 = vpop.permute.xlu0 %3828  ;;  %4557 = vadd.xlane.f32.xlu0 %v4556_v8  ;;  %v3191_v32 = vmul.f32 %v7285_v0, %v12733_v57  ;;  %v4397_v46 = vmul.f32 %v6711_v60, %v6711_v60  ;;  %v4574_v56 = vsel %vm4248_vm0, %v4400_v16, 0.0 }
 0x360   : > { %4343 = vst.msk [vmem:[%s9786_s9 + $0x2f0] sm:$0xff] %vm4248_vm0, %v4214_v33  ;;  %v4082_v53 = vmul.f32 %v3829_v30, %v3313_v63  ;;  %v3814_v37 = vpop.permute.xlu1 %3813  ;;  %v12734_v33 = vld [vmem:[#allocation226_spill] sm:$0xff]  ;;  %v12736_v30 = vld [vmem:[#allocation52_spill] sm:$0xff]  ;;  %v4402_v24 = vmul.f32 %v6712_v23, %v6712_v23 }
 0x361   : > { %4340 = vst.msk [vmem:[%s9786_s9 + $0x2d8] sm:$0xff] %vm4248_vm0, %v4211_v59  ;;  %v4079_v47 = vmul.f32 %v3814_v37, %v3310_v3  ;;  %4548 = vadd.xlane.f32.xlu1 %v4547_v7  ;;  %v2547_v63 = vmul.f32 %v7283_v1, %v12734_v33  ;;  %v2544_v59 = vmul.f32 %v7283_v1, %v12735_v38  ;;  %v4565_v29 = vsel %vm4248_vm0, %v4397_v46, 0.0  ;;  %v6715_v38 = vld [vmem:[%s6873_s24 + $0xc0] sm:$0xff] }
 0x362   : > { %v4216_v10 = vadd.f32 %v11082_v4, %v4082_v53  ;;  %v3188_v3 = vmul.f32 %v7285_v0, %v12736_v30  ;;  %v4580_v57 = vsel %vm4248_vm0, %v4402_v24, 0.0  ;;  %v12742_v30 = vld [vmem:[#allocation55_spill] sm:$0xff] }
 0x363   : > { %v4213_v6 = vadd.f32 %v11082_v4, %v4079_v47  ;;  %v3839_v21 = vpop.permute.xlu0 %3838  ;;  %4563 = vadd.xlane.f32.xlu0 %v4562_v54  ;;  %v3314_v54 = vadd.f32 %v3186_v5, %v2542_v13  ;;  %v3193_v47 = vmul.f32 %v7285_v0, %v12737_v34  ;;  %v3319_v12 = vadd.f32 %v3191_v32, %v2547_v63  ;;  %v6713_v13 = vld [vmem:[%s6873_s24 + $0xb0] sm:$0xff]  ;;  %v12739_v5 = vld [vmem:[#allocation53_spill] sm:$0xff]  ;;  %v6716_v24 = vld [vmem:[%s6873_s24 + $0xe8] sm:$0xff] }
 0x364   : > { %4345 = vst.msk [vmem:[%s9786_s9 + $0x300] sm:$0xff] %vm4248_vm0, %v4216_v10  ;;  %v4084_v8 = vmul.f32 %v3839_v21, %v3315_v27  ;;  %v3824_v26 = vpop.permute.xlu1 %3823  ;;  %v12738_v10 = vld [vmem:[#allocation229_spill] sm:$0xff]  ;;  %v4399_v11 = vmul.f32 %v6713_v13, %v6713_v13  ;;  %v12740_v21 = vld [vmem:[#allocation54_spill] sm:$0xff]  ;;  %v3195_v63 = vmul.f32 %v7285_v0, %v9295_v36  ;;  %v2548_v36 = vmul.f32 %v7283_v1, %v12742_v30  ;;  %v12748_v30 = vld [vmem:[#allocation59_spill] sm:$0xff] }
 0x365   : > { %4342 = vst.msk [vmem:[%s9786_s9 + $0x2e8] sm:$0xff] %vm4248_vm0, %v4213_v6  ;;  %v4081_v7 = vmul.f32 %v3824_v26, %v3312_v18  ;;  %4554 = vadd.xlane.f32.xlu1 %v4553_v58  ;;  %v2549_v27 = vmul.f32 %v7283_v1, %v12738_v10  ;;  %v2546_v6 = vmul.f32 %v7283_v1, %v12739_v5  ;;  %v6714_v32 = vld [vmem:[%s6873_s24 + $0xd8] sm:$0xff] }
 0x366   : > { %v4218_v25 = vadd.f32 %v11082_v4, %v4084_v8  ;;  %v3190_v18 = vmul.f32 %v7285_v0, %v12740_v21  ;;  %v4404_v33 = vmul.f32 %v6714_v32, %v6714_v32  ;;  %v4571_v46 = vsel %vm4248_vm0, %v4399_v11, 0.0  ;;  %v6717_v11 = vld [vmem:[%s6873_s24 + $0xd0] sm:$0xff] }
 0x367   : > { %v4215_v53 = vadd.f32 %v11082_v4, %v4081_v7  ;;  %v3849_v37 = vpop.permute.xlu0 %3848  ;;  %4569 = vadd.xlane.f32.xlu0 %v4568_v41  ;;  %v3316_v41 = vadd.f32 %v3188_v3, %v2544_v59  ;;  %v12741_v7 = vld [vmem:[#allocation232_spill] sm:$0xff]  ;;  %v3321_v60 = vadd.f32 %v3193_v47, %v2549_v27  ;;  %v4401_v59 = vmul.f32 %v6715_v38, %v6715_v38  ;;  %v12745_v27 = vld [vmem:[#allocation237_spill] sm:$0xff]  ;;  %v6719_v38 = vld [vmem:[%s6873_s24 + $0xe0] sm:$0xff] }
 0x368   : > { %4347 = vst.msk [vmem:[%s9786_s9 + $0x310] sm:$0xff] %vm4248_vm0, %v4218_v25  ;;  %v4086_v31 = vmul.f32 %v3849_v37, %v3317_v15  ;;  %v3834_v42 = vpop.permute.xlu1 %3833  ;;  %v2551_v25 = vmul.f32 %v7283_v1, %v12741_v7  ;;  %v12743_v3 = vld [vmem:[#allocation56_spill] sm:$0xff]  ;;  %v4586_v23 = vsel %vm4248_vm0, %v4404_v33, 0.0  ;;  %v4406_v34 = vmul.f32 %v6716_v24, %v6716_v24  ;;  %v6718_v33 = vld [vmem:[%s6873_s24 + $0xf8] sm:$0xff] }
 0x369   : > { %4344 = vst.msk [vmem:[%s9786_s9 + $0x2f8] sm:$0xff] %vm4248_vm0, %v4215_v53  ;;  %v4083_v58 = vmul.f32 %v3834_v42, %v3314_v54  ;;  %4560 = vadd.xlane.f32.xlu1 %v4559_v45  ;;  %v3192_v53 = vmul.f32 %v7285_v0, %v12743_v3  ;;  %v12744_v47 = vld [vmem:[#allocation236_spill] sm:$0xff]  ;;  %v4577_v13 = vsel %vm4248_vm0, %v4401_v59, 0.0  ;;  %v4403_v5 = vmul.f32 %v6717_v11, %v6717_v11  ;;  %v12752_v11 = vld [vmem:[#allocation61_spill] sm:$0xff] }
 0x36a   : > { %v4220_v61 = vadd.f32 %v11082_v4, %v4086_v31  ;;  %v3318_v31 = vadd.f32 %v3190_v18, %v2546_v6  ;;  %v3197_v10 = vmul.f32 %v7285_v0, %v12744_v47  ;;  %v12746_v6 = vld [vmem:[#allocation57_spill] sm:$0xff]  ;;  %v12747_v18 = vld [vmem:[#allocation58_spill] sm:$0xff]  ;;  %v4592_v32 = vsel %vm4248_vm0, %v4406_v34, 0.0  ;;  %v12750_v24 = vld [vmem:[#allocation244_spill] sm:$0xff] }
 0x36b   : > { %v4217_v8 = vadd.f32 %v11082_v4, %v4083_v58  ;;  %v3859_v26 = vpop.permute.xlu0 %3858  ;;  %4575 = vadd.xlane.f32.xlu0 %v4574_v56  ;;  %v2553_v58 = vmul.f32 %v7283_v1, %v12745_v27  ;;  %v2550_v21 = vmul.f32 %v7283_v1, %v12746_v6  ;;  %v3199_v7 = vmul.f32 %v7285_v0, %v9395_v19  ;;  %v12751_v47 = vld [vmem:[#allocation245_spill] sm:$0xff]  ;;  %v12753_v6 = vld [vmem:[#allocation62_spill] sm:$0xff] }
 0x36c   : > { %4349 = vst.msk [vmem:[%s9786_s9 + $0x320] sm:$0xff] %vm4248_vm0, %v4220_v61  ;;  %v4088_v55 = vmul.f32 %v3859_v26, %v3319_v12  ;;  %v3844_v16 = vpop.permute.xlu1 %3843  ;;  %v4405_v59 = vmul.f32 %v6719_v38, %v6719_v38  ;;  %v2552_v19 = vmul.f32 %v7283_v1, %v12748_v30  ;;  %v3201_v34 = vmul.f32 %v7285_v0, %v12750_v24  ;;  %v6723_v38 = vld [vmem:[%s6873_s24 + $0x100] sm:$0xff]  ;;  %v12756_v30 = vld [vmem:[#allocation63_spill] sm:$0xff] }
 0x36d   : > { %4346 = vst.msk [vmem:[%s9786_s9 + $0x308] sm:$0xff] %vm4248_vm0, %v4217_v8  ;;  %v4085_v15 = vmul.f32 %v3844_v16, %v3316_v41  ;;  %4566 = vadd.xlane.f32.xlu1 %v4565_v29  ;;  %v3323_v29 = vadd.f32 %v3195_v63, %v2551_v25  ;;  %v3194_v8 = vmul.f32 %v7285_v0, %v12747_v18  ;;  %v12758_v24 = vld [vmem:[#allocation250_spill] sm:$0xff] }
 0x36e   : > { %v4222_v45 = vadd.f32 %v11082_v4, %v4088_v55  ;;  %v3320_v55 = vadd.f32 %v3192_v53, %v2548_v36  ;;  %v4408_v63 = vmul.f32 %v6718_v33, %v6718_v33  ;;  %v12749_v36 = vld [vmem:[#allocation60_spill] sm:$0xff]  ;;  %v12754_v33 = vld [vmem:[#allocation247_spill] sm:$0xff] }
 0x36f   : > { %v4219_v37 = vadd.f32 %v11082_v4, %v4085_v15  ;;  %v3869_v54 = vpop.permute.xlu0 %3868  ;;  %4581 = vadd.xlane.f32.xlu0 %v4580_v57  ;;  %v3325_v15 = vadd.f32 %v3197_v10, %v2553_v58  ;;  %v3196_v3 = vmul.f32 %v7285_v0, %v12749_v36  ;;  %v2557_v10 = vmul.f32 %v7283_v1, %v12751_v47  ;;  %v12757_v36 = vld [vmem:[#allocation64_spill] sm:$0xff]  ;;  %v12759_v47 = vld [vmem:[#allocation251_spill] sm:$0xff] }
 0x370   : > { %4351 = vst.msk [vmem:[%s9786_s9 + $0x330] sm:$0xff] %vm4248_vm0, %v4222_v45  ;;  %v4090_v42 = vmul.f32 %v3869_v54, %v3321_v60  ;;  %v3854_v56 = vpop.permute.xlu1 %3853  ;;  %v2555_v45 = vmul.f32 %v7283_v1, %v9397_v48  ;;  %v3322_v54 = vadd.f32 %v3194_v8, %v2550_v21  ;;  %v3198_v21 = vmul.f32 %v7285_v0, %v12753_v6  ;;  %v12761_v6 = vld [vmem:[#allocation66_spill] sm:$0xff] }
 0x371   : > { %4348 = vst.msk [vmem:[%s9786_s9 + $0x318] sm:$0xff] %vm4248_vm0, %v4219_v37  ;;  %v4087_v61 = vmul.f32 %v3854_v56, %v3318_v31  ;;  %4572 = vadd.xlane.f32.xlu1 %v4571_v46  ;;  %v4583_v46 = vsel %vm4248_vm0, %v4403_v5, 0.0  ;;  %v6720_v56 = vld [vmem:[%s6873_s24 + $0x108] sm:$0xff]  ;;  %v2554_v5 = vmul.f32 %v7283_v1, %v12752_v11  ;;  %v12760_v11 = vld [vmem:[#allocation65_spill] sm:$0xff] }
 0x372   : > { %v4224_v12 = vadd.f32 %v11082_v4, %v4090_v42  ;;  %v4598_v42 = vsel %vm4248_vm0, %v4408_v63, 0.0  ;;  %v3203_v63 = vmul.f32 %v7285_v0, %v12754_v33  ;;  %v12762_v33 = vld [vmem:[#allocation252_spill] sm:$0xff] }
 0x373   : > { %v4221_v26 = vadd.f32 %v11082_v4, %v4087_v61  ;;  %v3879_v41 = vpop.permute.xlu0 %3878  ;;  %4587 = vadd.xlane.f32.xlu0 %v4586_v23  ;;  %v4410_v23 = vmul.f32 %v6720_v56, %v6720_v56  ;;  %v3327_v61 = vadd.f32 %v3199_v7, %v2555_v45  ;;  %v6724_v56 = vld [vmem:[%s6873_s24 + $0x128] sm:$0xff] }
 0x374   : > { %4353 = vst.msk [vmem:[%s9786_s9 + $0x340] sm:$0xff] %vm4248_vm0, %v4224_v12  ;;  %v4092_v16 = vmul.f32 %v3879_v41, %v3323_v29  ;;  %v3864_v57 = vpop.permute.xlu1 %3863  ;;  %v4589_v12 = vsel %vm4248_vm0, %v4405_v59, 0.0  ;;  %v6721_v29 = vld [vmem:[%s6873_s24 + $0xf0] sm:$0xff]  ;;  %v4409_v59 = vmul.f32 %v6723_v38, %v6723_v38  ;;  %v6727_v38 = vld [vmem:[%s6873_s24 + $0x120] sm:$0xff] }
 0x375   : > { %4350 = vst.msk [vmem:[%s9786_s9 + $0x328] sm:$0xff] %vm4248_vm0, %v4221_v26  ;;  %v4089_v25 = vmul.f32 %v3864_v57, %v3320_v55  ;;  %4578 = vadd.xlane.f32.xlu1 %v4577_v13  ;;  %v4407_v13 = vmul.f32 %v6721_v29, %v6721_v29  ;;  %v3324_v26 = vadd.f32 %v3196_v3, %v2552_v19  ;;  %v6722_v57 = vld [vmem:[%s6873_s24 + $0x118] sm:$0xff]  ;;  %v6725_v29 = vld [vmem:[%s6873_s24 + $0x110] sm:$0xff] }
 0x376   : > { %v4226_v60 = vadd.f32 %v11082_v4, %v4092_v16  ;;  %v4604_v16 = vsel %vm4248_vm0, %v4410_v23, 0.0  ;;  %v2556_v19 = vmul.f32 %v7283_v1, %v12756_v30  ;;  %v3200_v3 = vmul.f32 %v7285_v0, %v12757_v36  ;;  %v12764_v30 = vld [vmem:[#allocation67_spill] sm:$0xff]  ;;  %v12765_v36 = vld [vmem:[#allocation68_spill] sm:$0xff] }
 0x377   : > { %v4223_v53 = vadd.f32 %v11082_v4, %v4089_v25  ;;  %v3889_v37 = vpop.permute.xlu0 %3888  ;;  %4593 = vadd.xlane.f32.xlu0 %v4592_v32  ;;  %v4412_v32 = vmul.f32 %v6722_v57, %v6722_v57  ;;  %v3329_v25 = vadd.f32 %v3201_v34, %v2557_v10  ;;  %v4414_v23 = vmul.f32 %v6724_v56, %v6724_v56  ;;  %v6726_v57 = vld [vmem:[%s6873_s24 + $0x138] sm:$0xff]  ;;  %v6728_v56 = vld [vmem:[%s6873_s24 + $0x148] sm:$0xff] }
 0x378   : > { %4355 = vst.msk [vmem:[%s9786_s9 + $0x350] sm:$0xff] %vm4248_vm0, %v4226_v60  ;;  %v4094_v48 = vmul.f32 %v3889_v37, %v3325_v15  ;;  %v3874_v31 = vpop.permute.xlu1 %3873  ;;  %v12755_v15 = vld [vmem:[#allocation248_spill] sm:$0xff]  ;;  %v3205_v34 = vmul.f32 %v7285_v0, %v12758_v24  ;;  %v2561_v10 = vmul.f32 %v7283_v1, %v12759_v47  ;;  %v12767_v47 = vld [vmem:[#allocation257_spill] sm:$0xff] }
 0x379   : > { %4352 = vst.msk [vmem:[%s9786_s9 + $0x338] sm:$0xff] %vm4248_vm0, %v4223_v53  ;;  %v4091_v27 = vmul.f32 %v3874_v31, %v3322_v54  ;;  %4584 = vadd.xlane.f32.xlu1 %v4583_v46  ;;  %v2559_v45 = vmul.f32 %v7283_v1, %v12755_v15  ;;  %v4595_v46 = vsel %vm4248_vm0, %v4407_v13, 0.0  ;;  %v3326_v54 = vadd.f32 %v3198_v21, %v2554_v5  ;;  %v12766_v24 = vld [vmem:[#allocation256_spill] sm:$0xff] }
 0x37a   : > { %v4228_v58 = vadd.f32 %v11082_v4, %v4094_v48  ;;  %v4411_v13 = vmul.f32 %v6725_v29, %v6725_v29  ;;  %v2558_v5 = vmul.f32 %v7283_v1, %v12760_v11  ;;  %v3202_v21 = vmul.f32 %v7285_v0, %v12761_v6  ;;  %v6729_v29 = vld [vmem:[%s6873_s24 + $0x130] sm:$0xff]  ;;  %v12768_v11 = vld [vmem:[#allocation69_spill] sm:$0xff]  ;;  %v12769_v6 = vld [vmem:[#allocation70_spill] sm:$0xff] }
 0x37b   : > { %v4225_v18 = vadd.f32 %v11082_v4, %v4091_v27  ;;  %v3899_v8 = vpop.permute.xlu0 %3898  ;;  %4599 = vadd.xlane.f32.xlu0 %v4598_v42  ;;  %v4610_v42 = vsel %vm4248_vm0, %v4412_v32, 0.0  ;;  %v4416_v32 = vmul.f32 %v6726_v57, %v6726_v57  ;;  %v6730_v57 = vld [vmem:[%s6873_s24 + $0x158] sm:$0xff] }
 0x37c   : > { %4357 = vst.msk [vmem:[%s9786_s9 + $0x360] sm:$0xff] %vm4248_vm0, %v4228_v58  ;;  %v4096_v41 = vmul.f32 %v3899_v8, %v3327_v61  ;;  %v3884_v55 = vpop.permute.xlu1 %3883  ;;  %v3331_v61 = vadd.f32 %v3203_v63, %v2559_v45  ;;  %v3207_v63 = vmul.f32 %v7285_v0, %v12762_v33  ;;  %v12770_v33 = vld [vmem:[#allocation260_spill] sm:$0xff] }
 0x37d   : > { %4354 = vst.msk [vmem:[%s9786_s9 + $0x348] sm:$0xff] %vm4248_vm0, %v4225_v18  ;;  %v4093_v7 = vmul.f32 %v3884_v55, %v3324_v26  ;;  %4590 = vadd.xlane.f32.xlu1 %v4589_v12  ;;  %v4601_v12 = vsel %vm4248_vm0, %v4409_v59, 0.0  ;;  %v3328_v26 = vadd.f32 %v3200_v3, %v2556_v19  ;;  %v4413_v59 = vmul.f32 %v6727_v38, %v6727_v38  ;;  %v6731_v38 = vld [vmem:[%s6873_s24 + $0x140] sm:$0xff] }
 0x37e   : > { %v4230_v60 = vadd.f32 %v11082_v4, %v4096_v41  ;;  %v2560_v19 = vmul.f32 %v7283_v1, %v12764_v30  ;;  %v3204_v3 = vmul.f32 %v7285_v0, %v12765_v36  ;;  %v12772_v30 = vld [vmem:[#allocation71_spill] sm:$0xff]  ;;  %v12773_v36 = vld [vmem:[#allocation72_spill] sm:$0xff] }
 0x37f   : > { %v4227_v53 = vadd.f32 %v11082_v4, %v4093_v7  ;;  %v3909_v37 = vpop.permute.xlu0 %3908  ;;  %4605 = vadd.xlane.f32.xlu0 %v4604_v16  ;;  %v4616_v16 = vsel %vm4248_vm0, %v4414_v23, 0.0  ;;  %v12763_v7 = vld [vmem:[#allocation253_spill] sm:$0xff]  ;;  %v4418_v23 = vmul.f32 %v6728_v56, %v6728_v56  ;;  %v6732_v56 = vld [vmem:[%s6873_s24 + $0x168] sm:$0xff] }
 0x380   : > { %4359 = vst.msk [vmem:[%s9786_s9 + $0x370] sm:$0xff] %vm4248_vm0, %v4230_v60  ;;  %v4098_v48 = vmul.f32 %v3909_v37, %v3329_v25  ;;  %v3894_v31 = vpop.permute.xlu1 %3893  ;;  %v2563_v25 = vmul.f32 %v7283_v1, %v12763_v7  ;;  %v3333_v60 = vadd.f32 %v3205_v34, %v2561_v10  ;;  %v3209_v34 = vmul.f32 %v7285_v0, %v12766_v24  ;;  %v12771_v7 = vld [vmem:[#allocation261_spill] sm:$0xff]  ;;  %v12774_v24 = vld [vmem:[#allocation264_spill] sm:$0xff] }
 0x381   : > { %4356 = vst.msk [vmem:[%s9786_s9 + $0x358] sm:$0xff] %vm4248_vm0, %v4227_v53  ;;  %v4095_v27 = vmul.f32 %v3894_v31, %v3326_v54  ;;  %4596 = vadd.xlane.f32.xlu1 %v4595_v46  ;;  %v4607_v46 = vsel %vm4248_vm0, %v4411_v13, 0.0  ;;  %v3330_v54 = vadd.f32 %v3202_v21, %v2558_v5  ;;  %v2565_v10 = vmul.f32 %v7283_v1, %v12767_v47  ;;  %v12775_v47 = vld [vmem:[#allocation265_spill] sm:$0xff] }
 0x382   : > { %v4232_v58 = vadd.f32 %v11082_v4, %v4098_v48  ;;  %v4415_v13 = vmul.f32 %v6729_v29, %v6729_v29  ;;  %v2562_v5 = vmul.f32 %v7283_v1, %v12768_v11  ;;  %v3206_v21 = vmul.f32 %v7285_v0, %v12769_v6  ;;  %v6733_v29 = vld [vmem:[%s6873_s24 + $0x150] sm:$0xff]  ;;  %v12776_v11 = vld [vmem:[#allocation73_spill] sm:$0xff]  ;;  %v12777_v6 = vld [vmem:[#allocation74_spill] sm:$0xff] }
 0x383   : > { %v4229_v18 = vadd.f32 %v11082_v4, %v4095_v27  ;;  %v3919_v8 = vpop.permute.xlu0 %3918  ;;  %4611 = vadd.xlane.f32.xlu0 %v4610_v42  ;;  %v4622_v42 = vsel %vm4248_vm0, %v4416_v32, 0.0  ;;  %v4420_v32 = vmul.f32 %v6730_v57, %v6730_v57  ;;  %v6734_v57 = vld [vmem:[%s6873_s24 + $0x178] sm:$0xff] }
 0x384   : > { %4361 = vst.msk [vmem:[%s9786_s9 + $0x380] sm:$0xff] %vm4248_vm0, %v4232_v58  ;;  %v4100_v41 = vmul.f32 %v3919_v8, %v3331_v61  ;;  %v3904_v55 = vpop.permute.xlu1 %3903  ;;  %v3335_v61 = vadd.f32 %v3207_v63, %v2563_v25  ;;  %v3211_v63 = vmul.f32 %v7285_v0, %v12770_v33  ;;  %v2567_v25 = vmul.f32 %v7283_v1, %v12771_v7  ;;  %v12778_v33 = vld [vmem:[#allocation268_spill] sm:$0xff]  ;;  %v12779_v7 = vld [vmem:[#allocation269_spill] sm:$0xff] }
 0x385   : > { %4358 = vst.msk [vmem:[%s9786_s9 + $0x368] sm:$0xff] %vm4248_vm0, %v4229_v18  ;;  %v4097_v15 = vmul.f32 %v3904_v55, %v3328_v26  ;;  %4602 = vadd.xlane.f32.xlu1 %v4601_v12  ;;  %v4613_v12 = vsel %vm4248_vm0, %v4413_v59, 0.0  ;;  %v3332_v26 = vadd.f32 %v3204_v3, %v2560_v19  ;;  %v4417_v59 = vmul.f32 %v6731_v38, %v6731_v38  ;;  %v6735_v38 = vld [vmem:[%s6873_s24 + $0x160] sm:$0xff] }
 0x386   : > { %v4234_v45 = vadd.f32 %v11082_v4, %v4100_v41  ;;  %v2564_v19 = vmul.f32 %v7283_v1, %v12772_v30  ;;  %v3208_v3 = vmul.f32 %v7285_v0, %v12773_v36  ;;  %v12780_v30 = vld [vmem:[#allocation75_spill] sm:$0xff]  ;;  %v12781_v36 = vld [vmem:[#allocation76_spill] sm:$0xff] }
 0x387   : > { %v4231_v53 = vadd.f32 %v11082_v4, %v4097_v15  ;;  %v3929_v37 = vpop.permute.xlu0 %3928  ;;  %4617 = vadd.xlane.f32.xlu0 %v4616_v16  ;;  %v4628_v16 = vsel %vm4248_vm0, %v4418_v23, 0.0  ;;  %v4422_v23 = vmul.f32 %v6732_v56, %v6732_v56  ;;  %v6736_v56 = vld [vmem:[%s6873_s24 + $0x188] sm:$0xff] }
 0x388   : > { %4363 = vst.msk [vmem:[%s9786_s9 + $0x390] sm:$0xff] %vm4248_vm0, %v4234_v45  ;;  %v4102_v48 = vmul.f32 %v3929_v37, %v3333_v60  ;;  %v3914_v31 = vpop.permute.xlu1 %3913  ;;  %v3337_v60 = vadd.f32 %v3209_v34, %v2565_v10  ;;  %v3213_v34 = vmul.f32 %v7285_v0, %v12774_v24  ;;  %v2569_v10 = vmul.f32 %v7283_v1, %v12775_v47 }
 0x389   : > { %4360 = vst.msk [vmem:[%s9786_s9 + $0x378] sm:$0xff] %vm4248_vm0, %v4231_v53  ;;  %v4099_v27 = vmul.f32 %v3914_v31, %v3330_v54  ;;  %4608 = vadd.xlane.f32.xlu1 %v4607_v46  ;;  %v4619_v46 = vsel %vm4248_vm0, %v4415_v13, 0.0  ;;  %v3334_v54 = vadd.f32 %v3206_v21, %v2562_v5  ;;  %v4419_v13 = vmul.f32 %v6733_v29, %v6733_v29  ;;  %v12783_v29 = vld [vmem:[#allocation78_spill] sm:$0xff] }
 0x38a   : > { %v4236_v58 = vadd.f32 %v11082_v4, %v4102_v48  ;;  %v2566_v5 = vmul.f32 %v7283_v1, %v12776_v11  ;;  %v3210_v21 = vmul.f32 %v7285_v0, %v12777_v6 }
 0x38b   : > { %v4233_v18 = vadd.f32 %v11082_v4, %v4099_v27  ;;  %v3939_v8 = vpop.permute.xlu0 %3938  ;;  %4623 = vadd.xlane.f32.xlu0 %v4622_v42  ;;  %v4634_v42 = vsel %vm4248_vm0, %v4420_v32, 0.0  ;;  %v4424_v32 = vmul.f32 %v6734_v57, %v6734_v57 }
 0x38c   : > { %4365 = vst.msk [vmem:[%s9786_s9 + $0x3a0] sm:$0xff] %vm4248_vm0, %v4236_v58  ;;  %v4104_v41 = vmul.f32 %v3939_v8, %v3335_v61  ;;  %v3924_v55 = vpop.permute.xlu1 %3923  ;;  %v3339_v61 = vadd.f32 %v3211_v63, %v2567_v25  ;;  %v3215_v63 = vmul.f32 %v7285_v0, %v12778_v33  ;;  %v2571_v25 = vmul.f32 %v7283_v1, %v12779_v7 }
 0x38d   : > { %4362 = vst.msk [vmem:[%s9786_s9 + $0x388] sm:$0xff] %vm4248_vm0, %v4233_v18  ;;  %v4101_v15 = vmul.f32 %v3924_v55, %v3332_v26  ;;  %4614 = vadd.xlane.f32.xlu1 %v4613_v12  ;;  %v4625_v12 = vsel %vm4248_vm0, %v4417_v59, 0.0  ;;  %v3336_v26 = vadd.f32 %v3208_v3, %v2564_v19  ;;  %v4421_v59 = vmul.f32 %v6735_v38, %v6735_v38 }
 0x38e   : > { %v4238_v45 = vadd.f32 %v11082_v4, %v4104_v41  ;;  %v2568_v19 = vmul.f32 %v7283_v1, %v12780_v30  ;;  %v3212_v3 = vmul.f32 %v7285_v0, %v12781_v36  ;;  %v3343_v47 = vadd.f32 %v3215_v63, %v2571_v25  ;;  %v12784_v63 = vld [vmem:[#allocation79_spill] sm:$0xff]  ;;  %v12785_v25 = vld [vmem:[#allocation80_spill] sm:$0xff] }
 0x38f   : > { %v4235_v53 = vadd.f32 %v11082_v4, %v4101_v15  ;;  %v3949_v37 = vpop.permute.xlu0 %3948  ;;  %4629 = vadd.xlane.f32.xlu0 %v4628_v16  ;;  %v4640_v16 = vsel %vm4248_vm0, %v4422_v23, 0.0  ;;  %v4426_v23 = vmul.f32 %v6736_v56, %v6736_v56  ;;  %v2572_v7 = vmul.f32 %v7283_v1, %v12784_v63  ;;  %v6751_v63 = vld [vmem:[%s6873_s24 + $0x1e0] sm:$0xff] }
 0x390   : > { %4367 = vst.msk [vmem:[%s9786_s9 + $0x3b0] sm:$0xff] %vm4248_vm0, %v4238_v45  ;;  %v4106_v48 = vmul.f32 %v3949_v37, %v3337_v60  ;;  %v3934_v31 = vpop.permute.xlu1 %3933  ;;  %v3341_v60 = vadd.f32 %v3213_v34, %v2569_v10  ;;  %v4637_v10 = vsel %vm4248_vm0, %v4421_v59, 0.0  ;;  %v3340_v6 = vadd.f32 %v3212_v3, %v2568_v19  ;;  %v6740_v59 = vld [vmem:[%s6873_s24 + $0x1a8] sm:$0xff] }
 0x391   : > { %4364 = vst.msk [vmem:[%s9786_s9 + $0x398] sm:$0xff] %vm4248_vm0, %v4235_v53  ;;  %v4103_v27 = vmul.f32 %v3934_v31, %v3334_v54  ;;  %4620 = vadd.xlane.f32.xlu1 %v4619_v46  ;;  %v4631_v46 = vsel %vm4248_vm0, %v4419_v13, 0.0  ;;  %v3338_v54 = vadd.f32 %v3210_v21, %v2566_v5  ;;  %v3214_v13 = vmul.f32 %v7285_v0, %v12783_v29 }
 0x392   : > { %v4240_v58 = vadd.f32 %v11082_v4, %v4106_v48  ;;  %v4430_v30 = vmul.f32 %v6740_v59, %v6740_v59 }
 0x393   : > { %v4237_v18 = vadd.f32 %v11082_v4, %v4103_v27  ;;  %v3959_v8 = vpop.permute.xlu0 %3958  ;;  %4635 = vadd.xlane.f32.xlu0 %v4634_v42  ;;  %v4646_v42 = vsel %vm4248_vm0, %v4424_v32, 0.0  ;;  %v6737_v27 = vld [vmem:[%s6873_s24 + $0x170] sm:$0xff]  ;;  %v6739_v32 = vld [vmem:[%s6873_s24 + $0x180] sm:$0xff] }
 0x394   : > { %4369 = vst.msk [vmem:[%s9786_s9 + $0x3c0] sm:$0xff] %vm4248_vm0, %v4240_v58  ;;  %v4108_v41 = vmul.f32 %v3959_v8, %v3339_v61  ;;  %v3944_v55 = vpop.permute.xlu1 %3943  ;;  %v4423_v58 = vmul.f32 %v6737_v27, %v6737_v27  ;;  %v12782_v61 = vld [vmem:[#allocation77_spill] sm:$0xff]  ;;  %v4652_v8 = vsel %vm4248_vm0, %v4426_v23, 0.0  ;;  %v4425_v33 = vmul.f32 %v6739_v32, %v6739_v32  ;;  %v6743_v23 = vld [vmem:[%s6873_s24 + $0x1a0] sm:$0xff] }
 0x395   : > { %4366 = vst.msk [vmem:[%s9786_s9 + $0x3a8] sm:$0xff] %vm4248_vm0, %v4237_v18  ;;  %v4105_v15 = vmul.f32 %v3944_v55, %v3336_v26  ;;  %4626 = vadd.xlane.f32.xlu1 %v4625_v12  ;;  %v2570_v12 = vmul.f32 %v7283_v1, %v12782_v61  ;;  %v6738_v26 = vld [vmem:[%s6873_s24 + $0x198] sm:$0xff]  ;;  %v6741_v1 = vld [vmem:[%s6873_s24 + $0x190] sm:$0xff] }
 0x396   : > { %v4242_v45 = vadd.f32 %v11082_v4, %v4108_v41  ;;  %v4428_v41 = vmul.f32 %v6738_v26, %v6738_v26  ;;  %v4643_v57 = vsel %vm4248_vm0, %v4423_v58, 0.0  ;;  %v4427_v36 = vmul.f32 %v6741_v1, %v6741_v1  ;;  %v6745_v61 = vld [vmem:[%s6873_s24 + $0x1b0] sm:$0xff]  ;;  %v6755_v1 = vld [vmem:[%s6873_s24 + $0x200] sm:$0xff] }
 0x397   : > { %v4239_v53 = vadd.f32 %v11082_v4, %v4105_v15  ;;  %v3969_v37 = vpop.permute.xlu0 %3968  ;;  %4641 = vadd.xlane.f32.xlu0 %v4640_v16  ;;  %v3216_v15 = vmul.f32 %v7285_v0, %v12785_v25  ;;  %v4649_v0 = vsel %vm4248_vm0, %v4425_v33, 0.0 }
 0x398   : > { %4371 = vst.msk [vmem:[%s9786_s9 + $0x3d0] sm:$0xff] %vm4248_vm0, %v4242_v45  ;;  %v4110_v48 = vmul.f32 %v3969_v37, %v3341_v60  ;;  %v3954_v31 = vpop.permute.xlu1 %3953  ;;  %v3342_v60 = vadd.f32 %v3214_v13, %v2570_v12  ;;  %v4658_v38 = vsel %vm4248_vm0, %v4428_v41, 0.0  ;;  %v4655_v56 = vsel %vm4248_vm0, %v4427_v36, 0.0  ;;  %v6746_v13 = vld [vmem:[%s6873_s24 + $0x1d8] sm:$0xff]  ;;  %v6749_v41 = vld [vmem:[%s6873_s24 + $0x1d0] sm:$0xff] }
 0x399   : > { %4368 = vst.msk [vmem:[%s9786_s9 + $0x3b8] sm:$0xff] %vm4248_vm0, %v4239_v53  ;;  %v4107_v24 = vmul.f32 %v3954_v31, %v3338_v54  ;;  %4632 = vadd.xlane.f32.xlu1 %v4631_v46  ;;  %v3344_v53 = vadd.f32 %v3216_v15, %v2572_v7  ;;  %v4664_v54 = vsel %vm4248_vm0, %v4430_v30, 0.0  ;;  %v4431_v12 = vmul.f32 %v6745_v61, %v6745_v61  ;;  %v6752_v15 = vld [vmem:[%s6873_s24 + $0x208] sm:$0xff]  ;;  %v6754_v30 = vld [vmem:[%s6873_s24 + $0x218] sm:$0xff] }
 0x39a   : > { %v4244_v34 = vadd.f32 %v11082_v4, %v4110_v48  ;;  %v6742_v48 = vld [vmem:[%s6873_s24 + $0x1b8] sm:$0xff]  ;;  %v4437_v7 = vmul.f32 %v6751_v63, %v6751_v63  ;;  %v4441_v36 = vmul.f32 %v6755_v1, %v6755_v1 }
 0x39b   : > { %v4241_v11 = vadd.f32 %v11082_v4, %v4107_v24  ;;  %v3979_v5 = vpop.permute.xlu0 %3978  ;;  %4647 = vadd.xlane.f32.xlu0 %v4646_v42  ;;  %v4432_v31 = vmul.f32 %v6742_v48, %v6742_v48  ;;  %v4429_v24 = vmul.f32 %v6743_v23, %v6743_v23  ;;  %v6757_v48 = vld [vmem:[%s6873_s24 + $0x210] sm:$0xff] }
 0x39c   : > { %4373 = vst.msk [vmem:[%s9786_s9 + $0x3e0] sm:$0xff] %vm4248_vm0, %v4244_v34  ;;  %v4112_v21 = vmul.f32 %v3979_v5, %v3343_v47  ;;  %v3964_v18 = vpop.permute.xlu1 %3963  ;;  %v6747_v5 = vld [vmem:[%s6873_s24 + $0x1c0] sm:$0xff] }
 0x39d   : > { %4370 = vst.msk [vmem:[%s9786_s9 + $0x3c8] sm:$0xff] %vm4248_vm0, %v4241_v11  ;;  %v4109_v55 = vmul.f32 %v3964_v18, %v3340_v6  ;;  %4638 = vadd.xlane.f32.xlu1 %v4637_v10  ;;  %v4670_v47 = vsel %vm4248_vm0, %v4432_v31, 0.0  ;;  %v6744_v10 = vld [vmem:[%s6873_s24 + $0x1c8] sm:$0xff]  ;;  %v4661_v58 = vsel %vm4248_vm0, %v4429_v24, 0.0  ;;  %v4667_v11 = vsel %vm4248_vm0, %v4431_v12, 0.0  ;;  %v12786_v12 = vld [vmem:[#allocation109_spill] sm:$0xff] }
 0x39e   : > { %v4246_v16 = vadd.f32 %v11082_v4, %v4112_v21  ;;  %v4434_v27 = vmul.f32 %v6744_v10, %v6744_v10  ;;  %v4433_v6 = vmul.f32 %v6747_v5, %v6747_v5  ;;  %v6748_v18 = vld [vmem:[%s6873_s24 + $0x1e8] sm:$0xff]  ;;  %v4443_v31 = vmul.f32 %v6757_v48, %v6757_v48 }
 0x39f   : > { %v4243_v45 = vadd.f32 %v11082_v4, %v4109_v55  ;;  %4653 = vadd.xlane.f32.xlu0 %v4652_v8  ;;  %v4438_v8 = vmul.f32 %v6748_v18, %v6748_v18  ;;  %v4435_v55 = vmul.f32 %v6749_v41, %v6749_v41  ;;  %v6762_v18 = vld [vmem:[%s6873_s24 + $0x258] sm:$0xff] }
 0x3a0   : > { %4375 = vst.msk [vmem:[%s9786_s9 + $0x3f0] sm:$0xff] %vm4248_vm0, %v4246_v16  ;;  %v3974_v46 = vpop.permute.xlu1 %3973  ;;  %v4676_v29 = vsel %vm4248_vm0, %v4434_v27, 0.0  ;;  %v4673_v26 = vsel %vm4248_vm0, %v4433_v6, 0.0  ;;  %v4703_v24 = vsel %vm4248_vm0, %v4443_v31, 0.0 }
 0x3a1   : > { %4372 = vst.msk [vmem:[%s9786_s9 + $0x3d8] sm:$0xff] %vm4248_vm0, %v4243_v45  ;;  %v4111_v19 = vmul.f32 %v3974_v46, %v3342_v60  ;;  %4644 = vadd.xlane.f32.xlu1 %v4643_v57  ;;  %v4688_v16 = vsel %vm4248_vm0, %v4438_v8, 0.0  ;;  %v6750_v57 = vld [vmem:[%s6873_s24 + $0x1f8] sm:$0xff]  ;;  %v4679_v33 = vsel %vm4248_vm0, %v4435_v55, 0.0  ;;  %v4442_v45 = vmul.f32 %v6752_v15, %v6752_v15  ;;  %v6753_v46 = vld [vmem:[%s6873_s24 + $0x1f0] sm:$0xff] }
 0x3a2   : > { %v4440_v32 = vmul.f32 %v6750_v57, %v6750_v57  ;;  %v4685_v60 = vsel %vm4248_vm0, %v4437_v7, 0.0  ;;  %v4452_v8 = vmul.f32 %v6762_v18, %v6762_v18  ;;  %v6764_v7 = vld [vmem:[%s6873_s24 + $0x268] sm:$0xff]  ;;  %v12788_v15 = vld [vmem:[#allocation117_spill] sm:$0xff] }
 0x3a3   : > { %v4245_v3 = vadd.f32 %v11082_v4, %v4111_v19  ;;  %4659 = vadd.xlane.f32.xlu0 %v4658_v38  ;;  %v4439_v38 = vmul.f32 %v6753_v46, %v6753_v46  ;;  %v4700_v59 = vsel %vm4248_vm0, %v4442_v45, 0.0  ;;  %v4444_v19 = vmul.f32 %v6754_v30, %v6754_v30  ;;  %v6765_v46 = vld [vmem:[%s6873_s24 + $0x250] sm:$0xff] }
 0x3a4   : > { %v3984_v37 = vpop.permute.xlu1 %3983  ;;  %v4694_v25 = vsel %vm4248_vm0, %v4440_v32, 0.0  ;;  %v4730_v63 = vsel %vm4248_vm0, %v4452_v8, 0.0 }
 0x3a5   : > { %4374 = vst.msk [vmem:[%s9786_s9 + $0x3e8] sm:$0xff] %vm4248_vm0, %v4245_v3  ;;  %v4113_v42 = vmul.f32 %v3984_v37, %v3344_v53  ;;  %4650 = vadd.xlane.f32.xlu1 %v4649_v0  ;;  %v4691_v0 = vsel %vm4248_vm0, %v4439_v38, 0.0  ;;  %v4706_v3 = vsel %vm4248_vm0, %v4444_v19, 0.0  ;;  %v6756_v53 = vld [vmem:[%s6873_s24 + $0x228] sm:$0xff]  ;;  %v4451_v38 = vmul.f32 %v6765_v46, %v6765_v46 }
 0x3a6   : > { %v4446_v37 = vmul.f32 %v6756_v53, %v6756_v53 }
 0x3a7   : > { %v4247_v34 = vadd.f32 %v11082_v4, %v4113_v42  ;;  %4665 = vadd.xlane.f32.xlu0 %v4664_v54  ;;  %v4436_v4 = vmul.f32 %v6746_v13, %v6746_v13  ;;  %v4697_v54 = vsel %vm4248_vm0, %v4441_v36, 0.0  ;;  %v12789_v36 = vld [vmem:[#allocation2_spill] sm:$0xff] }
 0x3a8   : > { %v4712_v42 = vsel %vm4248_vm0, %v4446_v37, 0.0  ;;  %v4727_v37 = vsel %vm4248_vm0, %v4451_v38, 0.0 }
 0x3a9   : > { %4376 = vst.msk [vmem:[%s9786_s9 + $0x3f8] sm:$0xff] %vm4248_vm0, %v4247_v34  ;;  %4656 = vadd.xlane.f32.xlu1 %v4655_v56  ;;  %v4682_v21 = vsel %vm4248_vm0, %v4436_v4, 0.0  ;;  %v6758_v56 = vld [vmem:[%s6873_s24 + $0x238] sm:$0xff]  ;;  %v6759_v34 = vld [vmem:[%s6873_s24 + $0x220] sm:$0xff]  ;;  %v6761_v4 = vld [vmem:[%s6873_s24 + $0x230] sm:$0xff] }
 0x3aa   : > { %v4448_v23 = vmul.f32 %v6758_v56, %v6758_v56 }
 0x3ab   : > { %4671 = vadd.xlane.f32.xlu0 %v4670_v47  ;;  %v4445_v47 = vmul.f32 %v6759_v34, %v6759_v34 }
 0x3ac   : > { %v4718_v27 = vsel %vm4248_vm0, %v4448_v23, 0.0 }
 0x3ad   : > { %4662 = vadd.xlane.f32.xlu1 %v4661_v58  ;;  %v6760_v58 = vld [vmem:[%s6873_s24 + $0x248] sm:$0xff]  ;;  %v4709_v13 = vsel %vm4248_vm0, %v4445_v47, 0.0 }
 0x3ae   : > { %v4450_v61 = vmul.f32 %v6760_v58, %v6760_v58 }
 0x3af   : > { %4677 = vadd.xlane.f32.xlu0 %v4676_v29 }
 0x3b1   : > { %4668 = vadd.xlane.f32.xlu1 %v4667_v11  ;;  %v4447_v11 = vmul.f32 %v6761_v4, %v6761_v4 }
 0x3b3   : > { %4683 = vadd.xlane.f32.xlu0 %v4682_v21  ;;  %v4724_v21 = vsel %vm4248_vm0, %v4450_v61, 0.0  ;;  %v4715_v55 = vsel %vm4248_vm0, %v4447_v11, 0.0  ;;  %v12791_v61 = vld [vmem:[#allocation8_spill] sm:$0xff] }
 0x3b4   : > { %v6769_v11 = vld [vmem:[%s6873_s24 + $0x270] sm:$0xff] }
 0x3b5   : > { %4674 = vadd.xlane.f32.xlu1 %v4673_v26  ;;  %v12787_v26 = vld [vmem:[#allocation115_spill] sm:$0xff] }
 0x3b7   : > { %4689 = vadd.xlane.f32.xlu0 %v4688_v16  ;;  %v6763_v16 = vld [vmem:[%s6873_s24 + $0x240] sm:$0xff] }
 0x3b8   : > { %v4449_v57 = vmul.f32 %v6763_v16, %v6763_v16 }
 0x3b9   : > { %4680 = vadd.xlane.f32.xlu1 %v4679_v33 }
 0x3bb   : > { %4695 = vadd.xlane.f32.xlu0 %v4694_v25  ;;  %v4454_v25 = vmul.f32 %v6764_v7, %v6764_v7 }
 0x3bd   : > { %4686 = vadd.xlane.f32.xlu1 %v4685_v60  ;;  %v4721_v60 = vsel %vm4248_vm0, %v4449_v57, 0.0  ;;  %v4736_v19 = vsel %vm4248_vm0, %v4454_v25, 0.0  ;;  %v6770_v57 = vld [vmem:[%s6873_s24 + $0x298] sm:$0xff] }
 0x3bf   : > { %4701 = vadd.xlane.f32.xlu0 %v4700_v59 }
 0x3c1   : > { %4692 = vadd.xlane.f32.xlu1 %v4691_v0  ;;  %v6766_v0 = vld [vmem:[%s6873_s24 + $0x278] sm:$0xff] }
 0x3c2   : > { %v4456_v1 = vmul.f32 %v6766_v0, %v6766_v0 }
 0x3c3   : > { %4707 = vadd.xlane.f32.xlu0 %v4706_v3 }
 0x3c4   : > { %v4742_v47 = vsel %vm4248_vm0, %v4456_v1, 0.0 }
 0x3c5   : > { %4698 = vadd.xlane.f32.xlu1 %v4697_v54  ;;  %v6767_v54 = vld [vmem:[%s6873_s24 + $0x260] sm:$0xff] }
 0x3c6   : > { %v4453_v48 = vmul.f32 %v6767_v54, %v6767_v54 }
 0x3c7   : > { %4713 = vadd.xlane.f32.xlu0 %v4712_v42  ;;  %v12790_v42 = vld [vmem:[#allocation101_spill] sm:$0xff] }
 0x3c8   : > { %v4507_v10 = vpop.xlane.xlu0 %4506  ;;  %v4733_v4 = vsel %vm4248_vm0, %v4453_v48, 0.0  ;;  %v12795_v48 = vld [vmem:[#allocation84_spill] sm:$0xff] }
 0x3c9   : > { %4704 = vadd.xlane.f32.xlu1 %v4703_v24  ;;  %v4889_v29 = vmul.f32 %v12786_v12, %v4507_v10  ;;  %v6768_v10 = vld [vmem:[%s6873_s24 + $0x288] sm:$0xff] }
 0x3cb   : > { %v5017_v5 = vadd.f32 1.0, %v4889_v29  ;;  %4719 = vadd.xlane.f32.xlu0 %v4718_v27  ;;  %v4458_v27 = vmul.f32 %v6768_v10, %v6768_v10  ;;  %v12796_v10 = vld [vmem:[#allocation124_spill] sm:$0xff] }
 0x3cc   : > { %v4513_v6 = vpop.xlane.xlu0 %4512 }
 0x3cd   : > { %4710 = vadd.xlane.f32.xlu1 %v4709_v13  ;;  %6431 = vlog2.f32 %v5017_v5  ;;  %v4891_v41 = vmul.f32 %v12787_v26, %v4513_v6  ;;  %v4455_v5 = vmul.f32 %v6769_v11, %v6769_v11  ;;  %v4748_v16 = vsel %vm4248_vm0, %v4458_v27, 0.0 }
 0x3cf   : > { %v5019_v32 = vadd.f32 1.0, %v4891_v41  ;;  %4725 = vadd.xlane.f32.xlu0 %v4724_v21  ;;  %v12792_v21 = vld [vmem:[#allocation113_spill] sm:$0xff] }
 0x3d0   : > { %v4516_v33 = vpop.xlane.xlu0 %4515 }
 0x3d1   : > { %4716 = vadd.xlane.f32.xlu1 %v4715_v55  ;;  %6433 = vlog2.f32 %v5019_v32  ;;  %v4892_v45 = vmul.f32 %v12788_v15, %v4516_v33  ;;  %v4460_v32 = vmul.f32 %v6770_v57, %v6770_v57 }
 0x3d3   : > { %v5020_v59 = vadd.f32 1.0, %v4892_v45  ;;  %4731 = vadd.xlane.f32.xlu0 %v4730_v63  ;;  %v12793_v63 = vld [vmem:[#allocation130_spill] sm:$0xff]  ;;  %v4739_v45 = vsel %vm4248_vm0, %v4455_v5, 0.0 }
 0x3d4   : > { %v4522_v30 = vpop.xlane.xlu0 %4521 }
 0x3d5   : > { %4722 = vadd.xlane.f32.xlu1 %v4721_v60  ;;  %6435 = vlog2.f32 %v5020_v59  ;;  %v4894_v3 = vmul.f32 %v12789_v36, %v4522_v30  ;;  %v6771_v60 = vld [vmem:[%s6873_s24 + $0x280] sm:$0xff]  ;;  %v12794_v59 = vld [vmem:[#allocation116_spill] sm:$0xff] }
 0x3d6   : > { %v4510_v53 = vpop.xlane.xlu1 %4509  ;;  %v4457_v46 = vmul.f32 %v6771_v60, %v6771_v60 }
 0x3d7   : > { %v6432_v31 = vpop.eup %6431  ;;  %v4890_v56 = vmul.f32 %v12790_v42, %v4510_v53  ;;  %v5022_v23 = vadd.f32 1.0, %v4894_v3  ;;  %4737 = vadd.xlane.f32.xlu0 %v4736_v19  ;;  %v4754_v3 = vsel %vm4248_vm0, %v4460_v32, 0.0  ;;  %v6772_v53 = vld [vmem:[%s6873_s24 + $0x2a8] sm:$0xff] }
 0x3d8   : > { %v5146_v24 = vmul.f32 0.6931472, %v6432_v31  ;;  %v4528_v34 = vpop.xlane.xlu0 %4527 }
 0x3d9   : > { %v5018_v58 = vadd.f32 1.0, %v4890_v56  ;;  %4728 = vadd.xlane.f32.xlu1 %v4727_v37  ;;  %6437 = vlog2.f32 %v5022_v23  ;;  %v4896_v12 = vmul.f32 %v12791_v61, %v4528_v34  ;;  %v4462_v37 = vmul.f32 %v6772_v53, %v6772_v53 }
 0x3da   : > { %v5401_v29 = vmul.f32 2.0, %v5146_v24  ;;  %v4519_v13 = vpop.xlane.xlu1 %4518  ;;  %v4745_v23 = vsel %vm4248_vm0, %v4457_v46, 0.0  ;;  %v6773_v24 = vld [vmem:[%s6873_s24 + $0x290] sm:$0xff] }
 0x3db   : > { %v6434_v6 = vpop.eup %6433  ;;  %6439 = vlog2.f32 %v5018_v58  ;;  %v4893_v18 = vmul.f32 %v12792_v21, %v4519_v13  ;;  %v5024_v8 = vadd.f32 1.0, %v4896_v12  ;;  %4743 = vadd.xlane.f32.xlu0 %v4742_v47  ;;  %v4459_v34 = vmul.f32 %v6773_v24, %v6773_v24  ;;  %v12797_v21 = vld [vmem:[#allocation90_spill] sm:$0xff] }
 0x3dc   : > { %v5529_v26 = vsub.f32 -3.0596964, %v5401_v29  ;;  %v5150_v41 = vmul.f32 0.6931472, %v6434_v6  ;;  %v4534_v55 = vpop.xlane.xlu0 %4533  ;;  %v4760_v13 = vsel %vm4248_vm0, %v4462_v37, 0.0 }
 0x3dd   : > { %v5021_v33 = vadd.f32 1.0, %v4893_v18  ;;  %4734 = vadd.xlane.f32.xlu1 %v4733_v4  ;;  %6441 = vlog2.f32 %v5024_v8  ;;  %v4898_v7 = vmul.f32 %v12793_v63, %v4534_v55  ;;  %v6774_v4 = vld [vmem:[%s6873_s24 + $0x2b8] sm:$0xff]  ;;  %v6775_v8 = vld [vmem:[%s6873_s24 + $0x2a0] sm:$0xff]  ;;  %v4751_v57 = vsel %vm4248_vm0, %v4459_v34, 0.0 }
 0x3de   : > { %5658 = vst.msk [vmem:[%s11506_s16] sm:$0xff] %vm5657_vm7, %v5529_v26  ;;  %v5403_v25 = vmul.f32 2.0, %v5150_v41  ;;  %v4525_v15 = vpop.xlane.xlu1 %4524  ;;  %v4464_v11 = vmul.f32 %v6774_v4, %v6774_v4  ;;  %v4461_v26 = vmul.f32 %v6775_v8, %v6775_v8  ;;  %v12801_v4 = vld [vmem:[#allocation139_spill] sm:$0xff] }
 0x3df   : > { %v6436_v38 = vpop.eup %6435  ;;  %6443 = vlog2.f32 %v5021_v33  ;;  %v4895_v30 = vmul.f32 %v12794_v59, %v4525_v15  ;;  %v5026_v19 = vadd.f32 1.0, %v4898_v7  ;;  %4749 = vadd.xlane.f32.xlu0 %v4748_v16  ;;  %v12798_v33 = vld [vmem:[#allocation3_spill] sm:$0xff] }
 0x3e0   : > { %v5531_v0 = vsub.f32 -3.0596964, %v5403_v25  ;;  %v5152_v1 = vmul.f32 0.6931472, %v6436_v38  ;;  %v4540_v36 = vpop.xlane.xlu0 %4539  ;;  %v6776_v25 = vld [vmem:[%s6873_s24 + $0x2c8] sm:$0xff]  ;;  %v4766_v59 = vsel %vm4248_vm0, %v4464_v11, 0.0 }
 0x3e1   : > { %v5023_v54 = vadd.f32 1.0, %v4895_v30  ;;  %4740 = vadd.xlane.f32.xlu1 %v4739_v45  ;;  %6445 = vlog2.f32 %v5026_v19  ;;  %v4900_v31 = vmul.f32 %v12795_v48, %v4540_v36  ;;  %v4466_v15 = vmul.f32 %v6776_v25, %v6776_v25  ;;  %v6777_v48 = vld [vmem:[%s6873_s24 + $0x2b0] sm:$0xff] }
 0x3e2   : > { %5660 = vst.msk [vmem:[%s11506_s16 + $0x10] sm:$0xff] %vm5657_vm7, %v5531_v0  ;;  %v5404_v42 = vmul.f32 2.0, %v5152_v1  ;;  %v4531_v56 = vpop.xlane.xlu1 %4530  ;;  %v4757_v0 = vsel %vm4248_vm0, %v4461_v26, 0.0  ;;  %v12799_v1 = vld [vmem:[#allocation136_spill] sm:$0xff] }
 0x3e3   : > { %v6438_v47 = vpop.eup %6437  ;;  %6447 = vlog2.f32 %v5023_v54  ;;  %v4897_v27 = vmul.f32 %v12796_v10, %v4531_v56  ;;  %v5028_v58 = vadd.f32 1.0, %v4900_v31  ;;  %4755 = vadd.xlane.f32.xlu0 %v4754_v3  ;;  %v4463_v31 = vmul.f32 %v6777_v48, %v6777_v48  ;;  %v12800_v56 = vld [vmem:[#allocation11_spill] sm:$0xff] }
 0x3e4   : > { %v5532_v61 = vsub.f32 -3.0596964, %v5404_v42  ;;  %v5156_v12 = vmul.f32 0.6931472, %v6438_v47  ;;  %v4546_v29 = vpop.xlane.xlu0 %4545  ;;  %v4772_v34 = vsel %vm4248_vm0, %v4466_v15, 0.0  ;;  %v12804_v48 = vld [vmem:[#allocation87_spill] sm:$0xff] }
 0x3e5   : > { %v6440_v5 = vpop.eup %6439  ;;  %v5025_v6 = vadd.f32 1.0, %v4897_v27  ;;  %4746 = vadd.xlane.f32.xlu1 %v4745_v23  ;;  %6449 = vlog2.f32 %v5028_v58  ;;  %v4902_v18 = vmul.f32 %v12797_v21, %v4546_v29 }
 0x3e6   : > { %v5148_v41 = vmul.f32 0.6931472, %v6440_v5  ;;  %5661 = vst.msk [vmem:[%s11506_s16 + $0x18] sm:$0xff] %vm5657_vm7, %v5532_v61  ;;  %v5406_v55 = vmul.f32 2.0, %v5156_v12  ;;  %v4537_v16 = vpop.xlane.xlu1 %4536  ;;  %v6778_v61 = vld [vmem:[%s6873_s24 + $0x2d8] sm:$0xff]  ;;  %v6779_v5 = vld [vmem:[%s6873_s24 + $0x2c0] sm:$0xff] }
 0x3e7   : > { %v6442_v32 = vpop.eup %6441  ;;  %6451 = vlog2.f32 %v5025_v6  ;;  %v4899_v63 = vmul.f32 %v12798_v33, %v4537_v16  ;;  %v5030_v7 = vadd.f32 1.0, %v4902_v18  ;;  %4761 = vadd.xlane.f32.xlu0 %v4760_v13  ;;  %v4468_v12 = vmul.f32 %v6778_v61, %v6778_v61  ;;  %v12802_v16 = vld [vmem:[#allocation81_spill] sm:$0xff]  ;;  %v6780_v33 = vld [vmem:[%s6873_s24 + $0x2e8] sm:$0xff] }
 0x3e8   : > { %v5402_v45 = vmul.f32 2.0, %v5148_v41  ;;  %v5534_v60 = vsub.f32 -3.0596964, %v5406_v55  ;;  %v5160_v46 = vmul.f32 0.6931472, %v6442_v32  ;;  %v4552_v38 = vpop.xlane.xlu0 %4551  ;;  %v4465_v6 = vmul.f32 %v6779_v5, %v6779_v5 }
 0x3e9   : > { %v6444_v30 = vpop.eup %6443  ;;  %v5027_v19 = vadd.f32 1.0, %v4899_v63  ;;  %4752 = vadd.xlane.f32.xlu1 %v4751_v57  ;;  %6453 = vlog2.f32 %v5030_v7  ;;  %v4904_v36 = vmul.f32 %v12799_v1, %v4552_v38  ;;  %v4763_v41 = vsel %vm4248_vm0, %v4463_v31, 0.0 }
 0x3ea   : > { %v5530_v3 = vsub.f32 -3.0596964, %v5402_v45  ;;  %v5154_v53 = vmul.f32 0.6931472, %v6444_v30  ;;  %5663 = vst.msk [vmem:[%s11506_s16 + $0x28] sm:$0xff] %vm5657_vm7, %v5534_v60  ;;  %v5408_v37 = vmul.f32 2.0, %v5160_v46  ;;  %v4543_v54 = vpop.xlane.xlu1 %4542  ;;  %v4470_v63 = vmul.f32 %v6780_v33, %v6780_v33 }
 0x3eb   : > { %v6446_v42 = vpop.eup %6445  ;;  %6455 = vlog2.f32 %v5027_v19  ;;  %v4901_v23 = vmul.f32 %v12800_v56, %v4543_v54  ;;  %v5032_v24 = vadd.f32 1.0, %v4904_v36  ;;  %4767 = vadd.xlane.f32.xlu0 %v4766_v59  ;;  %v4778_v60 = vsel %vm4248_vm0, %v4468_v12, 0.0  ;;  %v12803_v30 = vld [vmem:[#allocation145_spill] sm:$0xff] }
 0x3ec   : > { %5659 = vst.msk [vmem:[%s11506_s16 + $0x8] sm:$0xff] %vm5657_vm7, %v5530_v3  ;;  %v5405_v47 = vmul.f32 2.0, %v5154_v53  ;;  %v5536_v10 = vsub.f32 -3.0596964, %v5408_v37  ;;  %v5164_v27 = vmul.f32 0.6931472, %v6446_v42  ;;  %v4558_v58 = vpop.xlane.xlu0 %4557 }
 0x3ed   : > { %v6448_v29 = vpop.eup %6447  ;;  %v5029_v13 = vadd.f32 1.0, %v4901_v23  ;;  %4758 = vadd.xlane.f32.xlu1 %v4757_v0  ;;  %6457 = vlog2.f32 %v5032_v24  ;;  %v4906_v11 = vmul.f32 %v12801_v4, %v4558_v58  ;;  %v4769_v59 = vsel %vm4248_vm0, %v4465_v6, 0.0  ;;  %v6781_v53 = vld [vmem:[%s6873_s24 + $0x2d0] sm:$0xff]  ;;  %v12805_v12 = vld [vmem:[#allocation149_spill] sm:$0xff] }
 0x3ee   : > { %v5533_v21 = vsub.f32 -3.0596964, %v5405_v47  ;;  %v5158_v18 = vmul.f32 0.6931472, %v6448_v29  ;;  %5665 = vst.msk [vmem:[%s11506_s16 + $0x38] sm:$0xff] %vm5657_vm7, %v5536_v10  ;;  %v5410_v8 = vmul.f32 2.0, %v5164_v27  ;;  %v4549_v26 = vpop.xlane.xlu1 %4548  ;;  %v4467_v37 = vmul.f32 %v6781_v53, %v6781_v53 }
 0x3ef   : > { %v6450_v55 = vpop.eup %6449  ;;  %6459 = vlog2.f32 %v5029_v13  ;;  %v4903_v57 = vmul.f32 %v12802_v16, %v4549_v26  ;;  %v5034_v32 = vadd.f32 1.0, %v4906_v11  ;;  %4773 = vadd.xlane.f32.xlu0 %v4772_v34  ;;  %v4784_v56 = vsel %vm4248_vm0, %v4470_v63, 0.0  ;;  %v6782_v10 = vld [vmem:[%s6873_s24 + $0x2f8] sm:$0xff]  ;;  %v6783_v13 = vld [vmem:[%s6873_s24 + $0x2e0] sm:$0xff]  ;;  %v12806_v26 = vld [vmem:[#allocation132_spill] sm:$0xff] }
 0x3f0   : > { %5662 = vst.msk [vmem:[%s11506_s16 + $0x20] sm:$0xff] %vm5657_vm7, %v5533_v21  ;;  %v5407_v7 = vmul.f32 2.0, %v5158_v18  ;;  %v5538_v25 = vsub.f32 -3.0596964, %v5410_v8  ;;  %v5168_v15 = vmul.f32 0.6931472, %v6450_v55  ;;  %v4564_v45 = vpop.xlane.xlu0 %4563  ;;  %v4472_v27 = vmul.f32 %v6782_v10, %v6782_v10 }
 0x3f1   : > { %v6452_v46 = vpop.eup %6451  ;;  %v5031_v38 = vadd.f32 1.0, %v4903_v57  ;;  %4764 = vadd.xlane.f32.xlu1 %v4763_v41  ;;  %6461 = vlog2.f32 %v5034_v32  ;;  %v4908_v19 = vmul.f32 %v12803_v30, %v4564_v45  ;;  %v4469_v4 = vmul.f32 %v6783_v13, %v6783_v13  ;;  %v6784_v16 = vld [vmem:[%s6873_s24 + $0x308] sm:$0xff] }
 0x3f2   : > { %v5535_v0 = vsub.f32 -3.0596964, %v5407_v7  ;;  %v5162_v1 = vmul.f32 0.6931472, %v6452_v46  ;;  %5667 = vst.msk [vmem:[%s11506_s16 + $0x48] sm:$0xff] %vm5657_vm7, %v5538_v25  ;;  %v5412_v36 = vmul.f32 2.0, %v5168_v15  ;;  %v4555_v3 = vpop.xlane.xlu1 %4554  ;;  %v4474_v57 = vmul.f32 %v6784_v16, %v6784_v16 }
 0x3f3   : > { %v6454_v54 = vpop.eup %6453  ;;  %6463 = vlog2.f32 %v5031_v38  ;;  %v4905_v31 = vmul.f32 %v12804_v48, %v4555_v3  ;;  %v5036_v42 = vadd.f32 1.0, %v4908_v19  ;;  %4779 = vadd.xlane.f32.xlu0 %v4778_v60  ;;  %v4775_v18 = vsel %vm4248_vm0, %v4467_v37, 0.0  ;;  %v12807_v46 = vld [vmem:[#allocation99_spill] sm:$0xff] }
 0x3f4   : > { %5664 = vst.msk [vmem:[%s11506_s16 + $0x30] sm:$0xff] %vm5657_vm7, %v5535_v0  ;;  %v5409_v23 = vmul.f32 2.0, %v5162_v1  ;;  %v5540_v24 = vsub.f32 -3.0596964, %v5412_v36  ;;  %v5172_v34 = vmul.f32 0.6931472, %v6454_v54  ;;  %v4570_v47 = vpop.xlane.xlu0 %4569 }
 0x3f5   : > { %v6456_v58 = vpop.eup %6455  ;;  %v5033_v61 = vadd.f32 1.0, %v4905_v31  ;;  %4770 = vadd.xlane.f32.xlu1 %v4769_v59  ;;  %6465 = vlog2.f32 %v5036_v42  ;;  %v4910_v29 = vmul.f32 %v12805_v12, %v4570_v47  ;;  %v4790_v25 = vsel %vm4248_vm0, %v4472_v27, 0.0  ;;  %v6785_v1 = vld [vmem:[%s6873_s24 + $0x2f0] sm:$0xff]  ;;  %v12808_v53 = vld [vmem:[#allocation91_spill] sm:$0xff]  ;;  %v12809_v27 = vld [vmem:[#allocation161_spill] sm:$0xff] }
 0x3f6   : > { %v5537_v11 = vsub.f32 -3.0596964, %v5409_v23  ;;  %v5166_v5 = vmul.f32 0.6931472, %v6456_v58  ;;  %5669 = vst.msk [vmem:[%s11506_s16 + $0x58] sm:$0xff] %vm5657_vm7, %v5540_v24  ;;  %v5414_v6 = vmul.f32 2.0, %v5172_v34  ;;  %v4561_v21 = vpop.xlane.xlu1 %4560  ;;  %v4471_v36 = vmul.f32 %v6785_v1, %v6785_v1 }
 0x3f7   : > { %v6458_v8 = vpop.eup %6457  ;;  %6467 = vlog2.f32 %v5033_v61  ;;  %v4907_v41 = vmul.f32 %v12806_v26, %v4561_v21  ;;  %v5038_v55 = vadd.f32 1.0, %v4910_v29  ;;  %4785 = vadd.xlane.f32.xlu0 %v4784_v56  ;;  %v4781_v60 = vsel %vm4248_vm0, %v4469_v4, 0.0  ;;  %v6786_v24 = vld [vmem:[%s6873_s24 + $0x318] sm:$0xff]  ;;  %v6787_v61 = vld [vmem:[%s6873_s24 + $0x300] sm:$0xff]  ;;  %v12810_v21 = vld [vmem:[#allocation140_spill] sm:$0xff] }
 0x3f8   : > { %5666 = vst.msk [vmem:[%s11506_s16 + $0x40] sm:$0xff] %vm5657_vm7, %v5537_v11  ;;  %v5411_v32 = vmul.f32 2.0, %v5166_v5  ;;  %v5542_v33 = vsub.f32 -3.0596964, %v5414_v6  ;;  %v5176_v63 = vmul.f32 0.6931472, %v6458_v8  ;;  %v4576_v7 = vpop.xlane.xlu0 %4575  ;;  %v4476_v34 = vmul.f32 %v6786_v24, %v6786_v24 }
 0x3f9   : > { %v6460_v15 = vpop.eup %6459  ;;  %v5035_v45 = vadd.f32 1.0, %v4907_v41  ;;  %4776 = vadd.xlane.f32.xlu1 %v4775_v18  ;;  %6469 = vlog2.f32 %v5038_v55  ;;  %v4912_v38 = vmul.f32 %v12807_v46, %v4576_v7  ;;  %v4796_v48 = vsel %vm4248_vm0, %v4474_v57, 0.0  ;;  %v6788_v26 = vld [vmem:[%s6873_s24 + $0x328] sm:$0xff]  ;;  %v12812_v1 = vld [vmem:[#allocation146_spill] sm:$0xff] }
 0x3fa   : > { %v5539_v59 = vsub.f32 -3.0596964, %v5411_v32  ;;  %v5170_v30 = vmul.f32 0.6931472, %v6460_v15  ;;  %5671 = vst.msk [vmem:[%s11506_s16 + $0x68] sm:$0xff] %vm5657_vm7, %v5542_v33  ;;  %v5416_v19 = vmul.f32 2.0, %v5176_v63  ;;  %v4567_v0 = vpop.xlane.xlu1 %4566  ;;  %v4473_v12 = vmul.f32 %v6787_v61, %v6787_v61 }
 0x3fb   : > { %v6462_v3 = vpop.eup %6461  ;;  %6471 = vlog2.f32 %v5035_v45  ;;  %v4909_v37 = vmul.f32 %v12808_v53, %v4567_v0  ;;  %v5040_v54 = vadd.f32 1.0, %v4912_v38  ;;  %4791 = vadd.xlane.f32.xlu0 %v4790_v25  ;;  %v4787_v5 = vsel %vm4248_vm0, %v4471_v36, 0.0  ;;  %v12811_v15 = vld [vmem:[#allocation165_spill] sm:$0xff] }
 0x3fc   : > { %5668 = vst.msk [vmem:[%s11506_s16 + $0x50] sm:$0xff] %vm5657_vm7, %v5539_v59  ;;  %v5413_v31 = vmul.f32 2.0, %v5170_v30  ;;  %v5544_v42 = vsub.f32 -3.0596964, %v5416_v19  ;;  %v5180_v56 = vmul.f32 0.6931472, %v6462_v3  ;;  %v4582_v23 = vpop.xlane.xlu0 %4581  ;;  %v4478_v41 = vmul.f32 %v6788_v26, %v6788_v26 }
 0x3fd   : > { %v6464_v47 = vpop.eup %6463  ;;  %v5037_v10 = vadd.f32 1.0, %v4909_v37  ;;  %4782 = vadd.xlane.f32.xlu1 %v4781_v60  ;;  %6473 = vlog2.f32 %v5040_v54  ;;  %v4914_v58 = vmul.f32 %v12809_v27, %v4582_v23  ;;  %v4802_v33 = vsel %vm4248_vm0, %v4476_v34, 0.0  ;;  %v6789_v30 = vld [vmem:[%s6873_s24 + $0x310] sm:$0xff] }
 0x3fe   : > { %v5541_v29 = vsub.f32 -3.0596964, %v5413_v31  ;;  %v5174_v13 = vmul.f32 0.6931472, %v6464_v47  ;;  %5673 = vst.msk [vmem:[%s11506_s16 + $0x78] sm:$0xff] %vm5657_vm7, %v5544_v42  ;;  %v5418_v4 = vmul.f32 2.0, %v5180_v56  ;;  %v4573_v11 = vpop.xlane.xlu1 %4572  ;;  %v4475_v19 = vmul.f32 %v6789_v30, %v6789_v30 }
 0x3ff   : > { %v6466_v6 = vpop.eup %6465  ;;  %6475 = vlog2.f32 %v5037_v10  ;;  %v4911_v18 = vmul.f32 %v12810_v21, %v4573_v11  ;;  %v5042_v8 = vadd.f32 1.0, %v4914_v58  ;;  %4797 = vadd.xlane.f32.xlu0 %v4796_v48  ;;  %v4793_v25 = vsel %vm4248_vm0, %v4473_v12, 0.0  ;;  %v6790_v42 = vld [vmem:[%s6873_s24 + $0x338] sm:$0xff]  ;;  %v12813_v34 = vld [vmem:[#allocation168_spill] sm:$0xff]  ;;  %v6791_v10 = vld [vmem:[%s6873_s24 + $0x320] sm:$0xff] }
 0x400   : > { %5670 = vst.msk [vmem:[%s11506_s16 + $0x60] sm:$0xff] %vm5657_vm7, %v5541_v29  ;;  %v5415_v55 = vmul.f32 2.0, %v5174_v13  ;;  %v5546_v16 = vsub.f32 -3.0596964, %v5418_v4  ;;  %v5184_v57 = vmul.f32 0.6931472, %v6466_v6  ;;  %v4588_v32 = vpop.xlane.xlu0 %4587  ;;  %v4480_v56 = vmul.f32 %v6790_v42, %v6790_v42 }
 0x401   : > { %v6468_v63 = vpop.eup %6467  ;;  %v5039_v7 = vadd.f32 1.0, %v4911_v18  ;;  %4788 = vadd.xlane.f32.xlu1 %v4787_v5  ;;  %6477 = vlog2.f32 %v5042_v8  ;;  %v4916_v45 = vmul.f32 %v12811_v15, %v4588_v32  ;;  %v4808_v53 = vsel %vm4248_vm0, %v4478_v41, 0.0  ;;  %v12814_v11 = vld [vmem:[#allocation98_spill] sm:$0xff]  ;;  %v6792_v21 = vld [vmem:[%s6873_s24 + $0x348] sm:$0xff] }
 0x402   : > { %v5543_v60 = vsub.f32 -3.0596964, %v5415_v55  ;;  %v5178_v46 = vmul.f32 0.6931472, %v6468_v63  ;;  %5675 = vst.msk [vmem:[%s11506_s16 + $0x88] sm:$0xff] %vm5657_vm7, %v5546_v16  ;;  %v5420_v38 = vmul.f32 2.0, %v5184_v57  ;;  %v4579_v59 = vpop.xlane.xlu1 %4578  ;;  %v4477_v27 = vmul.f32 %v6791_v10, %v6791_v10 }
 0x403   : > { %v6470_v0 = vpop.eup %6469  ;;  %6479 = vlog2.f32 %v5039_v7  ;;  %v4913_v36 = vmul.f32 %v12812_v1, %v4579_v59  ;;  %v5044_v3 = vadd.f32 1.0, %v4916_v45  ;;  %4803 = vadd.xlane.f32.xlu0 %v4802_v33  ;;  %v4799_v13 = vsel %vm4248_vm0, %v4475_v19, 0.0  ;;  %v12815_v63 = vld [vmem:[#allocation173_spill] sm:$0xff]  ;;  %v12816_v30 = vld [vmem:[#allocation158_spill] sm:$0xff] }
 0x404   : > { %5672 = vst.msk [vmem:[%s11506_s16 + $0x70] sm:$0xff] %vm5657_vm7, %v5543_v60  ;;  %v5417_v37 = vmul.f32 2.0, %v5178_v46  ;;  %v5548_v54 = vsub.f32 -3.0596964, %v5420_v38  ;;  %v5188_v48 = vmul.f32 0.6931472, %v6470_v0  ;;  %v4594_v31 = vpop.xlane.xlu0 %4593  ;;  %v4482_v18 = vmul.f32 %v6792_v21, %v6792_v21 }
 0x405   : > { %v6472_v23 = vpop.eup %6471  ;;  %v5041_v24 = vadd.f32 1.0, %v4913_v36  ;;  %4794 = vadd.xlane.f32.xlu1 %v4793_v25  ;;  %6481 = vlog2.f32 %v5044_v3  ;;  %v4918_v47 = vmul.f32 %v12813_v34, %v4594_v31  ;;  %v4814_v16 = vsel %vm4248_vm0, %v4480_v56, 0.0  ;;  %v6793_v46 = vld [vmem:[%s6873_s24 + $0x330] sm:$0xff]  ;;  %v12817_v56 = vld [vmem:[#allocation178_spill] sm:$0xff] }
 0x406   : > { %v5545_v58 = vsub.f32 -3.0596964, %v5417_v37  ;;  %v5182_v61 = vmul.f32 0.6931472, %v6472_v23  ;;  %5677 = vst.msk [vmem:[%s11506_s16 + $0x98] sm:$0xff] %vm5657_vm7, %v5548_v54  ;;  %v5422_v12 = vmul.f32 2.0, %v5188_v48  ;;  %v4585_v29 = vpop.xlane.xlu1 %4584  ;;  %v4479_v38 = vmul.f32 %v6793_v46, %v6793_v46 }
 0x407   : > { %v6474_v4 = vpop.eup %6473  ;;  %6483 = vlog2.f32 %v5041_v24  ;;  %v4915_v5 = vmul.f32 %v12814_v11, %v4585_v29  ;;  %v5046_v6 = vadd.f32 1.0, %v4918_v47  ;;  %4809 = vadd.xlane.f32.xlu0 %v4808_v53  ;;  %v4805_v33 = vsel %vm4248_vm0, %v4477_v27, 0.0  ;;  %v6794_v54 = vld [vmem:[%s6873_s24 + $0x358] sm:$0xff]  ;;  %v6795_v24 = vld [vmem:[%s6873_s24 + $0x340] sm:$0xff]  ;;  %v12818_v29 = vld [vmem:[#allocation164_spill] sm:$0xff] }
 0x408   : > { %5674 = vst.msk [vmem:[%s11506_s16 + $0x80] sm:$0xff] %vm5657_vm7, %v5545_v58  ;;  %v5419_v8 = vmul.f32 2.0, %v5182_v61  ;;  %v5550_v26 = vsub.f32 -3.0596964, %v5422_v12  ;;  %v5192_v41 = vmul.f32 0.6931472, %v6474_v4  ;;  %v4600_v55 = vpop.xlane.xlu0 %4599  ;;  %v4484_v48 = vmul.f32 %v6794_v54, %v6794_v54 }
 0x409   : > { %v6476_v57 = vpop.eup %6475  ;;  %v5043_v32 = vadd.f32 1.0, %v4915_v5  ;;  %4800 = vadd.xlane.f32.xlu1 %v4799_v13  ;;  %6485 = vlog2.f32 %v5046_v6  ;;  %v4920_v7 = vmul.f32 %v12815_v63, %v4600_v55  ;;  %v4820_v1 = vsel %vm4248_vm0, %v4482_v18, 0.0  ;;  %v6796_v11 = vld [vmem:[%s6873_s24 + $0x368] sm:$0xff] }
 0x40a   : > { %v5547_v25 = vsub.f32 -3.0596964, %v5419_v8  ;;  %v5186_v15 = vmul.f32 0.6931472, %v6476_v57  ;;  %5679 = vst.msk [vmem:[%s11506_s16 + $0xa8] sm:$0xff] %vm5657_vm7, %v5550_v26  ;;  %v5424_v45 = vmul.f32 2.0, %v5192_v41  ;;  %v4591_v60 = vpop.xlane.xlu1 %4590  ;;  %v4481_v34 = vmul.f32 %v6795_v24, %v6795_v24 }
 0x40b   : > { %v6478_v59 = vpop.eup %6477  ;;  %6487 = vlog2.f32 %v5043_v32  ;;  %v4917_v19 = vmul.f32 %v12816_v30, %v4591_v60  ;;  %v5048_v0 = vadd.f32 1.0, %v4920_v7  ;;  %4815 = vadd.xlane.f32.xlu0 %v4814_v16  ;;  %v4811_v61 = vsel %vm4248_vm0, %v4479_v38, 0.0  ;;  %v12819_v57 = vld [vmem:[#allocation184_spill] sm:$0xff]  ;;  %v12820_v46 = vld [vmem:[#allocation167_spill] sm:$0xff] }
 0x40c   : > { %5676 = vst.msk [vmem:[%s11506_s16 + $0x90] sm:$0xff] %vm5657_vm7, %v5547_v25  ;;  %v5421_v36 = vmul.f32 2.0, %v5186_v15  ;;  %v5552_v3 = vsub.f32 -3.0596964, %v5424_v45  ;;  %v5196_v53 = vmul.f32 0.6931472, %v6478_v59  ;;  %v4606_v37 = vpop.xlane.xlu0 %4605  ;;  %v4486_v5 = vmul.f32 %v6796_v11, %v6796_v11 }
 0x40d   : > { %v6480_v31 = vpop.eup %6479  ;;  %v5045_v42 = vadd.f32 1.0, %v4917_v19  ;;  %4806 = vadd.xlane.f32.xlu1 %v4805_v33  ;;  %6489 = vlog2.f32 %v5048_v0  ;;  %v4922_v23 = vmul.f32 %v12817_v56, %v4606_v37  ;;  %v4826_v26 = vsel %vm4248_vm0, %v4484_v48, 0.0  ;;  %v6797_v15 = vld [vmem:[%s6873_s24 + $0x350] sm:$0xff]  ;;  %v12821_v48 = vld [vmem:[#allocation189_spill] sm:$0xff] }
 0x40e   : > { %v5549_v47 = vsub.f32 -3.0596964, %v5421_v36  ;;  %v5190_v10 = vmul.f32 0.6931472, %v6480_v31  ;;  %5681 = vst.msk [vmem:[%s11506_s16 + $0xb8] sm:$0xff] %vm5657_vm7, %v5552_v3  ;;  %v5426_v27 = vmul.f32 2.0, %v5196_v53  ;;  %v4597_v58 = vpop.xlane.xlu1 %4596  ;;  %v4483_v45 = vmul.f32 %v6797_v15, %v6797_v15 }
 0x40f   : > { %v6482_v12 = vpop.eup %6481  ;;  %6491 = vlog2.f32 %v5045_v42  ;;  %v4919_v13 = vmul.f32 %v12818_v29, %v4597_v58  ;;  %v5050_v4 = vadd.f32 1.0, %v4922_v23  ;;  %4821 = vadd.xlane.f32.xlu0 %v4820_v1  ;;  %v4817_v16 = vsel %vm4248_vm0, %v4481_v34, 0.0  ;;  %v6798_v3 = vld [vmem:[%s6873_s24 + $0x378] sm:$0xff]  ;;  %v6799_v42 = vld [vmem:[%s6873_s24 + $0x360] sm:$0xff]  ;;  %v12822_v58 = vld [vmem:[#allocation171_spill] sm:$0xff] }
 0x410   : > { %5678 = vst.msk [vmem:[%s11506_s16 + $0xa0] sm:$0xff] %vm5657_vm7, %v5549_v47  ;;  %v5423_v6 = vmul.f32 2.0, %v5190_v10  ;;  %v5554_v21 = vsub.f32 -3.0596964, %v5426_v27  ;;  %v5200_v18 = vmul.f32 0.6931472, %v6482_v12  ;;  %v4612_v8 = vpop.xlane.xlu0 %4611  ;;  %v4488_v53 = vmul.f32 %v6798_v3, %v6798_v3 }
 0x411   : > { %v6484_v41 = vpop.eup %6483  ;;  %v5047_v55 = vadd.f32 1.0, %v4919_v13  ;;  %4812 = vadd.xlane.f32.xlu1 %v4811_v61  ;;  %6493 = vlog2.f32 %v5050_v4  ;;  %v4924_v32 = vmul.f32 %v12819_v57, %v4612_v8  ;;  %v4832_v30 = vsel %vm4248_vm0, %v4486_v5, 0.0  ;;  %v6800_v29 = vld [vmem:[%s6873_s24 + $0x388] sm:$0xff]  ;;  %v12824_v15 = vld [vmem:[#allocation176_spill] sm:$0xff] }
 0x412   : > { %v5551_v33 = vsub.f32 -3.0596964, %v5423_v6  ;;  %v5194_v63 = vmul.f32 0.6931472, %v6484_v41  ;;  %5683 = vst.msk [vmem:[%s11506_s16 + $0xc8] sm:$0xff] %vm5657_vm7, %v5554_v21  ;;  %v5428_v7 = vmul.f32 2.0, %v5200_v18  ;;  %v4603_v25 = vpop.xlane.xlu1 %4602  ;;  %v4485_v56 = vmul.f32 %v6799_v42, %v6799_v42 }
 0x413   : > { %v6486_v60 = vpop.eup %6485  ;;  %6495 = vlog2.f32 %v5047_v55  ;;  %v4921_v38 = vmul.f32 %v12820_v46, %v4603_v25  ;;  %v5052_v59 = vadd.f32 1.0, %v4924_v32  ;;  %4827 = vadd.xlane.f32.xlu0 %v4826_v26  ;;  %v4823_v10 = vsel %vm4248_vm0, %v4483_v45, 0.0  ;;  %v12823_v41 = vld [vmem:[#allocation92_spill] sm:$0xff] }
 0x414   : > { %5680 = vst.msk [vmem:[%s11506_s16 + $0xb0] sm:$0xff] %vm5657_vm7, %v5551_v33  ;;  %v5425_v19 = vmul.f32 2.0, %v5194_v63  ;;  %v5556_v0 = vsub.f32 -3.0596964, %v5428_v7  ;;  %v5204_v1 = vmul.f32 0.6931472, %v6486_v60  ;;  %v4618_v36 = vpop.xlane.xlu0 %4617  ;;  %v4490_v13 = vmul.f32 %v6800_v29, %v6800_v29 }
 0x415   : > { %v6488_v37 = vpop.eup %6487  ;;  %v5049_v54 = vadd.f32 1.0, %v4921_v38  ;;  %4818 = vadd.xlane.f32.xlu1 %v4817_v16  ;;  %6497 = vlog2.f32 %v5052_v59  ;;  %v4926_v31 = vmul.f32 %v12821_v48, %v4618_v36  ;;  %v4838_v21 = vsel %vm4248_vm0, %v4488_v53, 0.0  ;;  %v6801_v63 = vld [vmem:[%s6873_s24 + $0x370] sm:$0xff]  ;;  %v12825_v53 = vld [vmem:[#allocation93_spill] sm:$0xff] }
 0x416   : > { %v5553_v23 = vsub.f32 -3.0596964, %v5425_v19  ;;  %v5198_v24 = vmul.f32 0.6931472, %v6488_v37  ;;  %5685 = vst.msk [vmem:[%s11506_s16 + $0xd8] sm:$0xff] %vm5657_vm7, %v5556_v0  ;;  %v5430_v34 = vmul.f32 2.0, %v5204_v1  ;;  %v4609_v47 = vpop.xlane.xlu1 %4608  ;;  %v4487_v7 = vmul.f32 %v6801_v63, %v6801_v63 }
 0x417   : > { %v6490_v27 = vpop.eup %6489  ;;  %6499 = vlog2.f32 %v5049_v54  ;;  %v4923_v61 = vmul.f32 %v12822_v58, %v4609_v47  ;;  %v5054_v12 = vadd.f32 1.0, %v4926_v31  ;;  %4833 = vadd.xlane.f32.xlu0 %v4832_v30  ;;  %v4829_v26 = vsel %vm4248_vm0, %v4485_v56, 0.0  ;;  %v6802_v0 = vld [vmem:[%s6873_s24 + $0x398] sm:$0xff]  ;;  %v6803_v54 = vld [vmem:[%s6873_s24 + $0x380] sm:$0xff]  ;;  %v12826_v47 = vld [vmem:[#allocation180_spill] sm:$0xff] }
 0x418   : > { %5682 = vst.msk [vmem:[%s11506_s16 + $0xc0] sm:$0xff] %vm5657_vm7, %v5553_v23  ;;  %v5427_v4 = vmul.f32 2.0, %v5198_v24  ;;  %v5558_v11 = vsub.f32 -3.0596964, %v5430_v34  ;;  %v5208_v5 = vmul.f32 0.6931472, %v6490_v27  ;;  %v4624_v6 = vpop.xlane.xlu0 %4623  ;;  %v4492_v1 = vmul.f32 %v6802_v0, %v6802_v0 }
 0x419   : > { %v6492_v18 = vpop.eup %6491  ;;  %v5051_v8 = vadd.f32 1.0, %v4923_v61  ;;  %4824 = vadd.xlane.f32.xlu1 %v4823_v10  ;;  %6501 = vlog2.f32 %v5054_v12  ;;  %v4928_v55 = vmul.f32 %v12823_v41, %v4624_v6  ;;  %v4844_v46 = vsel %vm4248_vm0, %v4490_v13, 0.0  ;;  %v6804_v58 = vld [vmem:[%s6873_s24 + $0x3a8] sm:$0xff]  ;;  %v12828_v63 = vld [vmem:[#allocation186_spill] sm:$0xff] }
 0x41a   : > { %v5555_v16 = vsub.f32 -3.0596964, %v5427_v4  ;;  %v5202_v57 = vmul.f32 0.6931472, %v6492_v18  ;;  %5687 = vst.msk [vmem:[%s11506_s16 + $0xe8] sm:$0xff] %vm5657_vm7, %v5558_v11  ;;  %v5432_v32 = vmul.f32 2.0, %v5208_v5  ;;  %v4615_v33 = vpop.xlane.xlu1 %4614  ;;  %v4489_v48 = vmul.f32 %v6803_v54, %v6803_v54 }
 0x41b   : > { %v6494_v25 = vpop.eup %6493  ;;  %6503 = vlog2.f32 %v5051_v8  ;;  %v4925_v45 = vmul.f32 %v12824_v15, %v4615_v33  ;;  %v5056_v60 = vadd.f32 1.0, %v4928_v55  ;;  %4839 = vadd.xlane.f32.xlu0 %v4838_v21  ;;  %v4835_v24 = vsel %vm4248_vm0, %v4487_v7, 0.0  ;;  %v12827_v18 = vld [vmem:[#allocation96_spill] sm:$0xff] }
 0x41c   : > { %5684 = vst.msk [vmem:[%s11506_s16 + $0xd0] sm:$0xff] %vm5657_vm7, %v5555_v16  ;;  %v5429_v38 = vmul.f32 2.0, %v5202_v57  ;;  %v5560_v59 = vsub.f32 -3.0596964, %v5432_v32  ;;  %v5212_v30 = vmul.f32 0.6931472, %v6494_v25  ;;  %v4630_v19 = vpop.xlane.xlu0 %4629  ;;  %v4494_v61 = vmul.f32 %v6804_v58, %v6804_v58 }
 0x41d   : > { %v6496_v36 = vpop.eup %6495  ;;  %v5053_v3 = vadd.f32 1.0, %v4925_v45  ;;  %4830 = vadd.xlane.f32.xlu1 %v4829_v26  ;;  %6505 = vlog2.f32 %v5056_v60  ;;  %v4930_v37 = vmul.f32 %v12825_v53, %v4630_v19  ;;  %v4850_v11 = vsel %vm4248_vm0, %v4492_v1, 0.0  ;;  %v6805_v57 = vld [vmem:[%s6873_s24 + $0x390] sm:$0xff]  ;;  %v12829_v1 = vld [vmem:[#allocation193_spill] sm:$0xff] }
 0x41e   : > { %v5557_v31 = vsub.f32 -3.0596964, %v5429_v38  ;;  %v5206_v42 = vmul.f32 0.6931472, %v6496_v36  ;;  %5689 = vst.msk [vmem:[%s11506_s16 + $0xf8] sm:$0xff] %vm5657_vm7, %v5560_v59  ;;  %v5434_v56 = vmul.f32 2.0, %v5212_v30  ;;  %v4621_v23 = vpop.xlane.xlu1 %4620  ;;  %v4491_v32 = vmul.f32 %v6805_v57, %v6805_v57 }
 0x41f   : > { %v6498_v34 = vpop.eup %6497  ;;  %6507 = vlog2.f32 %v5053_v3  ;;  %v4927_v10 = vmul.f32 %v12826_v47, %v4621_v23  ;;  %v5058_v27 = vadd.f32 1.0, %v4930_v37  ;;  %4845 = vadd.xlane.f32.xlu0 %v4844_v46  ;;  %v4841_v21 = vsel %vm4248_vm0, %v4489_v48, 0.0  ;;  %v6806_v59 = vld [vmem:[%s6873_s24 + $0x3b8] sm:$0xff]  ;;  %v6807_v3 = vld [vmem:[%s6873_s24 + $0x3a0] sm:$0xff]  ;;  %v6808_v47 = vld [vmem:[%s6873_s24 + $0x3c8] sm:$0xff] }
 0x420   : > { %5686 = vst.msk [vmem:[%s11506_s16 + $0xe0] sm:$0xff] %vm5657_vm7, %v5557_v31  ;;  %v5431_v12 = vmul.f32 2.0, %v5206_v42  ;;  %v5562_v29 = vsub.f32 -3.0596964, %v5434_v56  ;;  %v5216_v13 = vmul.f32 0.6931472, %v6498_v34  ;;  %v4636_v4 = vpop.xlane.xlu0 %4635  ;;  %v4496_v30 = vmul.f32 %v6806_v59, %v6806_v59 }
 0x421   : > { %v6500_v5 = vpop.eup %6499  ;;  %v5055_v6 = vadd.f32 1.0, %v4927_v10  ;;  %4836 = vadd.xlane.f32.xlu1 %v4835_v24  ;;  %6509 = vlog2.f32 %v5058_v27  ;;  %v4932_v8 = vmul.f32 %v12827_v18, %v4636_v4  ;;  %v4856_v15 = vsel %vm4248_vm0, %v4494_v61, 0.0  ;;  %v12830_v23 = vld [vmem:[#allocation138_spill] sm:$0xff]  ;;  %v12832_v57 = vld [vmem:[#allocation137_spill] sm:$0xff] }
 0x422   : > { %v5559_v26 = vsub.f32 -3.0596964, %v5431_v12  ;;  %v5210_v41 = vmul.f32 0.6931472, %v6500_v5  ;;  %5691 = vst.msk [vmem:[%s11506_s16 + $0x108] sm:$0xff] %vm5657_vm7, %v5562_v29  ;;  %v5436_v55 = vmul.f32 2.0, %v5216_v13  ;;  %v4627_v16 = vpop.xlane.xlu1 %4626  ;;  %v4493_v53 = vmul.f32 %v6807_v3, %v6807_v3 }
 0x423   : > { %v6502_v33 = vpop.eup %6501  ;;  %6511 = vlog2.f32 %v5055_v6  ;;  %v4929_v7 = vmul.f32 %v12828_v63, %v4627_v16  ;;  %v5060_v25 = vadd.f32 1.0, %v4932_v8  ;;  %4851 = vadd.xlane.f32.xlu0 %v4850_v11  ;;  %v4847_v42 = vsel %vm4248_vm0, %v4491_v32, 0.0  ;;  %v12831_v5 = vld [vmem:[#allocation197_spill] sm:$0xff] }
 0x424   : > { %5688 = vst.msk [vmem:[%s11506_s16 + $0xf0] sm:$0xff] %vm5657_vm7, %v5559_v26  ;;  %v5433_v45 = vmul.f32 2.0, %v5210_v41  ;;  %v5564_v60 = vsub.f32 -3.0596964, %v5436_v55  ;;  %v5220_v46 = vmul.f32 0.6931472, %v6502_v33  ;;  %v4642_v38 = vpop.xlane.xlu0 %4641  ;;  %v4498_v10 = vmul.f32 %v6808_v47, %v6808_v47 }
 0x425   : > { %v6504_v19 = vpop.eup %6503  ;;  %v5057_v0 = vadd.f32 1.0, %v4929_v7  ;;  %4842 = vadd.xlane.f32.xlu1 %v4841_v21  ;;  %6513 = vlog2.f32 %v5060_v25  ;;  %v4934_v36 = vmul.f32 %v12829_v1, %v4642_v38  ;;  %v4862_v29 = vsel %vm4248_vm0, %v4496_v30, 0.0  ;;  %v6809_v41 = vld [vmem:[%s6873_s24 + $0x3b0] sm:$0xff]  ;;  %v12833_v30 = vld [vmem:[#allocation199_spill] sm:$0xff] }
 0x426   : > { %v5561_v37 = vsub.f32 -3.0596964, %v5433_v45  ;;  %v5214_v54 = vmul.f32 0.6931472, %v6504_v19  ;;  %5693 = vst.msk [vmem:[%s11506_s16 + $0x118] sm:$0xff] %vm5657_vm7, %v5564_v60  ;;  %v5438_v48 = vmul.f32 2.0, %v5220_v46  ;;  %v4633_v31 = vpop.xlane.xlu1 %4632  ;;  %v4495_v55 = vmul.f32 %v6809_v41, %v6809_v41 }
 0x427   : > { %v6506_v56 = vpop.eup %6505  ;;  %6515 = vlog2.f32 %v5057_v0  ;;  %v4931_v24 = vmul.f32 %v12830_v23, %v4633_v31  ;;  %v5062_v34 = vadd.f32 1.0, %v4934_v36  ;;  %4857 = vadd.xlane.f32.xlu0 %v4856_v15  ;;  %v4853_v11 = vsel %vm4248_vm0, %v4493_v53, 0.0  ;;  %v6810_v60 = vld [vmem:[%s6873_s24 + $0x3d8] sm:$0xff]  ;;  %v6811_v0 = vld [vmem:[%s6873_s24 + $0x3c0] sm:$0xff]  ;;  %v12834_v31 = vld [vmem:[#allocation144_spill] sm:$0xff] }
 0x428   : > { %5690 = vst.msk [vmem:[%s11506_s16 + $0x100] sm:$0xff] %vm5657_vm7, %v5561_v37  ;;  %v5435_v27 = vmul.f32 2.0, %v5214_v54  ;;  %v5566_v58 = vsub.f32 -3.0596964, %v5438_v48  ;;  %v5224_v61 = vmul.f32 0.6931472, %v6506_v56  ;;  %v4648_v12 = vpop.xlane.xlu0 %4647  ;;  %v4500_v46 = vmul.f32 %v6810_v60, %v6810_v60 }
 0x429   : > { %v6508_v13 = vpop.eup %6507  ;;  %v5059_v4 = vadd.f32 1.0, %v4931_v24  ;;  %4848 = vadd.xlane.f32.xlu1 %v4847_v42  ;;  %6517 = vlog2.f32 %v5062_v34  ;;  %v4936_v6 = vmul.f32 %v12831_v5, %v4648_v12  ;;  %v4868_v63 = vsel %vm4248_vm0, %v4498_v10, 0.0  ;;  %v6812_v23 = vld [vmem:[%s6873_s24 + $0x3e8] sm:$0xff]  ;;  %v12836_v41 = vld [vmem:[#allocation150_spill] sm:$0xff] }
 0x42a   : > { %v5563_v21 = vsub.f32 -3.0596964, %v5435_v27  ;;  %v5218_v18 = vmul.f32 0.6931472, %v6508_v13  ;;  %5695 = vst.msk [vmem:[%s11506_s16 + $0x128] sm:$0xff] %vm5657_vm7, %v5566_v58  ;;  %v5440_v8 = vmul.f32 2.0, %v5224_v61  ;;  %v4639_v26 = vpop.xlane.xlu1 %4638  ;;  %v4497_v1 = vmul.f32 %v6811_v0, %v6811_v0 }
 0x42b   : > { %v6510_v16 = vpop.eup %6509  ;;  %6519 = vlog2.f32 %v5059_v4  ;;  %v4933_v32 = vmul.f32 %v12832_v57, %v4639_v26  ;;  %v5064_v33 = vadd.f32 1.0, %v4936_v6  ;;  %4863 = vadd.xlane.f32.xlu0 %v4862_v29  ;;  %v4859_v54 = vsel %vm4248_vm0, %v4495_v55, 0.0  ;;  %v12835_v13 = vld [vmem:[#allocation202_spill] sm:$0xff] }
 0x42c   : > { %5692 = vst.msk [vmem:[%s11506_s16 + $0x110] sm:$0xff] %vm5657_vm7, %v5563_v21  ;;  %v5437_v7 = vmul.f32 2.0, %v5218_v18  ;;  %v5568_v25 = vsub.f32 -3.0596964, %v5440_v8  ;;  %v5228_v15 = vmul.f32 0.6931472, %v6510_v16  ;;  %v4654_v45 = vpop.xlane.xlu0 %4653  ;;  %v4502_v24 = vmul.f32 %v6812_v23, %v6812_v23 }
 0x42d   : > { %v6512_v38 = vpop.eup %6511  ;;  %v5061_v59 = vadd.f32 1.0, %v4933_v32  ;;  %4854 = vadd.xlane.f32.xlu1 %v4853_v11  ;;  %6521 = vlog2.f32 %v5064_v33  ;;  %v4938_v19 = vmul.f32 %v12833_v30, %v4654_v45  ;;  %v4874_v58 = vsel %vm4248_vm0, %v4500_v46, 0.0  ;;  %v6813_v18 = vld [vmem:[%s6873_s24 + $0x3d0] sm:$0xff]  ;;  %v12837_v46 = vld [vmem:[#allocation209_spill] sm:$0xff] }
 0x42e   : > { %v5565_v36 = vsub.f32 -3.0596964, %v5437_v7  ;;  %v5222_v3 = vmul.f32 0.6931472, %v6512_v38  ;;  %5697 = vst.msk [vmem:[%s11506_s16 + $0x138] sm:$0xff] %vm5657_vm7, %v5568_v25  ;;  %v5442_v53 = vmul.f32 2.0, %v5228_v15  ;;  %v4645_v37 = vpop.xlane.xlu1 %4644  ;;  %v4499_v8 = vmul.f32 %v6813_v18, %v6813_v18 }
 0x42f   : > { %v6514_v48 = vpop.eup %6513  ;;  %6523 = vlog2.f32 %v5061_v59  ;;  %v4935_v42 = vmul.f32 %v12834_v31, %v4645_v37  ;;  %v5066_v56 = vadd.f32 1.0, %v4938_v19  ;;  %4869 = vadd.xlane.f32.xlu0 %v4868_v63  ;;  %v4865_v29 = vsel %vm4248_vm0, %v4497_v1, 0.0  ;;  %v6814_v25 = vld [vmem:[%s6873_s24 + $0x3f8] sm:$0xff]  ;;  %v6815_v59 = vld [vmem:[%s6873_s24 + $0x3e0] sm:$0xff]  ;;  %v12838_v37 = vld [vmem:[#allocation195_spill] sm:$0xff] }
 0x430   : > { %5694 = vst.msk [vmem:[%s11506_s16 + $0x120] sm:$0xff] %vm5657_vm7, %v5565_v36  ;;  %v5439_v34 = vmul.f32 2.0, %v5222_v3  ;;  %v5570_v47 = vsub.f32 -3.0596964, %v5442_v53  ;;  %v5232_v10 = vmul.f32 0.6931472, %v6514_v48  ;;  %v4660_v27 = vpop.xlane.xlu0 %4659  ;;  %v4504_v15 = vmul.f32 %v6814_v25, %v6814_v25 }
 0x431   : > { %v6516_v61 = vpop.eup %6515  ;;  %v5063_v12 = vadd.f32 1.0, %v4935_v42  ;;  %4860 = vadd.xlane.f32.xlu1 %v4859_v54  ;;  %6525 = vlog2.f32 %v5066_v56  ;;  %v4940_v4 = vmul.f32 %v12835_v13, %v4660_v27  ;;  %v4880_v57 = vsel %vm4248_vm0, %v4502_v24, 0.0  ;;  %v12839_v27 = vld [vmem:[#allocation211_spill] sm:$0xff] }
 0x432   : > { %v5567_v11 = vsub.f32 -3.0596964, %v5439_v34  ;;  %v5226_v5 = vmul.f32 0.6931472, %v6516_v61  ;;  %5699 = vst.msk [vmem:[%s11506_s16 + $0x148] sm:$0xff] %vm5657_vm7, %v5570_v47  ;;  %v5444_v6 = vmul.f32 2.0, %v5232_v10  ;;  %v4651_v21 = vpop.xlane.xlu1 %4650  ;;  %v4501_v30 = vmul.f32 %v6815_v59, %v6815_v59 }
 0x433   : > { %v6518_v26 = vpop.eup %6517  ;;  %6527 = vlog2.f32 %v5063_v12  ;;  %v4937_v55 = vmul.f32 %v12836_v41, %v4651_v21  ;;  %v5068_v16 = vadd.f32 1.0, %v4940_v4  ;;  %4875 = vadd.xlane.f32.xlu0 %v4874_v58  ;;  %v4871_v3 = vsel %vm4248_vm0, %v4499_v8, 0.0  ;;  %v6816_v4 = vld [vmem:[%s6873_s24 + $0x3f0] sm:$0xff] }
 0x434   : > { %5696 = vst.msk [vmem:[%s11506_s16 + $0x130] sm:$0xff] %vm5657_vm7, %v5567_v11  ;;  %v5441_v32 = vmul.f32 2.0, %v5226_v5  ;;  %v5572_v33 = vsub.f32 -3.0596964, %v5444_v6  ;;  %v5236_v63 = vmul.f32 0.6931472, %v6518_v26  ;;  %v4666_v7 = vpop.xlane.xlu0 %4665  ;;  %v4503_v11 = vmul.f32 %v6816_v4, %v6816_v4 }
 0x435   : > { %v6520_v45 = vpop.eup %6519  ;;  %v5065_v60 = vadd.f32 1.0, %v4937_v55  ;;  %4866 = vadd.xlane.f32.xlu1 %v4865_v29  ;;  %6529 = vlog2.f32 %v5068_v16  ;;  %v4942_v38 = vmul.f32 %v12837_v46, %v4666_v7  ;;  %v4886_v24 = vsel %vm4248_vm0, %v4504_v15, 0.0  ;;  %v12840_v6 = vld [vmem:[#allocation198_spill] sm:$0xff]  ;;  %v12842_v46 = vld [vmem:[#allocation201_spill] sm:$0xff] }
 0x436   : > { %v5569_v19 = vsub.f32 -3.0596964, %v5441_v32  ;;  %v5230_v0 = vmul.f32 0.6931472, %v6520_v45  ;;  %5701 = vst.msk [vmem:[%s11506_s16 + $0x158] sm:$0xff] %vm5657_vm7, %v5572_v33  ;;  %v5446_v1 = vmul.f32 2.0, %v5236_v63  ;;  %v4657_v36 = vpop.xlane.xlu1 %4656 }
 0x437   : > { %v6522_v53 = vpop.eup %6521  ;;  %6531 = vlog2.f32 %v5065_v60  ;;  %v4939_v54 = vmul.f32 %v12838_v37, %v4657_v36  ;;  %v5070_v48 = vadd.f32 1.0, %v4942_v38  ;;  %4881 = vadd.xlane.f32.xlu0 %v4880_v57  ;;  %v4877_v10 = vsel %vm4248_vm0, %v4501_v30, 0.0  ;;  %v12841_v32 = vld [vmem:[#allocation89_spill] sm:$0xff] }
 0x438   : > { %5698 = vst.msk [vmem:[%s11506_s16 + $0x140] sm:$0xff] %vm5657_vm7, %v5569_v19  ;;  %v5443_v31 = vmul.f32 2.0, %v5230_v0  ;;  %v5574_v42 = vsub.f32 -3.0596964, %v5446_v1  ;;  %v5240_v56 = vmul.f32 0.6931472, %v6522_v53  ;;  %v4672_v23 = vpop.xlane.xlu0 %4671 }
 0x439   : > { %v6524_v34 = vpop.eup %6523  ;;  %v5067_v47 = vadd.f32 1.0, %v4939_v54  ;;  %4872 = vadd.xlane.f32.xlu1 %v4871_v3  ;;  %6533 = vlog2.f32 %v5070_v48  ;;  %v4944_v58 = vmul.f32 %v12839_v27, %v4672_v23  ;;  %v4883_v45 = vsel %vm4248_vm0, %v4503_v11, 0.0  ;;  %v12843_v53 = vld [vmem:[#allocation215_spill] sm:$0xff]  ;;  %v12844_v23 = vld [vmem:[#allocation208_spill] sm:$0xff] }
 0x43a   : > { %v5571_v61 = vsub.f32 -3.0596964, %v5443_v31  ;;  %v5234_v12 = vmul.f32 0.6931472, %v6524_v34  ;;  %5703 = vst.msk [vmem:[%s11506_s16 + $0x168] sm:$0xff] %vm5657_vm7, %v5574_v42  ;;  %v5448_v29 = vmul.f32 2.0, %v5240_v56  ;;  %v4663_v13 = vpop.xlane.xlu1 %4662 }
 0x43b   : > { %v6526_v5 = vpop.eup %6525  ;;  %6535 = vlog2.f32 %v5067_v47  ;;  %v4941_v21 = vmul.f32 %v12840_v6, %v4663_v13  ;;  %v5072_v18 = vadd.f32 1.0, %v4944_v58  ;;  %4887 = vadd.xlane.f32.xlu0 %v4886_v24 }
 0x43c   : > { %5700 = vst.msk [vmem:[%s11506_s16 + $0x150] sm:$0xff] %vm5657_vm7, %v5571_v61  ;;  %v5445_v8 = vmul.f32 2.0, %v5234_v12  ;;  %v5576_v26 = vsub.f32 -3.0596964, %v5448_v29  ;;  %v5244_v41 = vmul.f32 0.6931472, %v6526_v5  ;;  %v4678_v55 = vpop.xlane.xlu0 %4677 }
 0x43d   : > { %v6528_v16 = vpop.eup %6527  ;;  %v5069_v57 = vadd.f32 1.0, %v4941_v21  ;;  %4878 = vadd.xlane.f32.xlu1 %v4877_v10  ;;  %6537 = vlog2.f32 %v5072_v18  ;;  %v4946_v33 = vmul.f32 %v12841_v32, %v4678_v55  ;;  %v12845_v29 = vld [vmem:[#allocation217_spill] sm:$0xff]  ;;  %v12846_v18 = vld [vmem:[#allocation210_spill] sm:$0xff] }
 0x43e   : > { %v5573_v63 = vsub.f32 -3.0596964, %v5445_v8  ;;  %v5238_v7 = vmul.f32 0.6931472, %v6528_v16  ;;  %5705 = vst.msk [vmem:[%s11506_s16 + $0x178] sm:$0xff] %vm5657_vm7, %v5576_v26  ;;  %v5450_v25 = vmul.f32 2.0, %v5244_v41  ;;  %v4669_v15 = vpop.xlane.xlu1 %4668 }
 0x43f   : > { %v6530_v60 = vpop.eup %6529  ;;  %6539 = vlog2.f32 %v5069_v57  ;;  %v4943_v38 = vmul.f32 %v12842_v46, %v4669_v15  ;;  %v5074_v59 = vadd.f32 1.0, %v4946_v33 }
 0x440   : > { %5702 = vst.msk [vmem:[%s11506_s16 + $0x160] sm:$0xff] %vm5657_vm7, %v5573_v63  ;;  %v5447_v30 = vmul.f32 2.0, %v5238_v7  ;;  %v5578_v19 = vsub.f32 -3.0596964, %v5450_v25  ;;  %v5248_v0 = vmul.f32 0.6931472, %v6530_v60  ;;  %v4684_v1 = vpop.xlane.xlu0 %4683 }
 0x441   : > { %v6532_v36 = vpop.eup %6531  ;;  %v5071_v3 = vadd.f32 1.0, %v4943_v38  ;;  %4884 = vadd.xlane.f32.xlu1 %v4883_v45  ;;  %6541 = vlog2.f32 %v5074_v59  ;;  %v4948_v37 = vmul.f32 %v12843_v53, %v4684_v1  ;;  %v12847_v63 = vld [vmem:[#allocation220_spill] sm:$0xff]  ;;  %v12848_v38 = vld [vmem:[#allocation214_spill] sm:$0xff] }
 0x442   : > { %v5575_v54 = vsub.f32 -3.0596964, %v5447_v30  ;;  %v5242_v48 = vmul.f32 0.6931472, %v6532_v36  ;;  %5707 = vst.msk [vmem:[%s11506_s16 + $0x188] sm:$0xff] %vm5657_vm7, %v5578_v19  ;;  %v5452_v31 = vmul.f32 2.0, %v5248_v0  ;;  %v4675_v42 = vpop.xlane.xlu1 %4674 }
 0x443   : > { %v6534_v56 = vpop.eup %6533  ;;  %6543 = vlog2.f32 %v5071_v3  ;;  %v4945_v24 = vmul.f32 %v12844_v23, %v4675_v42  ;;  %v5076_v34 = vadd.f32 1.0, %v4948_v37  ;;  %v12849_v37 = vld [vmem:[#allocation227_spill] sm:$0xff] }
 0x444   : > { %5704 = vst.msk [vmem:[%s11506_s16 + $0x170] sm:$0xff] %vm5657_vm7, %v5575_v54  ;;  %v5449_v47 = vmul.f32 2.0, %v5242_v48  ;;  %v5580_v10 = vsub.f32 -3.0596964, %v5452_v31  ;;  %v5252_v27 = vmul.f32 0.6931472, %v6534_v56  ;;  %v4690_v58 = vpop.xlane.xlu0 %4689 }
 0x445   : > { %v6536_v61 = vpop.eup %6535  ;;  %v5073_v12 = vadd.f32 1.0, %v4945_v24  ;;  %6545 = vlog2.f32 %v5076_v34  ;;  %v4950_v13 = vmul.f32 %v12845_v29, %v4690_v58  ;;  %v12850_v24 = vld [vmem:[#allocation133_spill] sm:$0xff] }
 0x446   : > { %v5577_v4 = vsub.f32 -3.0596964, %v5449_v47  ;;  %v5246_v11 = vmul.f32 0.6931472, %v6536_v61  ;;  %5709 = vst.msk [vmem:[%s11506_s16 + $0x198] sm:$0xff] %vm5657_vm7, %v5580_v10  ;;  %v5454_v5 = vmul.f32 2.0, %v5252_v27  ;;  %v4681_v6 = vpop.xlane.xlu1 %4680 }
 0x447   : > { %v6538_v21 = vpop.eup %6537  ;;  %6547 = vlog2.f32 %v5073_v12  ;;  %v4947_v8 = vmul.f32 %v12846_v18, %v4681_v6  ;;  %v5078_v26 = vadd.f32 1.0, %v4950_v13  ;;  %v12851_v13 = vld [vmem:[#allocation231_spill] sm:$0xff] }
 0x448   : > { %5706 = vst.msk [vmem:[%s11506_s16 + $0x180] sm:$0xff] %vm5657_vm7, %v5577_v4  ;;  %v5451_v41 = vmul.f32 2.0, %v5246_v11  ;;  %v5582_v55 = vsub.f32 -3.0596964, %v5454_v5  ;;  %v5256_v16 = vmul.f32 0.6931472, %v6538_v21  ;;  %v4696_v57 = vpop.xlane.xlu0 %4695 }
 0x449   : > { %v6540_v32 = vpop.eup %6539  ;;  %v5075_v33 = vadd.f32 1.0, %v4947_v8  ;;  %6549 = vlog2.f32 %v5078_v26  ;;  %v4952_v7 = vmul.f32 %v12847_v63, %v4696_v57  ;;  %v12852_v8 = vld [vmem:[#allocation216_spill] sm:$0xff] }
 0x44a   : > { %v5579_v25 = vsub.f32 -3.0596964, %v5451_v41  ;;  %v5250_v15 = vmul.f32 0.6931472, %v6540_v32  ;;  %5711 = vst.msk [vmem:[%s11506_s16 + $0x1a8] sm:$0xff] %vm5657_vm7, %v5582_v55  ;;  %v5456_v45 = vmul.f32 2.0, %v5256_v16  ;;  %v4687_v60 = vpop.xlane.xlu1 %4686 }
 0x44b   : > { %v6542_v46 = vpop.eup %6541  ;;  %6551 = vlog2.f32 %v5075_v33  ;;  %v4949_v59 = vmul.f32 %v12848_v38, %v4687_v60  ;;  %v5080_v30 = vadd.f32 1.0, %v4952_v7  ;;  %v12853_v7 = vld [vmem:[#allocation234_spill] sm:$0xff] }
 0x44c   : > { %5708 = vst.msk [vmem:[%s11506_s16 + $0x190] sm:$0xff] %vm5657_vm7, %v5579_v25  ;;  %v5453_v19 = vmul.f32 2.0, %v5250_v15  ;;  %v5584_v0 = vsub.f32 -3.0596964, %v5456_v45  ;;  %v5260_v1 = vmul.f32 0.6931472, %v6542_v46  ;;  %v4702_v36 = vpop.xlane.xlu0 %4701 }
 0x44d   : > { %v6544_v3 = vpop.eup %6543  ;;  %v5077_v53 = vadd.f32 1.0, %v4949_v59  ;;  %6553 = vlog2.f32 %v5080_v30  ;;  %v4954_v54 = vmul.f32 %v12849_v37, %v4702_v36  ;;  %v12854_v59 = vld [vmem:[#allocation219_spill] sm:$0xff] }
 0x44e   : > { %v5581_v48 = vsub.f32 -3.0596964, %v5453_v19  ;;  %v5254_v31 = vmul.f32 0.6931472, %v6544_v3  ;;  %5713 = vst.msk [vmem:[%s11506_s16 + $0x1b8] sm:$0xff] %vm5657_vm7, %v5584_v0  ;;  %v5458_v42 = vmul.f32 2.0, %v5260_v1  ;;  %v4693_v56 = vpop.xlane.xlu1 %4692 }
 0x44f   : > { %v6546_v23 = vpop.eup %6545  ;;  %6555 = vlog2.f32 %v5077_v53  ;;  %v4951_v34 = vmul.f32 %v12850_v24, %v4693_v56  ;;  %v5082_v47 = vadd.f32 1.0, %v4954_v54  ;;  %v12855_v54 = vld [vmem:[#allocation238_spill] sm:$0xff] }
 0x450   : > { %5710 = vst.msk [vmem:[%s11506_s16 + $0x1a0] sm:$0xff] %vm5657_vm7, %v5581_v48  ;;  %v5455_v10 = vmul.f32 2.0, %v5254_v31  ;;  %v5586_v27 = vsub.f32 -3.0596964, %v5458_v42  ;;  %v5264_v58 = vmul.f32 0.6931472, %v6546_v23  ;;  %v4708_v61 = vpop.xlane.xlu0 %4707 }
 0x451   : > { %v6548_v12 = vpop.eup %6547  ;;  %v5079_v29 = vadd.f32 1.0, %v4951_v34  ;;  %6557 = vlog2.f32 %v5082_v47  ;;  %v4956_v4 = vmul.f32 %v12851_v13, %v4708_v61  ;;  %v12856_v34 = vld [vmem:[#allocation221_spill] sm:$0xff] }
 0x452   : > { %v5583_v11 = vsub.f32 -3.0596964, %v5455_v10  ;;  %v5258_v5 = vmul.f32 0.6931472, %v6548_v12  ;;  %5715 = vst.msk [vmem:[%s11506_s16 + $0x1c8] sm:$0xff] %vm5657_vm7, %v5586_v27  ;;  %v5460_v6 = vmul.f32 2.0, %v5264_v58  ;;  %v4699_v21 = vpop.xlane.xlu1 %4698 }
 0x453   : > { %v6550_v18 = vpop.eup %6549  ;;  %6559 = vlog2.f32 %v5079_v29  ;;  %v4953_v26 = vmul.f32 %v12852_v8, %v4699_v21  ;;  %v5084_v41 = vadd.f32 1.0, %v4956_v4  ;;  %v12857_v4 = vld [vmem:[#allocation240_spill] sm:$0xff] }
 0x454   : > { %5712 = vst.msk [vmem:[%s11506_s16 + $0x1b0] sm:$0xff] %vm5657_vm7, %v5583_v11  ;;  %v5457_v55 = vmul.f32 2.0, %v5258_v5  ;;  %v5588_v16 = vsub.f32 -3.0596964, %v5460_v6  ;;  %v5268_v57 = vmul.f32 0.6931472, %v6550_v18  ;;  %v4714_v32 = vpop.xlane.xlu0 %4713 }
 0x455   : > { %v6552_v33 = vpop.eup %6551  ;;  %v5081_v63 = vadd.f32 1.0, %v4953_v26  ;;  %6561 = vlog2.f32 %v5084_v41  ;;  %v4958_v25 = vmul.f32 %v12853_v7, %v4714_v32  ;;  %v12858_v26 = vld [vmem:[#allocation230_spill] sm:$0xff] }
 0x456   : > { %v5585_v15 = vsub.f32 -3.0596964, %v5457_v55  ;;  %v5262_v45 = vmul.f32 0.6931472, %v6552_v33  ;;  %5717 = vst.msk [vmem:[%s11506_s16 + $0x1d8] sm:$0xff] %vm5657_vm7, %v5588_v16  ;;  %v5462_v60 = vmul.f32 2.0, %v5268_v57  ;;  %v4705_v46 = vpop.xlane.xlu1 %4704 }
 0x457   : > { %v6554_v38 = vpop.eup %6553  ;;  %6563 = vlog2.f32 %v5081_v63  ;;  %v4955_v30 = vmul.f32 %v12854_v59, %v4705_v46  ;;  %v5086_v19 = vadd.f32 1.0, %v4958_v25  ;;  %v12859_v25 = vld [vmem:[#allocation242_spill] sm:$0xff] }
 0x458   : > { %5714 = vst.msk [vmem:[%s11506_s16 + $0x1c0] sm:$0xff] %vm5657_vm7, %v5585_v15  ;;  %v5459_v0 = vmul.f32 2.0, %v5262_v45  ;;  %v5590_v1 = vsub.f32 -3.0596964, %v5462_v60  ;;  %v5272_v36 = vmul.f32 0.6931472, %v6554_v38  ;;  %v4720_v3 = vpop.xlane.xlu0 %4719 }
 0x459   : > { %v6556_v53 = vpop.eup %6555  ;;  %v5083_v37 = vadd.f32 1.0, %v4955_v30  ;;  %6565 = vlog2.f32 %v5086_v19  ;;  %v4960_v48 = vmul.f32 %v12855_v54, %v4720_v3  ;;  %v12860_v30 = vld [vmem:[#allocation233_spill] sm:$0xff] }
 0x45a   : > { %v5587_v31 = vsub.f32 -3.0596964, %v5459_v0  ;;  %v5266_v42 = vmul.f32 0.6931472, %v6556_v53  ;;  %5719 = vst.msk [vmem:[%s11506_s16 + $0x1e8] sm:$0xff] %vm5657_vm7, %v5590_v1  ;;  %v5464_v56 = vmul.f32 2.0, %v5272_v36  ;;  %v4711_v23 = vpop.xlane.xlu1 %4710 }
 0x45b   : > { %v6558_v24 = vpop.eup %6557  ;;  %6567 = vlog2.f32 %v5083_v37  ;;  %v4957_v47 = vmul.f32 %v12856_v34, %v4711_v23  ;;  %v5088_v10 = vadd.f32 1.0, %v4960_v48  ;;  %v12861_v48 = vld [vmem:[#allocation246_spill] sm:$0xff] }
 0x45c   : > { %5716 = vst.msk [vmem:[%s11506_s16 + $0x1d0] sm:$0xff] %vm5657_vm7, %v5587_v31  ;;  %v5461_v27 = vmul.f32 2.0, %v5266_v42  ;;  %v5592_v58 = vsub.f32 -3.0596964, %v5464_v56  ;;  %v5276_v61 = vmul.f32 0.6931472, %v6558_v24  ;;  %v4726_v12 = vpop.xlane.xlu0 %4725 }
 0x45d   : > { %v6560_v29 = vpop.eup %6559  ;;  %v5085_v13 = vadd.f32 1.0, %v4957_v47  ;;  %6569 = vlog2.f32 %v5088_v10  ;;  %v4962_v11 = vmul.f32 %v12857_v4, %v4726_v12  ;;  %v12862_v47 = vld [vmem:[#allocation235_spill] sm:$0xff] }
 0x45e   : > { %v5589_v5 = vsub.f32 -3.0596964, %v5461_v27  ;;  %v5270_v6 = vmul.f32 0.6931472, %v6560_v29  ;;  %5721 = vst.msk [vmem:[%s11506_s16 + $0x1f8] sm:$0xff] %vm5657_vm7, %v5592_v58  ;;  %v5466_v21 = vmul.f32 2.0, %v5276_v61  ;;  %v4717_v18 = vpop.xlane.xlu1 %4716 }
 0x45f   : > { %v6562_v8 = vpop.eup %6561  ;;  %6571 = vlog2.f32 %v5085_v13  ;;  %v4959_v41 = vmul.f32 %v12858_v26, %v4717_v18  ;;  %v5090_v55 = vadd.f32 1.0, %v4962_v11  ;;  %v12863_v11 = vld [vmem:[#allocation254_spill] sm:$0xff] }
 0x460   : > { %5718 = vst.msk [vmem:[%s11506_s16 + $0x1e0] sm:$0xff] %vm5657_vm7, %v5589_v5  ;;  %v5463_v16 = vmul.f32 2.0, %v5270_v6  ;;  %v5594_v57 = vsub.f32 -3.0596964, %v5466_v21  ;;  %v5280_v32 = vmul.f32 0.6931472, %v6562_v8  ;;  %v4732_v33 = vpop.xlane.xlu0 %4731 }
 0x461   : > { %v6564_v63 = vpop.eup %6563  ;;  %v5087_v7 = vadd.f32 1.0, %v4959_v41  ;;  %6573 = vlog2.f32 %v5090_v55  ;;  %v4964_v15 = vmul.f32 %v12859_v25, %v4732_v33  ;;  %v12864_v41 = vld [vmem:[#allocation239_spill] sm:$0xff] }
 0x462   : > { %v5591_v45 = vsub.f32 -3.0596964, %v5463_v16  ;;  %v5274_v60 = vmul.f32 0.6931472, %v6564_v63  ;;  %5723 = vst.msk [vmem:[%s11506_s16 + $0x208] sm:$0xff] %vm5657_vm7, %v5594_v57  ;;  %v5468_v46 = vmul.f32 2.0, %v5280_v32  ;;  %v4723_v38 = vpop.xlane.xlu1 %4722 }
 0x463   : > { %v6566_v59 = vpop.eup %6565  ;;  %6575 = vlog2.f32 %v5087_v7  ;;  %v4961_v19 = vmul.f32 %v12860_v30, %v4723_v38  ;;  %v5092_v0 = vadd.f32 1.0, %v4964_v15  ;;  %v12865_v15 = vld [vmem:[#allocation258_spill] sm:$0xff] }
 0x464   : > { %5720 = vst.msk [vmem:[%s11506_s16 + $0x1f0] sm:$0xff] %vm5657_vm7, %v5591_v45  ;;  %v5465_v1 = vmul.f32 2.0, %v5274_v60  ;;  %v5596_v36 = vsub.f32 -3.0596964, %v5468_v46  ;;  %v5284_v3 = vmul.f32 0.6931472, %v6566_v59  ;;  %v4738_v53 = vpop.xlane.xlu0 %4737 }
 0x465   : > { %v6568_v37 = vpop.eup %6567  ;;  %v5089_v54 = vadd.f32 1.0, %v4961_v19  ;;  %6577 = vlog2.f32 %v5092_v0  ;;  %v4966_v31 = vmul.f32 %v12861_v48, %v4738_v53  ;;  %v12866_v19 = vld [vmem:[#allocation241_spill] sm:$0xff] }
 0x466   : > { %v5593_v42 = vsub.f32 -3.0596964, %v5465_v1  ;;  %v5278_v56 = vmul.f32 0.6931472, %v6568_v37  ;;  %5725 = vst.msk [vmem:[%s11506_s16 + $0x218] sm:$0xff] %vm5657_vm7, %v5596_v36  ;;  %v5470_v23 = vmul.f32 2.0, %v5284_v3  ;;  %v4729_v24 = vpop.xlane.xlu1 %4728 }
 0x467   : > { %v6570_v34 = vpop.eup %6569  ;;  %6579 = vlog2.f32 %v5089_v54  ;;  %v4963_v10 = vmul.f32 %v12862_v47, %v4729_v24  ;;  %v5094_v27 = vadd.f32 1.0, %v4966_v31  ;;  %v12867_v31 = vld [vmem:[#allocation262_spill] sm:$0xff] }
 0x468   : > { %5722 = vst.msk [vmem:[%s11506_s16 + $0x200] sm:$0xff] %vm5657_vm7, %v5593_v42  ;;  %v5467_v58 = vmul.f32 2.0, %v5278_v56  ;;  %v5598_v61 = vsub.f32 -3.0596964, %v5470_v23  ;;  %v5288_v12 = vmul.f32 0.6931472, %v6570_v34  ;;  %v4744_v29 = vpop.xlane.xlu0 %4743 }
 0x469   : > { %v6572_v13 = vpop.eup %6571  ;;  %v5091_v4 = vadd.f32 1.0, %v4963_v10  ;;  %6581 = vlog2.f32 %v5094_v27  ;;  %v4968_v5 = vmul.f32 %v12863_v11, %v4744_v29  ;;  %v12868_v10 = vld [vmem:[#allocation243_spill] sm:$0xff] }
 0x46a   : > { %v5595_v6 = vsub.f32 -3.0596964, %v5467_v58  ;;  %v5282_v21 = vmul.f32 0.6931472, %v6572_v13  ;;  %5727 = vst.msk [vmem:[%s11506_s16 + $0x228] sm:$0xff] %vm5657_vm7, %v5598_v61  ;;  %v5472_v18 = vmul.f32 2.0, %v5288_v12  ;;  %v4735_v8 = vpop.xlane.xlu1 %4734 }
 0x46b   : > { %v6574_v26 = vpop.eup %6573  ;;  %6583 = vlog2.f32 %v5091_v4  ;;  %v4965_v55 = vmul.f32 %v12864_v41, %v4735_v8  ;;  %v5096_v16 = vadd.f32 1.0, %v4968_v5  ;;  %v12869_v5 = vld [vmem:[#allocation266_spill] sm:$0xff] }
 0x46c   : > { %5724 = vst.msk [vmem:[%s11506_s16 + $0x210] sm:$0xff] %vm5657_vm7, %v5595_v6  ;;  %v5469_v57 = vmul.f32 2.0, %v5282_v21  ;;  %v5600_v32 = vsub.f32 -3.0596964, %v5472_v18  ;;  %v5292_v33 = vmul.f32 0.6931472, %v6574_v26  ;;  %v4750_v63 = vpop.xlane.xlu0 %4749 }
 0x46d   : > { %v6576_v7 = vpop.eup %6575  ;;  %v5093_v25 = vadd.f32 1.0, %v4965_v55  ;;  %6585 = vlog2.f32 %v5096_v16  ;;  %v4970_v45 = vmul.f32 %v12865_v15, %v4750_v63  ;;  %v12870_v55 = vld [vmem:[#allocation249_spill] sm:$0xff] }
 0x46e   : > { %v5597_v60 = vsub.f32 -3.0596964, %v5469_v57  ;;  %v5286_v46 = vmul.f32 0.6931472, %v6576_v7  ;;  %5729 = vst.msk [vmem:[%s11506_s16 + $0x238] sm:$0xff] %vm5657_vm7, %v5600_v32  ;;  %v5474_v38 = vmul.f32 2.0, %v5292_v33  ;;  %v4741_v59 = vpop.xlane.xlu1 %4740 }
 0x46f   : > { %v6578_v30 = vpop.eup %6577  ;;  %6587 = vlog2.f32 %v5093_v25  ;;  %v4967_v0 = vmul.f32 %v12866_v19, %v4741_v59  ;;  %v5098_v1 = vadd.f32 1.0, %v4970_v45  ;;  %v12871_v45 = vld [vmem:[#allocation270_spill] sm:$0xff] }
 0x470   : > { %5726 = vst.msk [vmem:[%s11506_s16 + $0x220] sm:$0xff] %vm5657_vm7, %v5597_v60  ;;  %v5471_v36 = vmul.f32 2.0, %v5286_v46  ;;  %v5602_v3 = vsub.f32 -3.0596964, %v5474_v38  ;;  %v5296_v53 = vmul.f32 0.6931472, %v6578_v30  ;;  %v4756_v37 = vpop.xlane.xlu0 %4755 }
 0x471   : > { %v6580_v54 = vpop.eup %6579  ;;  %v5095_v48 = vadd.f32 1.0, %v4967_v0  ;;  %6589 = vlog2.f32 %v5098_v1  ;;  %v4972_v42 = vmul.f32 %v12867_v31, %v4756_v37  ;;  %v12872_v0 = vld [vmem:[#allocation255_spill] sm:$0xff] }
 0x472   : > { %v5599_v56 = vsub.f32 -3.0596964, %v5471_v36  ;;  %v5290_v23 = vmul.f32 0.6931472, %v6580_v54  ;;  %5731 = vst.msk [vmem:[%s11506_s16 + $0x248] sm:$0xff] %vm5657_vm7, %v5602_v3  ;;  %v5476_v24 = vmul.f32 2.0, %v5296_v53  ;;  %v4747_v34 = vpop.xlane.xlu1 %4746 }
 0x473   : > { %v6582_v47 = vpop.eup %6581  ;;  %6591 = vlog2.f32 %v5095_v48  ;;  %v4969_v27 = vmul.f32 %v12868_v10, %v4747_v34  ;;  %v5100_v58 = vadd.f32 1.0, %v4972_v42  ;;  %v12873_v42 = vld [vmem:[#allocation272_spill] sm:$0xff] }
 0x474   : > { %5728 = vst.msk [vmem:[%s11506_s16 + $0x230] sm:$0xff] %vm5657_vm7, %v5599_v56  ;;  %v5473_v61 = vmul.f32 2.0, %v5290_v23  ;;  %v5604_v12 = vsub.f32 -3.0596964, %v5476_v24  ;;  %v5300_v29 = vmul.f32 0.6931472, %v6582_v47  ;;  %v4762_v13 = vpop.xlane.xlu0 %4761 }
 0x475   : > { %v6584_v4 = vpop.eup %6583  ;;  %v5097_v11 = vadd.f32 1.0, %v4969_v27  ;;  %6593 = vlog2.f32 %v5100_v58  ;;  %v4974_v6 = vmul.f32 %v12869_v5, %v4762_v13  ;;  %v12874_v27 = vld [vmem:[#allocation259_spill] sm:$0xff] }
 0x476   : > { %v5601_v21 = vsub.f32 -3.0596964, %v5473_v61  ;;  %v5294_v18 = vmul.f32 0.6931472, %v6584_v4  ;;  %5733 = vst.msk [vmem:[%s11506_s16 + $0x258] sm:$0xff] %vm5657_vm7, %v5604_v12  ;;  %v5478_v8 = vmul.f32 2.0, %v5300_v29  ;;  %v4753_v26 = vpop.xlane.xlu1 %4752 }
 0x477   : > { %v6586_v41 = vpop.eup %6585  ;;  %6595 = vlog2.f32 %v5097_v11  ;;  %v4971_v16 = vmul.f32 %v12870_v55, %v4753_v26  ;;  %v5102_v57 = vadd.f32 1.0, %v4974_v6  ;;  %v12875_v55 = vld [vmem:[#allocation263_spill] sm:$0xff] }
 0x478   : > { %5730 = vst.msk [vmem:[%s11506_s16 + $0x240] sm:$0xff] %vm5657_vm7, %v5601_v21  ;;  %v5475_v32 = vmul.f32 2.0, %v5294_v18  ;;  %v5606_v33 = vsub.f32 -3.0596964, %v5478_v8  ;;  %v5304_v63 = vmul.f32 0.6931472, %v6586_v41  ;;  %v4768_v7 = vpop.xlane.xlu0 %4767 }
 0x479   : > { %v6588_v25 = vpop.eup %6587  ;;  %v5099_v15 = vadd.f32 1.0, %v4971_v16  ;;  %6597 = vlog2.f32 %v5102_v57  ;;  %v4976_v60 = vmul.f32 %v12871_v45, %v4768_v7 }
 0x47a   : > { %v5603_v46 = vsub.f32 -3.0596964, %v5475_v32  ;;  %v5298_v38 = vmul.f32 0.6931472, %v6588_v25  ;;  %5735 = vst.msk [vmem:[%s11506_s16 + $0x268] sm:$0xff] %vm5657_vm7, %v5606_v33  ;;  %v5480_v59 = vmul.f32 2.0, %v5304_v63  ;;  %v4759_v30 = vpop.xlane.xlu1 %4758 }
 0x47b   : > { %v6590_v19 = vpop.eup %6589  ;;  %6599 = vlog2.f32 %v5099_v15  ;;  %v4973_v1 = vmul.f32 %v12872_v0, %v4759_v30  ;;  %v5104_v36 = vadd.f32 1.0, %v4976_v60  ;;  %v12876_v30 = vld [vmem:[#allocation267_spill] sm:$0xff] }
 0x47c   : > { %5732 = vst.msk [vmem:[%s11506_s16 + $0x250] sm:$0xff] %vm5657_vm7, %v5603_v46  ;;  %v5477_v3 = vmul.f32 2.0, %v5298_v38  ;;  %v5608_v53 = vsub.f32 -3.0596964, %v5480_v59  ;;  %v5308_v37 = vmul.f32 0.6931472, %v6590_v19  ;;  %v4774_v54 = vpop.xlane.xlu0 %4773 }
 0x47d   : > { %v6592_v48 = vpop.eup %6591  ;;  %v5101_v31 = vadd.f32 1.0, %v4973_v1  ;;  %6601 = vlog2.f32 %v5104_v36  ;;  %v4978_v56 = vmul.f32 %v12873_v42, %v4774_v54 }
 0x47e   : > { %v5605_v23 = vsub.f32 -3.0596964, %v5477_v3  ;;  %v5302_v24 = vmul.f32 0.6931472, %v6592_v48  ;;  %5737 = vst.msk [vmem:[%s11506_s16 + $0x278] sm:$0xff] %vm5657_vm7, %v5608_v53  ;;  %v5482_v34 = vmul.f32 2.0, %v5308_v37  ;;  %v4765_v47 = vpop.xlane.xlu1 %4764 }
 0x47f   : > { %v6594_v10 = vpop.eup %6593  ;;  %6603 = vlog2.f32 %v5101_v31  ;;  %v4975_v58 = vmul.f32 %v12874_v27, %v4765_v47  ;;  %v5106_v61 = vadd.f32 1.0, %v4978_v56 }
 0x480   : > { %5734 = vst.msk [vmem:[%s11506_s16 + $0x260] sm:$0xff] %vm5657_vm7, %v5605_v23  ;;  %v5479_v12 = vmul.f32 2.0, %v5302_v24  ;;  %v5610_v29 = vsub.f32 -3.0596964, %v5482_v34  ;;  %v5312_v13 = vmul.f32 0.6931472, %v6594_v10  ;;  %v4780_v4 = vpop.xlane.xlu0 %4779 }
 0x481   : > { %v6596_v11 = vpop.eup %6595  ;;  %v5103_v5 = vadd.f32 1.0, %v4975_v58  ;;  %6605 = vlog2.f32 %v5106_v61  ;;  %v4980_v6 = vmul.f32 %v9838_v39, %v4780_v4  ;;  %v12877_v24 = vld [vmem:[#allocation271_spill] sm:$0xff] }
 0x482   : > { %v5607_v21 = vsub.f32 -3.0596964, %v5479_v12  ;;  %v5306_v18 = vmul.f32 0.6931472, %v6596_v11  ;;  %5739 = vst.msk [vmem:[%s11506_s16 + $0x288] sm:$0xff] %vm5657_vm7, %v5610_v29  ;;  %v5484_v8 = vmul.f32 2.0, %v5312_v13  ;;  %v4771_v26 = vpop.xlane.xlu1 %4770 }
 0x483   : > { %v6598_v41 = vpop.eup %6597  ;;  %6607 = vlog2.f32 %v5103_v5  ;;  %v4977_v16 = vmul.f32 %v12875_v55, %v4771_v26  ;;  %v5108_v57 = vadd.f32 1.0, %v4980_v6 }
 0x484   : > { %5736 = vst.msk [vmem:[%s11506_s16 + $0x270] sm:$0xff] %vm5657_vm7, %v5607_v21  ;;  %v5481_v32 = vmul.f32 2.0, %v5306_v18  ;;  %v5612_v33 = vsub.f32 -3.0596964, %v5484_v8  ;;  %v5316_v63 = vmul.f32 0.6931472, %v6598_v41  ;;  %v4786_v7 = vpop.xlane.xlu0 %4785 }
 0x485   : > { %v6600_v39 = vpop.eup %6599  ;;  %v5105_v25 = vadd.f32 1.0, %v4977_v16  ;;  %6609 = vlog2.f32 %v5108_v57  ;;  %v4982_v15 = vmul.f32 %v9919_v52, %v4786_v7  ;;  %v12878_v21 = vld [vmem:[#allocation88_spill] sm:$0xff] }
 0x486   : > { %v5609_v45 = vsub.f32 -3.0596964, %v5481_v32  ;;  %v5310_v60 = vmul.f32 0.6931472, %v6600_v39  ;;  %5741 = vst.msk [vmem:[%s11506_s16 + $0x298] sm:$0xff] %vm5657_vm7, %v5612_v33  ;;  %v5486_v46 = vmul.f32 2.0, %v5316_v63  ;;  %v4777_v38 = vpop.xlane.xlu1 %4776 }
 0x487   : > { %v6602_v59 = vpop.eup %6601  ;;  %6611 = vlog2.f32 %v5105_v25  ;;  %v4979_v19 = vmul.f32 %v12876_v30, %v4777_v38  ;;  %v5110_v0 = vadd.f32 1.0, %v4982_v15  ;;  %v12879_v15 = vld [vmem:[#allocation135_spill] sm:$0xff] }
 0x488   : > { %5738 = vst.msk [vmem:[%s11506_s16 + $0x280] sm:$0xff] %vm5657_vm7, %v5609_v45  ;;  %v5483_v1 = vmul.f32 2.0, %v5310_v60  ;;  %v5614_v36 = vsub.f32 -3.0596964, %v5486_v46  ;;  %v5320_v3 = vmul.f32 0.6931472, %v6602_v59  ;;  %v4792_v53 = vpop.xlane.xlu0 %4791 }
 0x489   : > { %v6604_v52 = vpop.eup %6603  ;;  %v5107_v37 = vadd.f32 1.0, %v4979_v19  ;;  %6613 = vlog2.f32 %v5110_v0  ;;  %v4984_v54 = vmul.f32 %v9961_v14, %v4792_v53 }
 0x48a   : > { %v5611_v48 = vsub.f32 -3.0596964, %v5483_v1  ;;  %v5314_v31 = vmul.f32 0.6931472, %v6604_v52  ;;  %5743 = vst.msk [vmem:[%s11506_s16 + $0x2a8] sm:$0xff] %vm5657_vm7, %v5614_v36  ;;  %v5488_v42 = vmul.f32 2.0, %v5320_v3  ;;  %v4783_v56 = vpop.xlane.xlu1 %4782 }
 0x48b   : > { %v6606_v23 = vpop.eup %6605  ;;  %6615 = vlog2.f32 %v5107_v37  ;;  %v4981_v34 = vmul.f32 %v12877_v24, %v4783_v56  ;;  %v5112_v47 = vadd.f32 1.0, %v4984_v54  ;;  %v12880_v37 = vld [vmem:[#allocation141_spill] sm:$0xff] }
 0x48c   : > { %5740 = vst.msk [vmem:[%s11506_s16 + $0x290] sm:$0xff] %vm5657_vm7, %v5611_v48  ;;  %v5485_v10 = vmul.f32 2.0, %v5314_v31  ;;  %v5616_v27 = vsub.f32 -3.0596964, %v5488_v42  ;;  %v5324_v58 = vmul.f32 0.6931472, %v6606_v23  ;;  %v4798_v61 = vpop.xlane.xlu0 %4797 }
 0x48d   : > { %v6608_v14 = vpop.eup %6607  ;;  %v5109_v12 = vadd.f32 1.0, %v4981_v34  ;;  %6617 = vlog2.f32 %v5112_v47  ;;  %v4986_v29 = vmul.f32 %v10026_v50, %v4798_v61 }
 0x48e   : > { %v5613_v13 = vsub.f32 -3.0596964, %v5485_v10  ;;  %v5318_v4 = vmul.f32 0.6931472, %v6608_v14  ;;  %5745 = vst.msk [vmem:[%s11506_s16 + $0x2b8] sm:$0xff] %vm5657_vm7, %v5616_v27  ;;  %v5490_v11 = vmul.f32 2.0, %v5324_v58  ;;  %v4789_v5 = vpop.xlane.xlu1 %4788 }
 0x48f   : > { %v6610_v6 = vpop.eup %6609  ;;  %6619 = vlog2.f32 %v5109_v12  ;;  %v4983_v18 = vmul.f32 %v12878_v21, %v4789_v5  ;;  %v5114_v8 = vadd.f32 1.0, %v4986_v29  ;;  %v12881_v14 = vld [vmem:[#allocation142_spill] sm:$0xff]  ;;  %v12882_v21 = vld [vmem:[#allocation148_spill] sm:$0xff] }
 0x490   : > { %5742 = vst.msk [vmem:[%s11506_s16 + $0x2a0] sm:$0xff] %vm5657_vm7, %v5613_v13  ;;  %v5487_v26 = vmul.f32 2.0, %v5318_v4  ;;  %v5618_v41 = vsub.f32 -3.0596964, %v5490_v11  ;;  %v5328_v55 = vmul.f32 0.6931472, %v6610_v6  ;;  %v4804_v16 = vpop.xlane.xlu0 %4803 }
 0x491   : > { %v6612_v50 = vpop.eup %6611  ;;  %v5111_v57 = vadd.f32 1.0, %v4983_v18  ;;  %6621 = vlog2.f32 %v5114_v8  ;;  %v4988_v32 = vmul.f32 %v10078_v17, %v4804_v16 }
 0x492   : > { %v5615_v33 = vsub.f32 -3.0596964, %v5487_v26  ;;  %v5322_v63 = vmul.f32 0.6931472, %v6612_v50  ;;  %5747 = vst.msk [vmem:[%s11506_s16 + $0x2c8] sm:$0xff] %vm5657_vm7, %v5618_v41  ;;  %v5492_v7 = vmul.f32 2.0, %v5328_v55  ;;  %v4795_v39 = vpop.xlane.xlu1 %4794 }
 0x493   : > { %v6614_v25 = vpop.eup %6613  ;;  %6623 = vlog2.f32 %v5111_v57  ;;  %v4985_v45 = vmul.f32 %v12879_v15, %v4795_v39  ;;  %v5116_v60 = vadd.f32 1.0, %v4988_v32  ;;  %v12883_v50 = vld [vmem:[#allocation143_spill] sm:$0xff] }
 0x494   : > { %5744 = vst.msk [vmem:[%s11506_s16 + $0x2b0] sm:$0xff] %vm5657_vm7, %v5615_v33  ;;  %v5489_v46 = vmul.f32 2.0, %v5322_v63  ;;  %v5620_v38 = vsub.f32 -3.0596964, %v5492_v7  ;;  %v5332_v59 = vmul.f32 0.6931472, %v6614_v25  ;;  %v4810_v30 = vpop.xlane.xlu0 %4809 }
 0x495   : > { %v6616_v17 = vpop.eup %6615  ;;  %v5113_v19 = vadd.f32 1.0, %v4985_v45  ;;  %6625 = vlog2.f32 %v5116_v60  ;;  %v4990_v0 = vmul.f32 %v10113_v35, %v4810_v30 }
 0x496   : > { %v5617_v1 = vsub.f32 -3.0596964, %v5489_v46  ;;  %v5326_v36 = vmul.f32 0.6931472, %v6616_v17  ;;  %5749 = vst.msk [vmem:[%s11506_s16 + $0x2d8] sm:$0xff] %vm5657_vm7, %v5620_v38  ;;  %v5494_v3 = vmul.f32 2.0, %v5332_v59  ;;  %v4801_v53 = vpop.xlane.xlu1 %4800 }
 0x497   : > { %v6618_v52 = vpop.eup %6617  ;;  %6627 = vlog2.f32 %v5113_v19  ;;  %v4987_v54 = vmul.f32 %v12880_v37, %v4801_v53  ;;  %v5118_v48 = vadd.f32 1.0, %v4990_v0  ;;  %v12884_v17 = vld [vmem:[#allocation102_spill] sm:$0xff] }
 0x498   : > { %5746 = vst.msk [vmem:[%s11506_s16 + $0x2c0] sm:$0xff] %vm5657_vm7, %v5617_v1  ;;  %v5491_v31 = vmul.f32 2.0, %v5326_v36  ;;  %v5622_v42 = vsub.f32 -3.0596964, %v5494_v3  ;;  %v5336_v56 = vmul.f32 0.6931472, %v6618_v52  ;;  %v4816_v23 = vpop.xlane.xlu0 %4815 }
 0x499   : > { %v6620_v35 = vpop.eup %6619  ;;  %v5115_v24 = vadd.f32 1.0, %v4987_v54  ;;  %6629 = vlog2.f32 %v5118_v48  ;;  %v4992_v34 = vmul.f32 %v10217_v51, %v4816_v23  ;;  %v12885_v23 = vld [vmem:[#allocation147_spill] sm:$0xff] }
 0x49a   : > { %v5619_v47 = vsub.f32 -3.0596964, %v5491_v31  ;;  %v5330_v10 = vmul.f32 0.6931472, %v6620_v35  ;;  %5751 = vst.msk [vmem:[%s11506_s16 + $0x2e8] sm:$0xff] %vm5657_vm7, %v5622_v42  ;;  %v5496_v27 = vmul.f32 2.0, %v5336_v56  ;;  %v4807_v58 = vpop.xlane.xlu1 %4806 }
 0x49b   : > { %v6622_v61 = vpop.eup %6621  ;;  %6631 = vlog2.f32 %v5115_v24  ;;  %v4989_v12 = vmul.f32 %v12881_v14, %v4807_v58  ;;  %v5120_v29 = vadd.f32 1.0, %v4992_v34 }
 0x49c   : > { %5748 = vst.msk [vmem:[%s11506_s16 + $0x2d0] sm:$0xff] %vm5657_vm7, %v5619_v47  ;;  %v5493_v13 = vmul.f32 2.0, %v5330_v10  ;;  %v5624_v4 = vsub.f32 -3.0596964, %v5496_v27  ;;  %v5340_v11 = vmul.f32 0.6931472, %v6622_v61  ;;  %v4822_v5 = vpop.xlane.xlu0 %4821 }
 0x49d   : > { %v6624_v51 = vpop.eup %6623  ;;  %v5117_v6 = vadd.f32 1.0, %v4989_v12  ;;  %6633 = vlog2.f32 %v5120_v29  ;;  %v4994_v18 = vmul.f32 %v12882_v21, %v4822_v5 }
 0x49e   : > { %v5621_v8 = vsub.f32 -3.0596964, %v5493_v13  ;;  %v5334_v26 = vmul.f32 0.6931472, %v6624_v51  ;;  %5753 = vst.msk [vmem:[%s11506_s16 + $0x2f8] sm:$0xff] %vm5657_vm7, %v5624_v4  ;;  %v5498_v41 = vmul.f32 2.0, %v5340_v11  ;;  %v4813_v55 = vpop.xlane.xlu1 %4812 }
 0x49f   : > { %v6626_v16 = vpop.eup %6625  ;;  %6635 = vlog2.f32 %v5117_v6  ;;  %v4991_v57 = vmul.f32 %v12883_v50, %v4813_v55  ;;  %v5122_v32 = vadd.f32 1.0, %v4994_v18  ;;  %v12886_v11 = vld [vmem:[#allocation103_spill] sm:$0xff] }
 0x4a0   : > { %5750 = vst.msk [vmem:[%s11506_s16 + $0x2e0] sm:$0xff] %vm5657_vm7, %v5621_v8  ;;  %v5495_v33 = vmul.f32 2.0, %v5334_v26  ;;  %v5626_v63 = vsub.f32 -3.0596964, %v5498_v41  ;;  %v5344_v7 = vmul.f32 0.6931472, %v6626_v16  ;;  %v4828_v39 = vpop.xlane.xlu0 %4827 }
 0x4a1   : > { %v6628_v25 = vpop.eup %6627  ;;  %v5119_v15 = vadd.f32 1.0, %v4991_v57  ;;  %6637 = vlog2.f32 %v5122_v32  ;;  %v4996_v45 = vmul.f32 %v10295_v20, %v4828_v39 }
 0x4a2   : > { %v5623_v60 = vsub.f32 -3.0596964, %v5495_v33  ;;  %v5338_v46 = vmul.f32 0.6931472, %v6628_v25  ;;  %5755 = vst.msk [vmem:[%s11506_s16 + $0x308] sm:$0xff] %vm5657_vm7, %v5626_v63  ;;  %v5500_v38 = vmul.f32 2.0, %v5344_v7  ;;  %v4819_v59 = vpop.xlane.xlu1 %4818 }
 0x4a3   : > { %v6630_v30 = vpop.eup %6629  ;;  %6639 = vlog2.f32 %v5119_v15  ;;  %v4993_v19 = vmul.f32 %v12884_v17, %v4819_v59  ;;  %v5124_v0 = vadd.f32 1.0, %v4996_v45  ;;  %v12887_v33 = vld [vmem:[#allocation104_spill] sm:$0xff] }
 0x4a4   : > { %5752 = vst.msk [vmem:[%s11506_s16 + $0x2f0] sm:$0xff] %vm5657_vm7, %v5623_v60  ;;  %v5497_v1 = vmul.f32 2.0, %v5338_v46  ;;  %v5628_v36 = vsub.f32 -3.0596964, %v5500_v38  ;;  %v5348_v3 = vmul.f32 0.6931472, %v6630_v30  ;;  %v4834_v53 = vpop.xlane.xlu0 %4833 }
 0x4a5   : > { %v6632_v20 = vpop.eup %6631  ;;  %v5121_v52 = vadd.f32 1.0, %v4993_v19  ;;  %6641 = vlog2.f32 %v5124_v0  ;;  %v4998_v37 = vmul.f32 %v10342_v28, %v4834_v53 }
 0x4a6   : > { %v5625_v54 = vsub.f32 -3.0596964, %v5497_v1  ;;  %v5342_v48 = vmul.f32 0.6931472, %v6632_v20  ;;  %5757 = vst.msk [vmem:[%s11506_s16 + $0x318] sm:$0xff] %vm5657_vm7, %v5628_v36  ;;  %v5502_v31 = vmul.f32 2.0, %v5348_v3  ;;  %v4825_v42 = vpop.xlane.xlu1 %4824 }
 0x4a7   : > { %v6634_v56 = vpop.eup %6633  ;;  %6643 = vlog2.f32 %v5121_v52  ;;  %v4995_v35 = vmul.f32 %v12885_v23, %v4825_v42  ;;  %v5126_v24 = vadd.f32 1.0, %v4998_v37  ;;  %v12888_v37 = vld [vmem:[#allocation166_spill] sm:$0xff]  ;;  %v12889_v23 = vld [vmem:[#allocation97_spill] sm:$0xff] }
 0x4a8   : > { %5754 = vst.msk [vmem:[%s11506_s16 + $0x300] sm:$0xff] %vm5657_vm7, %v5625_v54  ;;  %v5499_v34 = vmul.f32 2.0, %v5342_v48  ;;  %v5630_v47 = vsub.f32 -3.0596964, %v5502_v31  ;;  %v5352_v10 = vmul.f32 0.6931472, %v6634_v56  ;;  %v4840_v27 = vpop.xlane.xlu0 %4839 }
 0x4a9   : > { %v6636_v28 = vpop.eup %6635  ;;  %v5123_v58 = vadd.f32 1.0, %v4995_v35  ;;  %6645 = vlog2.f32 %v5126_v24  ;;  %v5000_v61 = vmul.f32 %v10360_v22, %v4840_v27 }
 0x4aa   : > { %v5627_v14 = vsub.f32 -3.0596964, %v5499_v34  ;;  %v5346_v12 = vmul.f32 0.6931472, %v6636_v28  ;;  %5759 = vst.msk [vmem:[%s11506_s16 + $0x328] sm:$0xff] %vm5657_vm7, %v5630_v47  ;;  %v5504_v29 = vmul.f32 2.0, %v5352_v10  ;;  %v4831_v13 = vpop.xlane.xlu1 %4830 }
 0x4ab   : > { %v6638_v4 = vpop.eup %6637  ;;  %6647 = vlog2.f32 %v5123_v58  ;;  %v4997_v5 = vmul.f32 %v12886_v11, %v4831_v13  ;;  %v5128_v51 = vadd.f32 1.0, %v5000_v61  ;;  %v12890_v61 = vld [vmem:[#allocation169_spill] sm:$0xff] }
 0x4ac   : > { %5756 = vst.msk [vmem:[%s11506_s16 + $0x310] sm:$0xff] %vm5657_vm7, %v5627_v14  ;;  %v5501_v6 = vmul.f32 2.0, %v5346_v12  ;;  %v5632_v21 = vsub.f32 -3.0596964, %v5504_v29  ;;  %v5356_v18 = vmul.f32 0.6931472, %v6638_v4  ;;  %v4846_v8 = vpop.xlane.xlu0 %4845 }
 0x4ad   : > { %v6640_v22 = vpop.eup %6639  ;;  %v5125_v26 = vadd.f32 1.0, %v4997_v5  ;;  %6649 = vlog2.f32 %v5128_v51  ;;  %v5002_v41 = vmul.f32 %v10431_v49, %v4846_v8  ;;  %v12891_v5 = vld [vmem:[#allocation105_spill] sm:$0xff] }
 0x4ae   : > { %v5629_v55 = vsub.f32 -3.0596964, %v5501_v6  ;;  %v5350_v16 = vmul.f32 0.6931472, %v6640_v22  ;;  %5761 = vst.msk [vmem:[%s11506_s16 + $0x338] sm:$0xff] %vm5657_vm7, %v5632_v21  ;;  %v5506_v50 = vmul.f32 2.0, %v5356_v18  ;;  %v4837_v57 = vpop.xlane.xlu1 %4836 }
 0x4af   : > { %v6642_v32 = vpop.eup %6641  ;;  %6651 = vlog2.f32 %v5125_v26  ;;  %v4999_v63 = vmul.f32 %v12887_v33, %v4837_v57  ;;  %v5130_v7 = vadd.f32 1.0, %v5002_v41 }
 0x4b0   : > { %5758 = vst.msk [vmem:[%s11506_s16 + $0x320] sm:$0xff] %vm5657_vm7, %v5629_v55  ;;  %v5503_v39 = vmul.f32 2.0, %v5350_v16  ;;  %v5634_v25 = vsub.f32 -3.0596964, %v5506_v50  ;;  %v5360_v15 = vmul.f32 0.6931472, %v6642_v32  ;;  %v4852_v45 = vpop.xlane.xlu0 %4851 }
 0x4b1   : > { %v6644_v49 = vpop.eup %6643  ;;  %v5127_v60 = vadd.f32 1.0, %v4999_v63  ;;  %6653 = vlog2.f32 %v5130_v7  ;;  %v5004_v46 = vmul.f32 %v10541_v62, %v4852_v45  ;;  %v12892_v55 = vld [vmem:[#allocation170_spill] sm:$0xff] }
 0x4b2   : > { %v5631_v38 = vsub.f32 -3.0596964, %v5503_v39  ;;  %v5354_v59 = vmul.f32 0.6931472, %v6644_v49  ;;  %5763 = vst.msk [vmem:[%s11506_s16 + $0x348] sm:$0xff] %vm5657_vm7, %v5634_v25  ;;  %v5508_v30 = vmul.f32 2.0, %v5360_v15  ;;  %v4843_v17 = vpop.xlane.xlu1 %4842 }
 0x4b3   : > { %v6646_v19 = vpop.eup %6645  ;;  %6655 = vlog2.f32 %v5127_v60  ;;  %v5001_v0 = vmul.f32 %v10314_v43, %v4843_v17  ;;  %v5132_v1 = vadd.f32 1.0, %v5004_v46  ;;  %v12893_v7 = vld [vmem:[#allocation162_spill] sm:$0xff] }
 0x4b4   : > { %5760 = vst.msk [vmem:[%s11506_s16 + $0x330] sm:$0xff] %vm5657_vm7, %v5631_v38  ;;  %v5505_v36 = vmul.f32 2.0, %v5354_v59  ;;  %v5636_v3 = vsub.f32 -3.0596964, %v5508_v30  ;;  %v5364_v53 = vmul.f32 0.6931472, %v6646_v19  ;;  %v4858_v20 = vpop.xlane.xlu0 %4857 }
 0x4b5   : > { %v6648_v62 = vpop.eup %6647  ;;  %v5129_v52 = vadd.f32 1.0, %v5001_v0  ;;  %6657 = vlog2.f32 %v5132_v1  ;;  %v5006_v54 = vmul.f32 %v12888_v37, %v4858_v20 }
 0x4b6   : > { %v5633_v48 = vsub.f32 -3.0596964, %v5505_v36  ;;  %v5358_v31 = vmul.f32 0.6931472, %v6648_v62  ;;  %5765 = vst.msk [vmem:[%s11506_s16 + $0x358] sm:$0xff] %vm5657_vm7, %v5636_v3  ;;  %v5510_v42 = vmul.f32 2.0, %v5364_v53  ;;  %v4849_v56 = vpop.xlane.xlu1 %4848 }
 0x4b7   : > { %v6650_v43 = vpop.eup %6649  ;;  %6659 = vlog2.f32 %v5129_v52  ;;  %v5003_v35 = vmul.f32 %v12889_v23, %v4849_v56  ;;  %v5134_v24 = vadd.f32 1.0, %v5006_v54  ;;  %v12894_v36 = vld [vmem:[#allocation106_spill] sm:$0xff] }
 0x4b8   : > { %5762 = vst.msk [vmem:[%s11506_s16 + $0x340] sm:$0xff] %vm5657_vm7, %v5633_v48  ;;  %v5507_v34 = vmul.f32 2.0, %v5358_v31  ;;  %v5638_v47 = vsub.f32 -3.0596964, %v5510_v42  ;;  %v5368_v10 = vmul.f32 0.6931472, %v6650_v43  ;;  %v4864_v27 = vpop.xlane.xlu0 %4863 }
 0x4b9   : > { %v6652_v28 = vpop.eup %6651  ;;  %v5131_v58 = vadd.f32 1.0, %v5003_v35  ;;  %6661 = vlog2.f32 %v5134_v24  ;;  %v5008_v14 = vmul.f32 %v12890_v61, %v4864_v27  ;;  %v12895_v35 = vld [vmem:[#allocation107_spill] sm:$0xff] }
 0x4ba   : > { %v5635_v12 = vsub.f32 -3.0596964, %v5507_v34  ;;  %v5362_v29 = vmul.f32 0.6931472, %v6652_v28  ;;  %5767 = vst.msk [vmem:[%s11506_s16 + $0x368] sm:$0xff] %vm5657_vm7, %v5638_v47  ;;  %v5512_v13 = vmul.f32 2.0, %v5368_v10  ;;  %v4855_v4 = vpop.xlane.xlu1 %4854 }
 0x4bb   : > { %v6654_v11 = vpop.eup %6653  ;;  %6663 = vlog2.f32 %v5131_v58  ;;  %v5005_v51 = vmul.f32 %v12891_v5, %v4855_v4  ;;  %v5136_v6 = vadd.f32 1.0, %v5008_v14 }
 0x4bc   : > { %5764 = vst.msk [vmem:[%s11506_s16 + $0x350] sm:$0xff] %vm5657_vm7, %v5635_v12  ;;  %v5509_v21 = vmul.f32 2.0, %v5362_v29  ;;  %v5640_v18 = vsub.f32 -3.0596964, %v5512_v13  ;;  %v5372_v8 = vmul.f32 0.6931472, %v6654_v11  ;;  %v4870_v22 = vpop.xlane.xlu0 %4869 }
 0x4bd   : > { %v6656_v26 = vpop.eup %6655  ;;  %v5133_v41 = vadd.f32 1.0, %v5005_v51  ;;  %6665 = vlog2.f32 %v5136_v6  ;;  %v5010_v16 = vmul.f32 %v12892_v55, %v4870_v22  ;;  %v12896_v11 = vld [vmem:[#allocation108_spill] sm:$0xff] }
 0x4be   : > { %v5637_v50 = vsub.f32 -3.0596964, %v5509_v21  ;;  %v5366_v57 = vmul.f32 0.6931472, %v6656_v26  ;;  %5769 = vst.msk [vmem:[%s11506_s16 + $0x378] sm:$0xff] %vm5657_vm7, %v5640_v18  ;;  %v5514_v32 = vmul.f32 2.0, %v5372_v8  ;;  %v4861_v33 = vpop.xlane.xlu1 %4860 }
 0x4bf   : > { %v6658_v63 = vpop.eup %6657  ;;  %6667 = vlog2.f32 %v5133_v41  ;;  %v5007_v39 = vmul.f32 %v12893_v7, %v4861_v33  ;;  %v5138_v25 = vadd.f32 1.0, %v5010_v16 }
 0x4c0   : > { %5766 = vst.msk [vmem:[%s11506_s16 + $0x360] sm:$0xff] %vm5657_vm7, %v5637_v50  ;;  %v5511_v15 = vmul.f32 2.0, %v5366_v57  ;;  %v5642_v45 = vsub.f32 -3.0596964, %v5514_v32  ;;  %v5376_v49 = vmul.f32 0.6931472, %v6658_v63  ;;  %v4876_v60 = vpop.xlane.xlu0 %4875 }
 0x4c1   : > { %v6660_v46 = vpop.eup %6659  ;;  %v5135_v38 = vadd.f32 1.0, %v5007_v39  ;;  %6669 = vlog2.f32 %v5138_v25  ;;  %v5012_v59 = vmul.f32 %v10658_v44, %v4876_v60 }
 0x4c2   : > { %v5639_v30 = vsub.f32 -3.0596964, %v5511_v15  ;;  %v5370_v17 = vmul.f32 0.6931472, %v6660_v46  ;;  %5771 = vst.msk [vmem:[%s11506_s16 + $0x388] sm:$0xff] %vm5657_vm7, %v5642_v45  ;;  %v5516_v19 = vmul.f32 2.0, %v5376_v49  ;;  %v4867_v0 = vpop.xlane.xlu1 %4866 }
 0x4c3   : > { %v6662_v1 = vpop.eup %6661  ;;  %6671 = vlog2.f32 %v5135_v38  ;;  %v5009_v3 = vmul.f32 %v12894_v36, %v4867_v0  ;;  %v5140_v53 = vadd.f32 1.0, %v5012_v59 }
 0x4c4   : > { %5768 = vst.msk [vmem:[%s11506_s16 + $0x370] sm:$0xff] %vm5657_vm7, %v5639_v30  ;;  %v5513_v20 = vmul.f32 2.0, %v5370_v17  ;;  %v5644_v62 = vsub.f32 -3.0596964, %v5516_v19  ;;  %v5380_v52 = vmul.f32 0.6931472, %v6662_v1  ;;  %v4882_v37 = vpop.xlane.xlu0 %4881 }
 0x4c5   : > { %v6664_v44 = vpop.eup %6663  ;;  %v5137_v54 = vadd.f32 1.0, %v5009_v3  ;;  %6673 = vlog2.f32 %v5140_v53  ;;  %v5014_v48 = vmul.f32 %v10681_v9, %v4882_v37 }
 0x4c6   : > { %v5641_v31 = vsub.f32 -3.0596964, %v5513_v20  ;;  %v5374_v42 = vmul.f32 0.6931472, %v6664_v44  ;;  %5773 = vst.msk [vmem:[%s11506_s16 + $0x398] sm:$0xff] %vm5657_vm7, %v5644_v62  ;;  %v5518_v56 = vmul.f32 2.0, %v5380_v52  ;;  %v4873_v43 = vpop.xlane.xlu1 %4872 }
 0x4c7   : > { %v6666_v23 = vpop.eup %6665  ;;  %6675 = vlog2.f32 %v5137_v54  ;;  %v5011_v24 = vmul.f32 %v12895_v35, %v4873_v43  ;;  %v5142_v34 = vadd.f32 1.0, %v5014_v48 }
 0x4c8   : > { %5770 = vst.msk [vmem:[%s11506_s16 + $0x380] sm:$0xff] %vm5657_vm7, %v5641_v31  ;;  %v5515_v47 = vmul.f32 2.0, %v5374_v42  ;;  %v5646_v10 = vsub.f32 -3.0596964, %v5518_v56  ;;  %v5384_v27 = vmul.f32 0.6931472, %v6666_v23  ;;  %v4888_v28 = vpop.xlane.xlu0 %4887 }
 0x4c9   : > { %v6668_v9 = vpop.eup %6667  ;;  %v5139_v58 = vadd.f32 1.0, %v5011_v24  ;;  %6677 = vlog2.f32 %v5142_v34  ;;  %v5016_v61 = vmul.f32 %v10721_v2, %v4888_v28 }
 0x4ca   : > { %v5643_v14 = vsub.f32 -3.0596964, %v5515_v47  ;;  %v5378_v12 = vmul.f32 0.6931472, %v6668_v9  ;;  %5775 = vst.msk [vmem:[%s11506_s16 + $0x3a8] sm:$0xff] %vm5657_vm7, %v5646_v10  ;;  %v5520_v29 = vmul.f32 2.0, %v5384_v27  ;;  %v4879_v13 = vpop.xlane.xlu1 %4878 }
 0x4cb   : > { %v6670_v4 = vpop.eup %6669  ;;  %6679 = vlog2.f32 %v5139_v58  ;;  %v5013_v5 = vmul.f32 %v12896_v11, %v4879_v13  ;;  %v5144_v51 = vadd.f32 1.0, %v5016_v61 }
 0x4cc   : > { %5772 = vst.msk [vmem:[%s11506_s16 + $0x390] sm:$0xff] %vm5657_vm7, %v5643_v14  ;;  %v5517_v6 = vmul.f32 2.0, %v5378_v12  ;;  %v5648_v21 = vsub.f32 -3.0596964, %v5520_v29  ;;  %v5388_v18 = vmul.f32 0.6931472, %v6670_v4 }
 0x4cd   : > { %v6672_v8 = vpop.eup %6671  ;;  %v5141_v2 = vadd.f32 1.0, %v5013_v5  ;;  %6681 = vlog2.f32 %v5144_v51 }
 0x4ce   : > { %v5645_v22 = vsub.f32 -3.0596964, %v5517_v6  ;;  %v5382_v26 = vmul.f32 0.6931472, %v6672_v8  ;;  %5777 = vst.msk [vmem:[%s11506_s16 + $0x3b8] sm:$0xff] %vm5657_vm7, %v5648_v21  ;;  %v5522_v41 = vmul.f32 2.0, %v5388_v18  ;;  %v4885_v55 = vpop.xlane.xlu1 %4884 }
 0x4cf   : > { %v6674_v16 = vpop.eup %6673  ;;  %6683 = vlog2.f32 %v5141_v2  ;;  %v5015_v50 = vmul.f32 %v10650_v40, %v4885_v55 }
 0x4d0   : > { %5774 = vst.msk [vmem:[%s11506_s16 + $0x3a0] sm:$0xff] %vm5657_vm7, %v5645_v22  ;;  %v5519_v57 = vmul.f32 2.0, %v5382_v26  ;;  %v5650_v32 = vsub.f32 -3.0596964, %v5522_v41  ;;  %v5392_v33 = vmul.f32 0.6931472, %v6674_v16 }
 0x4d1   : > { %v6676_v63 = vpop.eup %6675  ;;  %v5143_v7 = vadd.f32 1.0, %v5015_v50 }
 0x4d2   : > { %v5647_v39 = vsub.f32 -3.0596964, %v5519_v57  ;;  %v5386_v25 = vmul.f32 0.6931472, %v6676_v63  ;;  %5779 = vst.msk [vmem:[%s11506_s16 + $0x3c8] sm:$0xff] %vm5657_vm7, %v5650_v32  ;;  %v5524_v15 = vmul.f32 2.0, %v5392_v33 }
 0x4d3   : > { %v6678_v45 = vpop.eup %6677  ;;  %6685 = vlog2.f32 %v5143_v7 }
 0x4d4   : > { %5776 = vst.msk [vmem:[%s11506_s16 + $0x3b0] sm:$0xff] %vm5657_vm7, %v5647_v39  ;;  %v5521_v49 = vmul.f32 2.0, %v5386_v25  ;;  %v5652_v40 = vsub.f32 -3.0596964, %v5524_v15  ;;  %v5396_v60 = vmul.f32 0.6931472, %v6678_v45 }
 0x4d5   : > { %v6680_v46 = vpop.eup %6679 }
 0x4d6   : > { %v5649_v38 = vsub.f32 -3.0596964, %v5521_v49  ;;  %v5390_v59 = vmul.f32 0.6931472, %v6680_v46  ;;  %5781 = vst.msk [vmem:[%s11506_s16 + $0x3d8] sm:$0xff] %vm5657_vm7, %v5652_v40  ;;  %v5526_v30 = vmul.f32 2.0, %v5396_v60 }
 0x4d7   : > { %v6682_v17 = vpop.eup %6681 }
 0x4d8   : > { %5778 = vst.msk [vmem:[%s11506_s16 + $0x3c0] sm:$0xff] %vm5657_vm7, %v5649_v38  ;;  %v5523_v19 = vmul.f32 2.0, %v5390_v59  ;;  %v5654_v0 = vsub.f32 -3.0596964, %v5526_v30  ;;  %v5400_v1 = vmul.f32 0.6931472, %v6682_v17 }
 0x4d9   : > { %v6684_v36 = vpop.eup %6683 }
 0x4da   : > { %v5651_v3 = vsub.f32 -3.0596964, %v5523_v19  ;;  %v5394_v53 = vmul.f32 0.6931472, %v6684_v36  ;;  %5783 = vst.msk [vmem:[%s11506_s16 + $0x3e8] sm:$0xff] %vm5657_vm7, %v5654_v0  ;;  %v5528_v20 = vmul.f32 2.0, %v5400_v1 }
 0x4dc   : > { %5780 = vst.msk [vmem:[%s11506_s16 + $0x3d0] sm:$0xff] %vm5657_vm7, %v5651_v3  ;;  %v5525_v62 = vmul.f32 2.0, %v5394_v53  ;;  %v5656_v52 = vsub.f32 -3.0596964, %v5528_v20 }
 0x4dd   : > { %v6686_v37 = vpop.eup %6685 }
 0x4de   : > { %v5653_v44 = vsub.f32 -3.0596964, %v5525_v62  ;;  %v5398_v54 = vmul.f32 0.6931472, %v6686_v37  ;;  %5785 = vst.msk [vmem:[%s11506_s16 + $0x3f8] sm:$0xff] %vm5657_vm7, %v5656_v52 }
 0x4e0   : > { %5782 = vst.msk [vmem:[%s11506_s16 + $0x3e0] sm:$0xff] %vm5657_vm7, %v5653_v44  ;;  %v5527_v48 = vmul.f32 2.0, %v5398_v54 }
 0x4e2   : > { %v5655_v31 = vsub.f32 -3.0596964, %v5527_v48 }
 0x4e4   : > { %5784 = vst.msk [vmem:[%s11506_s16 + $0x3f0] sm:$0xff] %vm5657_vm7, %v5655_v31 }
 0x4e5 PF: > { %s16_s18 = sadd.s32 1, %s6823_s18  }
 0x4e6   : > { %p13_p4 = scmp.ge.s32.totalorder %s16_s18, 4  }
 0x4e8   :  { %15 = sbr.rel (!%p13_p4) target bundleno = 1 (0x1), region = 81 }

</bundles_post_ra>
